<compile_context>
chip_gen: v5e
topology: v5e:2x2
jax: 0.10.0
libtpu: 0.0.40
codegen_flags: <defaults>
</compile_context>

<pallas_src>
import functools

import jax
import jax.numpy as jnp
from jax import lax
from jax.experimental import pallas as pl
from jax.experimental.pallas import tpu as pltpu


# ----------------------------------------------------------------------------
# helpers
# ----------------------------------------------------------------------------
def _gelu(x):
    # TODO(synk): tanh-approximate GELU; torch nn.GELU defaults to the exact
    # erf form, so there is a tiny numeric difference vs. the reference.
    c = 0.7978845608028654
    return 0.5 * x * (1.0 + jnp.tanh(c * (x + 0.044715 * x * x * x)))


def _msva_layernorm(y, gamma, beta, eps=1e-6):
    """MSVA_LayerNorm: gamma*(x-mean)/(std+eps)+beta, unbiased std (ddof=1).

    Two-pass centered variance (no E[x^2]-E[x]^2 cancellation), exact divide.
    """
    d = y.shape[-1]
    mean = jnp.mean(y, axis=-1, keepdims=True)
    c = y - mean
    var = jnp.sum(c * c, axis=-1, keepdims=True) * (1.0 / (d - 1))
    return gamma * c / (jnp.sqrt(var) + eps) + beta


# ----------------------------------------------------------------------------
# fused kernel: encoders + shared attention (x3) + head MLP, b_blk samples/step
# ----------------------------------------------------------------------------
def make_fused_kernel(*, S, N, F, D, H, B_blk, apperture, mxu_dtype):
    D3 = 3 * D
    R = B_blk * S                      # rows per grid step
    f32 = jnp.float32

    def dotg(a, b, dims):
        # bf16 MXU inputs, f32 accumulation; no explicit transposes.
        return lax.dot_general(a.astype(mxu_dtype), b.astype(mxu_dtype),
                               dimension_numbers=dims,
                               preferred_element_type=f32)

    def mm(a, b):                      # plain (M,K)@(K,N)
        return dotg(a, b, (((1,), (0,)), ((), ())))

    def kernel(x_ref, wenc_ref, wqkv_ref, wo_ref, wa_ref, wb_ref, wc_ref,
               wdt_ref, slab_ref, o_ref):
        # ---- unpack the single padded slab of small replicated vectors
        b_enc = slab_ref[0:1, :D3]
        gy, by = slab_ref[1:2, :D], slab_ref[2:3, :D]
        ba, bb, bc = slab_ref[3:4, :H], slab_ref[4:5, :H], slab_ref[5:6, :H]
        gc, bcn = slab_ref[6:7, :H], slab_ref[7:8, :H]
        bd = slab_ref[8:9, 0:1]

        # ---- 1. three shot encoders: block-diagonal Linear + GELU + frame max
        # rows are frame-major ([n, b, s]) -> max pool is a leading-axis reduce
        x = x_ref[...].reshape(N * R, F)
        h = _gelu(mm(x, wenc_ref[...]) + b_enc)           # (N*R, 3D) f32
        s_enc = jnp.max(h.reshape(N, R, D3), axis=0)      # (R, 3D), rows [b, s]

        # ---- band mask built ONCE per step (hoisted out of the stream unroll)
        use_mask = 0 < apperture < S
        if use_mask:
            ri = lax.broadcasted_iota(jnp.int32, (S, S), 0)
            ci = lax.broadcasted_iota(jnp.int32, (S, S), 1)
            band = (jnp.abs(ri - ci) >= apperture)[None]  # (1, S, S)

        # ---- 2. shared self-attention + residual + shared LayerNorm, per stream
        wqkv = wqkv_ref[...]           # (D, 3D) == [K | 0.06*Q | V]
        wo = wo_ref[...]
        y_sum = jnp.zeros((R, D), f32)
        for st in range(3):                               # static unroll of 3
            xs = s_enc[:, st * D:(st + 1) * D]            # (R, D)
            kqv = mm(xs, wqkv)                            # (R, 3D)
            Kb = kqv[:, 0:D].reshape(B_blk, S, D)
            Qb = kqv[:, D:2 * D].reshape(B_blk, S, D)     # Q-scale already folded
            Vb = kqv[:, 2 * D:D3].reshape(B_blk, S, D)
            logits = dotg(Qb, Kb, (((2,), (2,)), ((0,), (0,))))   # (B, S, S)
            if use_mask:
                logits = jnp.where(band, -jnp.inf, logits)
            m = jnp.max(logits, axis=-1, keepdims=True)
            e = jnp.exp(logits - m)
            att = e * pl.reciprocal(jnp.sum(e, axis=-1, keepdims=True),
                                    approx=True)
            # torch: y = (V^T @ att)^T == att^T @ V (contract over att's rows)
            yb = dotg(att, Vb, (((1,), (1,)), ((0,), (0,))))      # (B, S, D)
            y = mm(yb.reshape(R, D), wo) + xs             # output_linear + residual
            y_sum = y_sum + _msva_layernorm(y, gy, by)

        # ---- 3. head MLP: ka -> kb -> kc -> ReLU -> LayerNorm -> kd
        hh = mm(y_sum, wa_ref[...]) + ba
        hh = mm(hh, wb_ref[...]) + bb
        hh = mm(hh, wc_ref[...]) + bc
        hh = jnp.maximum(hh, 0.0)
        hh = _msva_layernorm(hh, gc, bcn)
        # kd (H -> 1) emitted lane-dense as one (1, B_blk*S) row: wd^T @ hh^T
        z = dotg(wdt_ref[...], hh, (((1,), (1,)), ((), ())))      # (1, R)
        o_ref[...] = z + bd

    return kernel


# ----------------------------------------------------------------------------
# wrapper: one pallas_call for the whole forward
# ----------------------------------------------------------------------------
def msva_adapted_forward(X, mask, params, *, first_feat_dim, second_feat_dim,
                         third_feat_dim, apperture, b_blk=16,
                         mxu_dtype=jnp.bfloat16):
    del mask  # inference path: dropout no-op, mask unused (see mlp_enc TODO)
    B, S, N, F = X.shape
    f1, f2, f3 = first_feat_dim, second_feat_dim, third_feat_dim
    assert F == f1 + f2 + f3
    D = params["enc1_w"].shape[1]
    H = params["ka_w"].shape[1]
    O = params["kd_w"].shape[1]
    # TODO(synk): lane-dense kd path assumes msva_out_dim == 1 (module default).
    assert O == 1
    D3 = 3 * D
    f32 = jnp.float32

    nblk = -(-B // b_blk)              # ceil(B / b_blk)
    B_pad = nblk * b_blk
    R = b_blk * S

    # Block-diagonal encoder weight: one (F, 3D) matmul covers all three streams.
    # TODO(synk): at production D >= 128 (3D spans >1 lane tile) switch to three
    # (f_i, D) matmuls to avoid the zero blocks' wasted MXU cadence.
    w_enc = jnp.zeros((F, D3), f32)
    w_enc = w_enc.at[:f1, 0:D].set(params["enc1_w"])
    w_enc = w_enc.at[f1:f1 + f2, D:2 * D].set(params["enc2_w"])
    w_enc = w_enc.at[f1 + f2:, 2 * D:].set(params["enc3_w"])
    # K | 0.06*Q | V packed column-wise: one lane-dense matmul per stream.
    w_qkv = jnp.concatenate(
        [params["wk"], params["wq"] * 0.06, params["wv"]], axis=1)   # (D, 3D)
    wd_t = params["kd_w"].T                                          # (1, H)

    # Pack all small replicated vectors into one padded f32 slab (single DMA).
    Wmax = max(D3, H, 1)

    def row(v):
        v = jnp.asarray(v, f32).reshape(1, -1)
        return jnp.pad(v, ((0, 0), (0, Wmax - v.shape[1])))

    b_enc = jnp.concatenate(
        [params["enc1_b"], params["enc2_b"], params["enc3_b"]], axis=-1)
    slab = jnp.concatenate([
        row(b_enc),
        row(params["ln_y_gamma"]), row(params["ln_y_beta"]),
        row(params["ka_b"]), row(params["kb_b"]), row(params["kc_b"]),
        row(params["ln_c_gamma"]), row(params["ln_c_beta"]),
        row(params["kd_b"]),
    ], axis=0)                                                       # (9, Wmax)

    # X: frame-major, batch-padded, bf16 in HBM (halves the dominant DMA).
    bf = mxu_dtype
    x_t = jnp.transpose(X, (2, 0, 1, 3))                             # (N, B, S, F)
    if B_pad != B:
        x_t = jnp.pad(x_t, ((0, 0), (0, B_pad - B), (0, 0), (0, 0)))
    x_t = x_t.astype(bf)

    kern = make_fused_kernel(S=S, N=N, F=F, D=D, H=H, B_blk=b_blk,
                             apperture=apperture, mxu_dtype=bf)

    def rep(shape):                    # grid-invariant (replicated) operand
        return pl.BlockSpec(shape, lambda i: (0,) * len(shape))

    out = pl.pallas_call(
        kern,
        out_shape=jax.ShapeDtypeStruct((nblk, R), f32),
        grid=(nblk,),
        in_specs=[
            pl.BlockSpec((N, b_blk, S, F), lambda i: (0, i, 0, 0)),
            rep((F, D3)), rep((D, D3)), rep((D, D)),
            rep((D, H)), rep((H, H)), rep((H, H)),
            rep((1, H)), rep((9, Wmax)),
        ],
        out_specs=pl.BlockSpec((1, R), lambda i: (i, 0)),
        compiler_params=pltpu.CompilerParams(
            dimension_semantics=("parallel",),
            # explicit budget with headroom below v7x's 64 MiB physical VMEM
            vmem_limit_bytes=48 * 1024 * 1024),
    )(x_t,
      w_enc.astype(bf), w_qkv.astype(bf), params["wo"].astype(bf),
      params["ka_w"].astype(bf), params["kb_w"].astype(bf),
      params["kc_w"].astype(bf), wd_t.astype(bf), slab)

    # (nblk, b_blk*S) -> (B_pad, S) -> drop padding; matches torch y.view(B, -1)
    return out.reshape(B_pad, S * O)[:B]


# ----------------------------------------------------------------------------
# pure-JAX reference (f32) for correctness checking
# ----------------------------------------------------------------------------
def reference_forward(X, params, *, first_feat_dim, second_feat_dim,
                      third_feat_dim, apperture):
    f1, f2, f3 = first_feat_dim, second_feat_dim, third_feat_dim

    def ln(y, g, b, eps=1e-6):
        mean = jnp.mean(y, axis=-1, keepdims=True)
        var = jnp.sum((y - mean) ** 2, axis=-1, keepdims=True) / (y.shape[-1] - 1)
        return g * (y - mean) / (jnp.sqrt(var) + eps) + b

    def enc(x, w, b):
        h = _gelu(jnp.einsum("bsnf,fd->bsnd", x, w) + b)
        return jnp.max(h, axis=2)

    def att(x):
        K = x @ params["wk"]
        Q = (x @ params["wq"]) * 0.06
        V = x @ params["wv"]
        logits = jnp.einsum("bsd,btd->bst", Q, K)
        S = x.shape[1]
        if apperture > 0:
            r = jnp.arange(S)[:, None]
            c = jnp.arange(S)[None, :]
            logits = jnp.where(jnp.abs(r - c) >= apperture, -jnp.inf, logits)
        a = jax.nn.softmax(logits, axis=-1)
        y = jnp.einsum("bks,bkd->bsd", a, V)      # (V^T @ att)^T == att^T @ V
        y = y @ params["wo"] + x
        return ln(y, params["ln_y_gamma"][0], params["ln_y_beta"][0])

    x1 = X[..., :f1]
    x2 = X[..., f1:f1 + f2]
    x3 = X[..., -f3:]
    s1 = enc(x1, params["enc1_w"], params["enc1_b"][0])
    s2 = enc(x2, params["enc2_w"], params["enc2_b"][0])
    s3 = enc(x3, params["enc3_w"], params["enc3_b"][0])
    y = att(s1) + att(s2) + att(s3)
    y = y @ params["ka_w"] + params["ka_b"][0]
    y = y @ params["kb_w"] + params["kb_b"][0]
    y = y @ params["kc_w"] + params["kc_b"][0]
    y = jax.nn.relu(y)
    y = ln(y, params["ln_c_gamma"][0], params["ln_c_beta"][0])
    y = y @ params["kd_w"] + params["kd_b"][0]
    return y.reshape(y.shape[0], -1)


# ----------------------------------------------------------------------------
# deterministic parameter construction
# ----------------------------------------------------------------------------
def init_params(key, *, f1, f2, f3, d_model, hidden, out_dim):
    keys = jax.random.split(key, 16)
    n = lambda k, shp, s=0.05: (s * jax.random.normal(k, shp)).astype(jnp.float32)
    return {
        # mlp_enc projections (weights (in, out); bias (1, out))
        "enc1_w": n(keys[0], (f1, d_model)), "enc1_b": n(keys[1], (1, d_model)),
        "enc2_w": n(keys[2], (f2, d_model)), "enc2_b": n(keys[3], (1, d_model)),
        "enc3_w": n(keys[4], (f3, d_model)), "enc3_b": n(keys[5], (1, d_model)),
        # shared MSVA_SelfAttention (no biases)
        "wk": n(keys[6], (d_model, d_model)), "wq": n(keys[7], (d_model, d_model)),
        "wv": n(keys[8], (d_model, d_model)), "wo": n(keys[9], (d_model, d_model)),
        # shared layer_norm_y_1_3
        "ln_y_gamma": jnp.ones((1, d_model), jnp.float32),
        "ln_y_beta": jnp.zeros((1, d_model), jnp.float32),
        # head MLP
        "ka_w": n(keys[10], (d_model, hidden)), "ka_b": n(keys[11], (1, hidden)),
        "kb_w": n(keys[12], (hidden, hidden)), "kb_b": n(keys[13], (1, hidden)),
        "kc_w": n(keys[14], (hidden, hidden)), "kc_b": n(keys[15], (1, hidden)),
        "ln_c_gamma": jnp.ones((1, hidden), jnp.float32),
        "ln_c_beta": jnp.zeros((1, hidden), jnp.float32),
        "kd_w": n(jax.random.fold_in(key, 100), (hidden, out_dim)),
        "kd_b": jnp.zeros((1, out_dim), jnp.float32),
    }


if __name__ == "__main__":
    # small shapes consistent with the module (scaled-down feature dims)
    B, S, N = 2, 8, 4                  # batch, shots (seq), frames per shot
    F1, F2, F3 = 48, 32, 16            # scaled-down first/second/third feat dims
    D_MODEL = 32                       # d_model == msva hidden_dim
    OUT_DIM = 1

    key = jax.random.PRNGKey(0)
    kx, kp = jax.random.split(key)
    X = jax.random.normal(kx, (B, S, N, F1 + F2 + F3), dtype=jnp.float32)
    params = init_params(kp, f1=F1, f2=F2, f3=F3, d_model=D_MODEL,
                         hidden=D_MODEL, out_dim=OUT_DIM)

    # run with the module-default apperture (band mask is a no-op at S=8) and
    # with an active band mask, checking both against the pure-JAX reference.
    for app in (250, 3):
        fwd = jax.jit(functools.partial(
            msva_adapted_forward, first_feat_dim=F1, second_feat_dim=F2,
            third_feat_dim=F3, apperture=app))
        out = jax.block_until_ready(fwd(X, None, params))

        assert out.shape == (B, S * OUT_DIM), out.shape
        assert bool(jnp.all(jnp.isfinite(out)))

        ref = reference_forward(X, params, first_feat_dim=F1, second_feat_dim=F2,
                                third_feat_dim=F3, apperture=app)
        max_err = float(jnp.max(jnp.abs(out - ref)))
        # tolerance accommodates bf16 inputs/weights + approx softmax reciprocal
        assert jnp.allclose(out, ref, atol=5e-2, rtol=5e-2), (app, max_err)

    print("KERNEL_OK")
</pallas_src>

<mosaic_0001>
module attributes {stable_mosaic.version = 11 : i64} {
  func.func @kernel(%arg0: i32, %arg1: memref<4x16x8x96xbf16, #tpu.memory_space<vmem>>, %arg2: memref<96x96xbf16, #tpu.memory_space<vmem>>, %arg3: memref<32x96xbf16, #tpu.memory_space<vmem>>, %arg4: memref<32x32xbf16, #tpu.memory_space<vmem>>, %arg5: memref<32x32xbf16, #tpu.memory_space<vmem>>, %arg6: memref<32x32xbf16, #tpu.memory_space<vmem>>, %arg7: memref<32x32xbf16, #tpu.memory_space<vmem>>, %arg8: memref<1x32xbf16, #tpu.memory_space<vmem>>, %arg9: memref<9x96xf32, #tpu.memory_space<vmem>>, %arg10: memref<1x128xf32, #tpu.memory_space<vmem>>) attributes {dimension_semantics = [#tpu.dimension_semantics<parallel>], iteration_bounds = array<i64: 1>, scalar_prefetch = 0 : i64, scratch_operands = 0 : i64, tpu.core_type = #tpu.core_type<tc>, window_params = [{transform_indices = @transform_0, window_bounds = array<i64: 4, 16, 8, 96>}, {pipeline_mode = #tpu.pipeline_mode<synchronous>, transform_indices = @transform_1, window_bounds = array<i64: 96, 96>}, {pipeline_mode = #tpu.pipeline_mode<synchronous>, transform_indices = @transform_2, window_bounds = array<i64: 32, 96>}, {pipeline_mode = #tpu.pipeline_mode<synchronous>, transform_indices = @transform_3, window_bounds = array<i64: 32, 32>}, {pipeline_mode = #tpu.pipeline_mode<synchronous>, transform_indices = @transform_4, window_bounds = array<i64: 32, 32>}, {pipeline_mode = #tpu.pipeline_mode<synchronous>, transform_indices = @transform_5, window_bounds = array<i64: 32, 32>}, {pipeline_mode = #tpu.pipeline_mode<synchronous>, transform_indices = @transform_6, window_bounds = array<i64: 32, 32>}, {pipeline_mode = #tpu.pipeline_mode<synchronous>, transform_indices = @transform_7, window_bounds = array<i64: 1, 32>}, {pipeline_mode = #tpu.pipeline_mode<synchronous>, transform_indices = @transform_8, window_bounds = array<i64: 9, 96>}, {transform_indices = @transform_9, window_bounds = array<i64: 1, 128>}]} {
    %c0 = arith.constant 0 : index
    %c0_0 = arith.constant 0 : index
    %0 = vector.load %arg9[%c0, %c0_0] : memref<9x96xf32, #tpu.memory_space<vmem>>, vector<1x96xf32>
    %c1 = arith.constant 1 : index
    %c0_1 = arith.constant 0 : index
    %1 = vector.load %arg9[%c1, %c0_1] : memref<9x96xf32, #tpu.memory_space<vmem>>, vector<1x32xf32>
    %c2 = arith.constant 2 : index
    %c0_2 = arith.constant 0 : index
    %2 = vector.load %arg9[%c2, %c0_2] : memref<9x96xf32, #tpu.memory_space<vmem>>, vector<1x32xf32>
    %c3 = arith.constant 3 : index
    %c0_3 = arith.constant 0 : index
    %3 = vector.load %arg9[%c3, %c0_3] : memref<9x96xf32, #tpu.memory_space<vmem>>, vector<1x32xf32>
    %c4 = arith.constant 4 : index
    %c0_4 = arith.constant 0 : index
    %4 = vector.load %arg9[%c4, %c0_4] : memref<9x96xf32, #tpu.memory_space<vmem>>, vector<1x32xf32>
    %c5 = arith.constant 5 : index
    %c0_5 = arith.constant 0 : index
    %5 = vector.load %arg9[%c5, %c0_5] : memref<9x96xf32, #tpu.memory_space<vmem>>, vector<1x32xf32>
    %c6 = arith.constant 6 : index
    %c0_6 = arith.constant 0 : index
    %6 = vector.load %arg9[%c6, %c0_6] : memref<9x96xf32, #tpu.memory_space<vmem>>, vector<1x32xf32>
    %c7 = arith.constant 7 : index
    %c0_7 = arith.constant 0 : index
    %7 = vector.load %arg9[%c7, %c0_7] : memref<9x96xf32, #tpu.memory_space<vmem>>, vector<1x32xf32>
    %c8 = arith.constant 8 : index
    %c0_8 = arith.constant 0 : index
    %8 = vector.load %arg9[%c8, %c0_8] : memref<9x96xf32, #tpu.memory_space<vmem>>, vector<1x1xf32>
    %c0_9 = arith.constant 0 : index
    %c0_10 = arith.constant 0 : index
    %c0_11 = arith.constant 0 : index
    %c0_12 = arith.constant 0 : index
    %9 = vector.load %arg1[%c0_9, %c0_10, %c0_11, %c0_12] : memref<4x16x8x96xbf16, #tpu.memory_space<vmem>>, vector<4x16x8x96xbf16>
    %10 = vector.shape_cast %9 : vector<4x16x8x96xbf16> to vector<512x96xbf16>
    %c0_13 = arith.constant 0 : index
    %c0_14 = arith.constant 0 : index
    %11 = vector.load %arg2[%c0_13, %c0_14] : memref<96x96xbf16, #tpu.memory_space<vmem>>, vector<96x96xbf16>
    %cst = arith.constant dense<0.000000e+00> : vector<512x96xf32>
    %12 = tpu.matmul %10, %11, %cst {dimension_numbers = #tpu.dot_dimension_numbers<[1], [0], [0], [1], [0, 0, 1, 1], [], []>} : vector<512x96xbf16>, vector<96x96xbf16>, vector<512x96xf32> -> vector<512x96xf32>
    %13 = vector.broadcast %0 : vector<1x96xf32> to vector<512x96xf32>
    %14 = arith.addf %12, %13 : vector<512x96xf32>
    %cst_15 = arith.constant 5.000000e-01 : f32
    %15 = vector.broadcast %cst_15 : f32 to vector<512x96xf32>
    %16 = arith.mulf %15, %14 : vector<512x96xf32>
    %cst_16 = arith.constant 4.471500e-02 : f32
    %17 = vector.broadcast %cst_16 : f32 to vector<512x96xf32>
    %18 = arith.mulf %17, %14 : vector<512x96xf32>
    %19 = arith.mulf %18, %14 : vector<512x96xf32>
    %20 = arith.mulf %19, %14 : vector<512x96xf32>
    %21 = arith.addf %14, %20 : vector<512x96xf32>
    %cst_17 = arith.constant 0.797884583 : f32
    %22 = vector.broadcast %cst_17 : f32 to vector<512x96xf32>
    %23 = arith.mulf %22, %21 : vector<512x96xf32>
    %24 = math.tanh %23 : vector<512x96xf32>
    %cst_18 = arith.constant 1.000000e+00 : f32
    %25 = vector.broadcast %cst_18 : f32 to vector<512x96xf32>
    %26 = arith.addf %25, %24 : vector<512x96xf32>
    %27 = arith.mulf %16, %26 : vector<512x96xf32>
    %28 = vector.shape_cast %27 : vector<512x96xf32> to vector<4x128x96xf32>
    %cst_19 = arith.constant dense<0xFF800000> : vector<128x96xf32>
    %29 = vector.multi_reduction <maximumf>, %28, %cst_19 [0] : vector<4x128x96xf32> to vector<128x96xf32>
    %c0_20 = arith.constant 0 : index
    %c0_21 = arith.constant 0 : index
    %30 = vector.load %arg3[%c0_20, %c0_21] : memref<32x96xbf16, #tpu.memory_space<vmem>>, vector<32x96xbf16>
    %c0_22 = arith.constant 0 : index
    %c0_23 = arith.constant 0 : index
    %31 = vector.load %arg4[%c0_22, %c0_23] : memref<32x32xbf16, #tpu.memory_space<vmem>>, vector<32x32xbf16>
    %cst_24 = arith.constant 0.000000e+00 : f32
    %32 = vector.broadcast %cst_24 : f32 to vector<128x32xf32>
    %33 = vector.extract_strided_slice %29 {offsets = [0, 0], sizes = [128, 32], strides = [1, 1]} : vector<128x96xf32> to vector<128x32xf32>
    %34 = arith.truncf %33 : vector<128x32xf32> to vector<128x32xbf16>
    %cst_25 = arith.constant dense<0.000000e+00> : vector<128x96xf32>
    %35 = tpu.matmul %34, %30, %cst_25 {dimension_numbers = #tpu.dot_dimension_numbers<[1], [0], [0], [1], [0, 0, 1, 1], [], []>} : vector<128x32xbf16>, vector<32x96xbf16>, vector<128x96xf32> -> vector<128x96xf32>
    %36 = vector.extract_strided_slice %35 {offsets = [0, 0], sizes = [128, 32], strides = [1, 1]} : vector<128x96xf32> to vector<128x32xf32>
    %37 = vector.shape_cast %36 : vector<128x32xf32> to vector<16x8x32xf32>
    %38 = vector.extract_strided_slice %35 {offsets = [0, 32], sizes = [128, 32], strides = [1, 1]} : vector<128x96xf32> to vector<128x32xf32>
    %39 = vector.shape_cast %38 : vector<128x32xf32> to vector<16x8x32xf32>
    %40 = vector.extract_strided_slice %35 {offsets = [0, 64], sizes = [128, 32], strides = [1, 1]} : vector<128x96xf32> to vector<128x32xf32>
    %41 = vector.shape_cast %40 : vector<128x32xf32> to vector<16x8x32xf32>
    %42 = arith.truncf %39 : vector<16x8x32xf32> to vector<16x8x32xbf16>
    %43 = arith.truncf %37 : vector<16x8x32xf32> to vector<16x8x32xbf16>
    %cst_26 = arith.constant dense<0.000000e+00> : vector<16x8x8xf32>
    %44 = tpu.matmul %42, %43, %cst_26 {dimension_numbers = #tpu.dot_dimension_numbers<[2], [2], [1], [1], [0, 0, 0, 1, 1, 1], [0], [0]>} : vector<16x8x32xbf16>, vector<16x8x32xbf16>, vector<16x8x8xf32> -> vector<16x8x8xf32>
    %cst_27 = arith.constant dense<0xFF800000> : vector<16x8xf32>
    %45 = vector.multi_reduction <maximumf>, %44, %cst_27 [2] : vector<16x8x8xf32> to vector<16x8xf32>
    %46 = vector.shape_cast %45 : vector<16x8xf32> to vector<16x8x1xf32>
    %47 = vector.broadcast %46 : vector<16x8x1xf32> to vector<16x8x8xf32>
    %48 = arith.subf %44, %47 : vector<16x8x8xf32>
    %49 = math.exp %48 : vector<16x8x8xf32>
    %cst_28 = arith.constant dense<0.000000e+00> : vector<16x8xf32>
    %50 = vector.multi_reduction <add>, %49, %cst_28 [2] : vector<16x8x8xf32> to vector<16x8xf32>
    %51 = vector.shape_cast %50 : vector<16x8xf32> to vector<16x8x1xf32>
    %52 = tpu.reciprocal %51 {approx = true} : vector<16x8x1xf32> -> vector<16x8x1xf32>
    %53 = vector.broadcast %52 : vector<16x8x1xf32> to vector<16x8x8xf32>
    %54 = arith.mulf %49, %53 : vector<16x8x8xf32>
    %55 = arith.truncf %54 : vector<16x8x8xf32> to vector<16x8x8xbf16>
    %56 = arith.truncf %41 : vector<16x8x32xf32> to vector<16x8x32xbf16>
    %cst_29 = arith.constant dense<0.000000e+00> : vector<16x8x32xf32>
    %57 = tpu.matmul %55, %56, %cst_29 {dimension_numbers = #tpu.dot_dimension_numbers<[1], [1], [2], [2], [0, 0, 0, 2, 1, 2], [0], [0]>} : vector<16x8x8xbf16>, vector<16x8x32xbf16>, vector<16x8x32xf32> -> vector<16x8x32xf32>
    %58 = vector.shape_cast %57 : vector<16x8x32xf32> to vector<128x32xf32>
    %59 = arith.truncf %58 : vector<128x32xf32> to vector<128x32xbf16>
    %cst_30 = arith.constant dense<0.000000e+00> : vector<128x32xf32>
    %60 = tpu.matmul %59, %31, %cst_30 {dimension_numbers = #tpu.dot_dimension_numbers<[1], [0], [0], [1], [0, 0, 1, 1], [], []>} : vector<128x32xbf16>, vector<32x32xbf16>, vector<128x32xf32> -> vector<128x32xf32>
    %61 = arith.addf %60, %33 : vector<128x32xf32>
    %cst_31 = arith.constant dense<0.000000e+00> : vector<128xf32>
    %62 = vector.multi_reduction <add>, %61, %cst_31 [1] : vector<128x32xf32> to vector<128xf32>
    %63 = vector.shape_cast %62 : vector<128xf32> to vector<128x1xf32>
    %cst_32 = arith.constant 3.200000e+01 : f32
    %64 = vector.broadcast %cst_32 : f32 to vector<128x1xf32>
    %65 = arith.divf %63, %64 : vector<128x1xf32>
    %66 = vector.broadcast %65 : vector<128x1xf32> to vector<128x32xf32>
    %67 = arith.subf %61, %66 : vector<128x32xf32>
    %68 = arith.mulf %67, %67 : vector<128x32xf32>
    %cst_33 = arith.constant dense<0.000000e+00> : vector<128xf32>
    %69 = vector.multi_reduction <add>, %68, %cst_33 [1] : vector<128x32xf32> to vector<128xf32>
    %70 = vector.shape_cast %69 : vector<128xf32> to vector<128x1xf32>
    %cst_34 = arith.constant 0.0322580636 : f32
    %71 = vector.broadcast %cst_34 : f32 to vector<128x1xf32>
    %72 = arith.mulf %70, %71 : vector<128x1xf32>
    %73 = vector.broadcast %1 : vector<1x32xf32> to vector<128x32xf32>
    %74 = arith.mulf %73, %67 : vector<128x32xf32>
    %75 = math.sqrt %72 : vector<128x1xf32>
    %cst_35 = arith.constant 9.99999997E-7 : f32
    %76 = vector.broadcast %cst_35 : f32 to vector<128x1xf32>
    %77 = arith.addf %75, %76 : vector<128x1xf32>
    %78 = vector.broadcast %77 : vector<128x1xf32> to vector<128x32xf32>
    %79 = arith.divf %74, %78 : vector<128x32xf32>
    %80 = vector.broadcast %2 : vector<1x32xf32> to vector<128x32xf32>
    %81 = arith.addf %79, %80 : vector<128x32xf32>
    %82 = arith.addf %32, %81 : vector<128x32xf32>
    %83 = vector.extract_strided_slice %29 {offsets = [0, 32], sizes = [128, 32], strides = [1, 1]} : vector<128x96xf32> to vector<128x32xf32>
    %84 = arith.truncf %83 : vector<128x32xf32> to vector<128x32xbf16>
    %cst_36 = arith.constant dense<0.000000e+00> : vector<128x96xf32>
    %85 = tpu.matmul %84, %30, %cst_36 {dimension_numbers = #tpu.dot_dimension_numbers<[1], [0], [0], [1], [0, 0, 1, 1], [], []>} : vector<128x32xbf16>, vector<32x96xbf16>, vector<128x96xf32> -> vector<128x96xf32>
    %86 = vector.extract_strided_slice %85 {offsets = [0, 0], sizes = [128, 32], strides = [1, 1]} : vector<128x96xf32> to vector<128x32xf32>
    %87 = vector.shape_cast %86 : vector<128x32xf32> to vector<16x8x32xf32>
    %88 = vector.extract_strided_slice %85 {offsets = [0, 32], sizes = [128, 32], strides = [1, 1]} : vector<128x96xf32> to vector<128x32xf32>
    %89 = vector.shape_cast %88 : vector<128x32xf32> to vector<16x8x32xf32>
    %90 = vector.extract_strided_slice %85 {offsets = [0, 64], sizes = [128, 32], strides = [1, 1]} : vector<128x96xf32> to vector<128x32xf32>
    %91 = vector.shape_cast %90 : vector<128x32xf32> to vector<16x8x32xf32>
    %92 = arith.truncf %89 : vector<16x8x32xf32> to vector<16x8x32xbf16>
    %93 = arith.truncf %87 : vector<16x8x32xf32> to vector<16x8x32xbf16>
    %cst_37 = arith.constant dense<0.000000e+00> : vector<16x8x8xf32>
    %94 = tpu.matmul %92, %93, %cst_37 {dimension_numbers = #tpu.dot_dimension_numbers<[2], [2], [1], [1], [0, 0, 0, 1, 1, 1], [0], [0]>} : vector<16x8x32xbf16>, vector<16x8x32xbf16>, vector<16x8x8xf32> -> vector<16x8x8xf32>
    %cst_38 = arith.constant dense<0xFF800000> : vector<16x8xf32>
    %95 = vector.multi_reduction <maximumf>, %94, %cst_38 [2] : vector<16x8x8xf32> to vector<16x8xf32>
    %96 = vector.shape_cast %95 : vector<16x8xf32> to vector<16x8x1xf32>
    %97 = vector.broadcast %96 : vector<16x8x1xf32> to vector<16x8x8xf32>
    %98 = arith.subf %94, %97 : vector<16x8x8xf32>
    %99 = math.exp %98 : vector<16x8x8xf32>
    %cst_39 = arith.constant dense<0.000000e+00> : vector<16x8xf32>
    %100 = vector.multi_reduction <add>, %99, %cst_39 [2] : vector<16x8x8xf32> to vector<16x8xf32>
    %101 = vector.shape_cast %100 : vector<16x8xf32> to vector<16x8x1xf32>
    %102 = tpu.reciprocal %101 {approx = true} : vector<16x8x1xf32> -> vector<16x8x1xf32>
    %103 = vector.broadcast %102 : vector<16x8x1xf32> to vector<16x8x8xf32>
    %104 = arith.mulf %99, %103 : vector<16x8x8xf32>
    %105 = arith.truncf %104 : vector<16x8x8xf32> to vector<16x8x8xbf16>
    %106 = arith.truncf %91 : vector<16x8x32xf32> to vector<16x8x32xbf16>
    %cst_40 = arith.constant dense<0.000000e+00> : vector<16x8x32xf32>
    %107 = tpu.matmul %105, %106, %cst_40 {dimension_numbers = #tpu.dot_dimension_numbers<[1], [1], [2], [2], [0, 0, 0, 2, 1, 2], [0], [0]>} : vector<16x8x8xbf16>, vector<16x8x32xbf16>, vector<16x8x32xf32> -> vector<16x8x32xf32>
    %108 = vector.shape_cast %107 : vector<16x8x32xf32> to vector<128x32xf32>
    %109 = arith.truncf %108 : vector<128x32xf32> to vector<128x32xbf16>
    %cst_41 = arith.constant dense<0.000000e+00> : vector<128x32xf32>
    %110 = tpu.matmul %109, %31, %cst_41 {dimension_numbers = #tpu.dot_dimension_numbers<[1], [0], [0], [1], [0, 0, 1, 1], [], []>} : vector<128x32xbf16>, vector<32x32xbf16>, vector<128x32xf32> -> vector<128x32xf32>
    %111 = arith.addf %110, %83 : vector<128x32xf32>
    %cst_42 = arith.constant dense<0.000000e+00> : vector<128xf32>
    %112 = vector.multi_reduction <add>, %111, %cst_42 [1] : vector<128x32xf32> to vector<128xf32>
    %113 = vector.shape_cast %112 : vector<128xf32> to vector<128x1xf32>
    %cst_43 = arith.constant 3.200000e+01 : f32
    %114 = vector.broadcast %cst_43 : f32 to vector<128x1xf32>
    %115 = arith.divf %113, %114 : vector<128x1xf32>
    %116 = vector.broadcast %115 : vector<128x1xf32> to vector<128x32xf32>
    %117 = arith.subf %111, %116 : vector<128x32xf32>
    %118 = arith.mulf %117, %117 : vector<128x32xf32>
    %cst_44 = arith.constant dense<0.000000e+00> : vector<128xf32>
    %119 = vector.multi_reduction <add>, %118, %cst_44 [1] : vector<128x32xf32> to vector<128xf32>
    %120 = vector.shape_cast %119 : vector<128xf32> to vector<128x1xf32>
    %cst_45 = arith.constant 0.0322580636 : f32
    %121 = vector.broadcast %cst_45 : f32 to vector<128x1xf32>
    %122 = arith.mulf %120, %121 : vector<128x1xf32>
    %123 = vector.broadcast %1 : vector<1x32xf32> to vector<128x32xf32>
    %124 = arith.mulf %123, %117 : vector<128x32xf32>
    %125 = math.sqrt %122 : vector<128x1xf32>
    %cst_46 = arith.constant 9.99999997E-7 : f32
    %126 = vector.broadcast %cst_46 : f32 to vector<128x1xf32>
    %127 = arith.addf %125, %126 : vector<128x1xf32>
    %128 = vector.broadcast %127 : vector<128x1xf32> to vector<128x32xf32>
    %129 = arith.divf %124, %128 : vector<128x32xf32>
    %130 = vector.broadcast %2 : vector<1x32xf32> to vector<128x32xf32>
    %131 = arith.addf %129, %130 : vector<128x32xf32>
    %132 = arith.addf %82, %131 : vector<128x32xf32>
    %133 = vector.extract_strided_slice %29 {offsets = [0, 64], sizes = [128, 32], strides = [1, 1]} : vector<128x96xf32> to vector<128x32xf32>
    %134 = arith.truncf %133 : vector<128x32xf32> to vector<128x32xbf16>
    %cst_47 = arith.constant dense<0.000000e+00> : vector<128x96xf32>
    %135 = tpu.matmul %134, %30, %cst_47 {dimension_numbers = #tpu.dot_dimension_numbers<[1], [0], [0], [1], [0, 0, 1, 1], [], []>} : vector<128x32xbf16>, vector<32x96xbf16>, vector<128x96xf32> -> vector<128x96xf32>
    %136 = vector.extract_strided_slice %135 {offsets = [0, 0], sizes = [128, 32], strides = [1, 1]} : vector<128x96xf32> to vector<128x32xf32>
    %137 = vector.shape_cast %136 : vector<128x32xf32> to vector<16x8x32xf32>
    %138 = vector.extract_strided_slice %135 {offsets = [0, 32], sizes = [128, 32], strides = [1, 1]} : vector<128x96xf32> to vector<128x32xf32>
    %139 = vector.shape_cast %138 : vector<128x32xf32> to vector<16x8x32xf32>
    %140 = vector.extract_strided_slice %135 {offsets = [0, 64], sizes = [128, 32], strides = [1, 1]} : vector<128x96xf32> to vector<128x32xf32>
    %141 = vector.shape_cast %140 : vector<128x32xf32> to vector<16x8x32xf32>
    %142 = arith.truncf %139 : vector<16x8x32xf32> to vector<16x8x32xbf16>
    %143 = arith.truncf %137 : vector<16x8x32xf32> to vector<16x8x32xbf16>
    %cst_48 = arith.constant dense<0.000000e+00> : vector<16x8x8xf32>
    %144 = tpu.matmul %142, %143, %cst_48 {dimension_numbers = #tpu.dot_dimension_numbers<[2], [2], [1], [1], [0, 0, 0, 1, 1, 1], [0], [0]>} : vector<16x8x32xbf16>, vector<16x8x32xbf16>, vector<16x8x8xf32> -> vector<16x8x8xf32>
    %cst_49 = arith.constant dense<0xFF800000> : vector<16x8xf32>
    %145 = vector.multi_reduction <maximumf>, %144, %cst_49 [2] : vector<16x8x8xf32> to vector<16x8xf32>
    %146 = vector.shape_cast %145 : vector<16x8xf32> to vector<16x8x1xf32>
    %147 = vector.broadcast %146 : vector<16x8x1xf32> to vector<16x8x8xf32>
    %148 = arith.subf %144, %147 : vector<16x8x8xf32>
    %149 = math.exp %148 : vector<16x8x8xf32>
    %cst_50 = arith.constant dense<0.000000e+00> : vector<16x8xf32>
    %150 = vector.multi_reduction <add>, %149, %cst_50 [2] : vector<16x8x8xf32> to vector<16x8xf32>
    %151 = vector.shape_cast %150 : vector<16x8xf32> to vector<16x8x1xf32>
    %152 = tpu.reciprocal %151 {approx = true} : vector<16x8x1xf32> -> vector<16x8x1xf32>
    %153 = vector.broadcast %152 : vector<16x8x1xf32> to vector<16x8x8xf32>
    %154 = arith.mulf %149, %153 : vector<16x8x8xf32>
    %155 = arith.truncf %154 : vector<16x8x8xf32> to vector<16x8x8xbf16>
    %156 = arith.truncf %141 : vector<16x8x32xf32> to vector<16x8x32xbf16>
    %cst_51 = arith.constant dense<0.000000e+00> : vector<16x8x32xf32>
    %157 = tpu.matmul %155, %156, %cst_51 {dimension_numbers = #tpu.dot_dimension_numbers<[1], [1], [2], [2], [0, 0, 0, 2, 1, 2], [0], [0]>} : vector<16x8x8xbf16>, vector<16x8x32xbf16>, vector<16x8x32xf32> -> vector<16x8x32xf32>
    %158 = vector.shape_cast %157 : vector<16x8x32xf32> to vector<128x32xf32>
    %159 = arith.truncf %158 : vector<128x32xf32> to vector<128x32xbf16>
    %cst_52 = arith.constant dense<0.000000e+00> : vector<128x32xf32>
    %160 = tpu.matmul %159, %31, %cst_52 {dimension_numbers = #tpu.dot_dimension_numbers<[1], [0], [0], [1], [0, 0, 1, 1], [], []>} : vector<128x32xbf16>, vector<32x32xbf16>, vector<128x32xf32> -> vector<128x32xf32>
    %161 = arith.addf %160, %133 : vector<128x32xf32>
    %cst_53 = arith.constant dense<0.000000e+00> : vector<128xf32>
    %162 = vector.multi_reduction <add>, %161, %cst_53 [1] : vector<128x32xf32> to vector<128xf32>
    %163 = vector.shape_cast %162 : vector<128xf32> to vector<128x1xf32>
    %cst_54 = arith.constant 3.200000e+01 : f32
    %164 = vector.broadcast %cst_54 : f32 to vector<128x1xf32>
    %165 = arith.divf %163, %164 : vector<128x1xf32>
    %166 = vector.broadcast %165 : vector<128x1xf32> to vector<128x32xf32>
    %167 = arith.subf %161, %166 : vector<128x32xf32>
    %168 = arith.mulf %167, %167 : vector<128x32xf32>
    %cst_55 = arith.constant dense<0.000000e+00> : vector<128xf32>
    %169 = vector.multi_reduction <add>, %168, %cst_55 [1] : vector<128x32xf32> to vector<128xf32>
    %170 = vector.shape_cast %169 : vector<128xf32> to vector<128x1xf32>
    %cst_56 = arith.constant 0.0322580636 : f32
    %171 = vector.broadcast %cst_56 : f32 to vector<128x1xf32>
    %172 = arith.mulf %170, %171 : vector<128x1xf32>
    %173 = vector.broadcast %1 : vector<1x32xf32> to vector<128x32xf32>
    %174 = arith.mulf %173, %167 : vector<128x32xf32>
    %175 = math.sqrt %172 : vector<128x1xf32>
    %cst_57 = arith.constant 9.99999997E-7 : f32
    %176 = vector.broadcast %cst_57 : f32 to vector<128x1xf32>
    %177 = arith.addf %175, %176 : vector<128x1xf32>
    %178 = vector.broadcast %177 : vector<128x1xf32> to vector<128x32xf32>
    %179 = arith.divf %174, %178 : vector<128x32xf32>
    %180 = vector.broadcast %2 : vector<1x32xf32> to vector<128x32xf32>
    %181 = arith.addf %179, %180 : vector<128x32xf32>
    %182 = arith.addf %132, %181 : vector<128x32xf32>
    %c0_58 = arith.constant 0 : index
    %c0_59 = arith.constant 0 : index
    %183 = vector.load %arg5[%c0_58, %c0_59] : memref<32x32xbf16, #tpu.memory_space<vmem>>, vector<32x32xbf16>
    %184 = arith.truncf %182 : vector<128x32xf32> to vector<128x32xbf16>
    %cst_60 = arith.constant dense<0.000000e+00> : vector<128x32xf32>
    %185 = tpu.matmul %184, %183, %cst_60 {dimension_numbers = #tpu.dot_dimension_numbers<[1], [0], [0], [1], [0, 0, 1, 1], [], []>} : vector<128x32xbf16>, vector<32x32xbf16>, vector<128x32xf32> -> vector<128x32xf32>
    %186 = vector.broadcast %3 : vector<1x32xf32> to vector<128x32xf32>
    %187 = arith.addf %185, %186 : vector<128x32xf32>
    %c0_61 = arith.constant 0 : index
    %c0_62 = arith.constant 0 : index
    %188 = vector.load %arg6[%c0_61, %c0_62] : memref<32x32xbf16, #tpu.memory_space<vmem>>, vector<32x32xbf16>
    %189 = arith.truncf %187 : vector<128x32xf32> to vector<128x32xbf16>
    %cst_63 = arith.constant dense<0.000000e+00> : vector<128x32xf32>
    %190 = tpu.matmul %189, %188, %cst_63 {dimension_numbers = #tpu.dot_dimension_numbers<[1], [0], [0], [1], [0, 0, 1, 1], [], []>} : vector<128x32xbf16>, vector<32x32xbf16>, vector<128x32xf32> -> vector<128x32xf32>
    %191 = vector.broadcast %4 : vector<1x32xf32> to vector<128x32xf32>
    %192 = arith.addf %190, %191 : vector<128x32xf32>
    %c0_64 = arith.constant 0 : index
    %c0_65 = arith.constant 0 : index
    %193 = vector.load %arg7[%c0_64, %c0_65] : memref<32x32xbf16, #tpu.memory_space<vmem>>, vector<32x32xbf16>
    %194 = arith.truncf %192 : vector<128x32xf32> to vector<128x32xbf16>
    %cst_66 = arith.constant dense<0.000000e+00> : vector<128x32xf32>
    %195 = tpu.matmul %194, %193, %cst_66 {dimension_numbers = #tpu.dot_dimension_numbers<[1], [0], [0], [1], [0, 0, 1, 1], [], []>} : vector<128x32xbf16>, vector<32x32xbf16>, vector<128x32xf32> -> vector<128x32xf32>
    %196 = vector.broadcast %5 : vector<1x32xf32> to vector<128x32xf32>
    %197 = arith.addf %195, %196 : vector<128x32xf32>
    %cst_67 = arith.constant 0.000000e+00 : f32
    %198 = vector.broadcast %cst_67 : f32 to vector<128x32xf32>
    %199 = arith.maximumf %197, %198 : vector<128x32xf32>
    %cst_68 = arith.constant dense<0.000000e+00> : vector<128xf32>
    %200 = vector.multi_reduction <add>, %199, %cst_68 [1] : vector<128x32xf32> to vector<128xf32>
    %201 = vector.shape_cast %200 : vector<128xf32> to vector<128x1xf32>
    %cst_69 = arith.constant 3.200000e+01 : f32
    %202 = vector.broadcast %cst_69 : f32 to vector<128x1xf32>
    %203 = arith.divf %201, %202 : vector<128x1xf32>
    %204 = vector.broadcast %203 : vector<128x1xf32> to vector<128x32xf32>
    %205 = arith.subf %199, %204 : vector<128x32xf32>
    %206 = arith.mulf %205, %205 : vector<128x32xf32>
    %cst_70 = arith.constant dense<0.000000e+00> : vector<128xf32>
    %207 = vector.multi_reduction <add>, %206, %cst_70 [1] : vector<128x32xf32> to vector<128xf32>
    %208 = vector.shape_cast %207 : vector<128xf32> to vector<128x1xf32>
    %cst_71 = arith.constant 0.0322580636 : f32
    %209 = vector.broadcast %cst_71 : f32 to vector<128x1xf32>
    %210 = arith.mulf %208, %209 : vector<128x1xf32>
    %211 = vector.broadcast %6 : vector<1x32xf32> to vector<128x32xf32>
    %212 = arith.mulf %211, %205 : vector<128x32xf32>
    %213 = math.sqrt %210 : vector<128x1xf32>
    %cst_72 = arith.constant 9.99999997E-7 : f32
    %214 = vector.broadcast %cst_72 : f32 to vector<128x1xf32>
    %215 = arith.addf %213, %214 : vector<128x1xf32>
    %216 = vector.broadcast %215 : vector<128x1xf32> to vector<128x32xf32>
    %217 = arith.divf %212, %216 : vector<128x32xf32>
    %218 = vector.broadcast %7 : vector<1x32xf32> to vector<128x32xf32>
    %219 = arith.addf %217, %218 : vector<128x32xf32>
    %c0_73 = arith.constant 0 : index
    %c0_74 = arith.constant 0 : index
    %220 = vector.load %arg8[%c0_73, %c0_74] : memref<1x32xbf16, #tpu.memory_space<vmem>>, vector<1x32xbf16>
    %221 = arith.truncf %219 : vector<128x32xf32> to vector<128x32xbf16>
    %cst_75 = arith.constant dense<0.000000e+00> : vector<1x128xf32>
    %222 = tpu.matmul %220, %221, %cst_75 {dimension_numbers = #tpu.dot_dimension_numbers<[1], [1], [0], [0], [0, 0, 1, 0], [], []>} : vector<1x32xbf16>, vector<128x32xbf16>, vector<1x128xf32> -> vector<1x128xf32>
    %223 = vector.broadcast %8 : vector<1x1xf32> to vector<1x128xf32>
    %224 = arith.addf %222, %223 : vector<1x128xf32>
    %c0_76 = arith.constant 0 : index
    %c0_77 = arith.constant 0 : index
    %225 = vector.load %arg10[%c0_76, %c0_77] : memref<1x128xf32, #tpu.memory_space<vmem>>, vector<1x128xf32>
    tpu.vector_store %arg10[%c0_76, %c0_77], %224 {strides = array<i32>} : memref<1x128xf32, #tpu.memory_space<vmem>>, vector<1x128xf32>,
    return
  }
  func.func @transform_0(%arg0: i32) -> (i32, i32, i32, i32) {
    %c0_i32 = arith.constant 0 : i32
    %c0_i32_0 = arith.constant 0 : i32
    %c0_i32_1 = arith.constant 0 : i32
    %c0_i32_2 = arith.constant 0 : i32
    return %c0_i32, %arg0, %c0_i32_0, %c0_i32_1 : i32, i32, i32, i32
  }
  func.func @transform_1(%arg0: i32) -> (i32, i32) {
    %c0_i32 = arith.constant 0 : i32
    %c0_i32_0 = arith.constant 0 : i32
    %c0_i32_1 = arith.constant 0 : i32
    return %c0_i32, %c0_i32_0 : i32, i32
  }
  func.func @transform_2(%arg0: i32) -> (i32, i32) {
    %c0_i32 = arith.constant 0 : i32
    %c0_i32_0 = arith.constant 0 : i32
    %c0_i32_1 = arith.constant 0 : i32
    return %c0_i32, %c0_i32_0 : i32, i32
  }
  func.func @transform_3(%arg0: i32) -> (i32, i32) {
    %c0_i32 = arith.constant 0 : i32
    %c0_i32_0 = arith.constant 0 : i32
    %c0_i32_1 = arith.constant 0 : i32
    return %c0_i32, %c0_i32_0 : i32, i32
  }
  func.func @transform_4(%arg0: i32) -> (i32, i32) {
    %c0_i32 = arith.constant 0 : i32
    %c0_i32_0 = arith.constant 0 : i32
    %c0_i32_1 = arith.constant 0 : i32
    return %c0_i32, %c0_i32_0 : i32, i32
  }
  func.func @transform_5(%arg0: i32) -> (i32, i32) {
    %c0_i32 = arith.constant 0 : i32
    %c0_i32_0 = arith.constant 0 : i32
    %c0_i32_1 = arith.constant 0 : i32
    return %c0_i32, %c0_i32_0 : i32, i32
  }
  func.func @transform_6(%arg0: i32) -> (i32, i32) {
    %c0_i32 = arith.constant 0 : i32
    %c0_i32_0 = arith.constant 0 : i32
    %c0_i32_1 = arith.constant 0 : i32
    return %c0_i32, %c0_i32_0 : i32, i32
  }
  func.func @transform_7(%arg0: i32) -> (i32, i32) {
    %c0_i32 = arith.constant 0 : i32
    %c0_i32_0 = arith.constant 0 : i32
    %c0_i32_1 = arith.constant 0 : i32
    return %c0_i32, %c0_i32_0 : i32, i32
  }
  func.func @transform_8(%arg0: i32) -> (i32, i32) {
    %c0_i32 = arith.constant 0 : i32
    %c0_i32_0 = arith.constant 0 : i32
    %c0_i32_1 = arith.constant 0 : i32
    return %c0_i32, %c0_i32_0 : i32, i32
  }
  func.func @transform_9(%arg0: i32) -> (i32, i32) {
    %c0_i32 = arith.constant 0 : i32
    %c0_i32_0 = arith.constant 0 : i32
    return %arg0, %c0_i32 : i32, i32
  }
}

</mosaic_0001>

<bundles_post_ra>
// kernel: msva_adapted_forward.1
= control target key start
LH: loop header
LB: loop body
LE: loop exit
PB: predicated region body
PF: predicated region fallthrough
CT: control target
= control target key end

     0   :  { %vm315_vm0 = vcmask 785408   ;;  %vm1297_vm1 = vcmask 261120   ;;  %s9589_s26 = smov 96   ;;  %vm1985_vm2 = vcmask 1043456   ;;  %vm1771_vm3 = vcmask 64512   ;;  %s14547_s1 = inlined_call_operand.vmem [shape: bf16[96,96], index: 1, kind: input, shape index: {}]   ;;  %s14548_s8 = inlined_call_operand.vmem [shape: f32[9,96], index: 8, kind: input, shape index: {}]   ;;  %s14549_s0 = inlined_call_operand.vmem [shape: bf16[4,16,8,96], index: 0, kind: input, shape index: {}]   ;;  %s14550_s2 = inlined_call_operand.vmem [shape: bf16[32,96], index: 2, kind: input, shape index: {}]   ;;  %s14551_s3 = inlined_call_operand.vmem [shape: bf16[32,32], index: 3, kind: input, shape index: {}]   ;;  %s14552_s4 = inlined_call_operand.vmem [shape: bf16[32,32], index: 4, kind: input, shape index: {}]   ;;  %s14553_s5 = inlined_call_operand.vmem [shape: bf16[32,32], index: 5, kind: input, shape index: {}]   ;;  %s14554_s6 = inlined_call_operand.vmem [shape: bf16[32,32], index: 6, kind: input, shape index: {}]   ;;  %s14555_s7 = inlined_call_operand.vmem [shape: bf16[1,32], index: 7, kind: input, shape index: {}]   ;;  %s14556_s9 = inlined_call_operand.vmem [shape: f32[1,128], index: 9, kind: output, shape index: {}]  }
   0x1   :  { %v8896_v0 = vld [vmem:[%s14547_s1 + $0x28] sm:$0xff]  ;;  %v8895_v1 = vld [vmem:[%s14547_s1 + $0x20] sm:$0xff]  ;;  %v8894_v2 = vld [vmem:[%s14547_s1 + $0x18] sm:$0xff] }
   0x2   :  { %414 = vmatpush.bf16.msra.mxu0 %v8896_v0  ;;  %v8893_v3 = vld [vmem:[%s14547_s1 + $0x10] sm:$0xff]  ;;  %v8892_v4 = vld [vmem:[%s14547_s1 + $0x8] sm:$0xff]  ;;  %v8891_v5 = vld [vmem:[%s14547_s1] sm:$0xff]  ;;  %s9590_s1 = smov 64  }
   0x3   :  { %v8859_v6 = vld [vmem:[%s14549_s0] sm:$0xff]  ;;  %v8860_v7 = vld [vmem:[%s14549_s0 + $0x8] sm:$0xff]  ;;  %v8861_v8 = vld [vmem:[%s14549_s0 + $0x10] sm:$0xff] }
   0x4   :  { %v8862_v9 = vld [vmem:[%s14549_s0 + $0x18] sm:$0xff]  ;;  %v8863_v10 = vld [vmem:[%s14549_s0 + $0x20] sm:$0xff]  ;;  %v8864_v11 = vld [vmem:[%s14549_s0 + $0x28] sm:$0xff] }
   0x5   :  { %v8865_v12 = vld [vmem:[%s14549_s0 + $0x30] sm:$0xff]  ;;  %v8866_v13 = vld [vmem:[%s14549_s0 + $0x38] sm:$0xff]  ;;  %v8867_v14 = vld [vmem:[%s14549_s0 + $0x40] sm:$0xff] }
   0x6   :  { %415 = vmatpush.bf16.msra.mxu0 %v8895_v1  ;;  %v8868_v17 = vld [vmem:[%s14549_s0 + $0x48] sm:$0xff]  ;;  %v8869_v20 = vld [vmem:[%s14549_s0 + $0x50] sm:$0xff]  ;;  %v8870_v23 = vld [vmem:[%s14549_s0 + $0x58] sm:$0xff] }
   0x7   :  { %v8871_v26 = vld [vmem:[%s14549_s0 + $0x60] sm:$0xff]  ;;  %v8872_v29 = vld [vmem:[%s14549_s0 + $0x68] sm:$0xff]  ;;  %v8873_v32 = vld [vmem:[%s14549_s0 + $0x70] sm:$0xff] }
   0x8   :  { %v9742_v35 = vld [vmem:[%s14548_s8] ss:$0 sm:$0xff]  ;;  %v8874_v37 = vld [vmem:[%s14549_s0 + $0x78] sm:$0xff] }
   0x9   :  { %v8875_v48 = vld [vmem:[%s14549_s0 + $0x80] sm:$0xff] }
   0xa   :  { %416 = vmatpush.bf16.msra.mxu0 %v8894_v2 }
   0xe   :  { %417 = vmatpush.bf16.msra.mxu0 %v8893_v3 }
  0x12   :  { %418 = vmatpush.bf16.msra.mxu0 %v8892_v4 }
  0x16   :  { %419 = vmatpush.bf16.msra.mxu0 %v8891_v5 }
  0x19   :  { %8618 = vmatmul.msk.bf16.vlgmr.msra.gmra.mxu0 %vm315_vm0, %v8859_v6 }
  0x29   :  { %8619 = vmatmul.msk.bf16.gmra.mxu0 %vm315_vm0, %v8860_v7 }
  0x39   :  { %8620 = vmatmul.msk.bf16.gmra.mxu0 %vm315_vm0, %v8861_v8 }
  0x49   :  { %8621 = vmatmul.msk.bf16.gmra.mxu0 %vm315_vm0, %v8862_v9 }
  0x59   :  { %8622 = vmatmul.msk.bf16.gmra.mxu0 %vm315_vm0, %v8863_v10  ;;  %v8876_v10 = vld [vmem:[%s14549_s0 + $0x88] sm:$0xff] }
  0x69   :  { %8623 = vmatmul.msk.bf16.gmra.mxu0 %vm315_vm0, %v8864_v11 }
  0x79   :  { %8624 = vmatmul.msk.bf16.gmra.mxu0 %vm315_vm0, %v8865_v12 }
  0x89   :  { %8625 = vmatmul.msk.bf16.gmra.mxu0 %vm315_vm0, %v8866_v13 }
  0x96   :  { %v421_v15 = vpop.f32.mrf.mxu0 }
  0x97   :  { %v422_v36 = vadd.f32 %v9742_v35, %v421_v15 }
  0x99   :  { %8626 = vmatmul.msk.bf16.gmra.mxu0 %vm315_vm0, %v8867_v14  ;;  %v645_v39 = vmul.f32 0.044715, %v422_v36  ;;  %v581_v15 = vmul.f32 0.5, %v422_v36 }
  0x9b   :  { %v709_v41 = vmul.f32 %v645_v39, %v422_v36 }
  0x9d   :  { %v773_v44 = vmul.f32 %v709_v41, %v422_v36 }
  0x9e   :  { %v423_v16 = vpop.f32.mrf.mxu0 }
  0x9f   :  { %v9752_v40 = vadd.f32 %v9742_v35, %v423_v16  ;;  %v837_v46 = vadd.f32 %v773_v44, %v422_v36 }
  0xa1   :  { %v646_v43 = vmul.f32 0.044715, %v9752_v40  ;;  %v901_v52 = vmul.f32 0.7978846, %v837_v46 }
  0xa3   :  { %v710_v45 = vmul.f32 %v646_v43, %v9752_v40  ;;  %8993 = vtanh.f32 %v901_v52  ;;  %v582_v52 = vmul.f32 0.5, %v9752_v40 }
  0xa5   :  { %v774_v51 = vmul.f32 %v710_v45, %v9752_v40 }
  0xa6   :  { %v426_v18 = vpop.f32.mrf.mxu0 }
  0xa7   :  { %v9759_v47 = vadd.f32 %v9742_v35, %v426_v18  ;;  %v838_v56 = vadd.f32 %v774_v51, %v9752_v40 }
  0xa9   :  { %8627 = vmatmul.msk.bf16.gmra.mxu0 %vm315_vm0, %v8868_v17  ;;  %v647_v53 = vmul.f32 0.044715, %v9759_v47  ;;  %v902_v63 = vmul.f32 0.7978846, %v838_v56  ;;  %v8994_v4 = vpop.eup %8993 }
  0xaa   :  { %v1029_v11 = vadd.f32 1.0, %v8994_v4 }
  0xab   :  { %v711_v57 = vmul.f32 %v647_v53, %v9759_v47 }
  0xad   :  { %v775_v0 = vmul.f32 %v711_v57, %v9759_v47 }
  0xae   :  { %v428_v19 = vpop.f32.mrf.mxu0 }
  0xaf   :  { %v9771_v58 = vadd.f32 %v9742_v35, %v428_v19  ;;  %v839_v7 = vadd.f32 %v775_v0, %v9759_v47 }
  0xb1   :  { %v648_v1 = vmul.f32 0.044715, %v9771_v58  ;;  %v903_v18 = vmul.f32 0.7978846, %v839_v7 }
  0xb3   :  { %v712_v8 = vmul.f32 %v648_v1, %v9771_v58 }
  0xb5   :  { %v776_v19 = vmul.f32 %v712_v8, %v9771_v58 }
  0xb6   :  { %v431_v21 = vpop.f32.mrf.mxu0 }
  0xb7   :  { %v9777_v6 = vadd.f32 %v9742_v35, %v431_v21  ;;  %v840_v43 = vadd.f32 %v776_v19, %v9771_v58 }
  0xb9   :  { %8628 = vmatmul.msk.bf16.gmra.mxu0 %vm315_vm0, %v8869_v20  ;;  %v649_v16 = vmul.f32 0.044715, %v9777_v6  ;;  %v904_v56 = vmul.f32 0.7978846, %v840_v43 }
  0xbb   :  { %v713_v36 = vmul.f32 %v649_v16, %v9777_v6 }
  0xbd   :  { %v777_v53 = vmul.f32 %v713_v36, %v9777_v6 }
  0xbe   :  { %v9705_v22 = vpop.f32.mrf.mxu0 }
  0xbf   :  { %v9795_v39 = vadd.f32 %v9742_v35, %v9705_v22 }
  0xc6   :  { %v9710_v24 = vpop.f32.mrf.mxu0 }
  0xc7   :  { %v9820_v4 = vadd.f32 %v9742_v35, %v9710_v24 }
  0xc9   :  { %8629 = vmatmul.msk.bf16.gmra.mxu0 %vm315_vm0, %v8870_v23  ;;  %v1093_v23 = vmul.f32 %v1029_v11, %v581_v15 }
  0xce   :  { %v9713_v25 = vpop.f32.mrf.mxu0 }
  0xd6   :  { %v9718_v27 = vpop.f32.mrf.mxu0 }
  0xd9   :  { %8630 = vmatmul.msk.bf16.gmra.mxu0 %vm315_vm0, %v8871_v26 }
  0xde   :  { %v9721_v28 = vpop.f32.mrf.mxu0 }
  0xe6   :  { %v9726_v30 = vpop.f32.mrf.mxu0 }
  0xe9   :  { %8631 = vmatmul.msk.bf16.gmra.mxu0 %vm315_vm0, %v8872_v29 }
  0xee   :  { %v9729_v31 = vpop.f32.mrf.mxu0 }
  0xf6   :  { %v9734_v33 = vpop.f32.mrf.mxu0 }
  0xf9   :  { %8632 = vmatmul.msk.bf16.gmra.mxu0 %vm315_vm0, %v8873_v32 }
  0xfe   :  { %v9737_v34 = vpop.f32.mrf.mxu0 }
 0x106   :  { %v9748_v38 = vpop.f32.mrf.mxu0 }
 0x109   :  { %8633 = vmatmul.msk.bf16.gmra.mxu0 %vm315_vm0, %v8874_v37 }
 0x10e   :  { %v9754_v42 = vpop.f32.mrf.mxu0 }
 0x116   :  { %v461_v49 = vpop.f32.mrf.mxu0 }
 0x117   :  { %v462_v50 = vadd.f32 %v9742_v35, %v461_v49 }
 0x119   :  { %v661_v54 = vmul.f32 0.044715, %v462_v50  ;;  %8634 = vmatmul.msk.bf16.gmra.mxu0 %vm315_vm0, %v8875_v48  ;;  %v597_v26 = vmul.f32 0.5, %v462_v50  ;;  %v9800_v48 = vsel %vm315_vm0, %v1093_v23, -inf }
 0x11b   :  { %v725_v55 = vmul.f32 %v661_v54, %v462_v50  ;;  %v650_v54 = vmul.f32 0.044715, %v9795_v39 }
 0x11d   :  { %v789_v59 = vmul.f32 %v725_v55, %v462_v50  ;;  %v714_v40 = vmul.f32 %v650_v54, %v9795_v39 }
 0x11e   :  { %v463_v60 = vpop.f32.mrf.mxu0 }
 0x11f   :  { %v853_v61 = vadd.f32 %v789_v59, %v462_v50  ;;  %v464_v62 = vadd.f32 %v9742_v35, %v463_v60  ;;  %v778_v16 = vmul.f32 %v714_v40, %v9795_v39 }
 0x121   :  { %v917_v2 = vmul.f32 0.7978846, %v853_v61  ;;  %v662_v3 = vmul.f32 0.044715, %v464_v62  ;;  %v598_v61 = vmul.f32 0.5, %v464_v62 }
 0x123   :  { %8995 = vtanh.f32 %v917_v2  ;;  %v726_v5 = vmul.f32 %v662_v3, %v464_v62  ;;  %v841_v2 = vadd.f32 %v777_v53, %v9777_v6 }
 0x124   :  { %8997 = vtanh.f32 %v902_v63 }
 0x125   :  { %v790_v9 = vmul.f32 %v726_v5, %v464_v62  ;;  %v905_v15 = vmul.f32 0.7978846, %v841_v2 }
 0x126   :  { %v466_v12 = vpop.f32.mrf.mxu0 }
 0x127   :  { %v854_v13 = vadd.f32 %v790_v9, %v464_v62  ;;  %v9785_v14 = vadd.f32 %v9742_v35, %v466_v12  ;;  %v8877_v62 = vld [vmem:[%s14549_s0 + $0x90] sm:$0xff] }
 0x129   :  { %v8996_v17 = vpop.eup %8995  ;;  %v918_v20 = vmul.f32 0.7978846, %v854_v13  ;;  %v663_v21 = vmul.f32 0.044715, %v9785_v14  ;;  %8635 = vmatmul.msk.bf16.gmra.mxu0 %vm315_vm0, %v8876_v10  ;;  %v583_v13 = vmul.f32 0.5, %v9759_v47  ;;  %v599_v23 = vmul.f32 0.5, %v9785_v14 }
 0x12a   :  { %v1045_v29 = vadd.f32 1.0, %v8996_v17  ;;  %v8998_v32 = vpop.eup %8997  ;;  %v842_v47 = vadd.f32 %v778_v16, %v9795_v39 }
 0x12b   :  { %8999 = vtanh.f32 %v918_v20  ;;  %v727_v37 = vmul.f32 %v663_v21, %v9785_v14  ;;  %v1030_v45 = vadd.f32 1.0, %v8998_v32 }
 0x12c   :  { %v1109_v41 = vmul.f32 %v1045_v29, %v597_v26  ;;  %9001 = vtanh.f32 %v903_v18  ;;  %v651_v18 = vmul.f32 0.044715, %v9820_v4  ;;  %v906_v54 = vmul.f32 0.7978846, %v842_v47 }
 0x12d   :  { %v791_v44 = vmul.f32 %v727_v37, %v9785_v14  ;;  %v1094_v60 = vmul.f32 %v1030_v45, %v582_v52 }
 0x12e   :  { %v468_v46 = vpop.f32.mrf.mxu0  ;;  %v9803_v49 = vsel %vm315_vm0, %v1109_v41, -inf  ;;  %v715_v36 = vmul.f32 %v651_v18, %v9820_v4  ;;  %v9849_v41 = vadd.f32 %v9742_v35, %v9713_v25  ;;  %v584_v25 = vmul.f32 0.5, %v9771_v58 }
 0x12f   :  { %v855_v50 = vadd.f32 %v791_v44, %v9785_v14  ;;  %v9807_v51 = vadd.f32 %v9742_v35, %v468_v46  ;;  %v1159_v22 = vmax.f32 %v9800_v48, %v9803_v49  ;;  %v9827_v9 = vsel %vm315_vm0, %v1094_v60, -inf }
 0x130   :  { %v9872_v58 = vadd.f32 %v9742_v35, %v9718_v27 }
 0x131   :  { %v9000_v55 = vpop.eup %8999  ;;  %v919_v57 = vmul.f32 0.7978846, %v855_v50  ;;  %v664_v59 = vmul.f32 0.044715, %v9807_v51 }
 0x132   :  { %v1046_v63 = vadd.f32 1.0, %v9000_v55  ;;  %v9002_v0 = vpop.eup %9001  ;;  %v653_v18 = vmul.f32 0.044715, %v9872_v58 }
 0x133   :  { %9003 = vtanh.f32 %v919_v57  ;;  %v728_v1 = vmul.f32 %v664_v59, %v9807_v51  ;;  %v1031_v7 = vadd.f32 1.0, %v9002_v0  ;;  %v652_v57 = vmul.f32 0.044715, %v9849_v41 }
 0x134   :  { %v1110_v3 = vmul.f32 %v1046_v63, %v598_v61  ;;  %9005 = vtanh.f32 %v904_v56  ;;  %v779_v56 = vmul.f32 %v715_v36, %v9820_v4  ;;  %v600_v63 = vmul.f32 0.5, %v9807_v51 }
 0x135   :  { %v792_v5 = vmul.f32 %v728_v1, %v9807_v51  ;;  %v1095_v21 = vmul.f32 %v1031_v7, %v583_v13 }
 0x136   :  { %v471_v8 = vpop.f32.mrf.mxu0  ;;  %v9830_v10 = vsel %vm315_vm0, %v1110_v3, -inf  ;;  %v843_v3 = vadd.f32 %v779_v56, %v9820_v4 }
 0x137   :  { %v856_v11 = vadd.f32 %v792_v5, %v9807_v51  ;;  %v9834_v12 = vadd.f32 %v9742_v35, %v471_v8  ;;  %v1166_v24 = vmax.f32 %v9827_v9, %v9830_v10  ;;  %v9853_v14 = vsel %vm315_vm0, %v1095_v21, -inf  ;;  %v8878_v51 = vld [vmem:[%s14549_s0 + $0x98] sm:$0xff] }
 0x138   :  { %v716_v5 = vmul.f32 %v652_v57, %v9849_v41 }
 0x139   :  { %v9004_v17 = vpop.eup %9003  ;;  %v920_v19 = vmul.f32 0.7978846, %v856_v11  ;;  %v665_v20 = vmul.f32 0.044715, %v9834_v12  ;;  %8636 = vmatmul.msk.bf16.gmra.mxu0 %vm315_vm0, %v8877_v62 }
 0x13a   :  { %v1047_v26 = vadd.f32 1.0, %v9004_v17  ;;  %v9006_v29 = vpop.eup %9005  ;;  %v585_v17 = vmul.f32 0.5, %v9777_v6  ;;  %v780_v21 = vmul.f32 %v716_v5, %v9849_v41  ;;  %v717_v6 = vmul.f32 %v653_v18, %v9872_v58 }
 0x13b   :  { %9007 = vtanh.f32 %v920_v19  ;;  %v729_v32 = vmul.f32 %v665_v20, %v9834_v12  ;;  %v1032_v44 = vadd.f32 1.0, %v9006_v29  ;;  %v907_v20 = vmul.f32 0.7978846, %v843_v3 }
 0x13c   :  { %v1111_v37 = vmul.f32 %v1047_v26, %v599_v23  ;;  %9009 = vtanh.f32 %v905_v15 }
 0x13d   :  { %v793_v43 = vmul.f32 %v729_v32, %v9834_v12  ;;  %v1096_v61 = vmul.f32 %v1032_v44, %v584_v25  ;;  %v601_v32 = vmul.f32 0.5, %v9834_v12 }
 0x13e   :  { %v473_v45 = vpop.f32.mrf.mxu0  ;;  %v9856_v46 = vsel %vm315_vm0, %v1111_v37, -inf }
 0x13f   :  { %v857_v50 = vadd.f32 %v793_v43, %v9834_v12  ;;  %v9860_v52 = vadd.f32 %v9742_v35, %v473_v45  ;;  %v1173_v53 = vmax.f32 %v9853_v14, %v9856_v46  ;;  %v9881_v11 = vsel %vm315_vm0, %v1096_v61, -inf  ;;  %v10180_v14 = vld [vmem:[%s14548_s8] ss:$0 sm:$0xff] }
 0x140   :  { %v9902_v43 = vadd.f32 %v9742_v35, %v9721_v28  ;;  %v844_v45 = vadd.f32 %v780_v21, %v9849_v41 }
 0x141   :  { %v9008_v55 = vpop.eup %9007  ;;  %v921_v59 = vmul.f32 0.7978846, %v857_v50  ;;  %v666_v60 = vmul.f32 0.044715, %v9860_v52  ;;  %v602_v3 = vmul.f32 0.5, %v9860_v52 }
 0x142   :  { %v1048_v0 = vadd.f32 1.0, %v9008_v55  ;;  %v9010_v1 = vpop.eup %9009  ;;  %v654_v61 = vmul.f32 0.044715, %v9902_v43 }
 0x143   :  { %9011 = vtanh.f32 %v921_v59  ;;  %v730_v2 = vmul.f32 %v666_v60, %v9860_v52  ;;  %v1033_v7 = vadd.f32 1.0, %v9010_v1  ;;  %v586_v59 = vmul.f32 0.5, %v9795_v39 }
 0x144   :  { %v1112_v40 = vmul.f32 %v1048_v0, %v600_v63  ;;  %9013 = vtanh.f32 %v906_v54  ;;  %v781_v60 = vmul.f32 %v717_v6, %v9872_v58  ;;  %v908_v0 = vmul.f32 0.7978846, %v844_v45 }
 0x145   :  { %v794_v62 = vmul.f32 %v730_v2, %v9860_v52  ;;  %v1097_v29 = vmul.f32 %v1033_v7, %v585_v17  ;;  %v718_v39 = vmul.f32 %v654_v61, %v9902_v43  ;;  %v9957_v61 = vadd.f32 %v9742_v35, %v9729_v31 }
 0x146   :  { %v476_v8 = vpop.f32.mrf.mxu0  ;;  %v9884_v27 = vsel %vm315_vm0, %v1112_v40, -inf  ;;  %v845_v7 = vadd.f32 %v781_v60, %v9872_v58  ;;  %v588_v31 = vmul.f32 0.5, %v9849_v41  ;;  %v9980_v41 = vadd.f32 %v9742_v35, %v9734_v33 }
 0x147   :  { %v858_v13 = vadd.f32 %v794_v62, %v9860_v52  ;;  %v9888_v15 = vadd.f32 %v9742_v35, %v476_v8  ;;  %v1180_v16 = vmax.f32 %v9881_v11, %v9884_v27  ;;  %v9907_v12 = vsel %vm315_vm0, %v1097_v29, -inf  ;;  %v8879_v52 = vld [vmem:[%s14549_s0 + $0xa0] sm:$0xff] }
 0x148   :  { %v587_v29 = vmul.f32 0.5, %v9820_v4 }
 0x149   :  { %v9012_v19 = vpop.eup %9011  ;;  %v922_v23 = vmul.f32 0.7978846, %v858_v13  ;;  %v667_v26 = vmul.f32 0.044715, %v9888_v15  ;;  %8637 = vmatmul.msk.bf16.gmra.mxu0 %vm315_vm0, %v8878_v51  ;;  %v9928_v13 = vadd.f32 %v9742_v35, %v9726_v30 }
 0x14a   :  { %v1049_v47 = vadd.f32 1.0, %v9012_v19  ;;  %v9014_v37 = vpop.eup %9013 }
 0x14b   :  { %9015 = vtanh.f32 %v922_v23  ;;  %v731_v36 = vmul.f32 %v667_v26, %v9888_v15  ;;  %v1034_v25 = vadd.f32 1.0, %v9014_v37 }
 0x14c   :  { %v1113_v44 = vmul.f32 %v1049_v47, %v601_v32  ;;  %9017 = vtanh.f32 %v907_v20  ;;  %v909_v32 = vmul.f32 0.7978846, %v845_v7  ;;  %v782_v47 = vmul.f32 %v718_v39, %v9902_v43 }
 0x14d   :  { %v795_v50 = vmul.f32 %v731_v36, %v9888_v15  ;;  %v1098_v40 = vmul.f32 %v1034_v25, %v586_v59  ;;  %v655_v36 = vmul.f32 0.044715, %v9928_v13  ;;  %v656_v39 = vmul.f32 0.044715, %v9957_v61 }
 0x14e   :  { %v478_v54 = vpop.f32.mrf.mxu0  ;;  %v9910_v55 = vsel %vm315_vm0, %v1113_v44, -inf  ;;  %v846_v4 = vadd.f32 %v782_v47, %v9902_v43 }
 0x14f   :  { %v859_v56 = vadd.f32 %v795_v50, %v9888_v15  ;;  %v9914_v57 = vadd.f32 %v9742_v35, %v478_v54  ;;  %v1187_v28 = vmax.f32 %v9907_v12, %v9910_v55  ;;  %v9935_v20 = vsel %vm315_vm0, %v1098_v40, -inf }
 0x150   :  { %v603_v50 = vmul.f32 0.5, %v9888_v15  ;;  %v719_v60 = vmul.f32 %v655_v36, %v9928_v13 }
 0x151   :  { %v9016_v63 = vpop.eup %9015  ;;  %v923_v1 = vmul.f32 0.7978846, %v859_v56  ;;  %v668_v2 = vmul.f32 0.044715, %v9914_v57 }
 0x152   :  { %v1050_v5 = vadd.f32 1.0, %v9016_v63  ;;  %v9018_v62 = vpop.eup %9017  ;;  %v783_v7 = vmul.f32 %v719_v60, %v9928_v13 }
 0x153   :  { %9019 = vtanh.f32 %v923_v1  ;;  %v732_v51 = vmul.f32 %v668_v2, %v9914_v57  ;;  %v1035_v18 = vadd.f32 1.0, %v9018_v62  ;;  %v910_v62 = vmul.f32 0.7978846, %v846_v4 }
 0x154   :  { %v1114_v8 = vmul.f32 %v1050_v5, %v602_v3  ;;  %9021 = vtanh.f32 %v908_v0  ;;  %v847_v47 = vadd.f32 %v783_v7, %v9928_v13  ;;  %v657_v4 = vmul.f32 0.044715, %v9980_v41 }
 0x155   :  { %v796_v17 = vmul.f32 %v732_v51, %v9914_v57  ;;  %v1099_v45 = vmul.f32 %v1035_v18, %v587_v29  ;;  %v604_v18 = vmul.f32 0.5, %v9914_v57 }
 0x156   :  { %v481_v19 = vpop.f32.mrf.mxu0  ;;  %v9938_v21 = vsel %vm315_vm0, %v1114_v8, -inf  ;;  %v911_v60 = vmul.f32 0.7978846, %v847_v47  ;;  %v590_v47 = vmul.f32 0.5, %v9902_v43 }
 0x157   :  { %v860_v23 = vadd.f32 %v796_v17, %v9914_v57  ;;  %v9942_v26 = vadd.f32 %v9742_v35, %v481_v19  ;;  %v1194_v30 = vmax.f32 %v9935_v20, %v9938_v21  ;;  %v9961_v15 = vsel %vm315_vm0, %v1099_v45, -inf  ;;  %v8880_v57 = vld [vmem:[%s14549_s0 + $0xa8] sm:$0xff] }
 0x159   :  { %v9020_v37 = vpop.eup %9019  ;;  %v924_v6 = vmul.f32 0.7978846, %v860_v23  ;;  %v669_v44 = vmul.f32 0.044715, %v9942_v26  ;;  %8638 = vmatmul.msk.bf16.gmra.mxu0 %vm315_vm0, %v8879_v52 }
 0x15a   :  { %v1051_v25 = vadd.f32 1.0, %v9020_v37  ;;  %v9022_v54 = vpop.eup %9021  ;;  %v720_v37 = vmul.f32 %v656_v39, %v9957_v61  ;;  %v10010_v39 = vadd.f32 %v9742_v35, %v9737_v34 }
 0x15b   :  { %9023 = vtanh.f32 %v924_v6  ;;  %v733_v56 = vmul.f32 %v669_v44, %v9942_v26  ;;  %v1036_v0 = vadd.f32 1.0, %v9022_v54 }
 0x15c   :  { %v1115_v59 = vmul.f32 %v1051_v25, %v603_v50  ;;  %9025 = vtanh.f32 %v909_v32 }
 0x15d   :  { %v797_v63 = vmul.f32 %v733_v56, %v9942_v26  ;;  %v1100_v52 = vmul.f32 %v1036_v0, %v588_v31  ;;  %v589_v56 = vmul.f32 0.5, %v9872_v58  ;;  %v605_v31 = vmul.f32 0.5, %v9942_v26 }
 0x15e   :  { %v483_v1 = vpop.f32.mrf.mxu0  ;;  %v9964_v2 = vsel %vm315_vm0, %v1115_v59, -inf  ;;  %v721_v58 = vmul.f32 %v657_v4, %v9980_v41 }
 0x15f   :  { %v861_v40 = vadd.f32 %v797_v63, %v9942_v26  ;;  %v9968_v3 = vadd.f32 %v9742_v35, %v483_v1  ;;  %v1201_v5 = vmax.f32 %v9961_v15, %v9964_v2  ;;  %v9989_v45 = vsel %vm315_vm0, %v1100_v52, -inf }
 0x160   :  { %v784_v63 = vmul.f32 %v720_v37, %v9957_v61  ;;  %v785_v37 = vmul.f32 %v721_v58, %v9980_v41 }
 0x161   :  { %v9024_v51 = vpop.eup %9023  ;;  %v925_v8 = vmul.f32 0.7978846, %v861_v40  ;;  %v670_v17 = vmul.f32 0.044715, %v9968_v3  ;;  %v606_v4 = vmul.f32 0.5, %v9968_v3 }
 0x162   :  { %v1052_v19 = vadd.f32 1.0, %v9024_v51  ;;  %v9026_v23 = vpop.eup %9025 }
 0x163   :  { %9027 = vtanh.f32 %v925_v8  ;;  %v734_v29 = vmul.f32 %v670_v17, %v9968_v3  ;;  %v1037_v6 = vadd.f32 1.0, %v9026_v23  ;;  %v848_v17 = vadd.f32 %v784_v63, %v9957_v61 }
 0x164   :  { %v1116_v32 = vmul.f32 %v1052_v19, %v604_v18  ;;  %9029 = vtanh.f32 %v910_v62 }
 0x165   :  { %v798_v36 = vmul.f32 %v734_v29, %v9968_v3  ;;  %v1101_v40 = vmul.f32 %v1037_v6, %v589_v56  ;;  %v912_v6 = vmul.f32 0.7978846, %v848_v17 }
 0x166   :  { %v486_v44 = vpop.f32.mrf.mxu0  ;;  %v9992_v33 = vsel %vm315_vm0, %v1116_v32, -inf }
 0x167   :  { %v862_v50 = vadd.f32 %v798_v36, %v9968_v3  ;;  %v9996_v25 = vadd.f32 %v9742_v35, %v486_v44  ;;  %v1208_v54 = vmax.f32 %v9989_v45, %v9992_v33  ;;  %v10015_v26 = vsel %vm315_vm0, %v1101_v40, -inf  ;;  %v8881_v3 = vld [vmem:[%s14549_s0 + $0xb0] sm:$0xff] }
 0x168   :  { %v658_v36 = vmul.f32 0.044715, %v10010_v39  ;;  %v10036_v40 = vadd.f32 %v9742_v35, %v9748_v38 }
 0x169   :  { %v9028_v59 = vpop.eup %9027  ;;  %v926_v0 = vmul.f32 0.7978846, %v862_v50  ;;  %v671_v1 = vmul.f32 0.044715, %v9996_v25  ;;  %8639 = vmatmul.msk.bf16.gmra.mxu0 %vm315_vm0, %v8880_v57 }
 0x16a   :  { %v1053_v62 = vadd.f32 1.0, %v9028_v59  ;;  %v9030_v51 = vpop.eup %9029  ;;  %v722_v43 = vmul.f32 %v658_v36, %v10010_v39 }
 0x16b   :  { %9031 = vtanh.f32 %v926_v0  ;;  %v735_v7 = vmul.f32 %v671_v1, %v9996_v25  ;;  %v1038_v18 = vadd.f32 1.0, %v9030_v51  ;;  %v849_v0 = vadd.f32 %v785_v37, %v9980_v41 }
 0x16c   :  { %v1117_v8 = vmul.f32 %v1053_v62, %v605_v31  ;;  %9033 = vtanh.f32 %v911_v60 }
 0x16d   :  { %v799_v52 = vmul.f32 %v735_v7, %v9996_v25  ;;  %v1102_v56 = vmul.f32 %v1038_v18, %v590_v47  ;;  %v913_v18 = vmul.f32 0.7978846, %v849_v0  ;;  %v659_v47 = vmul.f32 0.044715, %v10036_v40 }
 0x16e   :  { %v488_v19 = vpop.f32.mrf.mxu0  ;;  %v10018_v23 = vsel %vm315_vm0, %v1117_v8, -inf }
 0x16f   :  { %v863_v29 = vadd.f32 %v799_v52, %v9996_v25  ;;  %v10022_v32 = vadd.f32 %v9742_v35, %v488_v19  ;;  %v1215_v34 = vmax.f32 %v10015_v26, %v10018_v23  ;;  %v10043_v7 = vsel %vm315_vm0, %v1102_v56, -inf }
 0x170   :  { %v591_v52 = vmul.f32 0.5, %v9928_v13  ;;  %v786_v19 = vmul.f32 %v722_v43, %v10010_v39 }
 0x171   :  { %v9032_v57 = vpop.eup %9031  ;;  %v927_v44 = vmul.f32 0.7978846, %v863_v29  ;;  %v672_v50 = vmul.f32 0.044715, %v10022_v32 }
 0x172   :  { %v1054_v59 = vadd.f32 1.0, %v9032_v57  ;;  %v9034_v60 = vpop.eup %9033  ;;  %v850_v13 = vadd.f32 %v786_v19, %v10010_v39 }
 0x173   :  { %9035 = vtanh.f32 %v927_v44  ;;  %v736_v63 = vmul.f32 %v672_v50, %v10022_v32  ;;  %v1039_v62 = vadd.f32 1.0, %v9034_v60  ;;  %v10065_v60 = vadd.f32 %v9742_v35, %v9754_v42 }
 0x174   :  { %v1118_v1 = vmul.f32 %v1054_v59, %v606_v4  ;;  %9037 = vtanh.f32 %v912_v6  ;;  %v607_v6 = vmul.f32 0.5, %v9996_v25  ;;  %v723_v59 = vmul.f32 %v659_v47, %v10036_v40 }
 0x175   :  { %v800_v31 = vmul.f32 %v736_v63, %v10022_v32  ;;  %v1103_v57 = vmul.f32 %v1039_v62, %v591_v52  ;;  %v592_v42 = vmul.f32 0.5, %v9957_v61 }
 0x176   :  { %v491_v51 = vpop.f32.mrf.mxu0  ;;  %v10046_v58 = vsel %vm315_vm0, %v1118_v1, -inf  ;;  %v787_v52 = vmul.f32 %v723_v59, %v10036_v40 }
 0x177   :  { %v864_v8 = vadd.f32 %v800_v31, %v10022_v32  ;;  %v10050_v17 = vadd.f32 %v9742_v35, %v491_v51  ;;  %v10069_v25 = vsel %vm315_vm0, %v1103_v57, -inf  ;;  %v914_v51 = vmul.f32 0.7978846, %v850_v13  ;;  %v8882_v13 = vld [vmem:[%s14549_s0 + $0xb8] sm:$0xff] }
 0x179   :  { %v9036_v29 = vpop.eup %9035  ;;  %v928_v37 = vmul.f32 0.7978846, %v864_v8  ;;  %v673_v36 = vmul.f32 0.044715, %v10050_v17  ;;  %8640 = vmatmul.msk.bf16.gmra.mxu0 %vm315_vm0, %v8881_v3 }
 0x17a   :  { %v1055_v44 = vadd.f32 1.0, %v9036_v29  ;;  %v9038_v50 = vpop.eup %9037 }
 0x17b   :  { %9039 = vtanh.f32 %v928_v37  ;;  %v737_v56 = vmul.f32 %v673_v36, %v10050_v17  ;;  %v1040_v0 = vadd.f32 1.0, %v9038_v50  ;;  %v608_v37 = vmul.f32 0.5, %v10022_v32 }
 0x17c   :  { %v1119_v4 = vmul.f32 %v1055_v44, %v607_v6  ;;  %9041 = vtanh.f32 %v913_v18  ;;  %v660_v18 = vmul.f32 0.044715, %v10065_v60  ;;  %v851_v50 = vadd.f32 %v787_v52, %v10036_v40 }
 0x17d   :  { %v801_v63 = vmul.f32 %v737_v56, %v10050_v17  ;;  %v1104_v47 = vmul.f32 %v1040_v0, %v592_v42  ;;  %v593_v42 = vmul.f32 0.5, %v9980_v41 }
 0x17e   :  { %v493_v43 = vpop.f32.mrf.mxu0  ;;  %v10072_v1 = vsel %vm315_vm0, %v1119_v4, -inf  ;;  %v724_v61 = vmul.f32 %v660_v18, %v10065_v60 }
 0x17f   :  { %v865_v31 = vadd.f32 %v801_v63, %v10050_v17  ;;  %v494_v3 = vadd.f32 %v9742_v35, %v493_v43  ;;  %v1229_v62 = vmax.f32 %v10069_v25, %v10072_v1  ;;  %v10088_v63 = vsel %vm315_vm0, %v1104_v47, -inf }
 0x180   :  { %v788_v52 = vmul.f32 %v724_v61, %v10065_v60  ;;  %v609_v47 = vmul.f32 0.5, %v10050_v17 }
 0x181   :  { %v9040_v8 = vpop.eup %9039  ;;  %v929_v19 = vmul.f32 0.7978846, %v865_v31  ;;  %v674_v29 = vmul.f32 0.044715, %v494_v3 }
 0x182   :  { %v1056_v36 = vadd.f32 1.0, %v9040_v8  ;;  %v9042_v57 = vpop.eup %9041  ;;  %v915_v8 = vmul.f32 0.7978846, %v851_v50 }
 0x183   :  { %9043 = vtanh.f32 %v929_v19  ;;  %v738_v6 = vmul.f32 %v674_v29, %v494_v3  ;;  %v1041_v4 = vadd.f32 1.0, %v9042_v57 }
 0x184   :  { %v1120_v44 = vmul.f32 %v1056_v36, %v608_v37  ;;  %9045 = vtanh.f32 %v914_v51 }
 0x185   :  { %v802_v56 = vmul.f32 %v738_v6, %v494_v3  ;;  %v1105_v29 = vmul.f32 %v1041_v4, %v593_v42 }
 0x186   :  { %v496_v59 = vpop.f32.mrf.mxu0  ;;  %v10091_v32 = vsel %vm315_vm0, %v1120_v44, -inf  ;;  %v852_v44 = vadd.f32 %v788_v52, %v10065_v60 }
 0x187   :  { %v866_v0 = vadd.f32 %v802_v56, %v494_v3  ;;  %v497_v43 = vadd.f32 %v9742_v35, %v496_v59  ;;  %v10102_v61 = vsel %vm315_vm0, %v1105_v29, -inf }
 0x189   :  { %v9044_v51 = vpop.eup %9043  ;;  %v930_v18 = vmul.f32 0.7978846, %v866_v0  ;;  %v675_v19 = vmul.f32 0.044715, %v497_v43  ;;  %8641 = vmatmul.msk.bf16.gmra.mxu0 %vm315_vm0, %v8882_v13  ;;  %v594_v0 = vmul.f32 0.5, %v10010_v39 }
 0x18a   :  { %v1057_v37 = vadd.f32 1.0, %v9044_v51  ;;  %v9046_v36 = vpop.eup %9045  ;;  %v916_v51 = vmul.f32 0.7978846, %v852_v44 }
 0x18b   :  { %9047 = vtanh.f32 %v930_v18  ;;  %v739_v57 = vmul.f32 %v675_v19, %v497_v43  ;;  %v1042_v56 = vadd.f32 1.0, %v9046_v36  ;;  %v610_v19 = vmul.f32 0.5, %v494_v3 }
 0x18c   :  { %v1121_v6 = vmul.f32 %v1057_v37, %v609_v47  ;;  %9049 = vtanh.f32 %v915_v8 }
 0x18d   :  { %v803_v41 = vmul.f32 %v739_v57, %v497_v43  ;;  %v1106_v18 = vmul.f32 %v1042_v56, %v594_v0  ;;  %v595_v0 = vmul.f32 0.5, %v10036_v40 }
 0x18e   :  { %v498_v50 = vpop.f32.mrf.mxu0  ;;  %v10105_v59 = vsel %vm315_vm0, %v1121_v6, -inf  ;;  %v8883_v6 = vld [vmem:[%s14549_s0 + $0xc0] sm:$0xff] }
 0x18f   :  { %v867_v13 = vadd.f32 %v803_v41, %v497_v43  ;;  %v499_v17 = vadd.f32 %v9742_v35, %v498_v50  ;;  %v1243_v4 = vmax.f32 %v10102_v61, %v10105_v59  ;;  %v10115_v39 = vsel %vm315_vm0, %v1106_v18, -inf }
 0x191   :  { %v9048_v42 = vpop.eup %9047  ;;  %v931_v8 = vmul.f32 0.7978846, %v867_v13  ;;  %v676_v52 = vmul.f32 0.044715, %v499_v17 }
 0x192   :  { %v1058_v47 = vadd.f32 1.0, %v9048_v42  ;;  %v9050_v29 = vpop.eup %9049 }
 0x193   :  { %9051 = vtanh.f32 %v931_v8  ;;  %v740_v37 = vmul.f32 %v676_v52, %v499_v17  ;;  %v1043_v41 = vadd.f32 1.0, %v9050_v29 }
 0x194   :  { %v1122_v36 = vmul.f32 %v1058_v47, %v610_v19  ;;  %9053 = vtanh.f32 %v916_v51  ;;  %v611_v19 = vmul.f32 0.5, %v497_v43 }
 0x195   :  { %v804_v57 = vmul.f32 %v740_v37, %v499_v17  ;;  %v1107_v52 = vmul.f32 %v1043_v41, %v595_v0 }
 0x196   :  { %v501_v50 = vpop.f32.mrf.mxu0  ;;  %v10118_v44 = vsel %vm315_vm0, %v1122_v36, -inf }
 0x197   :  { %v868_v3 = vadd.f32 %v804_v57, %v499_v17  ;;  %v502_v56 = vadd.f32 %v9742_v35, %v501_v50  ;;  %v10126_v31 = vsel %vm315_vm0, %v1107_v52, -inf }
 0x199   :  { %v9052_v42 = vpop.eup %9051  ;;  %v932_v51 = vmul.f32 0.7978846, %v868_v3  ;;  %v677_v8 = vmul.f32 0.044715, %v502_v56  ;;  %8642 = vmatmul.msk.bf16.gmra.mxu0 %vm315_vm0, %v8883_v6  ;;  %v596_v6 = vmul.f32 0.5, %v10065_v60 }
 0x19a   :  { %v1059_v18 = vadd.f32 1.0, %v9052_v42  ;;  %v9054_v47 = vpop.eup %9053 }
 0x19b   :  { %9055 = vtanh.f32 %v932_v51  ;;  %v741_v29 = vmul.f32 %v677_v8, %v502_v56  ;;  %v1044_v57 = vadd.f32 1.0, %v9054_v47  ;;  %v612_v8 = vmul.f32 0.5, %v499_v17 }
 0x19c   :  { %v1123_v37 = vmul.f32 %v1059_v18, %v611_v19 }
 0x19d   :  { %v805_v36 = vmul.f32 %v741_v29, %v502_v56  ;;  %v1108_v51 = vmul.f32 %v1044_v57, %v596_v6  ;;  %v8884_v29 = vld [vmem:[%s14549_s0 + $0xc8] sm:$0xff] }
 0x19e   :  { %v503_v50 = vpop.f32.mrf.mxu0  ;;  %v10129_v40 = vsel %vm315_vm0, %v1123_v37, -inf }
 0x19f   :  { %v869_v3 = vadd.f32 %v805_v36, %v502_v56  ;;  %v504_v13 = vadd.f32 %v9742_v35, %v503_v50  ;;  %v1257_v43 = vmax.f32 %v10126_v31, %v10129_v40  ;;  %v10139_v36 = vsel %vm315_vm0, %v1108_v51, -inf }
 0x1a1   :  { %v9056_v41 = vpop.eup %9055  ;;  %v933_v0 = vmul.f32 0.7978846, %v869_v3  ;;  %v678_v42 = vmul.f32 0.044715, %v504_v13 }
 0x1a2   :  { %v1060_v19 = vadd.f32 1.0, %v9056_v41 }
 0x1a3   :  { %9057 = vtanh.f32 %v933_v0  ;;  %v742_v52 = vmul.f32 %v678_v42, %v504_v13  ;;  %v613_v0 = vmul.f32 0.5, %v502_v56  ;;  %v614_v56 = vmul.f32 0.5, %v504_v13 }
 0x1a4   :  { %v1124_v18 = vmul.f32 %v1060_v19, %v612_v8 }
 0x1a5   :  { %v806_v47 = vmul.f32 %v742_v52, %v504_v13 }
 0x1a6   :  { %v506_v37 = vpop.f32.mrf.mxu0  ;;  %v10142_v60 = vsel %vm315_vm0, %v1124_v18, -inf }
 0x1a7   :  { %v870_v50 = vadd.f32 %v806_v47, %v504_v13  ;;  %v507_v57 = vadd.f32 %v9742_v35, %v506_v37 }
 0x1a9   :  { %v9058_v3 = vpop.eup %9057  ;;  %v934_v6 = vmul.f32 0.7978846, %v870_v50  ;;  %v679_v41 = vmul.f32 0.044715, %v507_v57  ;;  %8643 = vmatmul.msk.bf16.gmra.mxu0 %vm315_vm0, %v8884_v29 }
 0x1aa   :  { %v1061_v42 = vadd.f32 1.0, %v9058_v3 }
 0x1ab   :  { %9059 = vtanh.f32 %v934_v6  ;;  %v743_v8 = vmul.f32 %v679_v41, %v507_v57 }
 0x1ac   :  { %v1125_v51 = vmul.f32 %v1061_v42, %v613_v0  ;;  %v8885_v42 = vld [vmem:[%s14549_s0 + $0xd0] sm:$0xff] }
 0x1ad   :  { %v807_v19 = vmul.f32 %v743_v8, %v507_v57 }
 0x1ae   :  { %v508_v52 = vpop.f32.mrf.mxu0  ;;  %v1160_v18 = vsel %vm315_vm0, %v1125_v51, -inf }
 0x1af   :  { %v871_v47 = vadd.f32 %v807_v19, %v507_v57  ;;  %v509_v37 = vadd.f32 %v9742_v35, %v508_v52  ;;  %v10153_v17 = vmax.f32 %v1159_v22, %v1160_v18  ;;  %v615_v52 = vmul.f32 0.5, %v507_v57 }
 0x1b1   :  { %v9060_v50 = vpop.eup %9059  ;;  %v935_v38 = vmul.f32 0.7978846, %v871_v47  ;;  %v680_v29 = vmul.f32 0.044715, %v509_v37  ;;  %v616_v57 = vmul.f32 0.5, %v509_v37 }
 0x1b2   :  { %v1062_v3 = vadd.f32 1.0, %v9060_v50 }
 0x1b3   :  { %9061 = vtanh.f32 %v935_v38  ;;  %v744_v6 = vmul.f32 %v680_v29, %v509_v37 }
 0x1b4   :  { %v1126_v41 = vmul.f32 %v1062_v3, %v614_v56 }
 0x1b5   :  { %v808_v0 = vmul.f32 %v744_v6, %v509_v37 }
 0x1b6   :  { %v511_v8 = vpop.f32.mrf.mxu0  ;;  %v1167_v51 = vsel %vm315_vm0, %v1126_v41, -inf }
 0x1b7   :  { %v872_v19 = vadd.f32 %v808_v0, %v509_v37  ;;  %v512_v48 = vadd.f32 %v9742_v35, %v511_v8  ;;  %v10163_v49 = vmax.f32 %v1166_v24, %v1167_v51 }
 0x1b9   :  { %v9062_v22 = vpop.eup %9061  ;;  %v936_v38 = vmul.f32 0.7978846, %v872_v19  ;;  %v681_v13 = vmul.f32 0.044715, %v512_v48  ;;  %8644 = vmatmul.msk.bf16.gmra.mxu0 %vm315_vm0, %v8885_v42 }
 0x1ba   :  { %v1063_v18 = vadd.f32 1.0, %v9062_v22  ;;  %v8886_v22 = vld [vmem:[%s14549_s0 + $0xd8] sm:$0xff] }
 0x1bb   :  { %9063 = vtanh.f32 %v936_v38  ;;  %v745_v47 = vmul.f32 %v681_v13, %v512_v48 }
 0x1bc   :  { %v1127_v50 = vmul.f32 %v1063_v18, %v615_v52 }
 0x1bd   :  { %v809_v29 = vmul.f32 %v745_v47, %v512_v48  ;;  %v617_v47 = vmul.f32 0.5, %v512_v48 }
 0x1be   :  { %v513_v56 = vpop.f32.mrf.mxu0  ;;  %v1174_v3 = vsel %vm315_vm0, %v1127_v50, -inf }
 0x1bf   :  { %v873_v6 = vadd.f32 %v809_v29, %v512_v48  ;;  %v514_v41 = vadd.f32 %v9742_v35, %v513_v56  ;;  %v10171_v9 = vmax.f32 %v1173_v53, %v1174_v3 }
 0x1c1   :  { %v9064_v10 = vpop.eup %9063  ;;  %v937_v24 = vmul.f32 0.7978846, %v873_v6  ;;  %v682_v0 = vmul.f32 0.044715, %v514_v41  ;;  %v618_v48 = vmul.f32 0.5, %v514_v41 }
 0x1c2   :  { %v1064_v42 = vadd.f32 1.0, %v9064_v10 }
 0x1c3   :  { %9065 = vtanh.f32 %v937_v24  ;;  %v746_v8 = vmul.f32 %v682_v0, %v514_v41 }
 0x1c4   :  { %v1128_v51 = vmul.f32 %v1064_v42, %v616_v57 }
 0x1c5   :  { %v810_v19 = vmul.f32 %v746_v8, %v514_v41 }
 0x1c6   :  { %v516_v38 = vpop.f32.mrf.mxu0  ;;  %v1181_v35 = vsel %vm315_vm0, %v1128_v51, -inf }
 0x1c7   :  { %v874_v13 = vadd.f32 %v810_v19, %v514_v41  ;;  %v517_v46 = vadd.f32 %v10180_v14, %v516_v38  ;;  %v10186_v53 = vmax.f32 %v1180_v16, %v1181_v35 }
 0x1c9   :  { %v9066_v37 = vpop.eup %9065  ;;  %v938_v52 = vmul.f32 0.7978846, %v874_v13  ;;  %v683_v18 = vmul.f32 0.044715, %v517_v46  ;;  %8645 = vmatmul.msk.bf16.gmra.mxu0 %vm315_vm0, %v8886_v22  ;;  %v8887_v22 = vld [vmem:[%s14549_s0 + $0xe0] sm:$0xff] }
 0x1ca   :  { %v1065_v50 = vadd.f32 1.0, %v9066_v37 }
 0x1cb   :  { %9067 = vtanh.f32 %v938_v52  ;;  %v747_v29 = vmul.f32 %v683_v18, %v517_v46  ;;  %v619_v52 = vmul.f32 0.5, %v517_v46 }
 0x1cc   :  { %v1129_v56 = vmul.f32 %v1065_v50, %v617_v47 }
 0x1cd   :  { %v811_v3 = vmul.f32 %v747_v29, %v517_v46 }
 0x1ce   :  { %v518_v6 = vpop.f32.mrf.mxu0  ;;  %v1188_v10 = vsel %vm315_vm0, %v1129_v56, -inf }
 0x1cf   :  { %v875_v24 = vadd.f32 %v811_v3, %v517_v46  ;;  %v519_v0 = vadd.f32 %v10180_v14, %v518_v6  ;;  %v10194_v11 = vmax.f32 %v1187_v28, %v1188_v10 }
 0x1d1   :  { %v9068_v27 = vpop.eup %9067  ;;  %v939_v16 = vmul.f32 0.7978846, %v875_v24  ;;  %v684_v57 = vmul.f32 0.044715, %v519_v0  ;;  %v620_v10 = vmul.f32 0.5, %v519_v0 }
 0x1d2   :  { %v1066_v42 = vadd.f32 1.0, %v9068_v27  ;;  %v8888_v27 = vld [vmem:[%s14549_s0 + $0xe8] sm:$0xff] }
 0x1d3   :  { %9069 = vtanh.f32 %v939_v16  ;;  %v748_v8 = vmul.f32 %v684_v57, %v519_v0 }
 0x1d4   :  { %v1130_v51 = vmul.f32 %v1066_v42, %v618_v48 }
 0x1d5   :  { %v812_v19 = vmul.f32 %v748_v8, %v519_v0 }
 0x1d6   :  { %v521_v38 = vpop.f32.mrf.mxu0  ;;  %v1195_v35 = vsel %vm315_vm0, %v1130_v51, -inf }
 0x1d7   :  { %v876_v13 = vadd.f32 %v812_v19, %v519_v0  ;;  %v522_v12 = vadd.f32 %v10180_v14, %v521_v38  ;;  %v10204_v55 = vmax.f32 %v1194_v30, %v1195_v35 }
 0x1d9   :  { %v9070_v28 = vpop.eup %9069  ;;  %v940_v41 = vmul.f32 0.7978846, %v876_v13  ;;  %v685_v37 = vmul.f32 0.044715, %v522_v12  ;;  %8646 = vmatmul.msk.bf16.gmra.mxu0 %vm315_vm0, %v8887_v22  ;;  %v621_v0 = vmul.f32 0.5, %v522_v12 }
 0x1da   :  { %v1067_v18 = vadd.f32 1.0, %v9070_v28 }
 0x1db   :  { %9071 = vtanh.f32 %v940_v41  ;;  %v749_v47 = vmul.f32 %v685_v37, %v522_v12 }
 0x1dc   :  { %v1131_v50 = vmul.f32 %v1067_v18, %v619_v52 }
 0x1dd   :  { %v813_v29 = vmul.f32 %v749_v47, %v522_v12 }
 0x1de   :  { %v10207_v56 = vpop.f32.mrf.mxu0  ;;  %v1202_v3 = vsel %vm315_vm0, %v1131_v50, -inf }
 0x1df   :  { %v877_v6 = vadd.f32 %v813_v29, %v522_v12  ;;  %v10213_v20 = vmax.f32 %v1201_v5, %v1202_v3 }
 0x1e1   :  { %v9072_v21 = vpop.eup %9071  ;;  %v941_v30 = vmul.f32 0.7978846, %v877_v6  ;;  %v8890_v6 = vld [vmem:[%s14549_s0 + $0xf8] sm:$0xff] }
 0x1e2   :  { %v1068_v24 = vadd.f32 1.0, %v9072_v21 }
 0x1e3   :  { %9073 = vtanh.f32 %v941_v30 }
 0x1e4   :  { %v1132_v46 = vmul.f32 %v1068_v24, %v620_v10 }
 0x1e6   :  { %v526_v16 = vpop.f32.mrf.mxu0  ;;  %v1209_v57 = vsel %vm315_vm0, %v1132_v46, -inf }
 0x1e7   :  { %v527_v48 = vadd.f32 %v10180_v14, %v526_v16  ;;  %v10223_v15 = vmax.f32 %v1208_v54, %v1209_v57  ;;  %v8889_v54 = vld [vmem:[%s14549_s0 + $0xf0] sm:$0xff] }
 0x1e9   :  { %v9074_v2 = vpop.eup %9073  ;;  %v687_v5 = vmul.f32 0.044715, %v527_v48  ;;  %8647 = vmatmul.msk.bf16.gmra.mxu0 %vm315_vm0, %v8888_v27  ;;  %v623_v37 = vmul.f32 0.5, %v527_v48 }
 0x1ea   :  { %v1069_v42 = vadd.f32 1.0, %v9074_v2 }
 0x1eb   :  { %v751_v8 = vmul.f32 %v687_v5, %v527_v48 }
 0x1ec   :  { %v1133_v51 = vmul.f32 %v1069_v42, %v621_v0  ;;  %v8898_v0 = vld [vmem:[%s14550_s2 + $0x8] sm:$0xff] }
 0x1ed   :  { %v815_v19 = vmul.f32 %v751_v8, %v527_v48  ;;  %1328 = vmatpush.bf16.msra.mxu1 %v8898_v0  ;;  %v8897_v8 = vld [vmem:[%s14550_s2] sm:$0xff] }
 0x1ee   :  { %v10226_v22 = vpop.f32.mrf.mxu0  ;;  %v1216_v38 = vsel %vm315_vm0, %v1133_v51, -inf }
 0x1ef   :  { %v879_v35 = vadd.f32 %v815_v19, %v527_v48  ;;  %v10232_v45 = vmax.f32 %v1215_v34, %v1216_v38 }
 0x1f1   :  { %v943_v33 = vmul.f32 0.7978846, %v879_v35  ;;  %1329 = vmatpush.bf16.msra.mxu1 %v8897_v8 }
 0x1f3   :  { %9075 = vtanh.f32 %v943_v33 }
 0x1f6   :  { %v531_v13 = vpop.f32.mrf.mxu0 }
 0x1f7   :  { %v532_v12 = vadd.f32 %v10180_v14, %v531_v13 }
 0x1f9   :  { %v9076_v28 = vpop.eup %9075  ;;  %v689_v41 = vmul.f32 0.044715, %v532_v12  ;;  %8648 = vmatmul.msk.bf16.gmra.mxu0 %vm315_vm0, %v8889_v54  ;;  %v625_v46 = vmul.f32 0.5, %v532_v12 }
 0x1fa   :  { %v1071_v52 = vadd.f32 1.0, %v9076_v28 }
 0x1fb   :  { %v753_v18 = vmul.f32 %v689_v41, %v532_v12 }
 0x1fc   :  { %v1135_v47 = vmul.f32 %v1071_v52, %v623_v37 }
 0x1fd   :  { %v817_v26 = vmul.f32 %v753_v18, %v532_v12 }
 0x1fe   :  { %v10239_v23 = vpop.f32.mrf.mxu0  ;;  %v1230_v34 = vsel %vm315_vm0, %v1135_v47, -inf }
 0x1ff   :  { %v881_v50 = vadd.f32 %v817_v26, %v532_v12  ;;  %v10245_v29 = vmax.f32 %v1229_v62, %v1230_v34 }
 0x201   :  { %v945_v3 = vmul.f32 0.7978846, %v881_v50 }
 0x203   :  { %9077 = vtanh.f32 %v945_v3 }
 0x206   :  { %v536_v21 = vpop.f32.mrf.mxu0 }
 0x207   :  { %v537_v30 = vadd.f32 %v10180_v14, %v536_v21 }
 0x209   :  { %v9078_v10 = vpop.eup %9077  ;;  %v691_v24 = vmul.f32 0.044715, %v537_v30  ;;  %8649 = vmatmul.msk.bf16.gmra.mxu0 %vm315_vm0, %v8890_v6  ;;  %v627_v61 = vmul.f32 0.5, %v537_v30 }
 0x20a   :  { %v1073_v27 = vadd.f32 1.0, %v9078_v10 }
 0x20b   :  { %v755_v16 = vmul.f32 %v691_v24, %v537_v30 }
 0x20c   :  { %v1137_v57 = vmul.f32 %v1073_v27, %v625_v46 }
 0x20d   :  { %v819_v25 = vmul.f32 %v755_v16, %v537_v30 }
 0x20e   :  { %v10252_v1 = vpop.f32.mrf.mxu0  ;;  %v1244_v62 = vsel %vm315_vm0, %v1137_v57, -inf }
 0x20f   :  { %v883_v48 = vadd.f32 %v819_v25, %v537_v30  ;;  %v10258_v2 = vmax.f32 %v1243_v4, %v1244_v62 }
 0x211   :  { %v947_v5 = vmul.f32 0.7978846, %v883_v48 }
 0x213   :  { %9079 = vtanh.f32 %v947_v5 }
 0x216   :  { %v541_v42 = vpop.f32.mrf.mxu0 }
 0x217   :  { %v542_v51 = vadd.f32 %v10180_v14, %v541_v42 }
 0x219   :  { %v9080_v19 = vpop.eup %9079  ;;  %v693_v38 = vmul.f32 0.044715, %v542_v51  ;;  %v629_v46 = vmul.f32 0.5, %v542_v51 }
 0x21a   :  { %v1075_v59 = vadd.f32 1.0, %v9080_v19 }
 0x21b   :  { %v757_v4 = vmul.f32 %v693_v38, %v542_v51 }
 0x21c   :  { %v1139_v35 = vmul.f32 %v1075_v59, %v627_v61 }
 0x21d   :  { %v821_v33 = vmul.f32 %v757_v4, %v542_v51 }
 0x21e   :  { %v543_v54 = vpop.f32.mrf.mxu0  ;;  %v1258_v13 = vsel %vm315_vm0, %v1139_v35, -inf }
 0x21f   :  { %v885_v12 = vadd.f32 %v821_v33, %v542_v51  ;;  %v544_v28 = vadd.f32 %v10180_v14, %v543_v54  ;;  %v10272_v41 = vmax.f32 %v1257_v43, %v1258_v13 }
 0x221   :  { %v949_v37 = vmul.f32 0.7978846, %v885_v12  ;;  %v694_v52 = vmul.f32 0.044715, %v544_v28  ;;  %v630_v62 = vmul.f32 0.5, %v544_v28 }
 0x223   :  { %9081 = vtanh.f32 %v949_v37  ;;  %v758_v18 = vmul.f32 %v694_v52, %v544_v28 }
 0x225   :  { %v822_v47 = vmul.f32 %v758_v18, %v544_v28 }
 0x226   :  { %v546_v26 = vpop.f32.mrf.mxu0 }
 0x227   :  { %v886_v34 = vadd.f32 %v822_v47, %v544_v28  ;;  %v547_v50 = vadd.f32 %v10180_v14, %v546_v26 }
 0x229   :  { %v9082_v3 = vpop.eup %9081  ;;  %v950_v6 = vmul.f32 0.7978846, %v886_v34  ;;  %v695_v21 = vmul.f32 0.044715, %v547_v50  ;;  %v631_v28 = vmul.f32 0.5, %v547_v50 }
 0x22a   :  { %v1077_v10 = vadd.f32 1.0, %v9082_v3 }
 0x22b   :  { %9083 = vtanh.f32 %v950_v6  ;;  %v759_v30 = vmul.f32 %v695_v21, %v547_v50 }
 0x22c   :  { %v1141_v27 = vmul.f32 %v1077_v10, %v629_v46 }
 0x22d   :  { %v823_v24 = vmul.f32 %v759_v30, %v547_v50 }
 0x22e   :  { %v548_v31 = vpop.f32.mrf.mxu0  ;;  %v1162_v42 = vsel %vm315_vm0, %v1141_v27, -inf }
 0x22f   :  { %v887_v40 = vadd.f32 %v823_v24, %v547_v50  ;;  %v549_v43 = vadd.f32 %v10180_v14, %v548_v31  ;;  %v10280_v59 = vmax.f32 %v10153_v17, %v1162_v42 }
 0x231   :  { %v9084_v16 = vpop.eup %9083  ;;  %v951_v57 = vmul.f32 0.7978846, %v887_v40  ;;  %v696_v25 = vmul.f32 0.044715, %v549_v43  ;;  %v632_v6 = vmul.f32 0.5, %v549_v43 }
 0x232   :  { %v1078_v48 = vadd.f32 1.0, %v9084_v16 }
 0x233   :  { %9085 = vtanh.f32 %v951_v57  ;;  %v760_v5 = vmul.f32 %v696_v25, %v549_v43 }
 0x234   :  { %v1142_v0 = vmul.f32 %v1078_v48, %v630_v62 }
 0x235   :  { %v824_v8 = vmul.f32 %v760_v5, %v549_v43 }
 0x236   :  { %v551_v19 = vpop.f32.mrf.mxu0  ;;  %v1169_v38 = vsel %vm315_vm0, %v1142_v0, -inf }
 0x237   :  { %v888_v51 = vadd.f32 %v824_v8, %v549_v43  ;;  %v552_v61 = vadd.f32 %v10180_v14, %v551_v19  ;;  %v10283_v4 = vmax.f32 %v10163_v49, %v1169_v38  ;;  %v10305_v43 = vadd.f32 %v10180_v14, %v10207_v56 }
 0x239   :  { %v9086_v35 = vpop.eup %9085  ;;  %v952_v33 = vmul.f32 0.7978846, %v888_v51  ;;  %v697_v54 = vmul.f32 0.044715, %v552_v61  ;;  %v10287_v13 = vpack.c.bf16 %v10283_v4, %v10280_v59  ;;  %v633_v42 = vmul.f32 0.5, %v552_v61 }
 0x23a   :  { %v1079_v17 = vadd.f32 1.0, %v9086_v35 }
 0x23b   :  { %9087 = vtanh.f32 %v952_v33  ;;  %v761_v12 = vmul.f32 %v697_v54, %v552_v61  ;;  %3323 = vrot.lane.b32.xlu2 %v10287_v13, %s9589_s26  ;;  %8658 = vmatmul.msk.bf16.vlgmr.msra.gmra.mxu1 %vm1297_vm1, %v10287_v13 }
 0x23c   :  { %v1143_v47 = vmul.f32 %v1079_v17, %v631_v28 }
 0x23d   :  { %v825_v49 = vmul.f32 %v761_v12, %v552_v61 }
 0x23e   :  { %v553_v37 = vpop.f32.mrf.mxu0  ;;  %v1176_v24 = vsel %vm315_vm0, %v1143_v47, -inf }
 0x23f   :  { %v889_v52 = vadd.f32 %v825_v49, %v552_v61  ;;  %v554_v18 = vadd.f32 %v10180_v14, %v553_v37  ;;  %v10298_v16 = vmax.f32 %v10171_v9, %v1176_v24  ;;  %v686_v9 = vmul.f32 0.044715, %v10305_v43 }
 0x240   :  { %v10331_v24 = vadd.f32 %v10180_v14, %v10226_v22 }
 0x241   :  { %v9088_v26 = vpop.eup %9087  ;;  %v953_v34 = vmul.f32 0.7978846, %v889_v52  ;;  %v698_v3 = vmul.f32 0.044715, %v554_v18  ;;  %v750_v51 = vmul.f32 %v686_v9, %v10305_v43  ;;  %v634_v17 = vmul.f32 0.5, %v554_v18 }
 0x242   :  { %v1080_v21 = vadd.f32 1.0, %v9088_v26 }
 0x243   :  { %9089 = vtanh.f32 %v953_v34  ;;  %v762_v30 = vmul.f32 %v698_v3, %v554_v18  ;;  %v814_v37 = vmul.f32 %v750_v51, %v10305_v43 }
 0x244   :  { %v1144_v10 = vmul.f32 %v1080_v21, %v632_v6 }
 0x245   :  { %v826_v46 = vmul.f32 %v762_v30, %v554_v18  ;;  %v878_v30 = vadd.f32 %v814_v37, %v10305_v43 }
 0x246   :  { %v556_v31 = vpop.f32.mrf.mxu0  ;;  %v1183_v40 = vsel %vm315_vm0, %v1144_v10, -inf }
 0x247   :  { %v890_v50 = vadd.f32 %v826_v46, %v554_v18  ;;  %v557_v27 = vadd.f32 %v10180_v14, %v556_v31  ;;  %v10301_v57 = vmax.f32 %v10186_v53, %v1183_v40 }
 0x249   :  { %v9090_v25 = vpop.eup %9089  ;;  %v954_v62 = vmul.f32 0.7978846, %v890_v50  ;;  %v699_v48 = vmul.f32 0.044715, %v557_v27  ;;  %v10309_v5 = vpack.c.bf16 %v10301_v57, %v10298_v16 }
 0x24a   :  { %v1081_v53 = vadd.f32 1.0, %v9090_v25  ;;  %v688_v25 = vmul.f32 0.044715, %v10331_v24 }
 0x24b   :  { %9091 = vtanh.f32 %v954_v62  ;;  %v763_v0 = vmul.f32 %v699_v48, %v557_v27  ;;  %3325 = vrot.lane.b32.xlu0 %v10309_v5, %s9589_s26  ;;  %8659 = vmatmul.msk.bf16.gmra.mxu1 %vm1297_vm1, %v10309_v5  ;;  %v635_v62 = vmul.f32 0.5, %v557_v27 }
 0x24c   :  { %v1145_v35 = vmul.f32 %v1081_v53, %v633_v42  ;;  %v752_v42 = vmul.f32 %v688_v25, %v10331_v24 }
 0x24d   :  { %v827_v56 = vmul.f32 %v763_v0, %v557_v27 }
 0x24e   :  { %v558_v8 = vpop.f32.mrf.mxu0  ;;  %v1190_v47 = vsel %vm315_vm0, %v1145_v35, -inf }
 0x24f   :  { %v891_v19 = vadd.f32 %v827_v56, %v557_v27  ;;  %v559_v38 = vadd.f32 %v10180_v14, %v558_v8  ;;  %v10323_v21 = vmax.f32 %v10194_v11, %v1190_v47  ;;  %v816_v27 = vmul.f32 %v752_v42, %v10331_v24 }
 0x251   :  { %v9092_v33 = vpop.eup %9091  ;;  %v955_v54 = vmul.f32 0.7978846, %v891_v19  ;;  %v700_v12 = vmul.f32 0.044715, %v559_v38  ;;  %v636_v51 = vmul.f32 0.5, %v559_v38 }
 0x252   :  { %v1082_v49 = vadd.f32 1.0, %v9092_v33 }
 0x253   :  { %9093 = vtanh.f32 %v955_v54  ;;  %v764_v28 = vmul.f32 %v700_v12, %v559_v38 }
 0x254   :  { %v1146_v52 = vmul.f32 %v1082_v49, %v634_v17 }
 0x255   :  { %v828_v61 = vmul.f32 %v764_v28, %v559_v38 }
 0x256   :  { %v561_v26 = vpop.f32.mrf.mxu0  ;;  %v1197_v34 = vsel %vm315_vm0, %v1146_v52, -inf }
 0x257   :  { %v892_v3 = vadd.f32 %v828_v61, %v559_v38  ;;  %v562_v6 = vadd.f32 %v10180_v14, %v561_v26  ;;  %v10326_v18 = vmax.f32 %v10204_v55, %v1197_v34  ;;  %v942_v55 = vmul.f32 0.7978846, %v878_v30 }
 0x258   :  { %v10356_v26 = vadd.f32 %v10180_v14, %v10239_v23 }
 0x259   :  { %v9094_v10 = vpop.eup %9093  ;;  %v956_v46 = vmul.f32 0.7978846, %v892_v3  ;;  %v701_v31 = vmul.f32 0.044715, %v562_v6  ;;  %v10335_v40 = vpack.c.bf16 %v10326_v18, %v10323_v21  ;;  %v880_v3 = vadd.f32 %v816_v27, %v10331_v24 }
 0x25a   :  { %v1083_v11 = vadd.f32 1.0, %v9094_v10  ;;  %v690_v23 = vmul.f32 0.044715, %v10356_v26 }
 0x25b   :  { %9095 = vtanh.f32 %v956_v46  ;;  %v765_v50 = vmul.f32 %v701_v31, %v562_v6  ;;  %3327 = vrot.lane.b32.xlu1 %v10335_v40, %s9589_s26  ;;  %8660 = vmatmul.msk.bf16.gmra.mxu1 %vm1297_vm1, %v10335_v40 }
 0x25c   :  { %v1147_v53 = vmul.f32 %v1083_v11, %v635_v62  ;;  %9097 = vtanh.f32 %v942_v55  ;;  %v944_v11 = vmul.f32 0.7978846, %v880_v3 }
 0x25d   :  { %v829_v22 = vmul.f32 %v765_v50, %v562_v6 }
 0x25e   :  { %v563_v48 = vpop.f32.mrf.mxu0  ;;  %v1204_v12 = vsel %vm315_vm0, %v1147_v53, -inf  ;;  %v754_v53 = vmul.f32 %v690_v23, %v10356_v26 }
 0x25f   :  { %v893_v0 = vadd.f32 %v829_v22, %v562_v6  ;;  %v564_v9 = vadd.f32 %v10180_v14, %v563_v48  ;;  %v10349_v61 = vmax.f32 %v10213_v20, %v1204_v12  ;;  %v637_v22 = vmul.f32 0.5, %v562_v6 }
 0x261   :  { %v9096_v56 = vpop.eup %9095  ;;  %v957_v8 = vmul.f32 0.7978846, %v893_v0  ;;  %v702_v19 = vmul.f32 0.044715, %v564_v9 }
 0x262   :  { %v1084_v35 = vadd.f32 1.0, %v9096_v56  ;;  %v9098_v37 = vpop.eup %9097 }
 0x263   :  { %9099 = vtanh.f32 %v957_v8  ;;  %v766_v33 = vmul.f32 %v702_v19, %v564_v9  ;;  %v1070_v31 = vadd.f32 1.0, %v9098_v37 }
 0x264   :  { %v1148_v54 = vmul.f32 %v1084_v35, %v636_v51  ;;  %v638_v51 = vmul.f32 0.5, %v564_v9 }
 0x265   :  { %v830_v17 = vmul.f32 %v766_v33, %v564_v9 }
 0x266   :  { %v566_v49 = vpop.f32.mrf.mxu0  ;;  %v1211_v28 = vsel %vm315_vm0, %v1148_v54, -inf  ;;  %v818_v54 = vmul.f32 %v754_v53, %v10356_v26 }
 0x267   :  { %v894_v52 = vadd.f32 %v830_v17, %v564_v9  ;;  %v567_v47 = vadd.f32 %v10180_v14, %v566_v49  ;;  %v10352_v38 = vmax.f32 %v10223_v15, %v1211_v28  ;;  %v622_v15 = vmul.f32 0.5, %v10305_v43 }
 0x268   :  { %v14576_v17 = vmax.f32 %v10043_v7, %v10046_v58 }
 0x269   :  { %v9100_v34 = vpop.eup %9099  ;;  %v958_v30 = vmul.f32 0.7978846, %v894_v52  ;;  %v703_v10 = vmul.f32 0.044715, %v567_v47  ;;  %v10361_v46 = vpack.c.bf16 %v10352_v38, %v10349_v61  ;;  %v1134_v25 = vmul.f32 %v1070_v31, %v622_v15 }
 0x26a   :  { %v1085_v50 = vadd.f32 1.0, %v9100_v34 }
 0x26b   :  { %9101 = vtanh.f32 %v958_v30  ;;  %v767_v20 = vmul.f32 %v703_v10, %v567_v47  ;;  %3329 = vrot.lane.b32.xlu2 %v10361_v46, %s9589_s26  ;;  %8661 = vmatmul.msk.bf16.gmra.mxu1 %vm1297_vm1, %v10361_v46  ;;  %v1223_v35 = vsel %vm315_vm0, %v1134_v25, -inf  ;;  %v882_v10 = vadd.f32 %v818_v54, %v10356_v26 }
 0x26c   :  { %v1149_v56 = vmul.f32 %v1085_v50, %v637_v22  ;;  %9103 = vtanh.f32 %v944_v11  ;;  %v1224_v49 = vmax.f32 %v14576_v17, %v1223_v35  ;;  %v639_v11 = vmul.f32 0.5, %v567_v47 }
 0x26d   :  { %v831_v55 = vmul.f32 %v767_v20, %v567_v47  ;;  %v10387_v20 = vadd.f32 %v10180_v14, %v10252_v1  ;;  %v14577_v17 = vmax.f32 %v10088_v63, %v10091_v32 }
 0x26e   :  { %v568_v62 = vpop.f32.mrf.mxu0  ;;  %v1218_v12 = vsel %vm315_vm0, %v1149_v56, -inf }
 0x26f   :  { %v895_v48 = vadd.f32 %v831_v55, %v567_v47  ;;  %v569_v0 = vadd.f32 %v10180_v14, %v568_v62  ;;  %v10380_v3 = vmax.f32 %v10232_v45, %v1218_v12  ;;  %v624_v45 = vmul.f32 0.5, %v10331_v24 }
 0x270   :  { %v946_v55 = vmul.f32 0.7978846, %v882_v10  ;;  %v692_v25 = vmul.f32 0.044715, %v10387_v20 }
 0x271   :  { %v9102_v42 = vpop.eup %9101  ;;  %v959_v8 = vmul.f32 0.7978846, %v895_v48  ;;  %v704_v19 = vmul.f32 0.044715, %v569_v0  ;;  %v640_v35 = vmul.f32 0.5, %v569_v0 }
 0x272   :  { %v1086_v43 = vadd.f32 1.0, %v9102_v42  ;;  %v9104_v52 = vpop.eup %9103 }
 0x273   :  { %9105 = vtanh.f32 %v959_v8  ;;  %v768_v33 = vmul.f32 %v704_v19, %v569_v0  ;;  %v1072_v23 = vadd.f32 1.0, %v9104_v52  ;;  %v756_v19 = vmul.f32 %v692_v25, %v10387_v20 }
 0x274   :  { %v1150_v6 = vmul.f32 %v1086_v43, %v638_v51 }
 0x275   :  { %v832_v27 = vmul.f32 %v768_v33, %v569_v0  ;;  %v1136_v62 = vmul.f32 %v1072_v23, %v624_v45  ;;  %v820_v12 = vmul.f32 %v756_v19, %v10387_v20 }
 0x276   :  { %v571_v28 = vpop.f32.mrf.mxu0  ;;  %v1225_v37 = vsel %vm315_vm0, %v1150_v6, -inf }
 0x277   :  { %v896_v9 = vadd.f32 %v832_v27, %v569_v0  ;;  %v572_v34 = vadd.f32 %v10180_v14, %v571_v28  ;;  %v10382_v30 = vmax.f32 %v1224_v49, %v1225_v37  ;;  %v1237_v47 = vsel %vm315_vm0, %v1136_v62, -inf }
 0x278   :  { %v1238_v49 = vmax.f32 %v14577_v17, %v1237_v47 }
 0x279   :  { %v9106_v31 = vpop.eup %9105  ;;  %v960_v7 = vmul.f32 0.7978846, %v896_v9  ;;  %v705_v58 = vmul.f32 0.044715, %v572_v34  ;;  %v10391_v15 = vpack.c.bf16 %v10382_v30, %v10380_v3 }
 0x27a   :  { %v1087_v1 = vadd.f32 1.0, %v9106_v31 }
 0x27b   :  { %9107 = vtanh.f32 %v960_v7  ;;  %v769_v50 = vmul.f32 %v705_v58, %v572_v34  ;;  %3331 = vrot.lane.b32.xlu0 %v10391_v15, %s9589_s26  ;;  %8662 = vmatmul.msk.bf16.gmra.mxu1 %vm1297_vm1, %v10391_v15  ;;  %v884_v58 = vadd.f32 %v820_v12, %v10387_v20 }
 0x27c   :  { %v1151_v42 = vmul.f32 %v1087_v1, %v639_v11  ;;  %9109 = vtanh.f32 %v946_v55  ;;  %v641_v11 = vmul.f32 0.5, %v572_v34 }
 0x27d   :  { %v833_v22 = vmul.f32 %v769_v50, %v572_v34  ;;  %v948_v55 = vmul.f32 0.7978846, %v884_v58 }
 0x27e   :  { %v573_v48 = vpop.f32.mrf.mxu0  ;;  %v1232_v6 = vsel %vm315_vm0, %v1151_v42, -inf }
 0x27f   :  { %v897_v53 = vadd.f32 %v833_v22, %v572_v34  ;;  %v574_v56 = vadd.f32 %v10180_v14, %v573_v48  ;;  %v10410_v10 = vmax.f32 %v10245_v29, %v1232_v6  ;;  %v626_v29 = vmul.f32 0.5, %v10356_v26 }
 0x281   :  { %v9108_v8 = vpop.eup %9107  ;;  %v961_v51 = vmul.f32 0.7978846, %v897_v53  ;;  %v706_v43 = vmul.f32 0.044715, %v574_v56  ;;  %v642_v42 = vmul.f32 0.5, %v574_v56 }
 0x282   :  { %v1088_v24 = vadd.f32 1.0, %v9108_v8  ;;  %v9110_v52 = vpop.eup %9109 }
 0x283   :  { %9111 = vtanh.f32 %v961_v51  ;;  %v770_v33 = vmul.f32 %v706_v43, %v574_v56  ;;  %v1074_v32 = vadd.f32 1.0, %v9110_v52 }
 0x284   :  { %v1152_v54 = vmul.f32 %v1088_v24, %v640_v35 }
 0x285   :  { %v834_v27 = vmul.f32 %v770_v33, %v574_v56  ;;  %v1138_v22 = vmul.f32 %v1074_v32, %v626_v29 }
 0x286   :  { %v576_v28 = vpop.f32.mrf.mxu0  ;;  %v1239_v37 = vsel %vm315_vm0, %v1152_v54, -inf  ;;  %v14579_v54 = vmax.f32 %v10115_v39, %v10118_v44  ;;  %v628_v39 = vmul.f32 0.5, %v10387_v20 }
 0x287   :  { %v898_v0 = vadd.f32 %v834_v27, %v574_v56  ;;  %v577_v9 = vadd.f32 %v10180_v14, %v576_v28  ;;  %v10412_v31 = vmax.f32 %v1238_v49, %v1239_v37  ;;  %v1251_v24 = vsel %vm315_vm0, %v1138_v22, -inf }
 0x288   :  { %v1252_v6 = vmax.f32 %v14579_v54, %v1251_v24 }
 0x289   :  { %14578 = vst [vmem:[#allocation2_spill] sm:$0xff] %v10412_v31  ;;  %v9112_v7 = vpop.eup %9111  ;;  %v962_v23 = vmul.f32 0.7978846, %v898_v0  ;;  %v707_v50 = vmul.f32 0.044715, %v577_v9  ;;  %v10417_v63 = vpack.c.bf16 %v10412_v31, %v10410_v10  ;;  %v643_v44 = vmul.f32 0.5, %v577_v9 }
 0x28a   :  { %v1089_v1 = vadd.f32 1.0, %v9112_v7 }
 0x28b   :  { %9113 = vtanh.f32 %v962_v23  ;;  %v771_v45 = vmul.f32 %v707_v50, %v577_v9  ;;  %3333 = vrot.lane.b32.xlu2 %v10417_v63, %s9589_s26  ;;  %8663 = vmatmul.msk.bf16.gmra.mxu1 %vm1297_vm1, %v10417_v63 }
 0x28c   :  { %v1153_v8 = vmul.f32 %v1089_v1, %v641_v11  ;;  %9115 = vtanh.f32 %v948_v55  ;;  %v14580_v11 = vmax.f32 %v10139_v36, %v10142_v60 }
 0x28d   :  { %v835_v25 = vmul.f32 %v771_v45, %v577_v9 }
 0x28e   :  { %v578_v62 = vpop.f32.mrf.mxu0  ;;  %v1246_v47 = vsel %vm315_vm0, %v1153_v8, -inf }
 0x28f   :  { %v899_v48 = vadd.f32 %v835_v25, %v577_v9  ;;  %v579_v53 = vadd.f32 %v10180_v14, %v578_v62  ;;  %v10432_v27 = vmax.f32 %v10258_v2, %v1246_v47 }
 0x291   :  { %v9114_v19 = vpop.eup %9113  ;;  %v963_v51 = vmul.f32 0.7978846, %v899_v48  ;;  %v708_v43 = vmul.f32 0.044715, %v579_v53  ;;  %v644_v7 = vmul.f32 0.5, %v579_v53 }
 0x292   :  { %v1090_v35 = vadd.f32 1.0, %v9114_v19  ;;  %v9116_v56 = vpop.eup %9115 }
 0x293   :  { %9117 = vtanh.f32 %v963_v51  ;;  %v772_v26 = vmul.f32 %v708_v43, %v579_v53  ;;  %v1076_v52 = vadd.f32 1.0, %v9116_v56 }
 0x294   :  { %v1154_v34 = vmul.f32 %v1090_v35, %v642_v42 }
 0x295   :  { %v836_v33 = vmul.f32 %v772_v26, %v579_v53  ;;  %v1140_v0 = vmul.f32 %v1076_v52, %v628_v39 }
 0x296   :  { %v1253_v14 = vsel %vm315_vm0, %v1154_v34, -inf }
 0x297   :  { %v900_v12 = vadd.f32 %v836_v33, %v579_v53  ;;  %v10434_v17 = vmax.f32 %v1252_v6, %v1253_v14  ;;  %v1265_v32 = vsel %vm315_vm0, %v1140_v0, -inf }
 0x298   :  { %v1266_v1 = vmax.f32 %v14580_v11, %v1265_v32 }
 0x299   :  { %v9118_v49 = vpop.eup %9117  ;;  %v964_v28 = vmul.f32 0.7978846, %v900_v12  ;;  %v10438_v37 = vpack.c.bf16 %v10434_v17, %v10432_v27 }
 0x29a   :  { %v1091_v2 = vadd.f32 1.0, %v9118_v49 }
 0x29b   :  { %9119 = vtanh.f32 %v964_v28  ;;  %3335 = vrot.lane.b32.xlu0 %v10438_v37, %s9589_s26  ;;  %8664 = vmatmul.msk.bf16.gmra.mxu1 %vm1297_vm1, %v10438_v37 }
 0x29c   :  { %v1155_v58 = vmul.f32 %v1091_v2, %v643_v44 }
 0x29e   :  { %v1260_v29 = vsel %vm315_vm0, %v1155_v58, -inf }
 0x29f   :  { %v10452_v20 = vmax.f32 %v10272_v41, %v1260_v29 }
 0x2a1   :  { %v9120_v23 = vpop.eup %9119  ;;  %14581 = vst [vmem:[#allocation3_spill] sm:$0xff] %v10452_v20 }
 0x2a2   :  { %v1092_v50 = vadd.f32 1.0, %v9120_v23 }
 0x2a4   :  { %v1156_v45 = vmul.f32 %v1092_v50, %v644_v7 }
 0x2a6   :  { %v1267_v55 = vsel %vm315_vm0, %v1156_v45, -inf }
 0x2a7   :  { %v10454_v9 = vmax.f32 %v1266_v1, %v1267_v55 }
 0x2a9   :  { %14582 = vst [vmem:[#allocation4_spill] sm:$0xff] %v10454_v9  ;;  %v10458_v25 = vpack.c.bf16 %v10454_v9, %v10452_v20 }
 0x2ab   :  { %8665 = vmatmul.msk.bf16.gmra.mxu1 %vm1297_vm1, %v10458_v25 }
 0x2b8   :  { %v1331_v22 = vpop.f32.mrf.mxu1 }
 0x2b9   :  { %v1371_v62 = vpack.c.bf16 %v1331_v22, %v1331_v22 }
 0x2bb   :  { %v1388_v48 = vunpack.c.l.b16 %v1371_v62  ;;  %v1396_v36 = vsel %vm1297_vm1, %v1371_v62, 0 }
 0x2bc   :  { %1405 = vmatpush.bf16.xpose.msra.mxu2 %v1396_v36 }
 0x2bd   :  { %v1389_v60 = vpack.c.b16 %v1388_v48, %v1388_v48 }
 0x2bf   :  { %1390 = vrot.lane.b32.xlu0 %v1389_v60, %s9589_s26 }
 0x2c0   :  { %v1333_v41 = vpop.f32.mrf.mxu1 }
 0x2c1   :  { %v1372_v53 = vpack.c.bf16 %v1333_v41, %v1333_v41 }
 0x2c3   :  { %v1412_v42 = vunpack.c.l.b16 %v1372_v53  ;;  %v1420_v8 = vsel %vm1297_vm1, %v1372_v53, 0 }
 0x2c4   :  { %1429 = vmatpush.bf16.xpose.msra.mxu3 %v1420_v8 }
 0x2c5   :  { %v1413_v19 = vpack.c.b16 %v1412_v42, %v1412_v42 }
 0x2c7   :  { %1980 = vrot.lane.b32.xlu0 %v1389_v60, %s9590_s1  ;;  %2018 = vrot.lane.b32.xlu1 %v1413_v19, %s9590_s1 }
 0x2c8   :  { %v1336_v51 = vpop.f32.mrf.mxu1 }
 0x2c9   :  { %v1373_v43 = vpack.c.bf16 %v1336_v51, %v1336_v51 }
 0x2cb   :  { %v1436_v35 = vunpack.c.l.b16 %v1373_v43  ;;  %v1444_v24 = vsel %vm1297_vm1, %v1373_v43, 0 }
 0x2cc   :  { %1453 = vmatpush.bf16.xpose.msrb.mxu2 %v1444_v24 }
 0x2cd   :  { %v1437_v26 = vpack.c.b16 %v1436_v35, %v1436_v35 }
 0x2cf   :  { %1414 = vrot.lane.b32.xlu0 %v1413_v19, %s9589_s26  ;;  %1438 = vrot.lane.b32.xlu1 %v1437_v26, %s9589_s26 }
 0x2d0   :  { %v1338_v34 = vpop.f32.mrf.mxu1 }
 0x2d1   :  { %v1374_v47 = vpack.c.bf16 %v1338_v34, %v1338_v34 }
 0x2d3   :  { %v1468_v33 = vsel %vm1297_vm1, %v1374_v47, 0  ;;  %v1460_v6 = vunpack.c.l.b16 %v1374_v47 }
 0x2d4   :  { %1477 = vmatpush.bf16.xpose.msrb.mxu3 %v1468_v33 }
 0x2d5   :  { %v1461_v49 = vpack.c.b16 %v1460_v6, %v1460_v6 }
 0x2d7   :  { %2055 = vrot.lane.b32.xlu1 %v1437_v26, %s9590_s1 }
 0x2d8   :  { %v1341_v54 = vpop.f32.mrf.mxu1 }
 0x2d9   :  { %v10472_v14 = vpack.c.bf16 %v1341_v54, %v1341_v54 }
 0x2db   :  { %v1484_v56 = vunpack.c.l.b16 %v10472_v14 }
 0x2dd   :  { %v1485_v12 = vpack.c.b16 %v1484_v56, %v1484_v56 }
 0x2df   :  { %1462 = vrot.lane.b32.xlu1 %v1461_v49, %s9589_s26  ;;  %1486 = vrot.lane.b32.xlu2 %v1485_v12, %s9589_s26 }
 0x2e0   :  { %v1343_v28 = vpop.f32.mrf.mxu1 }
 0x2e1   :  { %v10477_v52 = vpack.c.bf16 %v1343_v28, %v1343_v28 }
 0x2e3   :  { %v1508_v39 = vunpack.c.l.b16 %v10477_v52 }
 0x2e5   :  { %v1509_v44 = vpack.c.b16 %v1508_v39, %v1508_v39 }
 0x2e7   :  { %2092 = vrot.lane.b32.xlu1 %v1461_v49, %s9590_s1  ;;  %1510 = vrot.lane.b32.xlu2 %v1509_v44, %s9589_s26 }
 0x2e8   :  { %v1346_v2 = vpop.f32.mrf.mxu1 }
 0x2e9   :  { %v10482_v0 = vpack.c.bf16 %v1346_v2, %v1346_v2 }
 0x2eb   :  { %v1532_v7 = vunpack.c.l.b16 %v10482_v0  ;;  %v1540_v54 = vsel %vm1297_vm1, %v10482_v0, 0 }
 0x2ed   :  { %v1533_v58 = vpack.c.b16 %v1532_v7, %v1532_v7 }
 0x2ef   :  { %2129 = vrot.lane.b32.xlu1 %v1485_v12, %s9590_s1  ;;  %2203 = vrot.lane.b32.xlu2 %v1533_v58, %s9590_s1 }
 0x2f0   :  { %1534 = vrot.lane.b32.xlu0 %v1533_v58, %s9589_s26  ;;  %v1348_v23 = vpop.f32.mrf.mxu1 }
 0x2f1   :  { %v10488_v50 = vpack.c.bf16 %v1348_v23, %v1348_v23 }
 0x2f3   :  { %v1556_v45 = vunpack.c.l.b16 %v10488_v50  ;;  %v1564_v58 = vsel %vm1297_vm1, %v10488_v50, 0 }
 0x2f5   :  { %v1557_v55 = vpack.c.b16 %v1556_v45, %v1556_v45 }
 0x2f7   :  { %2166 = vrot.lane.b32.xlu1 %v1509_v44, %s9590_s1 }
 0x2f8   :  { %v1351_v32 = vpop.f32.mrf.mxu1 }
 0x2f9   :  { %v10492_v29 = vpack.c.bf16 %v1351_v32, %v1351_v32 }
 0x2fb   :  { %v1580_v11 = vunpack.c.l.b16 %v10492_v29  ;;  %v1588_v0 = vsel %vm1297_vm1, %v10492_v29, 0 }
 0x2fd   :  { %v1581_v1 = vpack.c.b16 %v1580_v11, %v1580_v11 }
 0x2ff   :  { %1558 = vrot.lane.b32.xlu1 %v1557_v55, %s9589_s26  ;;  %2277 = vrot.lane.b32.xlu0 %v1581_v1, %s9590_s1 }
 0x300   :  { %1582 = vrot.lane.b32.xlu2 %v1581_v1, %s9589_s26  ;;  %v1353_v22 = vpop.f32.mrf.mxu1 }
 0x301   :  { %v10498_v62 = vpack.c.bf16 %v1353_v22, %v1353_v22 }
 0x303   :  { %v1604_v48 = vunpack.c.l.b16 %v10498_v62 }
 0x305   :  { %v1605_v36 = vpack.c.b16 %v1604_v48, %v1604_v48 }
 0x307   :  { %2240 = vrot.lane.b32.xlu1 %v1557_v55, %s9590_s1  ;;  %1606 = vrot.lane.b32.xlu0 %v1605_v36, %s9589_s26 }
 0x308   :  { %5397 = vrot.lane.b32.xlu2 %v10287_v13, %s9590_s1  ;;  %v1356_v60 = vpop.f32.mrf.mxu1  ;;  %v10518_v13 = vpop.permute.xlu0 %3325 }
 0x309   :  { %v10505_v41 = vpack.c.bf16 %v1356_v60, %v1356_v60  ;;  %v1612_v60 = vsel %vm1297_vm1, %v10498_v62, 0 }
 0x30b   :  { %v1628_v53 = vunpack.c.l.b16 %v10505_v41 }
 0x30d   :  { %v1629_v42 = vpack.c.b16 %v1628_v53, %v1628_v53  ;;  %v1636_v53 = vsel %vm1297_vm1, %v10505_v41, 0 }
 0x30f   :  { %2314 = vrot.lane.b32.xlu1 %v1605_v36, %s9590_s1  ;;  %5399 = vrot.lane.b32.xlu0 %v10309_v5, %s9590_s1 }
 0x310   :  { %5407 = vrot.lane.b32.xlu2 %v10417_v63, %s9590_s1  ;;  %v10526_v5 = vpop.permute.xlu0 %3331  ;;  %v10528_v63 = vpop.permute.xlu2 %3323 }
 0x317   :  { %5401 = vrot.lane.b32.xlu0 %v10335_v40, %s9590_s1  ;;  %1630 = vrot.lane.b32.xlu1 %v1629_v42, %s9589_s26 }
 0x318   :  { %4622 = vrot.lane.b32.xlu2 %v10283_v4, %s9589_s26  ;;  %v10536_v40 = vpop.permute.xlu0 %3335 }
 0x31f   :  { %5403 = vrot.lane.b32.xlu0 %v10361_v46, %s9590_s1  ;;  %3337 = vrot.lane.b32.xlu1 %v10458_v25, %s9589_s26  ;;  %v10538_v46 = vpop.permute.xlu2 %3329 }
 0x320   :  { %6678 = vrot.lane.b32.xlu2 %v10280_v59, %s9590_s1 }
 0x327   :  { %5405 = vrot.lane.b32.xlu0 %v10391_v15, %s9590_s1  ;;  %5411 = vrot.lane.b32.xlu1 %v10458_v25, %s9590_s1  ;;  %v10546_v15 = vpop.permute.xlu1 %3327  ;;  %v1492_v25 = vsel %vm1297_vm1, %v10472_v14, 0  ;;  %v10551_v19 = vpop.permute.xlu2 %3333  ;;  %v1516_v14 = vsel %vm1297_vm1, %v10477_v52, 0 }
 0x328   :  { %6680 = vrot.lane.b32.xlu2 %v10283_v4, %s9590_s1 }
 0x32f   :  { %5409 = vrot.lane.b32.xlu0 %v10438_v37, %s9590_s1  ;;  %4626 = vrot.lane.b32.xlu1 %v10301_v57, %s9589_s26  ;;  %v1358_v37 = vpop.f32.mrf.mxu1 }
 0x330   :  { %4624 = vrot.lane.b32.xlu2 %v10298_v16, %s9589_s26  ;;  %v10562_v24 = vpack.c.bf16 %v1358_v37, %v1358_v37 }
 0x331   :  { %v1391_v8 = vpop.permute.xlu0 %1390 }
 0x332   :  { %8666 = vmatmul.msk.bf16.vlgmr.msra.gmra.mxu2 %vm1297_vm1, %v1391_v8  ;;  %v1652_v34 = vunpack.c.l.b16 %v10562_v24 }
 0x333   :  { %1501 = vmatpush.bf16.xpose.msra.mxu2 %v1492_v25 }
 0x334   :  { %v1653_v12 = vpack.c.b16 %v1652_v34, %v1652_v34 }
 0x337   :  { %4620 = vrot.lane.b32.xlu0 %v10280_v59, %s9589_s26  ;;  %6684 = vrot.lane.b32.xlu1 %v10301_v57, %s9590_s1  ;;  %v1361_v6 = vpop.f32.mrf.mxu1 }
 0x338   :  { %6682 = vrot.lane.b32.xlu2 %v10298_v16, %s9590_s1  ;;  %v10576_v56 = vpack.c.bf16 %v1361_v6, %v1361_v6 }
 0x339   :  { %v1981_v51 = vpop.permute.xlu0 %1980  ;;  %v10559_v43 = vpop.permute.xlu1 %2018 }
 0x33a   :  { %v1987_v35 = vsel %vm1985_vm2, %v1981_v51, 0  ;;  %v1487_v26 = vpop.permute.xlu2 %1486  ;;  %v1676_v28 = vunpack.c.l.b16 %v10576_v56 }
 0x33b   :  { %1996 = vmatpush.bf16.msrb.mxu1 %v1987_v35 }
 0x33c   :  { %v1677_v44 = vpack.c.b16 %v1676_v28, %v1676_v28 }
 0x33f   :  { %2351 = vrot.lane.b32.xlu0 %v1629_v42, %s9590_s1  ;;  %4630 = vrot.lane.b32.xlu1 %v10326_v18, %s9589_s26  ;;  %v1363_v52 = vpop.f32.mrf.mxu1 }
 0x340   :  { %4628 = vrot.lane.b32.xlu2 %v10323_v21, %s9589_s26  ;;  %v1384_v23 = vpack.c.bf16 %v1363_v52, %v1363_v52 }
 0x341   :  { %v1415_v47 = vpop.permute.xlu0 %1414  ;;  %v1439_v33 = vpop.permute.xlu1 %1438 }
 0x342   :  { %8667 = vmatmul.msk.bf16.vlgmr.msra.gmra.mxu3 %vm1297_vm1, %v1415_v47  ;;  %8668 = vmatmul.msk.bf16.vlgmr.msrb.gmra.mxu2 %vm1297_vm1, %v1439_v33  ;;  %v1511_v49 = vpop.permute.xlu2 %1510  ;;  %v1700_v45 = vunpack.c.l.b16 %v1384_v23  ;;  %v1660_v33 = vsel %vm1297_vm1, %v10562_v24, 0 }
 0x343   :  { %1525 = vmatpush.bf16.xpose.msra.mxu3 %v1516_v14  ;;  %1549 = vmatpush.bf16.xpose.msrb.mxu2 %v1540_v54  ;;  %v1684_v54 = vsel %vm1297_vm1, %v10576_v56, 0  ;;  %v1708_v56 = vsel %vm1297_vm1, %v1384_v23, 0 }
 0x344   :  { %v1701_v50 = vpack.c.b16 %v1700_v45, %v1700_v45 }
 0x347   :  { %6688 = vrot.lane.b32.xlu1 %v10326_v18, %s9590_s1  ;;  %2388 = vrot.lane.b32.xlu0 %v1653_v12, %s9590_s1  ;;  %v1366_v32 = vpop.f32.mrf.mxu1 }
 0x348   :  { %6686 = vrot.lane.b32.xlu2 %v10323_v21, %s9590_s1  ;;  %v1385_v42 = vpack.c.bf16 %v1366_v32, %v1366_v32 }
 0x349   :  { %v10584_v39 = vpop.permute.xlu1 %2055 }
 0x34a   :  { %v10593_v7 = vpop.permute.xlu2 %2203  ;;  %v1724_v25 = vunpack.c.l.b16 %v1385_v42 }
 0x34c   :  { %v1725_v41 = vpack.c.b16 %v1724_v25, %v1724_v25 }
 0x34f   :  { %4632 = vrot.lane.b32.xlu1 %v10349_v61, %s9589_s26  ;;  %1678 = vrot.lane.b32.xlu0 %v1677_v44, %s9589_s26  ;;  %v1368_v55 = vpop.f32.mrf.mxu1 }
 0x350   :  { %4634 = vrot.lane.b32.xlu2 %v10352_v38, %s9589_s26  ;;  %v1386_v8 = vpack.c.bf16 %v1368_v55, %v1368_v55 }
 0x351   :  { %v1463_v2 = vpop.permute.xlu1 %1462 }
 0x352   :  { %8669 = vmatmul.msk.bf16.vlgmr.msrb.gmra.mxu3 %vm1297_vm1, %v1463_v2  ;;  %8670 = vmatmul.msk.bf16.vlgmr.msra.gmra.mxu2 %vm1297_vm1, %v1487_v26  ;;  %v1748_v37 = vunpack.c.l.b16 %v1386_v8  ;;  %v1732_v2 = vsel %vm1297_vm1, %v1385_v42, 0 }
 0x353   :  { %1573 = vmatpush.bf16.xpose.msrb.mxu3 %v1564_v58  ;;  %1597 = vmatpush.bf16.xpose.msra.mxu2 %v1588_v0 }
 0x354   :  { %v1749_v35 = vpack.c.b16 %v1748_v37, %v1748_v37 }
 0x357   :  { %6690 = vrot.lane.b32.xlu1 %v10349_v61, %s9590_s1  ;;  %4636 = vrot.lane.b32.xlu0 %v10380_v3, %s9589_s26 }
 0x358   :  { %6692 = vrot.lane.b32.xlu2 %v10352_v38, %s9590_s1 }
 0x359   :  { %v2093_v29 = vpop.permute.xlu1 %2092 }
 0x35a   :  { %v2098_v11 = vsel %vm1985_vm2, %v2093_v29, 0  ;;  %v1583_v1 = vpop.permute.xlu2 %1582 }
 0x35b   :  { %2107 = vmatpush.bf16.msra.mxu1 %v2098_v11 }
 0x35f   :  { %4638 = vrot.lane.b32.xlu0 %v10382_v30, %s9589_s26  ;;  %1702 = vrot.lane.b32.xlu1 %v1701_v50, %s9589_s26 }
 0x360   :  { %1654 = vrot.lane.b32.xlu2 %v1653_v12, %s9589_s26 }
 0x361   :  { %v10610_v22 = vpop.permute.xlu1 %2129 }
 0x362   :  { %v1535_v48 = vpop.permute.xlu0 %1534  ;;  %v10612_v36 = vpop.permute.xlu2 %5397  ;;  %8671 = vmatmul.msk.bf16.vlgmr.msra.gmra.mxu3 %vm1297_vm1, %v1511_v49 }
 0x363   :  { %14583 = vst [vmem:[#allocation5_spill] sm:$0xff] %v10612_v36  ;;  %8672 = vmatmul.msk.bf16.vlgmr.msrb.gmra.mxu2 %vm1297_vm1, %v1535_v48  ;;  %1621 = vmatpush.bf16.xpose.msra.mxu3 %v1612_v60 }
 0x364   :  { %1645 = vmatpush.bf16.xpose.msrb.mxu2 %v1636_v53 }
 0x367   :  { %6694 = vrot.lane.b32.xlu0 %v10380_v3, %s9590_s1  ;;  %2462 = vrot.lane.b32.xlu1 %v1701_v50, %s9590_s1 }
 0x368   :  { %6696 = vrot.lane.b32.xlu2 %v10382_v30, %s9590_s1 }
 0x369   :  { %v10625_v62 = vpop.permute.xlu1 %2166 }
 0x36a   :  { %v10627_v51 = vpop.permute.xlu2 %5407 }
 0x36b   :  { %14584 = vst [vmem:[#allocation6_spill] sm:$0xff] %v10627_v51 }
 0x36f   :  { %2499 = vrot.lane.b32.xlu0 %v1725_v41, %s9590_s1  ;;  %2536 = vrot.lane.b32.xlu1 %v1749_v35, %s9590_s1 }
 0x370   :  { %2425 = vrot.lane.b32.xlu2 %v1677_v44, %s9590_s1 }
 0x371   :  { %v1559_v26 = vpop.permute.xlu1 %1558  ;;  %v10632_v34 = vpop.permute.xlu0 %2277 }
 0x372   :  { %v10634_v47 = vpop.permute.xlu2 %4622  ;;  %8673 = vmatmul.msk.bf16.vlgmr.msrb.gmra.mxu3 %vm1297_vm1, %v1559_v26 }
 0x373   :  { %14585 = vst [vmem:[#allocation7_spill] sm:$0xff] %v10634_v47  ;;  %8674 = vmatmul.msk.bf16.vlgmr.msra.gmra.mxu2 %vm1297_vm1, %v1583_v1  ;;  %1669 = vmatpush.bf16.xpose.msrb.mxu3 %v1660_v33 }
 0x374   :  { %1693 = vmatpush.bf16.xpose.msra.mxu2 %v1684_v54 }
 0x377   :  { %1750 = vrot.lane.b32.xlu0 %v1749_v35, %s9589_s26 }
 0x378   :  { %1726 = vrot.lane.b32.xlu2 %v1725_v41, %s9589_s26 }
 0x379   :  { %v10644_v6 = vpop.permute.xlu1 %2240  ;;  %v1607_v14 = vpop.permute.xlu0 %1606 }
 0x37a   :  { %v10646_v12 = vpop.permute.xlu2 %6678 }
 0x37b   :  { %14586 = vst [vmem:[#allocation8_spill] sm:$0xff] %v10646_v12 }
 0x381   :  { %v10648_v49 = vpop.permute.xlu1 %2314  ;;  %v10650_v28 = vpop.permute.xlu0 %5399 }
 0x382   :  { %14587 = vst [vmem:[#allocation9_spill] sm:$0xff] %v10650_v28  ;;  %v10652_v24 = vpop.permute.xlu2 %6680  ;;  %8675 = vmatmul.msk.bf16.vlgmr.msra.gmra.mxu3 %vm1297_vm1, %v1607_v14  ;;  %v1756_v14 = vsel %vm1297_vm1, %v1386_v8, 0 }
 0x383   :  { %14588 = vst [vmem:[#allocation10_spill] sm:$0xff] %v10652_v24  ;;  %1717 = vmatpush.bf16.xpose.msra.mxu3 %v1708_v56 }
 0x389   :  { %v10656_v44 = vpop.permute.xlu0 %5401  ;;  %v1631_v52 = vpop.permute.xlu1 %1630 }
 0x38a   :  { %14589 = vst [vmem:[#allocation11_spill] sm:$0xff] %v10656_v44  ;;  %v10659_v0 = vpop.permute.xlu2 %4624  ;;  %8676 = vmatmul.msk.bf16.vlgmr.msrb.gmra.mxu2 %vm1297_vm1, %v1631_v52 }
 0x38b   :  { %14590 = vst [vmem:[#allocation12_spill] sm:$0xff] %v10659_v0  ;;  %1741 = vmatpush.bf16.xpose.msrb.mxu2 %v1732_v2 }
 0x391   :  { %v10662_v58 = vpop.permute.xlu0 %5403  ;;  %v10664_v32 = vpop.permute.xlu1 %3337 }
 0x392   :  { %14591 = vst [vmem:[#allocation13_spill] sm:$0xff] %v10662_v58  ;;  %v10666_v45 = vpop.permute.xlu2 %6682 }
 0x393   :  { %14592 = vst [vmem:[#allocation14_spill] sm:$0xff] %v10666_v45  ;;  %v2061_v45 = vsel %vm1985_vm2, %v10584_v39, 0 }
 0x399   :  { %v10668_v29 = vpop.permute.xlu0 %5405  ;;  %v10670_v23 = vpop.permute.xlu1 %5411 }
 0x39a   :  { %14593 = vst [vmem:[#allocation15_spill] sm:$0xff] %v10668_v29  ;;  %v10672_v11 = vpop.permute.xlu2 %4628 }
 0x39b   :  { %14594 = vst [vmem:[#allocation16_spill] sm:$0xff] %v10670_v23 }
 0x39c   :  { %14595 = vst [vmem:[#allocation17_spill] sm:$0xff] %v10672_v11 }
 0x3a1   :  { %v10674_v1 = vpop.permute.xlu0 %5409  ;;  %v10676_v50 = vpop.permute.xlu1 %4626 }
 0x3a2   :  { %14596 = vst [vmem:[#allocation18_spill] sm:$0xff] %v10674_v1  ;;  %v10678_v55 = vpop.permute.xlu2 %6686 }
 0x3a3   :  { %14597 = vst [vmem:[#allocation19_spill] sm:$0xff] %v10676_v50 }
 0x3a4   :  { %14598 = vst [vmem:[#allocation20_spill] sm:$0xff] %v10678_v55 }
 0x3a9   :  { %v10680_v48 = vpop.permute.xlu0 %4620  ;;  %v10682_v60 = vpop.permute.xlu1 %6684 }
 0x3aa   :  { %14599 = vst [vmem:[#allocation21_spill] sm:$0xff] %v10680_v48  ;;  %v10684_v53 = vpop.permute.xlu2 %4634 }
 0x3ab   :  { %14600 = vst [vmem:[#allocation22_spill] sm:$0xff] %v10682_v60 }
 0x3ac   :  { %14601 = vst [vmem:[#allocation23_spill] sm:$0xff] %v10684_v53 }
 0x3b1   :  { %v10686_v42 = vpop.permute.xlu0 %2351  ;;  %v10688_v25 = vpop.permute.xlu1 %4630 }
 0x3b2   :  { %14602 = vst [vmem:[#allocation24_spill] sm:$0xff] %v10688_v25  ;;  %v10690_v37 = vpop.permute.xlu2 %6692 }
 0x3b3   :  { %14603 = vst [vmem:[#allocation25_spill] sm:$0xff] %v10690_v37  ;;  %v2024_v37 = vsel %vm1985_vm2, %v10559_v43, 0 }
 0x3b5   :  { %v10692_v41 = vpop.f32.mrf.mxu2 }
 0x3b6   :  { %v1772_v35 = vsel %vm1771_vm3, %v10692_v41, -inf }
 0x3b7   :  { %1773 = vmax.xlane.f32.xlu1 %v1772_v35 }
 0x3b9   :  { %v10696_v26 = vpop.permute.xlu1 %6688  ;;  %v10698_v33 = vpop.permute.xlu0 %2388 }
 0x3ba   :  { %14604 = vst [vmem:[#allocation26_spill] sm:$0xff] %v10696_v26  ;;  %v1655_v54 = vpop.permute.xlu2 %1654 }
 0x3bb   :  { %8677 = vmatmul.msk.bf16.vlgmr.msrb.gmra.mxu3 %vm1297_vm1, %v1655_v54 }
 0x3bc   :  { %1765 = vmatpush.bf16.xpose.msrb.mxu3 %v1756_v14 }
 0x3bd   :  { %v1409_v56 = vpop.f32.mrf.mxu2 }
 0x3c1   :  { %v10702_v52 = vpop.permute.xlu1 %4632  ;;  %v1679_v2 = vpop.permute.xlu0 %1678 }
 0x3c2   :  { %14605 = vst [vmem:[#allocation27_spill] sm:$0xff] %v10702_v52  ;;  %v10706_v60 = vpop.permute.xlu2 %6696  ;;  %8678 = vmatmul.msk.bf16.vlgmr.msra.gmra.mxu2 %vm1297_vm1, %v1679_v2 }
 0x3c3   :  { %14606 = vst [vmem:[#allocation28_spill] sm:$0xff] %v10706_v60  ;;  %2033 = vmatpush.bf16.msra.mxu2 %v2024_v37 }
 0x3c5   :  { %v10709_v35 = vpop.f32.mrf.mxu3  ;;  %v10711_v26 = vpop.f32.mrf.mxu2 }
 0x3c6   :  { %v1775_v8 = vsel %vm1771_vm3, %v10709_v35, -inf  ;;  %v1778_v54 = vsel %vm1771_vm3, %v10711_v26, -inf }
 0x3c7   :  { %1776 = vmax.xlane.f32.xlu2 %v1775_v8  ;;  %1779 = vmax.xlane.f32.xlu0 %v1778_v54  ;;  %v2135_v8 = vsel %vm1985_vm2, %v10610_v22, 0 }
 0x3c9   :  { %v10717_v14 = vpop.permute.xlu1 %6690  ;;  %v10719_v43 = vpop.permute.xlu0 %4636 }
 0x3ca   :  { %14607 = vst [vmem:[#allocation29_spill] sm:$0xff] %v10717_v14  ;;  %v10721_v56 = vpop.permute.xlu2 %2425 }
 0x3cb   :  { %14608 = vst [vmem:[#allocation30_spill] sm:$0xff] %v10719_v43 }
 0x3cd   :  { %v1433_v2 = vpop.f32.mrf.mxu3  ;;  %v1457_v37 = vpop.f32.mrf.mxu2 }
 0x3d1   :  { %v10723_v60 = vpop.permute.xlu0 %4638  ;;  %v1703_v55 = vpop.permute.xlu1 %1702 }
 0x3d2   :  { %14609 = vst [vmem:[#allocation31_spill] sm:$0xff] %v10723_v60  ;;  %v1727_v24 = vpop.permute.xlu2 %1726  ;;  %8679 = vmatmul.msk.bf16.vlgmr.msra.gmra.mxu3 %vm1297_vm1, %v1703_v55 }
 0x3d3   :  { %8680 = vmatmul.msk.bf16.vlgmr.msrb.gmra.mxu2 %vm1297_vm1, %v1727_v24  ;;  %2070 = vmatpush.bf16.msra.mxu3 %v2061_v45 }
 0x3d4   :  { %2144 = vmatpush.bf16.msrb.mxu2 %v2135_v8 }
 0x3d5   :  { %v10731_v54 = vpop.f32.mrf.mxu3  ;;  %v10733_v2 = vpop.f32.mrf.mxu2 }
 0x3d6   :  { %v1781_v37 = vsel %vm1771_vm3, %v10731_v54, -inf  ;;  %v1784_v39 = vsel %vm1771_vm3, %v10733_v2, -inf }
 0x3d7   :  { %1782 = vmax.xlane.f32.xlu2 %v1781_v37  ;;  %1785 = vmax.xlane.f32.xlu1 %v1784_v39  ;;  %v2172_v39 = vsel %vm1985_vm2, %v10625_v62, 0 }
 0x3d9   :  { %v10739_v55 = vpop.permute.xlu0 %6694  ;;  %v10770_v25 = vpop.permute.xlu1 %2462 }
 0x3da   :  { %14610 = vst [vmem:[#allocation32_spill] sm:$0xff] %v10739_v55 }
 0x3dd   :  { %v1481_v14 = vpop.f32.mrf.mxu3  ;;  %v1505_v22 = vpop.f32.mrf.mxu2 }
 0x3e1   :  { %v10741_v12 = vpop.permute.xlu0 %2499 }
 0x3e5   :  { %v10743_v24 = vpop.f32.mrf.mxu3 }
 0x3e6   :  { %v10745_v45 = vpop.f32.mrf.mxu2  ;;  %v1787_v8 = vsel %vm1771_vm3, %v10743_v24, -inf }
 0x3e7   :  { %1788 = vmax.xlane.f32.xlu2 %v1787_v8  ;;  %v1790_v43 = vsel %vm1771_vm3, %v10745_v45, -inf }
 0x3e8   :  { %1791 = vmax.xlane.f32.xlu0 %v1790_v43 }
 0x3e9   :  { %v1751_v37 = vpop.permute.xlu0 %1750 }
 0x3ea   :  { %8681 = vmatmul.msk.bf16.vlgmr.msrb.gmra.mxu3 %vm1297_vm1, %v1751_v37 }
 0x3eb   :  { %2181 = vmatpush.bf16.msrb.mxu3 %v2172_v39 }
 0x3ed   :  { %v1529_v14 = vpop.f32.mrf.mxu3 }
 0x3ee   :  { %v1553_v22 = vpop.f32.mrf.mxu2 }
 0x3f5   :  { %v10754_v55 = vpop.f32.mrf.mxu3 }
 0x3f6   :  { %v10756_v52 = vpop.f32.mrf.mxu2  ;;  %v1793_v8 = vsel %vm1771_vm3, %v10754_v55, -inf }
 0x3f7   :  { %v1796_v60 = vsel %vm1771_vm3, %v10756_v52, -inf  ;;  %1794 = vmax.xlane.f32.xlu1 %v1793_v8 }
 0x3f8   :  { %1797 = vmax.xlane.f32.xlu2 %v1796_v60  ;;  %v10776_v60 = vpop.permute.xlu1 %2536 }
 0x3fd   :  { %v1577_v43 = vpop.f32.mrf.mxu3 }
 0x3fe   :  { %v1601_v11 = vpop.f32.mrf.mxu2 }
 0x405   :  { %v10762_v62 = vpop.f32.mrf.mxu3 }
 0x406   :  { %v1799_v37 = vsel %vm1771_vm3, %v10762_v62, -inf }
 0x407   :  { %1800 = vmax.xlane.f32.xlu0 %v1799_v37 }
 0x40d   :  { %v1625_v39 = vpop.f32.mrf.mxu3  ;;  %v10766_v14 = vpop.f32.mrf.mxu2 }
 0x40e   :  { %v1802_v22 = vsel %vm1771_vm3, %v10766_v14, -inf }
 0x40f   :  { %1803 = vmax.xlane.f32.xlu1 %v1802_v22 }
 0x415   :  { %v1649_v53 = vpop.f32.mrf.mxu2 }
 0x42a   :  { %v1774_v50 = vpop.xlane.xlu1 %1773 }
 0x42b   :  { %v1820_v53 = vsub.f32 %v10692_v41, %v1774_v50 }
 0x42d   :  { %v1836_v48 = vmul.f32 1.442695, %v1820_v53 }
 0x42f   :  { %9121 = vpow2.f32 %v1836_v48 }
 0x435   :  { %v10794_v48 = vpop.eup %9121 }
 0x43a   :  { %v1777_v22 = vpop.xlane.xlu2 %1776 }
 0x43b   :  { %v1821_v47 = vsub.f32 %v10709_v35, %v1777_v22 }
 0x43d   :  { %v1838_v23 = vmul.f32 1.442695, %v1821_v47 }
 0x43e   :  { %v10772_v8 = vpop.f32.mrf.mxu3 }
 0x43f   :  { %v1805_v11 = vsel %vm1771_vm3, %v10772_v8, -inf  ;;  %9123 = vpow2.f32 %v1838_v23 }
 0x440   :  { %1806 = vmax.xlane.f32.xlu2 %v1805_v11  ;;  %v1780_v11 = vpop.xlane.xlu0 %1779 }
 0x445   :  { %v10778_v43 = vpop.f32.mrf.mxu2  ;;  %v10796_v35 = vpop.eup %9123 }
 0x446   :  { %v1673_v37 = vpop.f32.mrf.mxu3  ;;  %v1808_v39 = vsel %vm1771_vm3, %v10778_v43, -inf  ;;  %v1871_v22 = vsel %vm1771_vm3, %v10796_v35, 0.0 }
 0x447   :  { %1809 = vmax.xlane.f32.xlu0 %v1808_v39 }
 0x44a   :  { %v1783_v1 = vpop.xlane.xlu2 %1782  ;;  %v1786_v51 = vpop.xlane.xlu1 %1785 }
 0x44b   :  { %v1823_v29 = vsub.f32 %v10731_v54, %v1783_v1  ;;  %v1824_v39 = vsub.f32 %v10733_v2, %v1786_v51  ;;  %v1868_v2 = vsel %vm1771_vm3, %v10794_v48, 0.0 }
 0x44d   :  { %v1697_v0 = vpop.f32.mrf.mxu2  ;;  %v1842_v47 = vmul.f32 1.442695, %v1823_v29  ;;  %v1844_v41 = vmul.f32 1.442695, %v1824_v39 }
 0x44f   :  { %9125 = vpow2.f32 %v1842_v47 }
 0x450   :  { %9127 = vpow2.f32 %v1844_v41 }
 0x455   :  { %v10785_v37 = vpop.f32.mrf.mxu3  ;;  %v10803_v53 = vpop.eup %9125 }
 0x456   :  { %v10788_v58 = vpop.f32.mrf.mxu2  ;;  %v1811_v0 = vsel %vm1771_vm3, %v10785_v37, -inf  ;;  %v10805_v39 = vpop.eup %9127 }
 0x457   :  { %v1814_v50 = vsel %vm1771_vm3, %v10788_v58, -inf  ;;  %1812 = vmax.xlane.f32.xlu1 %v1811_v0  ;;  %v1822_v0 = vsub.f32 %v10711_v26, %v1780_v11 }
 0x458   :  { %1815 = vmax.xlane.f32.xlu2 %v1814_v50  ;;  %v1880_v50 = vsel %vm1771_vm3, %v10805_v39, 0.0 }
 0x459   :  { %v1840_v47 = vmul.f32 1.442695, %v1822_v0 }
 0x45a   :  { %v1789_v41 = vpop.xlane.xlu2 %1788 }
 0x45b   :  { %v1792_v1 = vpop.xlane.xlu0 %1791 }
 0x45c   :  { %v1826_v51 = vsub.f32 %v10745_v45, %v1792_v1  ;;  %v1877_v45 = vsel %vm1771_vm3, %v10803_v53, 0.0 }
 0x45d   :  { %v1721_v23 = vpop.f32.mrf.mxu3 }
 0x45e   :  { %v1745_v54 = vpop.f32.mrf.mxu2  ;;  %v1848_v29 = vmul.f32 1.442695, %v1826_v51 }
 0x45f   :  { %1869 = vadd.xlane.f32.xlu1 %v1868_v2  ;;  %v1825_v54 = vsub.f32 %v10743_v24, %v1789_v41 }
 0x460   :  { %1872 = vadd.xlane.f32.xlu2 %v1871_v22  ;;  %9129 = vpow2.f32 %v1848_v29 }
 0x461   :  { %9131 = vpow2.f32 %v1840_v47  ;;  %v1846_v29 = vmul.f32 1.442695, %v1825_v54 }
 0x466   :  { %v10812_v23 = vpop.eup %9129 }
 0x467   :  { %1878 = vadd.xlane.f32.xlu1 %v1877_v45  ;;  %v1886_v22 = vsel %vm1771_vm3, %v10812_v23, 0.0  ;;  %v10822_v45 = vpop.eup %9131 }
 0x468   :  { %1881 = vadd.xlane.f32.xlu2 %v1880_v50  ;;  %v1874_v41 = vsel %vm1771_vm3, %v10822_v45, 0.0 }
 0x46a   :  { %v1795_v1 = vpop.xlane.xlu1 %1794 }
 0x46b   :  { %v1827_v51 = vsub.f32 %v10754_v55, %v1795_v1  ;;  %v1798_v0 = vpop.xlane.xlu2 %1797 }
 0x46c   :  { %v1828_v24 = vsub.f32 %v10756_v52, %v1798_v0 }
 0x46d   :  { %v1850_v26 = vmul.f32 1.442695, %v1827_v51  ;;  %v10816_v11 = vpop.f32.mrf.mxu3 }
 0x46e   :  { %v1817_v2 = vsel %vm1771_vm3, %v10816_v11, -inf  ;;  %v1852_v1 = vmul.f32 1.442695, %v1828_v24 }
 0x46f   :  { %9133 = vpow2.f32 %v1850_v26  ;;  %1818 = vmax.xlane.f32.xlu0 %v1817_v2  ;;  %1887 = vadd.xlane.f32.xlu1 %v1886_v22 }
 0x470   :  { %9135 = vpow2.f32 %v1846_v29 }
 0x471   :  { %9137 = vpow2.f32 %v1852_v1 }
 0x475   :  { %v10824_v55 = vpop.eup %9133  ;;  %v1769_v50 = vpop.f32.mrf.mxu3 }
 0x476   :  { %v1889_v47 = vsel %vm1771_vm3, %v10824_v55, 0.0  ;;  %v10831_v54 = vpop.eup %9135 }
 0x477   :  { %1890 = vadd.xlane.f32.xlu2 %v1889_v47  ;;  %1875 = vadd.xlane.f32.xlu0 %v1874_v41  ;;  %v1883_v52 = vsel %vm1771_vm3, %v10831_v54, 0.0  ;;  %v10836_v29 = vpop.eup %9137 }
 0x478   :  { %v1892_v47 = vsel %vm1771_vm3, %v10836_v29, 0.0 }
 0x47a   :  { %v1801_v51 = vpop.xlane.xlu0 %1800 }
 0x47b   :  { %v1829_v26 = vsub.f32 %v10762_v62, %v1801_v51 }
 0x47d   :  { %v1854_v2 = vmul.f32 1.442695, %v1829_v26 }
 0x47f   :  { %9139 = vpow2.f32 %v1854_v2  ;;  %1884 = vadd.xlane.f32.xlu0 %v1883_v52 }
 0x482   :  { %v1804_v22 = vpop.xlane.xlu1 %1803 }
 0x483   :  { %v1830_v0 = vsub.f32 %v10766_v14, %v1804_v22 }
 0x485   :  { %v10839_v50 = vpop.eup %9139  ;;  %v1856_v24 = vmul.f32 1.442695, %v1830_v0 }
 0x486   :  { %v1895_v62 = vsel %vm1771_vm3, %v10839_v50, 0.0 }
 0x487   :  { %9141 = vpow2.f32 %v1856_v24  ;;  %1893 = vadd.xlane.f32.xlu0 %v1892_v47  ;;  %1896 = vadd.xlane.f32.xlu1 %v1895_v62 }
 0x48d   :  { %v10845_v41 = vpop.eup %9141 }
 0x48e   :  { %v1898_v1 = vsel %vm1771_vm3, %v10845_v41, 0.0 }
 0x48f   :  { %1899 = vadd.xlane.f32.xlu2 %v1898_v1 }
 0x4b3   :  { %v1807_v51 = vpop.xlane.xlu2 %1806 }
 0x4b4   :  { %v1831_v14 = vsub.f32 %v10772_v8, %v1807_v51 }
 0x4b6   :  { %v1858_v26 = vmul.f32 1.442695, %v1831_v14 }
 0x4b8   :  { %9143 = vpow2.f32 %v1858_v26 }
 0x4ba   :  { %v1810_v2 = vpop.xlane.xlu0 %1809 }
 0x4bb   :  { %v1832_v52 = vsub.f32 %v10778_v43, %v1810_v2 }
 0x4bd   :  { %v1860_v22 = vmul.f32 1.442695, %v1832_v52 }
 0x4be   :  { %v10851_v0 = vpop.eup %9143 }
 0x4bf   :  { %9145 = vpow2.f32 %v1860_v22  ;;  %v1901_v24 = vsel %vm1771_vm3, %v10851_v0, 0.0 }
 0x4c0   :  { %1902 = vadd.xlane.f32.xlu0 %v1901_v24 }
 0x4c5   :  { %v10855_v47 = vpop.eup %9145 }
 0x4c6   :  { %v1904_v62 = vsel %vm1771_vm3, %v10855_v47, 0.0 }
 0x4c7   :  { %1905 = vadd.xlane.f32.xlu1 %v1904_v62 }
 0x4ca   :  { %v1813_v8 = vpop.xlane.xlu1 %1812 }
 0x4cb   :  { %v1816_v1 = vpop.xlane.xlu2 %1815  ;;  %v1833_v51 = vsub.f32 %v10785_v37, %v1813_v8 }
 0x4cc   :  { %v1834_v43 = vsub.f32 %v10788_v58, %v1816_v1 }
 0x4cd   :  { %v1862_v14 = vmul.f32 1.442695, %v1833_v51 }
 0x4ce   :  { %v1864_v26 = vmul.f32 1.442695, %v1834_v43 }
 0x4cf   :  { %9147 = vpow2.f32 %v1862_v14 }
 0x4d0   :  { %9149 = vpow2.f32 %v1864_v26 }
 0x4d2   :  { %v1870_v58 = vpop.xlane.xlu1 %1869 }
 0x4d3   :  { %v1873_v51 = vpop.xlane.xlu2 %1872 }
 0x4d5   :  { %v10861_v2 = vpop.eup %9147 }
 0x4d6   :  { %v10863_v52 = vpop.eup %9149  ;;  %v1907_v22 = vsel %vm1771_vm3, %v10861_v2, 0.0 }
 0x4d7   :  { %1908 = vadd.xlane.f32.xlu2 %v1907_v22  ;;  %v1910_v24 = vsel %vm1771_vm3, %v10863_v52, 0.0 }
 0x4d8   :  { %1911 = vadd.xlane.f32.xlu0 %v1910_v24 }
 0x4da   :  { %v1879_v43 = vpop.xlane.xlu1 %1878 }
 0x4e2   :  { %v1819_v62 = vpop.xlane.xlu0 %1818  ;;  %v1888_v20 = vpop.xlane.xlu1 %1887 }
 0x4e3   :  { %v1835_v37 = vsub.f32 %v10816_v11, %v1819_v62  ;;  %v1882_v11 = vpop.xlane.xlu2 %1881 }
 0x4e5   :  { %v1866_v8 = vmul.f32 1.442695, %v1835_v37 }
 0x4e7   :  { %9151 = vpow2.f32 %v1866_v8 }
 0x4e8   :  { %9153 = vrcp.f32 %v1870_v58 }
 0x4e9   :  { %9155 = vrcp.f32 %v1873_v51 }
 0x4ea   :  { %v1876_v26 = vpop.xlane.xlu0 %1875  ;;  %9157 = vrcp.f32 %v1879_v43 }
 0x4eb   :  { %9159 = vrcp.f32 %v1876_v26  ;;  %v1891_v51 = vpop.xlane.xlu2 %1890 }
 0x4ec   :  { %9161 = vrcp.f32 %v1882_v11 }
 0x4ed   :  { %v10870_v1 = vpop.eup %9151  ;;  %9163 = vrcp.f32 %v1888_v20 }
 0x4ee   :  { %v1913_v14 = vsel %vm1771_vm3, %v10870_v1, 0.0  ;;  %v9154_v22 = vpop.eup %9153 }
 0x4ef   :  { %1914 = vadd.xlane.f32.xlu1 %v1913_v14  ;;  %v9156_v24 = vpop.eup %9155  ;;  %v1932_v37 = vmul.f32 %v9154_v22, %v10794_v48 }
 0x4f0   :  { %v9158_v44 = vpop.eup %9157  ;;  %v1933_v8 = vmul.f32 %v9156_v24, %v10796_v35 }
 0x4f1   :  { %v9160_v62 = vpop.eup %9159  ;;  %v1935_v36 = vmul.f32 %v9158_v44, %v10803_v53  ;;  %v1948_v31 = vpack.c.bf16 %v1932_v37, %v1932_v37 }
 0x4f2   :  { %v1934_v28 = vmul.f32 %v9160_v62, %v10822_v45  ;;  %v1885_v58 = vpop.xlane.xlu0 %1884  ;;  %v1949_v14 = vpack.c.bf16 %v1933_v8, %v1933_v8  ;;  %v9162_v48 = vpop.eup %9161 }
 0x4f3   :  { %v1951_v26 = vpack.c.bf16 %v1935_v36, %v1935_v36  ;;  %9165 = vrcp.f32 %v1885_v58  ;;  %v9164_v22 = vpop.eup %9163  ;;  %v1936_v45 = vmul.f32 %v9162_v48, %v10805_v39 }
 0x4f4   :  { %v1950_v43 = vpack.c.bf16 %v1934_v28, %v1934_v28  ;;  %9167 = vrcp.f32 %v1891_v51  ;;  %v1938_v53 = vmul.f32 %v9164_v22, %v10812_v23 }
 0x4f5   :  { %v1952_v62 = vpack.c.bf16 %v1936_v45, %v1936_v45 }
 0x4f6   :  { %v1954_v36 = vpack.c.bf16 %v1938_v53, %v1938_v53 }
 0x4f9   :  { %v9166_v35 = vpop.eup %9165 }
 0x4fa   :  { %v9168_v24 = vpop.eup %9167  ;;  %v1937_v44 = vmul.f32 %v9166_v35, %v10831_v54  ;;  %v1894_v37 = vpop.xlane.xlu0 %1893 }
 0x4fb   :  { %v1939_v11 = vmul.f32 %v9168_v24, %v10824_v55 }
 0x4fc   :  { %v1953_v28 = vpack.c.bf16 %v1937_v44, %v1937_v44 }
 0x4fd   :  { %v1955_v20 = vpack.c.bf16 %v1939_v11, %v1939_v11 }
 0x500   :  { %8911 = vxpose.binary.xlu2.c.b16.start.end [1/2] (short) (narrow) %v1949_v14, %v1948_v31, 16  ;;  %v1897_v31 = vpop.xlane.xlu1 %1896 }
 0x501   :  { %8914 = vxpose.binary.xlu0.c.b16.start.end [1/2] (short) (narrow) %v1951_v26, %v1950_v43, 16  ;;  %9169 = vrcp.f32 %v1897_v31 }
 0x502   :  { %9171 = vrcp.f32 %v1894_v37  ;;  %v1900_v55 = vpop.xlane.xlu2 %1899 }
 0x503   :  { %9173 = vrcp.f32 %v1900_v55 }
 0x507   :  { %v9170_v8 = vpop.eup %9169 }
 0x508   :  { %v9172_v58 = vpop.eup %9171  ;;  %v1941_v54 = vmul.f32 %v9170_v8, %v10839_v50 }
 0x509   :  { %v1940_v39 = vmul.f32 %v9172_v58, %v10836_v29  ;;  %v9174_v43 = vpop.eup %9173 }
 0x50a   :  { %v1957_v23 = vpack.c.bf16 %v1941_v54, %v1941_v54  ;;  %v1942_v26 = vmul.f32 %v9174_v43, %v10845_v41  ;;  %v2246_v54 = vsel %vm1985_vm2, %v10644_v6, 0  ;;  %v2357_v6 = vsel %vm1985_vm2, %v10686_v42, 0 }
 0x50b   :  { %v1956_v14 = vpack.c.bf16 %v1940_v39, %v1940_v39  ;;  %v2468_v42 = vsel %vm1985_vm2, %v10770_v25, 0 }
 0x50c   :  { %v1958_v35 = vpack.c.bf16 %v1942_v26, %v1942_v26 }
 0x510   :  { %8917 = vxpose.binary.xlu2.c.b16.start.end [1/2] (short) (narrow) %v1953_v28, %v1952_v62, 16 }
 0x511   :  { %8920 = vxpose.binary.xlu0.c.b16.start.end [1/2] (short) (narrow) %v1955_v20, %v1954_v36, 16 }
 0x529   :  { %8923 = vxpose.binary.xlu1.c.b16.start.end [1/2] (short) (narrow) %v1957_v23, %v1956_v14, 16 }
 0x533   :  { %v1903_v51 = vpop.xlane.xlu0 %1902 }
 0x534   :  { %9175 = vrcp.f32 %v1903_v51 }
 0x53a   :  { %v9176_v48 = vpop.eup %9175  ;;  %v1906_v45 = vpop.xlane.xlu1 %1905 }
 0x53b   :  { %v1943_v22 = vmul.f32 %v9176_v48, %v10851_v0  ;;  %9177 = vrcp.f32 %v1906_v45 }
 0x53d   :  { %v1959_v24 = vpack.c.bf16 %v1943_v22, %v1943_v22 }
 0x53f   :  { %8926 = vxpose.binary.xlu2.c.b16.start.end [1/2] (short) (narrow) %v1959_v24, %v1958_v35, 16  ;;  %v9573_v35 = vld [vmem:[%s14550_s2] sm:$0xff]  ;;  %v8900_v24 = vld [vmem:[%s14551_s3 + $0x8] sm:$0xff] }
 0x541   :  { %v9178_v50 = vpop.eup %9177 }
 0x542   :  { %v1944_v44 = vmul.f32 %v9178_v50, %v10855_v47 }
 0x544   :  { %v1960_v62 = vpack.c.bf16 %v1944_v44, %v1944_v44 }
 0x54a   :  { %v1909_v29 = vpop.xlane.xlu2 %1908 }
 0x54b   :  { %9179 = vrcp.f32 %v1909_v29  ;;  %v1912_v41 = vpop.xlane.xlu0 %1911  ;;  %v8899_v29 = vld [vmem:[%s14551_s3] sm:$0xff] }
 0x54c   :  { %9181 = vrcp.f32 %v1912_v41 }
 0x551   :  { %v9180_v53 = vpop.eup %9179 }
 0x552   :  { %v1945_v11 = vmul.f32 %v9180_v53, %v10861_v2  ;;  %v9182_v0 = vpop.eup %9181  ;;  %v2209_v2 = vsel %vm1985_vm2, %v10593_v7, 0  ;;  %v2320_v7 = vsel %vm1985_vm2, %v10648_v49, 0  ;;  %v2431_v49 = vsel %vm1985_vm2, %v10721_v56, 0 }
 0x553   :  { %v1946_v20 = vmul.f32 %v9182_v0, %v10863_v52  ;;  %v2542_v56 = vsel %vm1985_vm2, %v10776_v60, 0 }
 0x554   :  { %v1961_v28 = vpack.c.bf16 %v1945_v11, %v1945_v11 }
 0x555   :  { %v1962_v8 = vpack.c.bf16 %v1946_v20, %v1946_v20 }
 0x556   :  { %8929 = vxpose.binary.xlu0.c.b16.start.end [1/2] (short) (narrow) %v1961_v28, %v1960_v62, 16 }
 0x562   :  { %v1915_v36 = vpop.xlane.xlu1 %1914 }
 0x563   :  { %9183 = vrcp.f32 %v1915_v36 }
 0x569   :  { %v9184_v31 = vpop.eup %9183 }
 0x56a   :  { %v1947_v37 = vmul.f32 %v9184_v31, %v10870_v1  ;;  %v2283_v1 = vsel %vm1985_vm2, %v10632_v34, 0  ;;  %v2394_v34 = vsel %vm1985_vm2, %v10698_v33, 0  ;;  %v2505_v33 = vsel %vm1985_vm2, %v10741_v12, 0  ;;  %v9572_v12 = vld [vmem:[%s14550_s2 + $0x8] sm:$0xff] }
 0x56c   :  { %v1963_v58 = vpack.c.bf16 %v1947_v37, %v1947_v37 }
 0x56e   :  { %8932 = vxpose.binary.xlu1.c.b16.start.end [1/2] (short) (narrow) %v1963_v58, %v1962_v8, 16 }
 0x5a1   :  { %v8912_v47 = vpop.trf.xlu2 }
 0x5a2   :  { %8682 = vmatmul.msk.bf16.vlgmr.msrb.gmra.mxu1 %vm1771_vm3, %v8912_v47 }
 0x5a3   :  { %2218 = vmatpush.bf16.msrb.mxu1 %v2209_v2 }
 0x5a9   :  { %v8913_v39 = vpop.trf.xlu2 }
 0x5aa   :  { %8683 = vmatmul.msk.bf16.vlgmr.msra.gmra.mxu2 %vm1771_vm3, %v8913_v39 }
 0x5ab   :  { %2255 = vmatpush.bf16.msra.mxu2 %v2246_v54 }
 0x5ad   :  { %v8915_v52 = vpop.trf.xlu0 }
 0x5ae   :  { %8684 = vmatmul.msk.bf16.vlgmr.msra.gmra.mxu3 %vm1771_vm3, %v8915_v52 }
 0x5af   :  { %2292 = vmatpush.bf16.msra.mxu3 %v2283_v1 }
 0x5b1   :  { %v8918_v14 = vpop.trf.xlu2 }
 0x5b5   :  { %v8916_v23 = vpop.trf.xlu0 }
 0x5b6   :  { %8685 = vmatmul.msk.bf16.vlgmr.msra.gmra.mxu1 %vm1771_vm3, %v8916_v23 }
 0x5b7   :  { %2329 = vmatpush.bf16.msra.mxu1 %v2320_v7 }
 0x5b9   :  { %v8919_v55 = vpop.trf.xlu2 }
 0x5ba   :  { %8686 = vmatmul.msk.bf16.vlgmr.msrb.gmra.mxu2 %vm1771_vm3, %v8918_v14 }
 0x5bb   :  { %2366 = vmatpush.bf16.msrb.mxu2 %v2357_v6 }
 0x5bd   :  { %v8921_v51 = vpop.trf.xlu0 }
 0x5be   :  { %8687 = vmatmul.msk.bf16.vlgmr.msrb.gmra.mxu3 %vm1771_vm3, %v8919_v55 }
 0x5bf   :  { %2403 = vmatpush.bf16.msrb.mxu3 %v2394_v34 }
 0x5c5   :  { %v8922_v43 = vpop.trf.xlu0 }
 0x5c6   :  { %8688 = vmatmul.msk.bf16.vlgmr.msrb.gmra.mxu1 %vm1771_vm3, %v8921_v51 }
 0x5c7   :  { %2440 = vmatpush.bf16.msrb.mxu1 %v2431_v49 }
 0x5ca   :  { %8689 = vmatmul.msk.bf16.vlgmr.msra.gmra.mxu2 %vm1771_vm3, %v8922_v43 }
 0x5cb   :  { %2477 = vmatpush.bf16.msra.mxu2 %v2468_v42 }
 0x5d5   :  { %v8924_v26 = vpop.trf.xlu1 }
 0x5d6   :  { %8690 = vmatmul.msk.bf16.vlgmr.msra.gmra.mxu3 %vm1771_vm3, %v8924_v26 }
 0x5d7   :  { %2514 = vmatpush.bf16.msra.mxu3 %v2505_v33 }
 0x5dd   :  { %v8925_v48 = vpop.trf.xlu1 }
 0x5de   :  { %8691 = vmatmul.msk.bf16.vlgmr.msra.gmra.mxu1 %vm1771_vm3, %v8925_v48 }
 0x5df   :  { %2551 = vmatpush.bf16.msra.mxu1 %v2542_v56 }
 0x5e0   :  { %v8927_v22 = vpop.trf.xlu2 }
 0x5e1   :  { %8692 = vmatmul.msk.bf16.vlgmr.msrb.gmra.mxu2 %vm1771_vm3, %v8927_v22 }
 0x5e2   :  { %2607 = vmatpush.bf16.msrb.mxu2 %v8900_v24 }
 0x5e6   :  { %2608 = vmatpush.bf16.msrb.mxu2 %v8899_v29 }
 0x5e8   :  { %v8928_v25 = vpop.trf.xlu2 }
 0x5e9   :  { %8693 = vmatmul.msk.bf16.vlgmr.msrb.gmra.mxu3 %vm1771_vm3, %v8928_v25 }
 0x5ea   :  { %3369 = vmatpush.bf16.msrb.mxu3 %v9572_v12 }
 0x5ee   :  { %3370 = vmatpush.bf16.msrb.mxu3 %v9573_v35 }
 0x602   :  { %v8930_v60 = vpop.trf.xlu0 }
 0x603   :  { %8694 = vmatmul.msk.bf16.vlgmr.msrb.gmra.mxu1 %vm1771_vm3, %v8930_v60 }
 0x60a   :  { %v8931_v45 = vpop.trf.xlu0 }
 0x60b   :  { %8695 = vmatmul.msk.bf16.vlgmr.msra.gmra.mxu2 %vm1771_vm3, %v8931_v45 }
 0x61a   :  { %v8933_v50 = vpop.trf.xlu1 }
 0x61b   :  { %8696 = vmatmul.msk.bf16.vlgmr.msra.gmra.mxu3 %vm1771_vm3, %v8933_v50 }
 0x61f   :  { %v1998_v44 = vpop.f32.mrf.mxu1 }
 0x622   :  { %v8934_v53 = vpop.trf.xlu1 }
 0x623   :  { %8697 = vmatmul.msk.bf16.vlgmr.msra.gmra.mxu1 %vm1771_vm3, %v8934_v53 }
 0x627   :  { %v2000_v11 = vpop.f32.mrf.mxu1 }
 0x62b   :  { %8714 = vmatmul.msk.bf16.vlgmr.msrb.gmra.mxu3 %vm1297_vm1, %v10528_v63 }
 0x62d   :  { %v2035_v62 = vpop.f32.mrf.mxu2 }
 0x62e   :  { %v2557_v28 = vpack.c.bf16 %v2035_v62, %v1998_v44 }
 0x630   :  { %8706 = vmatmul.msk.bf16.vlgmr.msrb.gmra.mxu2 %vm1297_vm1, %v2557_v28 }
 0x631   :  { %v2072_v41 = vpop.f32.mrf.mxu3 }
 0x633   :  { %v2109_v36 = vpop.f32.mrf.mxu1 }
 0x634   :  { %v2558_v37 = vpack.c.bf16 %v2109_v36, %v2072_v41 }
 0x635   :  { %v2037_v0 = vpop.f32.mrf.mxu2 }
 0x639   :  { %v2074_v20 = vpop.f32.mrf.mxu3 }
 0x63b   :  { %8715 = vmatmul.msk.bf16.gmra.mxu3 %vm1297_vm1, %v10518_v13  ;;  %v2111_v31 = vpop.f32.mrf.mxu1 }
 0x63d   :  { %v2146_v8 = vpop.f32.mrf.mxu2 }
 0x640   :  { %8707 = vmatmul.msk.bf16.gmra.mxu2 %vm1297_vm1, %v2558_v37 }
 0x641   :  { %v2183_v58 = vpop.f32.mrf.mxu3 }
 0x642   :  { %v2559_v54 = vpack.c.bf16 %v2183_v58, %v2146_v8 }
 0x643   :  { %v2220_v47 = vpop.f32.mrf.mxu1 }
 0x645   :  { %v2148_v2 = vpop.f32.mrf.mxu2 }
 0x649   :  { %v2185_v63 = vpop.f32.mrf.mxu3 }
 0x64b   :  { %8716 = vmatmul.msk.bf16.gmra.mxu3 %vm1297_vm1, %v10546_v15  ;;  %v2222_v39 = vpop.f32.mrf.mxu1 }
 0x64d   :  { %v2257_v52 = vpop.f32.mrf.mxu2 }
 0x64e   :  { %v2560_v23 = vpack.c.bf16 %v2257_v52, %v2220_v47 }
 0x650   :  { %8708 = vmatmul.msk.bf16.gmra.mxu2 %vm1297_vm1, %v2559_v54 }
 0x655   :  { %v2259_v1 = vpop.f32.mrf.mxu2 }
 0x659   :  { %v2294_v14 = vpop.f32.mrf.mxu3 }
 0x65b   :  { %8717 = vmatmul.msk.bf16.gmra.mxu3 %vm1297_vm1, %v10538_v46  ;;  %v2331_v13 = vpop.f32.mrf.mxu1 }
 0x65c   :  { %v2561_v15 = vpack.c.bf16 %v2331_v13, %v2294_v14 }
 0x660   :  { %8709 = vmatmul.msk.bf16.gmra.mxu2 %vm1297_vm1, %v2560_v23 }
 0x661   :  { %v2296_v7 = vpop.f32.mrf.mxu3 }
 0x663   :  { %v2333_v6 = vpop.f32.mrf.mxu1 }
 0x664   :  { %v2368_v55 = vpop.f32.mrf.mxu2 }
 0x66b   :  { %8718 = vmatmul.msk.bf16.gmra.mxu3 %vm1297_vm1, %v10526_v5 }
 0x66c   :  { %v2405_v51 = vpop.f32.mrf.mxu3  ;;  %v2370_v34 = vpop.f32.mrf.mxu2 }
 0x66d   :  { %v2562_v46 = vpack.c.bf16 %v2405_v51, %v2368_v55 }
 0x670   :  { %8710 = vmatmul.msk.bf16.gmra.mxu2 %vm1297_vm1, %v2561_v15 }
 0x674   :  { %v2407_v49 = vpop.f32.mrf.mxu3 }
 0x67b   :  { %8719 = vmatmul.msk.bf16.gmra.mxu3 %vm1297_vm1, %v10551_v19 }
 0x680   :  { %8711 = vmatmul.msk.bf16.gmra.mxu2 %vm1297_vm1, %v2562_v46  ;;  %v2442_v43 = vpop.f32.mrf.mxu1 }
 0x688   :  { %v2444_v42 = vpop.f32.mrf.mxu1 }
 0x68b   :  { %8720 = vmatmul.msk.bf16.gmra.mxu3 %vm1297_vm1, %v10536_v40 }
 0x68e   :  { %v2479_v26 = vpop.f32.mrf.mxu2 }
 0x68f   :  { %v2563_v33 = vpack.c.bf16 %v2479_v26, %v2442_v43 }
 0x691   :  { %8712 = vmatmul.msk.bf16.gmra.mxu2 %vm1297_vm1, %v2563_v33 }
 0x696   :  { %v2481_v5 = vpop.f32.mrf.mxu2 }
 0x69b   :  { %8721 = vmatmul.msk.bf16.gmra.mxu3 %vm1297_vm1, %v10664_v32 }
 0x69e   :  { %v2516_v48 = vpop.f32.mrf.mxu3 }
 0x6a0   :  { %v2553_v56 = vpop.f32.mrf.mxu1 }
 0x6a1   :  { %v2564_v22 = vpack.c.bf16 %v2553_v56, %v2516_v48 }
 0x6a3   :  { %8713 = vmatmul.msk.bf16.gmra.mxu2 %vm1297_vm1, %v2564_v22 }
 0x6a6   :  { %v2518_v19 = vpop.f32.mrf.mxu3 }
 0x6a8   :  { %v2555_v25 = vpop.f32.mrf.mxu1 }
 0x6ae   :  { %v3372_v12 = vpop.f32.mrf.mxu3 }
 0x6af   :  { %v3412_v35 = vpack.c.bf16 %v3372_v12, %v3372_v12 }
 0x6b1   :  { %v3429_v60 = vunpack.c.l.b16 %v3412_v35  ;;  %v3437_v40 = vsel %vm1297_vm1, %v3412_v35, 0 }
 0x6b2   :  { %3446 = vmatpush.bf16.xpose.msrb.mxu1 %v3437_v40 }
 0x6b3   :  { %v3430_v24 = vpack.c.b16 %v3429_v60, %v3429_v60  ;;  %v2610_v8 = vpop.f32.mrf.mxu2 }
 0x6b4   :  { %v10978_v2 = vadd.f32 %v2610_v8, %v10280_v59 }
 0x6b5   :  { %4020 = vrot.lane.b32.xlu0 %v3430_v24, %s9590_s1  ;;  %3431 = vrot.lane.b32.xlu2 %v3430_v24, %s9589_s26 }
 0x6b6   :  { %v3374_v45 = vpop.f32.mrf.mxu3  ;;  %v2650_v54 = vsel %vm1297_vm1, %v10978_v2, 0.0 }
 0x6b7   :  { %v3413_v32 = vpack.c.bf16 %v3374_v45, %v3374_v45 }
 0x6b9   :  { %v3453_v29 = vunpack.c.l.b16 %v3413_v32  ;;  %v3461_v50 = vsel %vm1297_vm1, %v3413_v32, 0 }
 0x6ba   :  { %3470 = vmatpush.bf16.xpose.msra.mxu1 %v3461_v50 }
 0x6bb   :  { %v3454_v44 = vpack.c.b16 %v3453_v29, %v3453_v29  ;;  %v2612_v1 = vpop.f32.mrf.mxu2 }
 0x6bc   :  { %v10989_v13 = vadd.f32 %v2612_v1, %v10283_v4 }
 0x6bd   :  { %4057 = vrot.lane.b32.xlu1 %v3454_v44, %s9590_s1  ;;  %3455 = vrot.lane.b32.xlu0 %v3454_v44, %s9589_s26 }
 0x6be   :  { %v3377_v53 = vpop.f32.mrf.mxu3  ;;  %v2653_v7 = vsel %vm1297_vm1, %v10989_v13, 0.0 }
 0x6bf   :  { %v3414_v11 = vpack.c.bf16 %v3377_v53, %v3377_v53 }
 0x6c1   :  { %v3477_v62 = vunpack.c.l.b16 %v3414_v11  ;;  %v3485_v24 = vsel %vm1297_vm1, %v3414_v11, 0 }
 0x6c3   :  { %v3478_v28 = vpack.c.b16 %v3477_v62, %v3477_v62  ;;  %v2615_v15 = vpop.f32.mrf.mxu2 }
 0x6c4   :  { %v11021_v44 = vadd.f32 %v2615_v15, %v10298_v16 }
 0x6c5   :  { %3479 = vrot.lane.b32.xlu1 %v3478_v28, %s9589_s26 }
 0x6c6   :  { %v3379_v41 = vpop.f32.mrf.mxu3  ;;  %v2656_v53 = vsel %vm1297_vm1, %v11021_v44, 0.0 }
 0x6c7   :  { %v10969_v36 = vpack.c.bf16 %v3379_v41, %v3379_v41 }
 0x6c9   :  { %v3501_v20 = vunpack.c.l.b16 %v10969_v36 }
 0x6cb   :  { %v3502_v37 = vpack.c.b16 %v3501_v20, %v3501_v20  ;;  %v2617_v43 = vpop.f32.mrf.mxu2 }
 0x6cc   :  { %v11026_v11 = vadd.f32 %v2617_v43, %v10301_v57  ;;  %v3509_v57 = vsel %vm1297_vm1, %v10969_v36, 0 }
 0x6cd   :  { %4094 = vrot.lane.b32.xlu1 %v3478_v28, %s9590_s1 }
 0x6ce   :  { %v3382_v0 = vpop.f32.mrf.mxu3 }
 0x6cf   :  { %v10973_v31 = vpack.c.bf16 %v3382_v0, %v3382_v0 }
 0x6d1   :  { %v3525_v47 = vunpack.c.l.b16 %v10973_v31  ;;  %v3533_v36 = vsel %vm1297_vm1, %v10973_v31, 0 }
 0x6d3   :  { %v3526_v63 = vpack.c.b16 %v3525_v47, %v3525_v47  ;;  %v2620_v5 = vpop.f32.mrf.mxu2 }
 0x6d4   :  { %v11014_v32 = vadd.f32 %v2620_v5, %v10323_v21  ;;  %v2659_v21 = vsel %vm1297_vm1, %v11026_v11, 0.0 }
 0x6d5   :  { %4131 = vrot.lane.b32.xlu1 %v3502_v37, %s9590_s1 }
 0x6d6   :  { %v3384_v58 = vpop.f32.mrf.mxu3  ;;  %v2662_v29 = vsel %vm1297_vm1, %v11014_v32, 0.0 }
 0x6d7   :  { %v10980_v39 = vpack.c.bf16 %v3384_v58, %v3384_v58 }
 0x6d9   :  { %v3549_v14 = vunpack.c.l.b16 %v10980_v39 }
 0x6db   :  { %v3550_v23 = vpack.c.b16 %v3549_v14, %v3549_v14  ;;  %v11008_v35 = vpop.f32.mrf.mxu2 }
 0x6dd   :  { %4168 = vrot.lane.b32.xlu1 %v3526_v63, %s9590_s1 }
 0x6de   :  { %v10985_v52 = vpop.f32.mrf.mxu3  ;;  %2651 = vadd.xlane.f32.xlu2 %v2650_v54 }
 0x6df   :  { %v3418_v8 = vpack.c.bf16 %v10985_v52, %v10985_v52 }
 0x6e1   :  { %v3573_v47 = vunpack.c.l.b16 %v3418_v8 }
 0x6e3   :  { %v11018_v50 = vpop.f32.mrf.mxu2 }
 0x6e5   :  { %3551 = vrot.lane.b32.xlu1 %v3550_v23, %s9589_s26 }
 0x6e6   :  { %v3389_v59 = vpop.f32.mrf.mxu3 }
 0x6e7   :  { %2654 = vadd.xlane.f32.xlu0 %v2653_v7  ;;  %v10997_v49 = vpack.c.bf16 %v3389_v59, %v3389_v59 }
 0x6e9   :  { %v3597_v42 = vunpack.c.l.b16 %v10997_v49 }
 0x6eb   :  { %v3598_v33 = vpack.c.b16 %v3597_v42, %v3597_v42  ;;  %v11028_v62 = vpop.f32.mrf.mxu2 }
 0x6ed   :  { %4205 = vrot.lane.b32.xlu1 %v3550_v23, %s9590_s1 }
 0x6ee   :  { %v3392_v6 = vpop.f32.mrf.mxu3 }
 0x6ef   :  { %v3420_v55 = vpack.c.bf16 %v3392_v6, %v3392_v6 }
 0x6f1   :  { %v3629_v51 = vsel %vm1297_vm1, %v3420_v55, 0  ;;  %v3621_v20 = vunpack.c.l.b16 %v3420_v55 }
 0x6f2   :  { %3638 = vmatpush.bf16.xpose.msra.mxu2 %v3629_v51 }
 0x6f3   :  { %v2630_v41 = vpop.f32.mrf.mxu2 }
 0x6f4   :  { %v11035_v16 = vadd.f32 %v2630_v41, %v10380_v3  ;;  %v3622_v3 = vpack.c.b16 %v3621_v20, %v3621_v20 }
 0x6f6   :  { %v3394_v34 = vpop.f32.mrf.mxu3  ;;  %3503 = vrot.lane.b32.xlu2 %v3502_v37, %s9589_s26  ;;  %v2674_v37 = vsel %vm1297_vm1, %v11035_v16, 0.0 }
 0x6f7   :  { %v3421_v4 = vpack.c.bf16 %v3394_v34, %v3394_v34 }
 0x6f9   :  { %v3653_v46 = vsel %vm1297_vm1, %v3421_v4, 0  ;;  %v3645_v48 = vunpack.c.l.b16 %v3421_v4  ;;  %v3557_v4 = vsel %vm1297_vm1, %v10980_v39, 0  ;;  %v11085_v39 = vadd.f32 %v11008_v35, %v10326_v18 }
 0x6fa   :  { %3662 = vmatpush.bf16.xpose.msra.mxu3 %v3653_v46 }
 0x6fb   :  { %3527 = vrot.lane.b32.xlu0 %v3526_v63, %s9589_s26  ;;  %v11004_v25 = vpack.c.b16 %v3645_v48, %v3645_v48  ;;  %v3574_v63 = vpack.c.b16 %v3573_v47, %v3573_v47 }
 0x6fe   :  { %v3397_v26 = vpop.f32.mrf.mxu3 }
 0x6ff   :  { %v11048_v54 = vpack.c.bf16 %v3397_v26, %v3397_v26 }
 0x701   :  { %v3669_v52 = vunpack.c.l.b16 %v11048_v54 }
 0x703   :  { %3599 = vrot.lane.b32.xlu0 %v3598_v33, %s9589_s26  ;;  %v3670_v14 = vpack.c.b16 %v3669_v52, %v3669_v52  ;;  %v3677_v52 = vsel %vm1297_vm1, %v11048_v54, 0 }
 0x706   :  { %v3399_v56 = vpop.f32.mrf.mxu3 }
 0x707   :  { %v3423_v22 = vpack.c.bf16 %v3399_v56, %v3399_v56  ;;  %v11079_v56 = vpop.f32.mrf.mxu2 }
 0x709   :  { %v3701_v19 = vsel %vm1297_vm1, %v3423_v22, 0  ;;  %v3693_v23 = vunpack.c.l.b16 %v3423_v22 }
 0x70a   :  { %3710 = vmatpush.bf16.xpose.msrb.mxu2 %v3701_v19 }
 0x70b   :  { %4353 = vrot.lane.b32.xlu0 %v11004_v25, %s9590_s1  ;;  %v3694_v59 = vpack.c.b16 %v3693_v23, %v3693_v23 }
 0x70e   :  { %v3402_v12 = vpop.f32.mrf.mxu3 }
 0x70f   :  { %v3424_v60 = vpack.c.bf16 %v3402_v12, %v3402_v12  ;;  %v3432_v40 = vpop.permute.xlu2 %3431  ;;  %v3581_v12 = vsel %vm1297_vm1, %v3418_v8, 0 }
 0x710   :  { %8722 = vmatmul.msk.bf16.vlgmr.msrb.gmra.mxu1 %vm1297_vm1, %v3432_v40  ;;  %v11094_v40 = vadd.f32 %v11018_v50, %v10349_v61 }
 0x711   :  { %v3725_v45 = vsel %vm1297_vm1, %v3424_v60, 0  ;;  %3494 = vmatpush.bf16.xpose.msrb.mxu1 %v3485_v24  ;;  %v3717_v6 = vunpack.c.l.b16 %v3424_v60  ;;  %v2665_v60 = vsel %vm1297_vm1, %v11085_v39, 0.0  ;;  %v2635_v24 = vpop.f32.mrf.mxu2 }
 0x712   :  { %3734 = vmatpush.bf16.xpose.msrb.mxu3 %v3725_v45  ;;  %v11099_v18 = vadd.f32 %v2635_v24, %v10410_v10  ;;  %v2668_v35 = vsel %vm1297_vm1, %v11094_v40, 0.0 }
 0x713   :  { %v11063_v55 = vpack.c.b16 %v3717_v6, %v3717_v6 }
 0x716   :  { %v3404_v7 = vpop.f32.mrf.mxu3 }
 0x717   :  { %2663 = vadd.xlane.f32.xlu1 %v2662_v29  ;;  %v11065_v15 = vpack.c.bf16 %v3404_v7, %v3404_v7  ;;  %v2680_v29 = vsel %vm1297_vm1, %v11099_v18, 0.0 }
 0x719   :  { %v3741_v34 = vunpack.c.l.b16 %v11065_v15  ;;  %v11109_v61 = vpop.f32.mrf.mxu2 }
 0x71b   :  { %v3742_v43 = vpack.c.b16 %v3741_v34, %v3741_v34 }
 0x71e   :  { %v3407_v46 = vpop.f32.mrf.mxu3 }
 0x71f   :  { %2657 = vadd.xlane.f32.xlu2 %v2656_v53  ;;  %v3426_v42 = vpack.c.bf16 %v3407_v46, %v3407_v46  ;;  %v11107_v53 = vadd.f32 %v11028_v62, %v10352_v38 }
 0x721   :  { %v2671_v41 = vsel %vm1297_vm1, %v11107_v53, 0.0  ;;  %v3773_v6 = vsel %vm1297_vm1, %v3426_v42, 0 }
 0x727   :  { %2660 = vadd.xlane.f32.xlu2 %v2659_v21  ;;  %v11032_v28 = vpop.permute.xlu0 %4020  ;;  %v3605_v21 = vsel %vm1297_vm1, %v10997_v49, 0 }
 0x72f   :  { %v3456_v0 = vpop.permute.xlu0 %3455  ;;  %v11045_v58 = vpop.permute.xlu1 %4057 }
 0x730   :  { %4279 = vrot.lane.b32.xlu1 %v3598_v33, %s9590_s1  ;;  %8723 = vmatmul.msk.bf16.vlgmr.msra.gmra.mxu1 %vm1297_vm1, %v3456_v0  ;;  %v3765_v33 = vunpack.c.l.b16 %v3426_v42  ;;  %v2640_v0 = vpop.f32.mrf.mxu2  ;;  %v3749_v42 = vsel %vm1297_vm1, %v11065_v15, 0  ;;  %v11168_v15 = vadd.f32 %v11079_v56, %v10382_v30 }
 0x731   :  { %3518 = vmatpush.bf16.xpose.msra.mxu1 %v3509_v57 }
 0x732   :  { %v3766_v48 = vpack.c.b16 %v3765_v33, %v3765_v33 }
 0x735   :  { %2675 = vadd.xlane.f32.xlu0 %v2674_v37 }
 0x737   :  { %v3480_v1 = vpop.permute.xlu1 %3479 }
 0x738   :  { %3623 = vrot.lane.b32.xlu1 %v3622_v3, %s9589_s26  ;;  %v2642_v38 = vpop.f32.mrf.mxu2 }
 0x739   :  { %v11122_v37 = vadd.f32 %v2642_v38, %v10434_v17 }
 0x73b   :  { %v2689_v49 = vsel %vm1297_vm1, %v11122_v37, 0.0 }
 0x73f   :  { %3575 = vrot.lane.b32.xlu2 %v3574_v63, %s9589_s26  ;;  %v11073_v26 = vpop.permute.xlu1 %4094 }
 0x740   :  { %4316 = vrot.lane.b32.xlu1 %v3622_v3, %s9590_s1  ;;  %8724 = vmatmul.msk.bf16.vlgmr.msrb.gmra.mxu1 %vm1297_vm1, %v3480_v1  ;;  %v11144_v54 = vpop.f32.mrf.mxu2 }
 0x741   :  { %3542 = vmatpush.bf16.xpose.msrb.mxu1 %v3533_v36 }
 0x747   :  { %4242 = vrot.lane.b32.xlu2 %v3574_v63, %s9590_s1  ;;  %v11081_v22 = vpop.permute.xlu1 %4131  ;;  %v9591_v63 = vmov 32.0  }
 0x748   :  { %4390 = vrot.lane.b32.xlu1 %v3670_v14, %s9590_s1  ;;  %9185 = vrcp.f32 %v9591_v63 }
 0x749   :  { %3671 = vrot.lane.b32.xlu0 %v3670_v14, %s9589_s26 }
 0x74e   :  { %v9186_v14 = vpop.eup %9185 }
 0x74f   :  { %v11096_v45 = vpop.permute.xlu1 %4168  ;;  %vm2703_vm4 = vweird.f32 %v9186_v14 }
 0x750   :  { %3695 = vrot.lane.b32.xlu1 %v3694_v59, %s9589_s26 }
 0x751   :  { %4427 = vrot.lane.b32.xlu0 %v3694_v59, %s9590_s1  ;;  %v11061_v31 = vpop.xlane.xlu2 %2651 }
 0x757   :  { %v3552_v50 = vpop.permute.xlu1 %3551 }
 0x758   :  { %4464 = vrot.lane.b32.xlu1 %v11063_v55, %s9590_s1 }
 0x759   :  { %v3504_v51 = vpop.permute.xlu2 %3503 }
 0x75a   :  { %8725 = vmatmul.msk.bf16.vlgmr.msra.gmra.mxu1 %vm1297_vm1, %v3504_v51  ;;  %v11076_v5 = vpop.xlane.xlu0 %2654  ;;  %v2699_v51 = vmul.f32 32.0, %v9186_v14 }
 0x75b   :  { %3566 = vmatpush.bf16.xpose.msra.mxu1 %v3557_v4 }
 0x75c   :  { %v2700_v46 = vsub.f32 1.0, %v2699_v51 }
 0x75f   :  { %v11119_v62 = vpop.permute.xlu1 %4205 }
 0x760   :  { %4501 = vrot.lane.b32.xlu1 %v3742_v43, %s9590_s1 }
 0x768   :  { %3767 = vrot.lane.b32.xlu1 %v3766_v48, %s9589_s26 }
 0x76d   :  { %v3528_v19 = vpop.permute.xlu0 %3527 }
 0x76e   :  { %8726 = vmatmul.msk.bf16.vlgmr.msrb.gmra.mxu1 %vm1297_vm1, %v3528_v19  ;;  %v2701_v19 = vmul.f32 %v9186_v14, %v2700_v46 }
 0x76f   :  { %3590 = vmatpush.bf16.xpose.msrb.mxu1 %v3581_v12  ;;  %v11158_v12 = vadd.f32 %v2640_v0, %v10432_v27 }
 0x770   :  { %4538 = vrot.lane.b32.xlu1 %v3766_v48, %s9590_s1  ;;  %2666 = vadd.xlane.f32.xlu2 %v2665_v60  ;;  %v2702_v24 = vadd.f32 %v9186_v14, %v2701_v19 }
 0x775   :  { %v3600_v23 = vpop.permute.xlu0 %3599 }
 0x778   :  { %2669 = vadd.xlane.f32.xlu2 %v2668_v35  ;;  %v2686_v35 = vsel %vm1297_vm1, %v11158_v12, 0.0 }
 0x77b   :  { %2681 = vadd.xlane.f32.xlu0 %v2680_v29  ;;  %v2647_v29 = vpop.f32.mrf.mxu2 }
 0x77c   :  { %v11171_v0 = vadd.f32 %v2647_v29, %v10454_v9 }
 0x77d   :  { %v11148_v33 = vpop.permute.xlu0 %4353 }
 0x77e   :  { %8727 = vmatmul.msk.bf16.vlgmr.msra.gmra.mxu1 %vm1297_vm1, %v3552_v50  ;;  %v2695_v63 = vsel %vm1297_vm1, %v11171_v0, 0.0 }
 0x77f   :  { %3614 = vmatpush.bf16.xpose.msra.mxu1 %v3605_v21 }
 0x780   :  { %2672 = vadd.xlane.f32.xlu2 %v2671_v41  ;;  %v11164_v41 = vsel %vm2703_vm4, %v9186_v14, %v2702_v24 }
 0x78a   :  { %v11128_v3 = vpop.xlane.xlu1 %2663 }
 0x78d   :  { %v11116_v57 = vpop.f32.mrf.mxu1 }
 0x78f   :  { %3743 = vrot.lane.b32.xlu0 %v3742_v43, %s9589_s26 }
 0x792   :  { %v2658_v20 = vpop.xlane.xlu2 %2657 }
 0x793   :  { %v2707_v38 = vmul.f32 %v11164_v41, %v2658_v20  ;;  %v4063_v20 = vsel %vm1985_vm2, %v11045_v58, 0 }
 0x795   :  { %v3450_v8 = vpop.f32.mrf.mxu1 }
 0x798   :  { %3647 = vrot.lane.b32.xlu2 %v11004_v25, %s9589_s26  ;;  %v3409_v25 = vpop.f32.mrf.mxu3 }
 0x799   :  { %v11137_v59 = vpack.c.bf16 %v3409_v25, %v3409_v25 }
 0x79a   :  { %2690 = vadd.xlane.f32.xlu1 %v2689_v49  ;;  %v11130_v47 = vpop.xlane.xlu2 %2660  ;;  %v11177_v49 = vsub.f32 %v11021_v44, %v2707_v38 }
 0x79b   :  { %v3789_v34 = vunpack.c.l.b16 %v11137_v59  ;;  %v2708_v51 = vmul.f32 %v11164_v41, %v11130_v47 }
 0x79c   :  { %v2739_v44 = vmul.f32 %v11177_v49, %v11177_v49 }
 0x79d   :  { %v11146_v43 = vpack.c.b16 %v3789_v34, %v3789_v34 }
 0x79e   :  { %v2759_v14 = vsel %vm1297_vm1, %v2739_v44, 0.0 }
 0x7a2   :  { %v11132_v1 = vpop.permute.xlu1 %4279  ;;  %v3576_v36 = vpop.permute.xlu2 %3575 }
 0x7a3   :  { %8728 = vmatmul.msk.bf16.vlgmr.msrb.gmra.mxu1 %vm1297_vm1, %v3576_v36  ;;  %v2677_v36 = vsel %vm1297_vm1, %v11168_v15, 0.0 }
 0x7a4   :  { %3686 = vmatpush.bf16.xpose.msrb.mxu1 %v3677_v52  ;;  %v4026_v52 = vsel %vm1985_vm2, %v11032_v28, 0  ;;  %v2705_v28 = vmul.f32 %v11164_v41, %v11061_v31  ;;  %v4174_v31 = vsel %vm1985_vm2, %v11096_v45, 0 }
 0x7a6   :  { %v11199_v58 = vsub.f32 %v10978_v2, %v2705_v28  ;;  %v11215_v2 = vsub.f32 %v11026_v11, %v2708_v51 }
 0x7a8   :  { %v2676_v50 = vpop.xlane.xlu0 %2675  ;;  %v2737_v34 = vmul.f32 %v11199_v58, %v11199_v58  ;;  %14611 = vst [vmem:[#allocation33_spill] sm:$0xff] %v11215_v2 }
 0x7aa   :  { %v3624_v7 = vpop.permute.xlu1 %3623  ;;  %v11211_v19 = vpop.permute.xlu2 %4242  ;;  %v2753_v47 = vsel %vm1297_vm1, %v2737_v34, 0.0  ;;  %v3797_v34 = vsel %vm1297_vm1, %v11137_v59, 0 }
 0x7ab   :  { %8730 = vmatmul.msk.bf16.vlgmr.msra.gmra.mxu2 %vm1297_vm1, %v3624_v7 }
 0x7ac   :  { %3782 = vmatpush.bf16.xpose.msra.mxu2 %v3773_v6 }
 0x7ad   :  { %v11142_v4 = vpop.f32.mrf.mxu1 }
 0x7b2   :  { %v11150_v48 = vpop.permute.xlu1 %4316 }
 0x7b3   :  { %4575 = vrot.lane.b32.xlu1 %v11146_v43, %s9590_s1  ;;  %8729 = vmatmul.msk.bf16.vlgmr.msra.gmra.mxu1 %vm1297_vm1, %v3600_v23 }
 0x7b4   :  { %3758 = vmatpush.bf16.xpose.msra.mxu1 %v3749_v42 }
 0x7b5   :  { %v3474_v60 = vpop.f32.mrf.mxu1 }
 0x7b6   :  { %v2740_v60 = vmul.f32 %v11215_v2, %v11215_v2 }
 0x7b8   :  { %v2762_v45 = vsel %vm1297_vm1, %v2740_v60, 0.0  ;;  %v4137_v60 = vsel %vm1985_vm2, %v11081_v22, 0 }
 0x7b9   :  { %2687 = vadd.xlane.f32.xlu0 %v2686_v35  ;;  %v2713_v35 = vmul.f32 %v11164_v41, %v2676_v50 }
 0x7ba   :  { %v11162_v21 = vpop.permute.xlu1 %4390 }
 0x7bb   :  { %v3672_v30 = vpop.permute.xlu0 %3671  ;;  %v11229_v38 = vsub.f32 %v11035_v16, %v2713_v35 }
 0x7bd   :  { %v11174_v8 = vpop.f32.mrf.mxu1  ;;  %14612 = vst [vmem:[#allocation34_spill] sm:$0xff] %v11229_v38 }
 0x7c1   :  { %2696 = vadd.xlane.f32.xlu0 %v2695_v63  ;;  %2678 = vadd.xlane.f32.xlu2 %v2677_v36 }
 0x7c2   :  { %v3696_v56 = vpop.permute.xlu1 %3695 }
 0x7c3   :  { %8732 = vmatmul.msk.bf16.vlgmr.msrb.gmra.mxu1 %vm1297_vm1, %v3672_v30  ;;  %8733 = vmatmul.msk.bf16.vlgmr.msrb.gmra.mxu2 %vm1297_vm1, %v3696_v56 }
 0x7c4   :  { %4035 = vmatpush.bf16.msrb.mxu1 %v4026_v52  ;;  %4072 = vmatpush.bf16.msrb.mxu2 %v4063_v20  ;;  %v11242_v20 = vpop.permute.xlu0 %4427 }
 0x7c5   :  { %v3498_v25 = vpop.f32.mrf.mxu1 }
 0x7c9   :  { %2760 = vadd.xlane.f32.xlu0 %v2759_v14 }
 0x7ca   :  { %v11192_v23 = vpop.permute.xlu1 %4464 }
 0x7d2   :  { %v11196_v7 = vpop.permute.xlu1 %4501 }
 0x7d7   :  { %v11201_v6 = vpop.f32.mrf.mxu1 }
 0x7d9   :  { %3719 = vrot.lane.b32.xlu2 %v11063_v55, %s9589_s26 }
 0x7da   :  { %v3768_v46 = vpop.permute.xlu1 %3767 }
 0x7db   :  { %8736 = vmatmul.msk.bf16.vlgmr.msra.gmra.mxu2 %vm1297_vm1, %v3768_v46  ;;  %v14614_v46 = vld [vmem:[#allocation2_spill] sm:$0xff] }
 0x7dc   :  { %4183 = vmatpush.bf16.msra.mxu2 %v4174_v31  ;;  %v11255_v31 = vadd.f32 %v11109_v61, %v14614_v46 }
 0x7dd   :  { %2754 = vadd.xlane.f32.xlu1 %v2753_v47 }
 0x7df   :  { %v3522_v42 = vpop.f32.mrf.mxu1 }
 0x7e0   :  { %v2683_v42 = vsel %vm1297_vm1, %v11255_v31, 0.0 }
 0x7e3   :  { %v2667_v55 = vpop.xlane.xlu2 %2666 }
 0x7e4   :  { %v2710_v24 = vmul.f32 %v11164_v41, %v2667_v55 }
 0x7e5   :  { %2763 = vadd.xlane.f32.xlu1 %v2762_v45 }
 0x7e6   :  { %v11224_v29 = vsub.f32 %v11085_v39, %v2710_v24  ;;  %v2745_v39 = vmul.f32 %v11229_v38, %v11229_v38 }
 0x7e8   :  { %v2742_v11 = vmul.f32 %v11224_v29, %v11224_v29  ;;  %v2777_v44 = vsel %vm1297_vm1, %v2745_v39, 0.0 }
 0x7ea   :  { %v2768_v63 = vsel %vm1297_vm1, %v2742_v11, 0.0 }
 0x7eb   :  { %2769 = vadd.xlane.f32.xlu0 %v2768_v63  ;;  %v2670_v36 = vpop.xlane.xlu2 %2669  ;;  %v11232_v30 = vpop.f32.mrf.mxu1 }
 0x7ec   :  { %v2711_v56 = vmul.f32 %v11164_v41, %v2670_v36 }
 0x7ee   :  { %v11236_v52 = vsub.f32 %v11094_v40, %v2711_v56  ;;  %v11246_v28 = vpop.xlane.xlu0 %2681 }
 0x7f0   :  { %14613 = vst [vmem:[#allocation35_spill] sm:$0xff] %v11236_v52  ;;  %v2743_v50 = vmul.f32 %v11236_v52, %v11236_v52 }
 0x7f2   :  { %v2771_v16 = vsel %vm1297_vm1, %v2743_v50, 0.0 }
 0x7f3   :  { %2772 = vadd.xlane.f32.xlu1 %v2771_v16  ;;  %v2673_v25 = vpop.xlane.xlu2 %2672  ;;  %v3546_v14 = vpop.f32.mrf.mxu1  ;;  %2778 = vadd.xlane.f32.xlu0 %v2777_v44 }
 0x7fb   :  { %v3648_v40 = vpop.permute.xlu2 %3647  ;;  %v11248_v51 = vpop.f32.mrf.mxu1 }
 0x7fc   :  { %8731 = vmatmul.msk.bf16.vlgmr.msra.gmra.mxu3 %vm1297_vm1, %v3648_v40  ;;  %v4100_v40 = vsel %vm1985_vm2, %v11073_v26, 0 }
 0x7fd   :  { %3806 = vmatpush.bf16.xpose.msra.mxu3 %v3797_v34  ;;  %v14617_v34 = vld [vmem:[#allocation3_spill] sm:$0xff] }
 0x801   :  { %v3744_v47 = vpop.permute.xlu0 %3743 }
 0x802   :  { %2684 = vadd.xlane.f32.xlu2 %v2683_v42  ;;  %8735 = vmatmul.msk.bf16.vlgmr.msra.gmra.mxu1 %vm1297_vm1, %v3744_v47  ;;  %v2706_v47 = vmul.f32 %v11164_v41, %v11076_v5 }
 0x803   :  { %4146 = vmatpush.bf16.msra.mxu1 %v4137_v60  ;;  %v3570_v55 = vpop.f32.mrf.mxu1 }
 0x804   :  { %v11296_v55 = vsub.f32 %v10989_v13, %v2706_v47 }
 0x806   :  { %14618 = vst [vmem:[#allocation3_spill] sm:$0xff] %v11296_v55 }
 0x81a   :  { %3791 = vrot.lane.b32.xlu2 %v11146_v43, %s9589_s26 }
 0x820   :  { %v11264_v59 = vpop.f32.mrf.mxu1 }
 0x828   :  { %v3594_v61 = vpop.f32.mrf.mxu1 }
 0x829   :  { %v2709_v61 = vmul.f32 %v11164_v41, %v11128_v3  ;;  %v2712_v3 = vmul.f32 %v11164_v41, %v2673_v25 }
 0x82c   :  { %v2688_v35 = vpop.xlane.xlu0 %2687 }
 0x82d   :  { %v2717_v36 = vmul.f32 %v11164_v41, %v2688_v35 }
 0x82e   :  { %v11266_v24 = vpop.f32.mrf.mxu2 }
 0x82f   :  { %v11278_v50 = vsub.f32 %v11158_v12, %v2717_v36 }
 0x830   :  { %v11268_v45 = vpop.f32.mrf.mxu1 }
 0x831   :  { %14616 = vst [vmem:[#allocation36_spill] sm:$0xff] %v11278_v50  ;;  %v2749_v42 = vmul.f32 %v11278_v50, %v11278_v50 }
 0x833   :  { %v2789_v5 = vsel %vm1297_vm1, %v2749_v42, 0.0 }
 0x834   :  { %v2679_v11 = vpop.xlane.xlu2 %2678  ;;  %v2697_v44 = vpop.xlane.xlu0 %2696 }
 0x835   :  { %v2714_v63 = vmul.f32 %v11164_v41, %v2679_v11  ;;  %v2720_v12 = vmul.f32 %v11164_v41, %v2697_v44  ;;  %v2738_v11 = vmul.f32 %v11296_v55, %v11296_v55 }
 0x836   :  { %v3642_v22 = vpop.f32.mrf.mxu2 }
 0x837   :  { %v11273_v56 = vsub.f32 %v11168_v15, %v2714_v63  ;;  %v11286_v15 = vadd.f32 %v11144_v54, %v14617_v34  ;;  %v11301_v54 = vsub.f32 %v11171_v0, %v2720_v12  ;;  %v11313_v22 = vsub.f32 %v11014_v32, %v2709_v61 }
 0x838   :  { %v3618_v39 = vpop.f32.mrf.mxu1  ;;  %v2756_v0 = vsel %vm1297_vm1, %v2738_v11, 0.0  ;;  %v3815_v32 = vsel %vm1771_vm3, %v11142_v4, -inf }
 0x839   :  { %14615 = vst [vmem:[#allocation2_spill] sm:$0xff] %v11273_v56  ;;  %v2746_v43 = vmul.f32 %v11273_v56, %v11273_v56  ;;  %v2692_v26 = vsel %vm1297_vm1, %v11286_v15, 0.0  ;;  %v2752_v13 = vmul.f32 %v11301_v54, %v11301_v54 }
 0x83a   :  { %14619 = vst [vmem:[#allocation37_spill] sm:$0xff] %v11301_v54 }
 0x83b   :  { %v2780_v16 = vsel %vm1297_vm1, %v2746_v43, 0.0  ;;  %14620 = vst [vmem:[#allocation38_spill] sm:$0xff] %v11313_v22  ;;  %v2798_v36 = vsel %vm1297_vm1, %v2752_v13, 0.0  ;;  %v2741_v43 = vmul.f32 %v11313_v22, %v11313_v22 }
 0x83c   :  { %2781 = vadd.xlane.f32.xlu1 %v2780_v16  ;;  %v3720_v14 = vpop.permute.xlu2 %3719  ;;  %v11321_v16 = vsub.f32 %v11107_v53, %v2712_v3  ;;  %v11330_v25 = vpop.xlane.xlu0 %2760 }
 0x83d   :  { %8734 = vmatmul.msk.bf16.vlgmr.msrb.gmra.mxu3 %vm1297_vm1, %v3720_v14  ;;  %v2765_v44 = vsel %vm1297_vm1, %v2741_v43, 0.0  ;;  %v11324_v14 = vpop.permute.xlu1 %4538 }
 0x83e   :  { %4109 = vmatpush.bf16.msrb.mxu3 %v4100_v40  ;;  %v2715_v40 = vmul.f32 %v11164_v41, %v11246_v28  ;;  %v2744_v47 = vmul.f32 %v11321_v16, %v11321_v16 }
 0x840   :  { %v11293_v60 = vpop.f32.mrf.mxu1  ;;  %v11335_v53 = vsub.f32 %v11099_v18, %v2715_v40  ;;  %v2774_v12 = vsel %vm1297_vm1, %v2744_v47, 0.0 }
 0x842   :  { %14621 = vst [vmem:[#allocation39_spill] sm:$0xff] %v11335_v53  ;;  %v2747_v11 = vmul.f32 %v11335_v53, %v11335_v53 }
 0x843   :  { %2693 = vadd.xlane.f32.xlu2 %v2692_v26  ;;  %v3824_v26 = vsel %vm1771_vm3, %v11232_v30, -inf }
 0x844   :  { %2790 = vadd.xlane.f32.xlu1 %v2789_v5 }
 0x845   :  { %v2691_v42 = vpop.xlane.xlu1 %2690 }
 0x846   :  { %v11306_v35 = vpop.f32.mrf.mxu2  ;;  %v2718_v5 = vmul.f32 %v11164_v41, %v2691_v42 }
 0x848   :  { %v3690_v63 = vpop.f32.mrf.mxu1  ;;  %v11346_v18 = vsub.f32 %v11122_v37, %v2718_v5  ;;  %v3842_v37 = vsel %vm1771_vm3, %v11293_v60, -inf }
 0x849   :  { %v2783_v63 = vsel %vm1297_vm1, %v2747_v11, 0.0 }
 0x84a   :  { %14622 = vst [vmem:[#allocation40_spill] sm:$0xff] %v11346_v18  ;;  %v2750_v3 = vmul.f32 %v11346_v18, %v11346_v18 }
 0x84b   :  { %2757 = vadd.xlane.f32.xlu2 %v2756_v0  ;;  %v3833_v0 = vsel %vm1771_vm3, %v11268_v45, -inf }
 0x84c   :  { %2799 = vadd.xlane.f32.xlu1 %v2798_v36 }
 0x84e   :  { %v3714_v39 = vpop.f32.mrf.mxu2 }
 0x853   :  { %2766 = vadd.xlane.f32.xlu2 %v2765_v44 }
 0x854   :  { %3816 = vmax.xlane.f32.xlu1 %v3815_v32  ;;  %v2792_v32 = vsel %vm1297_vm1, %v2750_v3, 0.0 }
 0x85b   :  { %2775 = vadd.xlane.f32.xlu2 %v2774_v12 }
 0x85c   :  { %3825 = vmax.xlane.f32.xlu1 %v3824_v26  ;;  %v3818_v26 = vsel %vm1771_vm3, %v11174_v8, -inf }
 0x85e   :  { %v11341_v61 = vpop.f32.mrf.mxu2  ;;  %v2770_v28 = vpop.xlane.xlu0 %2769 }
 0x85f   :  { %v2806_v13 = vmul.f32 0.032258064, %v2770_v28 }
 0x861   :  { %9187 = vrsqrt.f32 %v2806_v13  ;;  %vm2901_vm5 = vcmp.eq.f32.partialorder %v2806_v13, inf  ;;  %v2904_v5 = vand.u32 2147483648, %v2806_v13  ;;  %vm2903_vm6 = vcmp.eq.f32.partialorder %v2806_v13, 0.0 }
 0x863   :  { %2784 = vadd.xlane.f32.xlu2 %v2783_v63 }
 0x864   :  { %3834 = vmax.xlane.f32.xlu1 %v3833_v0 }
 0x866   :  { %v3786_v36 = vpop.f32.mrf.mxu2 }
 0x867   :  { %v9188_v39 = vpop.eup %9187 }
 0x868   :  { %v2895_v43 = vmul.f32 %v9188_v39, %v2806_v13 }
 0x86a   :  { %v2896_v44 = vmul.f32 %v9188_v39, %v2895_v43 }
 0x86b   :  { %2793 = vadd.xlane.f32.xlu2 %v2792_v32 }
 0x86c   :  { %v2897_v40 = vmul.f32 0.5, %v2896_v44  ;;  %3843 = vmax.xlane.f32.xlu1 %v3842_v37  ;;  %v4211_v37 = vsel %vm1985_vm2, %v11119_v62, 0  ;;  %v3812_v62 = vsel %vm1771_vm3, %v11116_v57, -inf }
 0x86e   :  { %v2898_v47 = vsub.f32 1.5, %v2897_v40 }
 0x870   :  { %v2899_v12 = vmul.f32 %v9188_v39, %v2898_v47  ;;  %v3836_v39 = vsel %vm1771_vm3, %v11266_v24, -inf }
 0x872   :  { %v2900_v42 = vmul.f32 %v2899_v12, %v2806_v13 }
 0x873   :  { %3819 = vmax.xlane.f32.xlu2 %v3818_v26 }
 0x874   :  { %v2902_v28 = vsel %vm2901_vm5, %v2806_v13, %v2900_v42  ;;  %v3827_v42 = vsel %vm1771_vm3, %v11248_v51, -inf }
 0x875   :  { %v2905_v11 = vsel %vm2903_vm6, %v2904_v5, %v2902_v28  ;;  %v2685_v63 = vpop.xlane.xlu2 %2684 }
 0x876   :  { %v3031_v0 = vadd.f32 1e-06, %v2905_v11  ;;  %v2716_v36 = vmul.f32 %v11164_v41, %v2685_v63  ;;  %v11381_v11 = vld [vmem:[%s14548_s8 + $0x1] ss:$0 sm:$0xff] }
 0x878   :  { %9189 = vrcp.f32 %v3031_v0  ;;  %v11360_v3 = vsub.f32 %v11255_v31, %v2716_v36  ;;  %v3128_v26 = vand.u32 2147483648, %v3031_v0  ;;  %v3126_v28 = vand.u32 2147483647, %v3031_v0 }
 0x879   :  { %vm3122_vm8 = vweird.f32 %v3031_v0 }
 0x87a   :  { %v2748_v43 = vmul.f32 %v11360_v3, %v11360_v3  ;;  %v3129_v36 = vor.u32 1.1754944e-38, %v3128_v26  ;;  %vm3127_vm10 = vcmp.eq.f32.partialorder %v3126_v28, 8.507059e+37 }
 0x87b   :  { %3837 = vmax.xlane.f32.xlu2 %v3836_v39  ;;  %v2823_v39 = vmul.f32 %v11381_v11, %v11224_v29 }
 0x87c   :  { %v2786_v44 = vsel %vm1297_vm1, %v2748_v43, 0.0 }
 0x87d   :  { %v3792_v32 = vpop.permute.xlu2 %3791  ;;  %2787 = vadd.xlane.f32.xlu0 %v2786_v44 }
 0x87e   :  { %v9190_v13 = vpop.eup %9189  ;;  %8737 = vmatmul.msk.bf16.vlgmr.msra.gmra.mxu3 %vm1297_vm1, %v3792_v32 }
 0x87f   :  { %4220 = vmatpush.bf16.msra.mxu3 %v4211_v37  ;;  %v11370_v31 = vpop.f32.mrf.mxu3  ;;  %v11372_v40 = vpop.f32.mrf.mxu1  ;;  %v3118_v47 = vmul.f32 %v9190_v13, %v3031_v0  ;;  %vm3123_vm7 = vweird.f32 %v9190_v13  ;;  %v3854_v0 = vsel %vm1771_vm3, %v11341_v61, -inf }
 0x880   :  { %vm3124_vm9 = vmor %vm3122_vm8, %vm3123_vm7 }
 0x881   :  { %v3119_v12 = vsub.f32 1.0, %v3118_v47 }
 0x883   :  { %3828 = vmax.xlane.f32.xlu2 %v3827_v42  ;;  %v3120_v5 = vmul.f32 %v9190_v13, %v3119_v12  ;;  %v3845_v12 = vsel %vm1771_vm3, %v11306_v35, -inf  ;;  %v11389_v42 = vpop.permute.xlu1 %4575 }
 0x885   :  { %3813 = vmax.xlane.f32.xlu0 %v3812_v62  ;;  %v3121_v63 = vadd.f32 %v9190_v13, %v3120_v5 }
 0x887   :  { %v3666_v43 = vpop.f32.mrf.mxu3  ;;  %v3762_v44 = vpop.f32.mrf.mxu1  ;;  %v3125_v32 = vsel %vm3124_vm9, %v9190_v13, %v3121_v63 }
 0x888   :  { %v3130_v37 = vsel %vm3127_vm10, %v3129_v36, %v3125_v32 }
 0x889   :  { %v11385_v47 = vmul.f32 %v3130_v37, %v2823_v39 }
 0x88b   :  { %14623 = vst [vmem:[#allocation41_spill] sm:$0xff] %v11385_v47  ;;  %3846 = vmax.xlane.f32.xlu2 %v3845_v12  ;;  %v11393_v26 = vpop.xlane.xlu1 %2754  ;;  %v3821_v12 = vsel %vm1771_vm3, %v11201_v6, -inf }
 0x893   :  { %3855 = vmax.xlane.f32.xlu2 %v3854_v0  ;;  %v11395_v29 = vpop.xlane.xlu1 %2763 }
 0x894   :  { %14624 = vst [vmem:[#allocation42_spill] sm:$0xff] %v11395_v29 }
 0x89b   :  { %v11397_v5 = vpop.xlane.xlu1 %2772 }
 0x89c   :  { %14625 = vst [vmem:[#allocation43_spill] sm:$0xff] %v11397_v5 }
 0x8af   :  { %v11399_v13 = vpop.xlane.xlu1 %2781 }
 0x8b0   :  { %14626 = vst [vmem:[#allocation44_spill] sm:$0xff] %v11399_v13 }
 0x8b6   :  { %v2694_v28 = vpop.xlane.xlu2 %2693 }
 0x8b7   :  { %v2719_v62 = vmul.f32 %v11164_v41, %v2694_v28  ;;  %v11402_v63 = vpop.xlane.xlu1 %2790 }
 0x8b8   :  { %14627 = vst [vmem:[#allocation45_spill] sm:$0xff] %v11402_v63 }
 0x8b9   :  { %v11405_v36 = vsub.f32 %v11286_v15, %v2719_v62 }
 0x8bb   :  { %v2751_v39 = vmul.f32 %v11405_v36, %v11405_v36 }
 0x8bd   :  { %v2795_v43 = vsel %vm1297_vm1, %v2751_v39, 0.0  ;;  %v3839_v39 = vsel %vm1771_vm3, %v11370_v31, -inf }
 0x8be   :  { %v11410_v44 = vpop.xlane.xlu2 %2757  ;;  %2796 = vadd.xlane.f32.xlu0 %v2795_v43 }
 0x8bf   :  { %v11412_v32 = vpop.xlane.xlu1 %2799 }
 0x8c0   :  { %14628 = vst [vmem:[#allocation46_spill] sm:$0xff] %v11412_v32  ;;  %v11414_v37 = vpop.f32.mrf.mxu3 }
 0x8c6   :  { %v11418_v0 = vpop.xlane.xlu2 %2766  ;;  %3822 = vmax.xlane.f32.xlu0 %v3821_v12 }
 0x8c7   :  { %14629 = vst [vmem:[#allocation47_spill] sm:$0xff] %v11418_v0  ;;  %v3817_v15 = vpop.xlane.xlu1 %3816 }
 0x8c8   :  { %v3861_v28 = vsub.f32 %v11142_v4, %v3817_v15  ;;  %v3738_v62 = vpop.f32.mrf.mxu3  ;;  %v3830_v4 = vsel %vm1771_vm3, %v11264_v59, -inf }
 0x8ca   :  { %v3878_v54 = vmul.f32 1.442695, %v3861_v28 }
 0x8cc   :  { %9191 = vpow2.f32 %v3878_v54 }
 0x8ce   :  { %v2776_v43 = vpop.xlane.xlu2 %2775  ;;  %3840 = vmax.xlane.f32.xlu0 %v3839_v39 }
 0x8cf   :  { %v2808_v50 = vmul.f32 0.032258064, %v2776_v43  ;;  %v3826_v18 = vpop.xlane.xlu1 %3825 }
 0x8d0   :  { %v3864_v53 = vsub.f32 %v11232_v30, %v3826_v18 }
 0x8d1   :  { %9193 = vrsqrt.f32 %v2808_v50  ;;  %vm2925_vm11 = vcmp.eq.f32.partialorder %v2808_v50, inf  ;;  %vm2927_vm12 = vcmp.eq.f32.partialorder %v2808_v50, 0.0 }
 0x8d2   :  { %v11424_v32 = vpop.eup %9191  ;;  %v3884_v47 = vmul.f32 1.442695, %v3864_v53 }
 0x8d3   :  { %v3911_v12 = vsel %vm1771_vm3, %v11424_v32, 0.0 }
 0x8d4   :  { %9195 = vpow2.f32 %v3884_v47  ;;  %3912 = vadd.xlane.f32.xlu2 %v3911_v12  ;;  %v3848_v12 = vsel %vm1771_vm3, %v11414_v37, -inf }
 0x8d6   :  { %3831 = vmax.xlane.f32.xlu0 %v3830_v4  ;;  %v11431_v39 = vpop.xlane.xlu2 %2784 }
 0x8d7   :  { %v3835_v54 = vpop.xlane.xlu1 %3834  ;;  %v9194_v15 = vpop.eup %9193  ;;  %14630 = vst [vmem:[#allocation48_spill] sm:$0xff] %v11431_v39 }
 0x8d8   :  { %v3867_v28 = vsub.f32 %v11268_v45, %v3835_v54  ;;  %v2919_v62 = vmul.f32 %v9194_v15, %v2808_v50  ;;  %v11446_v39 = vpop.xlane.xlu0 %2778 }
 0x8d9   :  { %14632 = vst [vmem:[#allocation50_spill] sm:$0xff] %v11446_v39 }
 0x8da   :  { %v3890_v30 = vmul.f32 1.442695, %v3867_v28  ;;  %v11433_v18 = vpop.eup %9195  ;;  %v2920_v53 = vmul.f32 %v9194_v15, %v2919_v62 }
 0x8db   :  { %v3920_v47 = vsel %vm1771_vm3, %v11433_v18, 0.0 }
 0x8dc   :  { %9197 = vpow2.f32 %v3890_v30  ;;  %v2921_v43 = vmul.f32 0.5, %v2920_v53  ;;  %3921 = vadd.xlane.f32.xlu2 %v3920_v47  ;;  %v2928_v30 = vand.u32 2147483648, %v2808_v50 }
 0x8de   :  { %3849 = vmax.xlane.f32.xlu0 %v3848_v12  ;;  %v2922_v4 = vsub.f32 1.5, %v2921_v43  ;;  %v11444_v53 = vpop.xlane.xlu2 %2793 }
 0x8df   :  { %v3844_v56 = vpop.xlane.xlu1 %3843  ;;  %14631 = vst [vmem:[#allocation49_spill] sm:$0xff] %v11444_v53 }
 0x8e0   :  { %v3870_v45 = vsub.f32 %v11293_v60, %v3844_v56  ;;  %v2923_v54 = vmul.f32 %v9194_v15, %v2922_v4 }
 0x8e2   :  { %v11440_v38 = vpop.eup %9197  ;;  %v3896_v28 = vmul.f32 1.442695, %v3870_v45  ;;  %v2924_v63 = vmul.f32 %v2923_v54, %v2808_v50 }
 0x8e3   :  { %v3929_v62 = vsel %vm1771_vm3, %v11440_v38, 0.0 }
 0x8e4   :  { %9199 = vpow2.f32 %v3896_v28  ;;  %v2926_v47 = vsel %vm2925_vm11, %v2808_v50, %v2924_v63  ;;  %3930 = vadd.xlane.f32.xlu2 %v3929_v62 }
 0x8e5   :  { %v2929_v43 = vsel %vm2927_vm12, %v2928_v30, %v2926_v47  ;;  %v2825_v47 = vmul.f32 %v11381_v11, %v11321_v16 }
 0x8e6   :  { %v3033_v12 = vadd.f32 1e-06, %v2929_v43  ;;  %v3820_v15 = vpop.xlane.xlu2 %3819 }
 0x8e8   :  { %9201 = vrcp.f32 %v3033_v12  ;;  %v3158_v28 = vand.u32 2147483648, %v3033_v12  ;;  %v3156_v50 = vand.u32 2147483647, %v3033_v12  ;;  %vm3152_vm14 = vweird.f32 %v3033_v12 }
 0x8ea   :  { %v11448_v56 = vpop.eup %9199  ;;  %v3159_v30 = vor.u32 1.1754944e-38, %v3158_v28  ;;  %vm3157_vm0 = vcmp.eq.f32.partialorder %v3156_v50, 8.507059e+37 }
 0x8eb   :  { %v3938_v60 = vsel %vm1771_vm3, %v11448_v56, 0.0 }
 0x8ec   :  { %3939 = vadd.xlane.f32.xlu2 %v3938_v60  ;;  %v3862_v60 = vsub.f32 %v11174_v8, %v3820_v15 }
 0x8ee   :  { %v9202_v4 = vpop.eup %9201  ;;  %v3838_v43 = vpop.xlane.xlu2 %3837  ;;  %v3880_v5 = vmul.f32 1.442695, %v3862_v60 }
 0x8ef   :  { %v3148_v54 = vmul.f32 %v9202_v4, %v3033_v12  ;;  %vm3153_vm13 = vweird.f32 %v9202_v4  ;;  %v3868_v28 = vsub.f32 %v11266_v24, %v3838_v43 }
 0x8f0   :  { %v2788_v45 = vpop.xlane.xlu0 %2787  ;;  %vm3154_vm15 = vmor %vm3152_vm14, %vm3153_vm13 }
 0x8f1   :  { %v3149_v53 = vsub.f32 1.0, %v3148_v54  ;;  %v2812_v12 = vmul.f32 0.032258064, %v2788_v45 }
 0x8f3   :  { %v3150_v63 = vmul.f32 %v9202_v4, %v3149_v53  ;;  %vm2973_vm4 = vcmp.eq.f32.partialorder %v2812_v12, inf  ;;  %vm2975_vm5 = vcmp.eq.f32.partialorder %v2812_v12, 0.0 }
 0x8f5   :  { %v3151_v62 = vadd.f32 %v9202_v4, %v3150_v63 }
 0x8f6   :  { %v3829_v16 = vpop.xlane.xlu2 %3828 }
 0x8f7   :  { %v3155_v13 = vsel %vm3154_vm15, %v9202_v4, %v3151_v62  ;;  %v3865_v24 = vsub.f32 %v11248_v51, %v3829_v16  ;;  %v3851_v62 = vsel %vm1771_vm3, %v11372_v40, -inf }
 0x8f8   :  { %v3814_v52 = vpop.xlane.xlu0 %3813  ;;  %v3160_v54 = vsel %vm3157_vm0, %v3159_v30, %v3155_v13 }
 0x8f9   :  { %v3860_v22 = vsub.f32 %v11116_v57, %v3814_v52  ;;  %v11456_v39 = vmul.f32 %v3160_v54, %v2825_v47  ;;  %v3892_v52 = vmul.f32 1.442695, %v3868_v28  ;;  %v3886_v30 = vmul.f32 1.442695, %v3865_v24 }
 0x8fb   :  { %14633 = vst [vmem:[#allocation51_spill] sm:$0xff] %v11456_v39  ;;  %v3876_v53 = vmul.f32 1.442695, %v3860_v22 }
 0x8fd   :  { %9203 = vpow2.f32 %v3876_v53 }
 0x8fe   :  { %9205 = vpow2.f32 %v3880_v5  ;;  %v3847_v50 = vpop.xlane.xlu2 %3846 }
 0x8ff   :  { %9207 = vrsqrt.f32 %v2812_v12  ;;  %v3871_v60 = vsub.f32 %v11306_v35, %v3847_v50 }
 0x900   :  { %9209 = vpow2.f32 %v3892_v52 }
 0x901   :  { %v11459_v63 = vpop.f32.mrf.mxu3  ;;  %9211 = vpow2.f32 %v3886_v30  ;;  %v3898_v53 = vmul.f32 1.442695, %v3871_v60 }
 0x902   :  { %v3857_v4 = vsel %vm1771_vm3, %v11459_v63, -inf }
 0x903   :  { %v11463_v8 = vpop.eup %9203  ;;  %3858 = vmax.xlane.f32.xlu0 %v3857_v4  ;;  %9213 = vpow2.f32 %v3898_v53 }
 0x904   :  { %v3908_v57 = vsel %vm1771_vm3, %v11463_v8, 0.0  ;;  %v11467_v22 = vpop.eup %9205 }
 0x905   :  { %3909 = vadd.xlane.f32.xlu1 %v3908_v57  ;;  %v9208_v5 = vpop.eup %9207  ;;  %v3914_v15 = vsel %vm1771_vm3, %v11467_v22, 0.0 }
 0x906   :  { %v2967_v45 = vmul.f32 %v9208_v5, %v2812_v12  ;;  %v11474_v47 = vpop.eup %9209  ;;  %v3856_v28 = vpop.xlane.xlu2 %3855 }
 0x907   :  { %v3932_v51 = vsel %vm1771_vm3, %v11474_v47, 0.0  ;;  %v11479_v16 = vpop.eup %9211  ;;  %v3874_v57 = vsub.f32 %v11341_v61, %v3856_v28 }
 0x908   :  { %v2968_v43 = vmul.f32 %v9208_v5, %v2967_v45  ;;  %v3923_v52 = vsel %vm1771_vm3, %v11479_v16, 0.0 }
 0x909   :  { %v3810_v13 = vpop.f32.mrf.mxu3  ;;  %v11484_v35 = vpop.eup %9213 }
 0x90a   :  { %v2969_v54 = vmul.f32 0.5, %v2968_v43  ;;  %v3904_v13 = vmul.f32 1.442695, %v3874_v57  ;;  %v3941_v45 = vsel %vm1771_vm3, %v11484_v35, 0.0 }
 0x90b   :  { %3915 = vadd.xlane.f32.xlu0 %v3914_v15 }
 0x90c   :  { %v2970_v4 = vsub.f32 1.5, %v2969_v54  ;;  %9215 = vpow2.f32 %v3904_v13 }
 0x90d   :  { %3852 = vmax.xlane.f32.xlu1 %v3851_v62  ;;  %v2976_v62 = vand.u32 2147483648, %v2812_v12 }
 0x90e   :  { %v2971_v24 = vmul.f32 %v9208_v5, %v2970_v4 }
 0x910   :  { %v2972_v15 = vmul.f32 %v2971_v24, %v2812_v12 }
 0x912   :  { %v2974_v50 = vsel %vm2973_vm4, %v2812_v12, %v2972_v15  ;;  %v11488_v61 = vpop.eup %9215 }
 0x913   :  { %3933 = vadd.xlane.f32.xlu0 %v3932_v51  ;;  %v2977_v30 = vsel %vm2975_vm5, %v2976_v62, %v2974_v50  ;;  %v3950_v5 = vsel %vm1771_vm3, %v11488_v61, 0.0 }
 0x914   :  { %v3037_v43 = vadd.f32 1e-06, %v2977_v30 }
 0x916   :  { %9217 = vrcp.f32 %v3037_v43  ;;  %v3218_v4 = vand.u32 2147483648, %v3037_v43  ;;  %v3216_v12 = vand.u32 2147483647, %v3037_v43  ;;  %vm3212_vm7 = vweird.f32 %v3037_v43 }
 0x918   :  { %v3219_v15 = vor.u32 1.1754944e-38, %v3218_v4  ;;  %vm3217_vm9 = vcmp.eq.f32.partialorder %v3216_v12, 8.507059e+37 }
 0x91b   :  { %3924 = vadd.xlane.f32.xlu0 %v3923_v52 }
 0x91c   :  { %v9218_v51 = vpop.eup %9217 }
 0x91d   :  { %v3208_v54 = vmul.f32 %v9218_v51, %v3037_v43  ;;  %vm3213_vm6 = vweird.f32 %v9218_v51 }
 0x91e   :  { %vm3214_vm8 = vmor %vm3212_vm7, %vm3213_vm6 }
 0x91f   :  { %v3209_v53 = vsub.f32 1.0, %v3208_v54 }
 0x921   :  { %v3210_v52 = vmul.f32 %v9218_v51, %v3209_v53 }
 0x923   :  { %3942 = vadd.xlane.f32.xlu0 %v3941_v45  ;;  %v3211_v13 = vadd.f32 %v9218_v51, %v3210_v52  ;;  %v2829_v45 = vmul.f32 %v11381_v11, %v11360_v3 }
 0x925   :  { %v3215_v50 = vsel %vm3214_vm8, %v9218_v51, %v3211_v13 }
 0x926   :  { %v3220_v30 = vsel %vm3217_vm9, %v3219_v15, %v3215_v50 }
 0x92b   :  { %3951 = vadd.xlane.f32.xlu0 %v3950_v5  ;;  %v11495_v5 = vmul.f32 %v3220_v30, %v2829_v45 }
 0x92d   :  { %14634 = vst [vmem:[#allocation52_spill] sm:$0xff] %v11495_v5 }
 0x931   :  { %v2797_v60 = vpop.xlane.xlu0 %2796 }
 0x932   :  { %v2815_v62 = vmul.f32 0.032258064, %v2797_v60 }
 0x934   :  { %vm3009_vm10 = vcmp.eq.f32.partialorder %v2815_v62, inf  ;;  %vm3011_vm11 = vcmp.eq.f32.partialorder %v2815_v62, 0.0 }
 0x939   :  { %v3823_v28 = vpop.xlane.xlu0 %3822 }
 0x93a   :  { %v3863_v57 = vsub.f32 %v11201_v6, %v3823_v28 }
 0x93c   :  { %v3882_v24 = vmul.f32 1.442695, %v3863_v57 }
 0x93e   :  { %9219 = vpow2.f32 %v3882_v24 }
 0x93f   :  { %9221 = vrsqrt.f32 %v2815_v62 }
 0x941   :  { %v3841_v54 = vpop.xlane.xlu0 %3840 }
 0x942   :  { %v3869_v6 = vsub.f32 %v11370_v31, %v3841_v54 }
 0x944   :  { %v11498_v53 = vpop.eup %9219  ;;  %v3894_v28 = vmul.f32 1.442695, %v3869_v6 }
 0x945   :  { %v3917_v43 = vsel %vm1771_vm3, %v11498_v53, 0.0  ;;  %v9222_v3 = vpop.eup %9221 }
 0x946   :  { %9223 = vpow2.f32 %v3894_v28  ;;  %3918 = vadd.xlane.f32.xlu1 %v3917_v43  ;;  %v3003_v57 = vmul.f32 %v9222_v3, %v2815_v62 }
 0x948   :  { %v3004_v12 = vmul.f32 %v9222_v3, %v3003_v57 }
 0x949   :  { %v3832_v4 = vpop.xlane.xlu0 %3831 }
 0x94a   :  { %v3866_v51 = vsub.f32 %v11264_v59, %v3832_v4  ;;  %v3005_v45 = vmul.f32 0.5, %v3004_v12  ;;  %v3012_v4 = vand.u32 2147483648, %v2815_v62 }
 0x94c   :  { %v11503_v60 = vpop.eup %9223  ;;  %v3888_v52 = vmul.f32 1.442695, %v3866_v51  ;;  %v3006_v30 = vsub.f32 1.5, %v3005_v45 }
 0x94d   :  { %v3935_v31 = vsel %vm1771_vm3, %v11503_v60, 0.0 }
 0x94e   :  { %9225 = vpow2.f32 %v3888_v52  ;;  %3936 = vadd.xlane.f32.xlu1 %v3935_v31  ;;  %v3007_v6 = vmul.f32 %v9222_v3, %v3006_v30  ;;  %v3913_v52 = vpop.xlane.xlu2 %3912 }
 0x950   :  { %v3008_v43 = vmul.f32 %v3007_v6, %v2815_v62 }
 0x951   :  { %v3850_v24 = vpop.xlane.xlu0 %3849 }
 0x952   :  { %v3872_v13 = vsub.f32 %v11414_v37, %v3850_v24  ;;  %v3010_v37 = vsel %vm3009_vm10, %v2815_v62, %v3008_v43 }
 0x953   :  { %v3013_v51 = vsel %vm3011_vm11, %v3012_v4, %v3010_v37 }
 0x954   :  { %v11508_v15 = vpop.eup %9225  ;;  %v3900_v50 = vmul.f32 1.442695, %v3872_v13  ;;  %v3040_v57 = vadd.f32 1e-06, %v3013_v51 }
 0x955   :  { %v3926_v59 = vsel %vm1771_vm3, %v11508_v15, 0.0 }
 0x956   :  { %9227 = vpow2.f32 %v3900_v50  ;;  %3927 = vadd.xlane.f32.xlu1 %v3926_v59  ;;  %v3263_v59 = vand.u32 2147483648, %v3040_v57  ;;  %v3261_v62 = vand.u32 2147483647, %v3040_v57  ;;  %vm3257_vm13 = vweird.f32 %v3040_v57 }
 0x957   :  { %9229 = vrcp.f32 %v3040_v57 }
 0x958   :  { %9231 = vrcp.f32 %v3913_v52  ;;  %v3264_v37 = vor.u32 1.1754944e-38, %v3263_v59  ;;  %vm3262_vm15 = vcmp.eq.f32.partialorder %v3261_v62, 8.507059e+37  ;;  %v3922_v62 = vpop.xlane.xlu2 %3921 }
 0x95c   :  { %v11512_v54 = vpop.eup %9227 }
 0x95d   :  { %v3944_v28 = vsel %vm1771_vm3, %v11512_v54, 0.0  ;;  %v9230_v31 = vpop.eup %9229 }
 0x95e   :  { %3945 = vadd.xlane.f32.xlu1 %v3944_v28  ;;  %v3253_v13 = vmul.f32 %v9230_v31, %v3040_v57  ;;  %v9232_v30 = vpop.eup %9231  ;;  %vm3258_vm12 = vweird.f32 %v9230_v31 }
 0x95f   :  { %v3973_v43 = vmul.f32 %v9232_v30, %v11424_v32  ;;  %vm3259_vm14 = vmor %vm3257_vm13, %vm3258_vm12 }
 0x960   :  { %v3254_v50 = vsub.f32 1.0, %v3253_v13 }
 0x962   :  { %v3255_v6 = vmul.f32 %v9230_v31, %v3254_v50 }
 0x964   :  { %v3256_v28 = vadd.f32 %v9230_v31, %v3255_v6 }
 0x966   :  { %v3260_v51 = vsel %vm3259_vm14, %v9230_v31, %v3256_v28 }
 0x976   :  { %v3859_v12 = vpop.xlane.xlu0 %3858 }
 0x977   :  { %v3875_v24 = vsub.f32 %v11459_v63, %v3859_v12  ;;  %v2832_v63 = vmul.f32 %v11381_v11, %v11405_v36  ;;  %v3265_v12 = vsel %vm3262_vm15, %v3264_v37, %v3260_v51 }
 0x978   :  { %v3910_v3 = vpop.xlane.xlu1 %3909 }
 0x979   :  { %v3906_v45 = vmul.f32 1.442695, %v3875_v24  ;;  %9233 = vrcp.f32 %v3910_v3  ;;  %v11521_v13 = vmul.f32 %v3265_v12, %v2832_v63  ;;  %v3989_v3 = vpack.c.bf16 %v3973_v43, %v3973_v43 }
 0x97b   :  { %9235 = vpow2.f32 %v3906_v45  ;;  %14635 = vst [vmem:[#allocation53_spill] sm:$0xff] %v11521_v13 }
 0x97e   :  { %v3916_v32 = vpop.xlane.xlu0 %3915 }
 0x97f   :  { %v9234_v4 = vpop.eup %9233 }
 0x980   :  { %v3972_v52 = vmul.f32 %v9234_v4, %v11463_v8  ;;  %v3853_v11 = vpop.xlane.xlu1 %3852 }
 0x981   :  { %v9236_v24 = vpop.eup %9235 }
 0x982   :  { %v3988_v45 = vpack.c.bf16 %v3972_v52, %v3972_v52  ;;  %v3953_v57 = vsel %vm1771_vm3, %v9236_v24, 0.0 }
 0x983   :  { %3954 = vadd.xlane.f32.xlu1 %v3953_v57 }
 0x984   :  { %8935 = vxpose.binary.xlu2.c.b16.start.end [1/2] (short) (narrow) %v3989_v3, %v3988_v45, 16  ;;  %v3931_v3 = vpop.xlane.xlu2 %3930 }
 0x986   :  { %v3934_v50 = vpop.xlane.xlu0 %3933 }
 0x987   :  { %9237 = vrcp.f32 %v3934_v50 }
 0x98d   :  { %v9238_v36 = vpop.eup %9237 }
 0x98e   :  { %v3925_v59 = vpop.xlane.xlu0 %3924  ;;  %v3980_v8 = vmul.f32 %v9238_v36, %v11474_v47 }
 0x990   :  { %v3996_v43 = vpack.c.bf16 %v3980_v8, %v3980_v8 }
 0x996   :  { %v3943_v30 = vpop.xlane.xlu0 %3942 }
 0x997   :  { %9239 = vrcp.f32 %v3943_v30 }
 0x998   :  { %9241 = vrcp.f32 %v3916_v32 }
 0x99d   :  { %v9240_v31 = vpop.eup %9239 }
 0x99e   :  { %v3983_v6 = vmul.f32 %v9240_v31, %v11484_v35  ;;  %v9242_v4 = vpop.eup %9241 }
 0x99f   :  { %v3974_v63 = vmul.f32 %v9242_v4, %v11467_v22  ;;  %v3873_v22 = vsub.f32 %v11372_v40, %v3853_v11 }
 0x9a0   :  { %v3999_v37 = vpack.c.bf16 %v3983_v6, %v3983_v6 }
 0x9a1   :  { %v3990_v45 = vpack.c.bf16 %v3974_v63, %v3974_v63 }
 0x9b9   :  { %v3919_v28 = vpop.xlane.xlu1 %3918 }
 0x9ba   :  { %9243 = vrcp.f32 %v3919_v28 }
 0x9bb   :  { %9245 = vrcp.f32 %v3931_v3 }
 0x9bd   :  { %8944 = vxpose.binary.xlu1.c.b16.start.end [1/2] (short) (narrow) %v3999_v37, %v3996_v43, 16 }
 0x9c0   :  { %v9244_v51 = vpop.eup %9243 }
 0x9c1   :  { %v3975_v52 = vmul.f32 %v9244_v51, %v11498_v53  ;;  %v3937_v12 = vpop.xlane.xlu1 %3936  ;;  %v9246_v35 = vpop.eup %9245  ;;  %v3902_v53 = vmul.f32 1.442695, %v3873_v22 }
 0x9c2   :  { %v3979_v32 = vmul.f32 %v9246_v35, %v11440_v38  ;;  %v3952_v35 = vpop.xlane.xlu0 %3951 }
 0x9c3   :  { %v3991_v57 = vpack.c.bf16 %v3975_v52, %v3975_v52 }
 0x9c4   :  { %v3995_v31 = vpack.c.bf16 %v3979_v32, %v3979_v32  ;;  %v4248_v32 = vsel %vm1985_vm2, %v11211_v19, 0 }
 0x9c5   :  { %8938 = vxpose.binary.xlu0.c.b16.start.end [1/2] (short) (narrow) %v3991_v57, %v3990_v45, 16 }
 0x9c9   :  { %v3928_v47 = vpop.xlane.xlu1 %3927 }
 0x9ca   :  { %9247 = vrcp.f32 %v3928_v47  ;;  %v3940_v47 = vpop.xlane.xlu2 %3939 }
 0x9cb   :  { %9249 = vpow2.f32 %v3902_v53 }
 0x9d0   :  { %v9248_v50 = vpop.eup %9247 }
 0x9d1   :  { %v3978_v30 = vmul.f32 %v9248_v50, %v11508_v15  ;;  %v3946_v8 = vpop.xlane.xlu1 %3945  ;;  %v9250_v6 = vpop.eup %9249  ;;  %v4285_v50 = vsel %vm1985_vm2, %v11132_v1, 0 }
 0x9d2   :  { %9251 = vrcp.f32 %v3946_v8  ;;  %v3947_v28 = vsel %vm1771_vm3, %v9250_v6, 0.0 }
 0x9d3   :  { %v3994_v36 = vpack.c.bf16 %v3978_v30, %v3978_v30 }
 0x9d5   :  { %8947 = vxpose.binary.xlu0.c.b16.start.end [1/2] (short) (narrow) %v3995_v31, %v3994_v36, 16 }
 0x9d8   :  { %v9252_v37 = vpop.eup %9251 }
 0x9d9   :  { %v3984_v38 = vmul.f32 %v9252_v37, %v11512_v54 }
 0x9db   :  { %v4000_v63 = vpack.c.bf16 %v3984_v38, %v3984_v38 }
 0x9f5   :  { %3948 = vadd.xlane.f32.xlu2 %v3947_v28 }
 0x9f6   :  { %v3955_v43 = vpop.xlane.xlu1 %3954 }
 0x9f7   :  { %9253 = vrcp.f32 %v3955_v43  ;;  %v4359_v43 = vsel %vm1985_vm2, %v11148_v33, 0 }
 0x9f8   :  { %9255 = vrcp.f32 %v3922_v62 }
 0x9f9   :  { %9257 = vrcp.f32 %v3925_v59 }
 0x9fa   :  { %9259 = vrcp.f32 %v3952_v35  ;;  %v14636_v35 = vld [vmem:[#allocation5_spill] sm:$0xff] }
 0x9fb   :  { %9261 = vrcp.f32 %v3937_v12 }
 0x9fc   :  { %9263 = vrcp.f32 %v3940_v47  ;;  %v9574_v47 = vld [vmem:[%s14550_s2 + $0x8] sm:$0xff] }
 0x9fd   :  { %v9254_v4 = vpop.eup %9253 }
 0x9fe   :  { %v3987_v15 = vmul.f32 %v9254_v4, %v9236_v24  ;;  %v9256_v40 = vpop.eup %9255 }
 0x9ff   :  { %v9258_v11 = vpop.eup %9257  ;;  %v3976_v52 = vmul.f32 %v9256_v40, %v11433_v18  ;;  %v4433_v40 = vsel %vm1985_vm2, %v11242_v20, 0  ;;  %v4581_v20 = vsel %vm1985_vm2, %v11389_v42, 0 }
 0xa00   :  { %v4003_v51 = vpack.c.bf16 %v3987_v15, %v3987_v15  ;;  %v3977_v3 = vmul.f32 %v9258_v11, %v11479_v16  ;;  %v9260_v24 = vpop.eup %9259  ;;  %v4507_v11 = vsel %vm1985_vm2, %v11196_v7, 0 }
 0xa01   :  { %v3992_v45 = vpack.c.bf16 %v3976_v52, %v3976_v52  ;;  %v9262_v59 = vpop.eup %9261  ;;  %v3986_v16 = vmul.f32 %v9260_v24, %v11488_v61  ;;  %v4322_v61 = vsel %vm1985_vm2, %v11150_v48, 0  ;;  %v14637_v24 = vld [vmem:[#allocation9_spill] sm:$0xff] }
 0xa02   :  { %8953 = vxpose.binary.xlu1.c.b16.start.end [1/2] (short) (narrow) %v4003_v51, %v4000_v63, 16  ;;  %v3993_v57 = vpack.c.bf16 %v3977_v3, %v3977_v3  ;;  %v3981_v18 = vmul.f32 %v9262_v59, %v11503_v60  ;;  %v9264_v36 = vpop.eup %9263  ;;  %v4396_v63 = vsel %vm1985_vm2, %v11162_v21, 0  ;;  %v4544_v3 = vsel %vm1985_vm2, %v11324_v14, 0  ;;  %v9575_v14 = vld [vmem:[%s14550_s2] sm:$0xff] }
 0xa03   :  { %v4002_v30 = vpack.c.bf16 %v3986_v16, %v3986_v16  ;;  %v3982_v31 = vmul.f32 %v9264_v36, %v11448_v56 }
 0xa04   :  { %v3997_v12 = vpack.c.bf16 %v3981_v18, %v3981_v18 }
 0xa05   :  { %v3998_v1 = vpack.c.bf16 %v3982_v31, %v3982_v31  ;;  %v14639_v31 = vld [vmem:[#allocation13_spill] sm:$0xff] }
 0xa1e   :  { %8941 = vxpose.binary.xlu2.c.b16.start.end [1/2] (short) (narrow) %v3993_v57, %v3992_v45, 16 }
 0xa25   :  { %v8936_v54 = vpop.trf.xlu2 }
 0xa26   :  { %8738 = vmatmul.msk.bf16.vlgmr.msrb.gmra.mxu1 %vm1771_vm3, %v8936_v54 }
 0xa27   :  { %4257 = vmatpush.bf16.msrb.mxu1 %v4248_v32 }
 0xa2d   :  { %v8937_v62 = vpop.trf.xlu2 }
 0xa2e   :  { %8739 = vmatmul.msk.bf16.vlgmr.msrb.gmra.mxu2 %vm1771_vm3, %v8937_v62  ;;  %v9576_v62 = vld [vmem:[%s14551_s3 + $0x8] sm:$0xff] }
 0xa2f   :  { %4294 = vmatpush.bf16.msrb.mxu2 %v4285_v50  ;;  %v9577_v50 = vld [vmem:[%s14551_s3] sm:$0xff] }
 0xa30   :  { %8950 = vxpose.binary.xlu2.c.b16.start.end [1/2] (short) (narrow) %v3997_v12, %v4002_v30, 16  ;;  %v14638_v12 = vld [vmem:[#allocation11_spill] sm:$0xff] }
 0xa68   :  { %v3949_v19 = vpop.xlane.xlu2 %3948 }
 0xa69   :  { %9265 = vrcp.f32 %v3949_v19  ;;  %v8945_v21 = vpop.trf.xlu1 }
 0xa6f   :  { %v9266_v22 = vpop.eup %9265 }
 0xa70   :  { %v3985_v60 = vmul.f32 %v9266_v22, %v9250_v6  ;;  %v4470_v6 = vsel %vm1985_vm2, %v11192_v23, 0 }
 0xa71   :  { %v8939_v53 = vpop.trf.xlu0  ;;  %v8946_v57 = vpop.trf.xlu1 }
 0xa72   :  { %8740 = vmatmul.msk.bf16.vlgmr.msrb.gmra.mxu3 %vm1771_vm3, %v8939_v53  ;;  %v4001_v8 = vpack.c.bf16 %v3985_v60, %v3985_v60  ;;  %v14640_v60 = vld [vmem:[#allocation15_spill] sm:$0xff] }
 0xa73   :  { %4331 = vmatpush.bf16.msrb.mxu3 %v4322_v61 }
 0xa74   :  { %8956 = vxpose.binary.xlu0.c.b16.start.end [1/2] (short) (narrow) %v4001_v8, %v3998_v1, 16 }
 0xa79   :  { %v8940_v28 = vpop.trf.xlu0 }
 0xa7a   :  { %8741 = vmatmul.msk.bf16.vlgmr.msra.gmra.mxu1 %vm1771_vm3, %v8940_v28 }
 0xa7b   :  { %4368 = vmatpush.bf16.msra.mxu1 %v4359_v43 }
 0xa81   :  { %v8948_v56 = vpop.trf.xlu0 }
 0xa89   :  { %v8949_v23 = vpop.trf.xlu0 }
 0xa8a   :  { %8744 = vmatmul.msk.bf16.vlgmr.msrb.gmra.mxu1 %vm1771_vm3, %v8948_v56  ;;  %v14641_v56 = vld [vmem:[#allocation6_spill] sm:$0xff] }
 0xa8b   :  { %4479 = vmatpush.bf16.msrb.mxu1 %v4470_v6 }
 0xaa3   :  { %v4037_v48 = vpop.f32.mrf.mxu1 }
 0xaab   :  { %v4039_v38 = vpop.f32.mrf.mxu1 }
 0xaae   :  { %v8954_v7 = vpop.trf.xlu1 }
 0xab1   :  { %v4074_v37 = vpop.f32.mrf.mxu2 }
 0xab2   :  { %v4596_v4 = vpack.c.bf16 %v4074_v37, %v4037_v48 }
 0xab6   :  { %v8955_v42 = vpop.trf.xlu1 }
 0xab9   :  { %v4076_v33 = vpop.f32.mrf.mxu2 }
 0xabf   :  { %v8942_v15 = vpop.trf.xlu2 }
 0xac0   :  { %8742 = vmatmul.msk.bf16.vlgmr.msra.gmra.mxu2 %vm1771_vm3, %v8942_v15 }
 0xac1   :  { %4405 = vmatpush.bf16.msra.mxu2 %v4396_v63  ;;  %v14642_v63 = vld [vmem:[#allocation18_spill] sm:$0xff] }
 0xac7   :  { %v8943_v51 = vpop.trf.xlu2 }
 0xac8   :  { %8743 = vmatmul.msk.bf16.vlgmr.msra.gmra.mxu3 %vm1771_vm3, %v8943_v51 }
 0xac9   :  { %4442 = vmatpush.bf16.msra.mxu3 %v4433_v40 }
 0xad0   :  { %8745 = vmatmul.msk.bf16.vlgmr.msrb.gmra.mxu2 %vm1771_vm3, %v8949_v23 }
 0xad1   :  { %v8951_v52 = vpop.trf.xlu2  ;;  %4516 = vmatpush.bf16.msrb.mxu2 %v4507_v11 }
 0xad8   :  { %8746 = vmatmul.msk.bf16.vlgmr.msrb.gmra.mxu3 %vm1771_vm3, %v8945_v21 }
 0xad9   :  { %v8952_v45 = vpop.trf.xlu2  ;;  %4553 = vmatpush.bf16.msrb.mxu3 %v4544_v3 }
 0xada   :  { %8747 = vmatmul.msk.bf16.vlgmr.msra.gmra.mxu1 %vm1771_vm3, %v8952_v45 }
 0xadb   :  { %4590 = vmatpush.bf16.msra.mxu1 %v4581_v20 }
 0xae8   :  { %8749 = vmatmul.msk.bf16.vlgmr.msra.gmra.mxu3 %vm1771_vm3, %v8946_v57 }
 0xae9   :  { %5443 = vmatpush.bf16.msra.mxu3 %v9574_v47 }
 0xaea   :  { %8750 = vmatmul.msk.bf16.vlgmr.msrb.gmra.mxu1 %vm1771_vm3, %v8954_v7 }
 0xaed   :  { %5444 = vmatpush.bf16.msra.mxu3 %v9575_v14 }
 0xaf5   :  { %v4111_v54 = vpop.f32.mrf.mxu3 }
 0xaf7   :  { %v4148_v32 = vpop.f32.mrf.mxu1 }
 0xaf8   :  { %8752 = vmatmul.msk.bf16.vlgmr.msrb.gmra.mxu3 %vm1771_vm3, %v8951_v52  ;;  %v4597_v1 = vpack.c.bf16 %v4148_v32, %v4111_v54  ;;  %v14643_v52 = vld [vmem:[#allocation16_spill] sm:$0xff] }
 0xafa   :  { %8753 = vmatmul.msk.bf16.vlgmr.msra.gmra.mxu1 %vm1771_vm3, %v8955_v42 }
 0xafd   :  { %v4113_v59 = vpop.f32.mrf.mxu3 }
 0xaff   :  { %v4150_v16 = vpop.f32.mrf.mxu1 }
 0xb07   :  { %v4259_v30 = vpop.f32.mrf.mxu1 }
 0xb08   :  { %8762 = vmatmul.msk.bf16.vlgmr.msra.gmra.mxu3 %vm1297_vm1, %v14636_v35 }
 0xb0f   :  { %v4261_v36 = vpop.f32.mrf.mxu1 }
 0xb18   :  { %8763 = vmatmul.msk.bf16.gmra.mxu3 %vm1297_vm1, %v14637_v24 }
 0xb20   :  { %v8957_v18 = vpop.trf.xlu0 }
 0xb21   :  { %8748 = vmatmul.msk.bf16.vlgmr.msra.gmra.mxu2 %vm1771_vm3, %v8957_v18 }
 0xb22   :  { %4698 = vmatpush.bf16.msra.mxu2 %v9576_v62 }
 0xb26   :  { %4699 = vmatpush.bf16.msra.mxu2 %v9577_v50 }
 0xb28   :  { %8764 = vmatmul.msk.bf16.gmra.mxu3 %vm1297_vm1, %v14638_v12  ;;  %v8958_v19 = vpop.trf.xlu0 }
 0xb31   :  { %8751 = vmatmul.msk.bf16.vlgmr.msrb.gmra.mxu2 %vm1771_vm3, %v8958_v19 }
 0xb38   :  { %8765 = vmatmul.msk.bf16.gmra.mxu3 %vm1297_vm1, %v14639_v31 }
 0xb41   :  { %8754 = vmatmul.msk.bf16.vlgmr.msra.gmra.mxu2 %vm1297_vm1, %v4596_v4 }
 0xb43   :  { %v4185_v22 = vpop.f32.mrf.mxu2 }
 0xb48   :  { %8766 = vmatmul.msk.bf16.gmra.mxu3 %vm1297_vm1, %v14640_v60 }
 0xb4b   :  { %v4187_v53 = vpop.f32.mrf.mxu2  ;;  %v4222_v61 = vpop.f32.mrf.mxu3 }
 0xb4c   :  { %v4598_v37 = vpack.c.bf16 %v4222_v61, %v4185_v22 }
 0xb51   :  { %8755 = vmatmul.msk.bf16.gmra.mxu2 %vm1297_vm1, %v4597_v1 }
 0xb53   :  { %v4224_v8 = vpop.f32.mrf.mxu3  ;;  %v4296_v28 = vpop.f32.mrf.mxu2 }
 0xb54   :  { %v4599_v51 = vpack.c.bf16 %v4296_v28, %v4259_v30 }
 0xb57   :  { %v4370_v43 = vpop.f32.mrf.mxu1 }
 0xb58   :  { %8767 = vmatmul.msk.bf16.gmra.mxu3 %vm1297_vm1, %v14641_v56 }
 0xb5b   :  { %v4333_v6 = vpop.f32.mrf.mxu3  ;;  %v4298_v48 = vpop.f32.mrf.mxu2 }
 0xb5c   :  { %v4600_v45 = vpack.c.bf16 %v4370_v43, %v4333_v6 }
 0xb5f   :  { %v4372_v38 = vpop.f32.mrf.mxu1 }
 0xb60   :  { %v14644_v38 = vld [vmem:[#allocation21_spill] sm:$0xff] }
 0xb61   :  { %8756 = vmatmul.msk.bf16.gmra.mxu2 %vm1297_vm1, %v4598_v37 }
 0xb63   :  { %v4335_v4 = vpop.f32.mrf.mxu3 }
 0xb67   :  { %v4481_v15 = vpop.f32.mrf.mxu1 }
 0xb68   :  { %8768 = vmatmul.msk.bf16.gmra.mxu3 %vm1297_vm1, %v14642_v63 }
 0xb6b   :  { %v4444_v33 = vpop.f32.mrf.mxu3 }
 0xb6f   :  { %v4483_v40 = vpop.f32.mrf.mxu1 }
 0xb71   :  { %8757 = vmatmul.msk.bf16.gmra.mxu2 %vm1297_vm1, %v4599_v51  ;;  %v14645_v51 = vld [vmem:[#allocation7_spill] sm:$0xff] }
 0xb73   :  { %v4446_v23 = vpop.f32.mrf.mxu3 }
 0xb77   :  { %v4592_v11 = vpop.f32.mrf.mxu1 }
 0xb78   :  { %8769 = vmatmul.msk.bf16.gmra.mxu3 %vm1297_vm1, %v14643_v52 }
 0xb7b   :  { %v4555_v21 = vpop.f32.mrf.mxu3 }
 0xb7c   :  { %v4603_v3 = vpack.c.bf16 %v4592_v11, %v4555_v21  ;;  %v14646_v21 = vld [vmem:[#allocation12_spill] sm:$0xff] }
 0xb7f   :  { %v4594_v20 = vpop.f32.mrf.mxu1 }
 0xb81   :  { %8758 = vmatmul.msk.bf16.gmra.mxu2 %vm1297_vm1, %v4600_v45 }
 0xb83   :  { %v4557_v57 = vpop.f32.mrf.mxu3 }
 0xb8b   :  { %v5446_v7 = vpop.f32.mrf.mxu3 }
 0xb8c   :  { %v5486_v47 = vpack.c.bf16 %v5446_v7, %v5446_v7 }
 0xb8e   :  { %v5503_v14 = vunpack.c.l.b16 %v5486_v47  ;;  %v5511_v42 = vsel %vm1297_vm1, %v5486_v47, 0 }
 0xb8f   :  { %5520 = vmatpush.bf16.xpose.msrb.mxu1 %v5511_v42 }
 0xb90   :  { %v5504_v35 = vpack.c.b16 %v5503_v14, %v5503_v14 }
 0xb92   :  { %6094 = vrot.lane.b32.xlu2 %v5504_v35, %s9590_s1  ;;  %5505 = vrot.lane.b32.xlu0 %v5504_v35, %s9589_s26 }
 0xb93   :  { %v5448_v54 = vpop.f32.mrf.mxu3 }
 0xb94   :  { %v5487_v24 = vpack.c.bf16 %v5448_v54, %v5448_v54 }
 0xb96   :  { %v5527_v32 = vunpack.c.l.b16 %v5487_v24  ;;  %v5535_v59 = vsel %vm1297_vm1, %v5487_v24, 0 }
 0xb97   :  { %5544 = vmatpush.bf16.xpose.msra.mxu1 %v5535_v59 }
 0xb98   :  { %v5528_v18 = vpack.c.b16 %v5527_v32, %v5527_v32 }
 0xb9a   :  { %6131 = vrot.lane.b32.xlu0 %v5528_v18, %s9590_s1  ;;  %5529 = vrot.lane.b32.xlu1 %v5528_v18, %s9589_s26 }
 0xb9b   :  { %v5451_v16 = vpop.f32.mrf.mxu3 }
 0xb9c   :  { %v11613_v62 = vpack.c.bf16 %v5451_v16, %v5451_v16 }
 0xb9e   :  { %v5551_v50 = vunpack.c.l.b16 %v11613_v62 }
 0xba0   :  { %v5552_v12 = vpack.c.b16 %v5551_v50, %v5551_v50 }
 0xba2   :  { %6168 = vrot.lane.b32.xlu0 %v5552_v12, %s9590_s1 }
 0xba3   :  { %v5453_v30 = vpop.f32.mrf.mxu3 }
 0xba4   :  { %v5489_v19 = vpack.c.bf16 %v5453_v30, %v5453_v30  ;;  %v4407_v36 = vpop.f32.mrf.mxu2 }
 0xba5   :  { %v4601_v31 = vpack.c.bf16 %v4444_v33, %v4407_v36 }
 0xba6   :  { %v5583_v22 = vsel %vm1297_vm1, %v5489_v19, 0  ;;  %v5575_v57 = vunpack.c.l.b16 %v5489_v19 }
 0xba7   :  { %8759 = vmatmul.msk.bf16.gmra.mxu2 %vm1297_vm1, %v4601_v31  ;;  %5592 = vmatpush.bf16.xpose.msrb.mxu0 %v5583_v22 }
 0xba8   :  { %v5576_v14 = vpack.c.b16 %v5575_v57, %v5575_v57  ;;  %v14647_v57 = vld [vmem:[#allocation19_spill] sm:$0xff] }
 0xbab   :  { %v5456_v60 = vpop.f32.mrf.mxu3 }
 0xbac   :  { %v4409_v53 = vpop.f32.mrf.mxu2  ;;  %v5490_v42 = vpack.c.bf16 %v5456_v60, %v5456_v60 }
 0xbae   :  { %v5599_v54 = vunpack.c.l.b16 %v5490_v42 }
 0xbb0   :  { %v5600_v18 = vpack.c.b16 %v5599_v54, %v5599_v54 }
 0xbb3   :  { %v5458_v61 = vpop.f32.mrf.mxu3 }
 0xbb4   :  { %v5491_v1 = vpack.c.bf16 %v5458_v61, %v5458_v61  ;;  %v4518_v8 = vpop.f32.mrf.mxu2 }
 0xbb5   :  { %v4602_v28 = vpack.c.bf16 %v4518_v8, %v4481_v15 }
 0xbb6   :  { %v5631_v43 = vsel %vm1297_vm1, %v5491_v1, 0  ;;  %v5623_v50 = vunpack.c.l.b16 %v5491_v1 }
 0xbb7   :  { %8760 = vmatmul.msk.bf16.gmra.mxu2 %vm1297_vm1, %v4602_v28  ;;  %5640 = vmatpush.bf16.xpose.msra.mxu0 %v5631_v43  ;;  %v5559_v43 = vsel %vm1297_vm1, %v11613_v62, 0 }
 0xbb8   :  { %v5624_v36 = vpack.c.b16 %v5623_v50, %v5623_v50 }
 0xbbb   :  { %v5461_v56 = vpop.f32.mrf.mxu3 }
 0xbbc   :  { %v4520_v6 = vpop.f32.mrf.mxu2  ;;  %v11642_v7 = vpack.c.bf16 %v5461_v56, %v5461_v56 }
 0xbbe   :  { %v5647_v35 = vunpack.c.l.b16 %v11642_v7 }
 0xbc0   :  { %v5648_v24 = vpack.c.b16 %v5647_v35, %v5647_v35 }
 0xbc3   :  { %v5463_v48 = vpop.f32.mrf.mxu3 }
 0xbc4   :  { %v4701_v37 = vpop.f32.mrf.mxu2  ;;  %v5493_v56 = vpack.c.bf16 %v5463_v48, %v5463_v48  ;;  %v5607_v48 = vsel %vm1297_vm1, %v5490_v42, 0 }
 0xbc5   :  { %v11622_v4 = vadd.f32 %v4701_v37, %v14644_v38 }
 0xbc6   :  { %v5671_v37 = vunpack.c.l.b16 %v5493_v56 }
 0xbc7   :  { %8761 = vmatmul.msk.bf16.gmra.mxu2 %vm1297_vm1, %v4603_v3  ;;  %v4741_v63 = vsel %vm1297_vm1, %v11622_v4, 0.0 }
 0xbc8   :  { %4742 = vadd.xlane.f32.xlu2 %v4741_v63 }
 0xbcb   :  { %v11627_v33 = vpop.f32.mrf.mxu3 }
 0xbcc   :  { %v4703_v15 = vpop.f32.mrf.mxu2 }
 0xbcd   :  { %v11630_v40 = vadd.f32 %v4703_v15, %v14645_v51  ;;  %v5672_v15 = vpack.c.b16 %v5671_v37, %v5671_v37 }
 0xbcf   :  { %v4744_v23 = vsel %vm1297_vm1, %v11630_v40, 0.0 }
 0xbd0   :  { %4745 = vadd.xlane.f32.xlu1 %v4744_v23 }
 0xbd3   :  { %v11634_v11 = vpop.f32.mrf.mxu3 }
 0xbd4   :  { %v4706_v52 = vpop.f32.mrf.mxu2 }
 0xbd5   :  { %v11637_v45 = vadd.f32 %v4706_v52, %v14646_v21 }
 0xbd7   :  { %v4747_v3 = vsel %vm1297_vm1, %v11637_v45, 0.0 }
 0xbd8   :  { %4748 = vadd.xlane.f32.xlu0 %v4747_v3 }
 0xbdb   :  { %v5471_v20 = vpop.f32.mrf.mxu3 }
 0xbdc   :  { %v11649_v32 = vpack.c.bf16 %v5471_v20, %v5471_v20  ;;  %v4708_v52 = vpop.f32.mrf.mxu2  ;;  %v5494_v20 = vpack.c.bf16 %v11627_v33, %v11627_v33  ;;  %v5495_v33 = vpack.c.bf16 %v11634_v11, %v11634_v11 }
 0xbde   :  { %v5743_v16 = vunpack.c.l.b16 %v11649_v32  ;;  %v5695_v54 = vunpack.c.l.b16 %v5494_v20 }
 0xbe0   :  { %5553 = vrot.lane.b32.xlu2 %v5552_v12, %s9589_s26  ;;  %v5744_v12 = vpack.c.b16 %v5743_v16, %v5743_v16  ;;  %v5696_v42 = vpack.c.b16 %v5695_v54, %v5695_v54 }
 0xbe3   :  { %v11644_v47 = vpop.f32.mrf.mxu3 }
 0xbe8   :  { %5577 = vrot.lane.b32.xlu2 %v5576_v14, %s9589_s26 }
 0xbe9   :  { %6205 = vrot.lane.b32.xlu1 %v5576_v14, %s9590_s1  ;;  %v11678_v14 = vadd.f32 %v4708_v52, %v14647_v57 }
 0xbeb   :  { %v5476_v59 = vpop.f32.mrf.mxu3 }
 0xbec   :  { %6316 = vrot.lane.b32.xlu0 %v5648_v24, %s9590_s1  ;;  %v11658_v22 = vpack.c.bf16 %v5476_v59, %v5476_v59  ;;  %v5719_v59 = vunpack.c.l.b16 %v5495_v33 }
 0xbee   :  { %v5791_v61 = vunpack.c.l.b16 %v11658_v22  ;;  %v5720_v16 = vpack.c.b16 %v5719_v59, %v5719_v59  ;;  %v11736_v59 = vpop.f32.mrf.mxu2 }
 0xbf0   :  { %5601 = vrot.lane.b32.xlu2 %v5600_v18, %s9589_s26  ;;  %v5792_v8 = vpack.c.b16 %v5791_v61, %v5791_v61 }
 0xbf1   :  { %6242 = vrot.lane.b32.xlu1 %v5600_v18, %s9590_s1  ;;  %v5497_v18 = vpack.c.bf16 %v11644_v47, %v11644_v47 }
 0xbf3   :  { %v5478_v30 = vpop.f32.mrf.mxu3  ;;  %v5767_v50 = vunpack.c.l.b16 %v5497_v18 }
 0xbf4   :  { %v5499_v19 = vpack.c.bf16 %v5478_v30, %v5478_v30  ;;  %5745 = vrot.lane.b32.xlu0 %v5744_v12, %s9589_s26  ;;  %v11692_v30 = vpop.permute.xlu2 %6094 }
 0xbf6   :  { %v5823_v31 = vsel %vm1297_vm1, %v5499_v19, 0  ;;  %v5815_v6 = vunpack.c.l.b16 %v5499_v19 }
 0xbf7   :  { %5832 = vmatpush.bf16.xpose.msrb.mxu2 %v5823_v31 }
 0xbf8   :  { %5625 = vrot.lane.b32.xlu2 %v5624_v36, %s9589_s26  ;;  %v5816_v38 = vpack.c.b16 %v5815_v6, %v5815_v6 }
 0xbfb   :  { %v5481_v60 = vpop.f32.mrf.mxu3 }
 0xbfc   :  { %v5500_v53 = vpack.c.bf16 %v5481_v60, %v5481_v60  ;;  %6464 = vrot.lane.b32.xlu0 %v5744_v12, %s9590_s1  ;;  %v5768_v12 = vpack.c.b16 %v5767_v50, %v5767_v50 }
 0xbfe   :  { %v5847_v1 = vsel %vm1297_vm1, %v5500_v53, 0  ;;  %v5839_v51 = vunpack.c.l.b16 %v5500_v53  ;;  %v5655_v53 = vsel %vm1297_vm1, %v11642_v7, 0 }
 0xbff   :  { %5856 = vmatpush.bf16.xpose.msrb.mxu3 %v5847_v1  ;;  %v5679_v1 = vsel %vm1297_vm1, %v5493_v56, 0 }
 0xc00   :  { %6279 = vrot.lane.b32.xlu2 %v5624_v36, %s9590_s1  ;;  %v5840_v62 = vpack.c.b16 %v5839_v51, %v5839_v51 }
 0xc03   :  { %v5483_v19 = vpop.f32.mrf.mxu3 }
 0xc04   :  { %6538 = vrot.lane.b32.xlu0 %v5792_v8, %s9590_s1  ;;  %v5506_v28 = vpop.permute.xlu0 %5505  ;;  %v5501_v36 = vpack.c.bf16 %v5483_v19, %v5483_v19 }
 0xc05   :  { %8770 = vmatmul.msk.bf16.vlgmr.msrb.gmra.mxu1 %vm1297_vm1, %v5506_v28 }
 0xc06   :  { %5568 = vmatpush.bf16.xpose.msrb.mxu1 %v5559_v43  ;;  %v5863_v31 = vunpack.c.l.b16 %v5501_v36  ;;  %v5703_v43 = vsel %vm1297_vm1, %v5494_v20, 0  ;;  %v5871_v50 = vsel %vm1297_vm1, %v5501_v36, 0 }
 0xc08   :  { %5649 = vrot.lane.b32.xlu2 %v5648_v24, %s9589_s26  ;;  %v4750_v24 = vsel %vm1297_vm1, %v11678_v14, 0.0  ;;  %v5864_v47 = vpack.c.b16 %v5863_v31, %v5863_v31  ;;  %v11749_v31 = vpop.f32.mrf.mxu2 }
 0xc0c   :  { %5817 = vrot.lane.b32.xlu0 %v5816_v38, %s9589_s26  ;;  %v6132_v63 = vpop.permute.xlu0 %6131  ;;  %v5530_v21 = vpop.permute.xlu1 %5529 }
 0xc0d   :  { %v6137_v23 = vsel %vm1985_vm2, %v6132_v63, 0 }
 0xc0e   :  { %6146 = vmatpush.bf16.msra.mxu2 %v6137_v23 }
 0xc10   :  { %5673 = vrot.lane.b32.xlu2 %v5672_v15, %s9589_s26 }
 0xc14   :  { %5841 = vrot.lane.b32.xlu0 %v5840_v62, %s9589_s26  ;;  %v6169_v3 = vpop.permute.xlu0 %6168 }
 0xc15   :  { %8771 = vmatmul.msk.bf16.vlgmr.msra.gmra.mxu1 %vm1297_vm1, %v5530_v21  ;;  %v6174_v35 = vsel %vm1985_vm2, %v6169_v3, 0 }
 0xc16   :  { %5616 = vmatpush.bf16.xpose.msra.mxu1 %v5607_v48  ;;  %6183 = vmatpush.bf16.msra.mxu3 %v6174_v35  ;;  %v5799_v35 = vsel %vm1297_vm1, %v11658_v22, 0 }
 0xc18   :  { %6353 = vrot.lane.b32.xlu2 %v5672_v15, %s9590_s1  ;;  %v5751_v15 = vsel %vm1297_vm1, %v11649_v32, 0 }
 0xc1b   :  { %4751 = vadd.xlane.f32.xlu1 %v4750_v24 }
 0xc1c   :  { %6612 = vrot.lane.b32.xlu0 %v5840_v62, %s9590_s1  ;;  %v5775_v62 = vsel %vm1297_vm1, %v5497_v18, 0 }
 0xc20   :  { %5697 = vrot.lane.b32.xlu2 %v5696_v42, %s9589_s26 }
 0xc28   :  { %6390 = vrot.lane.b32.xlu2 %v5696_v42, %s9590_s1 }
 0xc30   :  { %5721 = vrot.lane.b32.xlu2 %v5720_v16, %s9589_s26 }
 0xc34   :  { %6501 = vrot.lane.b32.xlu1 %v5768_v12, %s9590_s1 }
 0xc38   :  { %6427 = vrot.lane.b32.xlu2 %v5720_v16, %s9590_s1 }
 0xc3b   :  { %v11696_v11 = vpop.xlane.xlu2 %4742 }
 0xc3c   :  { %6575 = vrot.lane.b32.xlu1 %v5816_v38, %s9590_s1 }
 0xc40   :  { %5769 = vrot.lane.b32.xlu2 %v5768_v12, %s9589_s26  ;;  %v6100_v12 = vsel %vm1985_vm2, %v11692_v30, 0 }
 0xc43   :  { %v5554_v60 = vpop.permute.xlu2 %5553  ;;  %v11747_v19 = vpop.xlane.xlu1 %4745 }
 0xc44   :  { %6649 = vrot.lane.b32.xlu1 %v5864_v47, %s9590_s1  ;;  %8772 = vmatmul.msk.bf16.vlgmr.msrb.gmra.mxu1 %vm1297_vm1, %v5554_v60 }
 0xc45   :  { %5664 = vmatpush.bf16.xpose.msrb.mxu1 %v5655_v53 }
 0xc48   :  { %5793 = vrot.lane.b32.xlu2 %v5792_v8, %s9589_s26  ;;  %v5727_v8 = vsel %vm1297_vm1, %v5495_v33, 0 }
 0xc4b   :  { %v5578_v61 = vpop.permute.xlu2 %5577  ;;  %v11710_v7 = vpop.xlane.xlu0 %4748 }
 0xc4c   :  { %8773 = vmatmul.msk.bf16.vlgmr.msrb.gmra.mxu0 %vm1297_vm1, %v5578_v61  ;;  %v11753_v61 = vpop.f32.mrf.mxu2 }
 0xc4d   :  { %5688 = vmatpush.bf16.xpose.msrb.mxu0 %v5679_v1 }
 0xc50   :  { %5865 = vrot.lane.b32.xlu2 %v5864_v47, %s9589_s26 }
 0xc53   :  { %v5602_v28 = vpop.permute.xlu2 %5601 }
 0xc54   :  { %8774 = vmatmul.msk.bf16.vlgmr.msra.gmra.mxu1 %vm1297_vm1, %v5602_v28 }
 0xc55   :  { %5712 = vmatpush.bf16.xpose.msra.mxu1 %v5703_v43  ;;  %v11757_v43 = vpop.f32.mrf.mxu2 }
 0xc5b   :  { %v5626_v6 = vpop.permute.xlu2 %5625  ;;  %v6206_v53 = vpop.permute.xlu1 %6205 }
 0xc5c   :  { %8775 = vmatmul.msk.bf16.vlgmr.msra.gmra.mxu0 %vm1297_vm1, %v5626_v6  ;;  %v6211_v36 = vsel %vm1985_vm2, %v6206_v53, 0 }
 0xc5d   :  { %5736 = vmatpush.bf16.xpose.msra.mxu0 %v5727_v8 }
 0xc5e   :  { %v6317_v37 = vpop.permute.xlu0 %6316 }
 0xc5f   :  { %v6322_v24 = vsel %vm1985_vm2, %v6317_v37, 0 }
 0xc63   :  { %v6280_v38 = vpop.permute.xlu2 %6279  ;;  %v6243_v30 = vpop.permute.xlu1 %6242 }
 0xc64   :  { %v6285_v3 = vsel %vm1985_vm2, %v6280_v38, 0  ;;  %v6248_v6 = vsel %vm1985_vm2, %v6243_v30, 0  ;;  %v11763_v38 = vpop.f32.mrf.mxu2 }
 0xc66   :  { %v5746_v56 = vpop.permute.xlu0 %5745 }
 0xc6b   :  { %v5650_v63 = vpop.permute.xlu2 %5649 }
 0xc6c   :  { %8776 = vmatmul.msk.bf16.vlgmr.msrb.gmra.mxu1 %vm1297_vm1, %v5650_v63 }
 0xc6d   :  { %5760 = vmatpush.bf16.xpose.msrb.mxu1 %v5751_v15 }
 0xc6e   :  { %v11717_v51 = vpop.permute.xlu0 %6464 }
 0xc73   :  { %v5674_v23 = vpop.permute.xlu2 %5673 }
 0xc74   :  { %8777 = vmatmul.msk.bf16.vlgmr.msrb.gmra.mxu0 %vm1297_vm1, %v5674_v23 }
 0xc75   :  { %5784 = vmatpush.bf16.xpose.msrb.mxu0 %v5775_v62 }
 0xc76   :  { %v11721_v52 = vpop.permute.xlu0 %6538 }
 0xc7b   :  { %v6354_v21 = vpop.permute.xlu2 %6353 }
 0xc7c   :  { %v6359_v37 = vsel %vm1985_vm2, %v6354_v21, 0 }
 0xc7e   :  { %v5818_v48 = vpop.permute.xlu0 %5817 }
 0xc7f   :  { %8783 = vmatmul.msk.bf16.vlgmr.msrb.gmra.mxu2 %vm1297_vm1, %v5818_v48 }
 0xc80   :  { %6294 = vmatpush.bf16.msrb.mxu2 %v6285_v3 }
 0xc82   :  { %v11725_v32 = vpop.f32.mrf.mxu1 }
 0xc83   :  { %v5698_v20 = vpop.permute.xlu2 %5697  ;;  %v5886_v57 = vsel %vm1771_vm3, %v11725_v32, -inf }
 0xc84   :  { %8778 = vmatmul.msk.bf16.vlgmr.msra.gmra.mxu1 %vm1297_vm1, %v5698_v20  ;;  %5887 = vmax.xlane.f32.xlu1 %v5886_v57 }
 0xc85   :  { %5808 = vmatpush.bf16.xpose.msra.mxu1 %v5799_v35 }
 0xc86   :  { %v5842_v54 = vpop.permute.xlu0 %5841 }
 0xc87   :  { %8784 = vmatmul.msk.bf16.vlgmr.msrb.gmra.mxu3 %vm1297_vm1, %v5842_v54 }
 0xc88   :  { %6331 = vmatpush.bf16.msrb.mxu3 %v6322_v24 }
 0xc8a   :  { %v5524_v42 = vpop.f32.mrf.mxu1 }
 0xc8b   :  { %v11734_v33 = vpop.permute.xlu2 %6390 }
 0xc92   :  { %v11738_v18 = vpop.f32.mrf.mxu1 }
 0xc93   :  { %v5722_v16 = vpop.permute.xlu2 %5721  ;;  %v5889_v22 = vsel %vm1771_vm3, %v11738_v18, -inf }
 0xc94   :  { %8779 = vmatmul.msk.bf16.vlgmr.msra.gmra.mxu0 %vm1297_vm1, %v5722_v16  ;;  %5890 = vmax.xlane.f32.xlu0 %v5889_v22 }
 0xc95   :  { %5880 = vmatpush.bf16.xpose.msra.mxu0 %v5871_v50  ;;  %8780 = vmatmul.msk.bf16.vlgmr.msrb.gmra.mxu1 %vm1297_vm1, %v5746_v56  ;;  %v11765_v56 = vpop.f32.mrf.mxu2 }
 0xc96   :  { %6109 = vmatpush.bf16.msrb.mxu1 %v6100_v12 }
 0xc9a   :  { %v5548_v47 = vpop.f32.mrf.mxu1 }
 0xc9b   :  { %v11751_v60 = vpop.permute.xlu2 %6427 }
 0xc9d   :  { %v11771_v23 = vpop.f32.mrf.mxu2 }
 0xc9e   :  { %14648 = vst [vmem:[#allocation5_spill] sm:$0xff] %v11771_v23 }
 0xca3   :  { %v5770_v1 = vpop.permute.xlu2 %5769 }
 0xca4   :  { %8781 = vmatmul.msk.bf16.vlgmr.msrb.gmra.mxu0 %vm1297_vm1, %v5770_v1 }
 0xca5   :  { %6220 = vmatpush.bf16.msrb.mxu0 %v6211_v36  ;;  %v11779_v57 = vpop.f32.mrf.mxu2 }
 0xca6   :  { %14649 = vst [vmem:[#allocation9_spill] sm:$0xff] %v11779_v57 }
 0xcab   :  { %v5794_v28 = vpop.permute.xlu2 %5793 }
 0xcac   :  { %8782 = vmatmul.msk.bf16.vlgmr.msra.gmra.mxu1 %vm1297_vm1, %v5794_v28 }
 0xcad   :  { %6257 = vmatpush.bf16.msra.mxu1 %v6248_v6  ;;  %v11787_v16 = vpop.f32.mrf.mxu2 }
 0xcae   :  { %14650 = vst [vmem:[#allocation11_spill] sm:$0xff] %v11787_v16 }
 0xcb3   :  { %v5866_v8 = vpop.permute.xlu2 %5865 }
 0xcb4   :  { %8785 = vmatmul.msk.bf16.vlgmr.msra.gmra.mxu0 %vm1297_vm1, %v5866_v8  ;;  %v11803_v8 = vpop.permute.xlu0 %6612 }
 0xcb5   :  { %6368 = vmatpush.bf16.msra.mxu0 %v6359_v37  ;;  %v11789_v50 = vpop.f32.mrf.mxu2 }
 0xcb6   :  { %14651 = vst [vmem:[#allocation13_spill] sm:$0xff] %v11789_v50 }
 0xcbd   :  { %v11795_v53 = vpop.f32.mrf.mxu2 }
 0xcbe   :  { %14652 = vst [vmem:[#allocation15_spill] sm:$0xff] %v11795_v53 }
 0xcc1   :  { %v11767_v63 = vpop.f32.mrf.mxu1 }
 0xcc2   :  { %v5892_v15 = vsel %vm1771_vm3, %v11767_v63, -inf }
 0xcc3   :  { %5893 = vmax.xlane.f32.xlu2 %v5892_v15 }
 0xcc5   :  { %v11801_v6 = vpop.f32.mrf.mxu2 }
 0xcc6   :  { %14653 = vst [vmem:[#allocation6_spill] sm:$0xff] %v11801_v6 }
 0xcc9   :  { %v5572_v62 = vpop.f32.mrf.mxu1  ;;  %v11773_v48 = vpop.f32.mrf.mxu0 }
 0xcca   :  { %v5895_v21 = vsel %vm1771_vm3, %v11773_v48, -inf }
 0xccb   :  { %5896 = vmax.xlane.f32.xlu0 %v5895_v21 }
 0xcd1   :  { %v5596_v3 = vpop.f32.mrf.mxu0  ;;  %v11777_v20 = vpop.f32.mrf.mxu1 }
 0xcd2   :  { %v5898_v35 = vsel %vm1771_vm3, %v11777_v20, -inf  ;;  %v11811_v3 = vpop.xlane.xlu1 %4751 }
 0xcd3   :  { %5899 = vmax.xlane.f32.xlu1 %v5898_v35 }
 0xcd9   :  { %v5620_v54 = vpop.f32.mrf.mxu1  ;;  %v11783_v24 = vpop.f32.mrf.mxu0 }
 0xcda   :  { %v5901_v42 = vsel %vm1771_vm3, %v11783_v24, -inf }
 0xcdb   :  { %5902 = vmax.xlane.f32.xlu2 %v5901_v42 }
 0xce1   :  { %v5644_v22 = vpop.f32.mrf.mxu0 }
 0xce9   :  { %v11791_v12 = vpop.f32.mrf.mxu1 }
 0xcea   :  { %v5904_v47 = vsel %vm1771_vm3, %v11791_v12, -inf }
 0xceb   :  { %5905 = vmax.xlane.f32.xlu0 %v5904_v47 }
 0xcf1   :  { %v5668_v1 = vpop.f32.mrf.mxu1  ;;  %v11797_v36 = vpop.f32.mrf.mxu0 }
 0xcf2   :  { %v5907_v30 = vsel %vm1771_vm3, %v11797_v36, -inf  ;;  %v11816_v1 = vpop.permute.xlu1 %6501 }
 0xcf3   :  { %5908 = vmax.xlane.f32.xlu1 %v5907_v30 }
 0xcf9   :  { %v5692_v28 = vpop.f32.mrf.mxu0 }
 0xd01   :  { %v11805_v37 = vpop.f32.mrf.mxu1 }
 0xd02   :  { %v11807_v15 = vpop.f32.mrf.mxu2  ;;  %v5910_v62 = vsel %vm1771_vm3, %v11805_v37, -inf }
 0xd03   :  { %5911 = vmax.xlane.f32.xlu0 %v5910_v62 }
 0xd07   :  { %v5891_v21 = vpop.xlane.xlu0 %5890 }
 0xd08   :  { %v5935_v35 = vsub.f32 %v11738_v18, %v5891_v21 }
 0xd09   :  { %v5716_v54 = vpop.f32.mrf.mxu1 }
 0xd0a   :  { %v5836_v42 = vpop.f32.mrf.mxu2  ;;  %v11814_v22 = vpop.f32.mrf.mxu3  ;;  %v5952_v47 = vmul.f32 1.442695, %v5935_v35 }
 0xd0b   :  { %v11828_v35 = vpop.permute.xlu1 %6575 }
 0xd0c   :  { %9267 = vpow2.f32 %v5952_v47 }
 0xd11   :  { %v11818_v30 = vpop.f32.mrf.mxu0 }
 0xd12   :  { %v11820_v28 = vpop.f32.mrf.mxu1  ;;  %v5860_v13 = vpop.f32.mrf.mxu3  ;;  %v5913_v62 = vsel %vm1771_vm3, %v11818_v30, -inf }
 0xd13   :  { %5914 = vmax.xlane.f32.xlu2 %v5913_v62  ;;  %v11824_v5 = vpop.eup %9267  ;;  %v11834_v13 = vpop.permute.xlu1 %6649 }
 0xd14   :  { %v5985_v54 = vsel %vm1771_vm3, %v11824_v5, 0.0 }
 0xd19   :  { %v5740_v18 = vpop.f32.mrf.mxu0 }
 0xd1a   :  { %v5764_v21 = vpop.f32.mrf.mxu1  ;;  %v5916_v18 = vsel %vm1771_vm3, %v11820_v28, -inf }
 0xd1b   :  { %5986 = vadd.xlane.f32.xlu2 %v5985_v54  ;;  %v5888_v54 = vpop.xlane.xlu1 %5887 }
 0xd1c   :  { %v5934_v6 = vsub.f32 %v11725_v32, %v5888_v54 }
 0xd1e   :  { %v5950_v50 = vmul.f32 1.442695, %v5934_v6 }
 0xd20   :  { %9269 = vpow2.f32 %v5950_v50 }
 0xd21   :  { %v11830_v42 = vpop.f32.mrf.mxu0 }
 0xd22   :  { %v5919_v47 = vsel %vm1771_vm3, %v11830_v42, -inf }
 0xd23   :  { %5920 = vmax.xlane.f32.xlu1 %v5919_v47  ;;  %v5925_v47 = vsel %vm1771_vm3, %v11807_v15, -inf }
 0xd26   :  { %v11852_v54 = vpop.eup %9269 }
 0xd29   :  { %v5788_v39 = vpop.f32.mrf.mxu0  ;;  %v11836_v62 = vpop.f32.mrf.mxu1 }
 0xd2a   :  { %v5922_v21 = vsel %vm1771_vm3, %v11836_v62, -inf  ;;  %v5928_v39 = vsel %vm1771_vm3, %v11814_v22, -inf }
 0xd2b   :  { %5917 = vmax.xlane.f32.xlu1 %v5916_v18  ;;  %5923 = vmax.xlane.f32.xlu0 %v5922_v21 }
 0xd31   :  { %v5812_v53 = vpop.f32.mrf.mxu1  ;;  %v11843_v16 = vpop.f32.mrf.mxu0 }
 0xd32   :  { %v5931_v32 = vsel %vm1771_vm3, %v11843_v16, -inf }
 0xd33   :  { %5926 = vmax.xlane.f32.xlu1 %v5925_v47  ;;  %5929 = vmax.xlane.f32.xlu0 %v5928_v39 }
 0xd36   :  { %v5894_v0 = vpop.xlane.xlu2 %5893 }
 0xd37   :  { %v5936_v23 = vsub.f32 %v11767_v63, %v5894_v0  ;;  %v5982_v0 = vsel %vm1771_vm3, %v11852_v54, 0.0 }
 0xd39   :  { %v5954_v18 = vmul.f32 1.442695, %v5936_v23  ;;  %v5884_v21 = vpop.f32.mrf.mxu0 }
 0xd3b   :  { %9271 = vpow2.f32 %v5954_v18  ;;  %5932 = vmax.xlane.f32.xlu0 %v5931_v32 }
 0xd3e   :  { %v5897_v53 = vpop.xlane.xlu0 %5896 }
 0xd3f   :  { %v5937_v57 = vsub.f32 %v11773_v48, %v5897_v53 }
 0xd41   :  { %v11855_v9 = vpop.eup %9271  ;;  %v5956_v47 = vmul.f32 1.442695, %v5937_v57 }
 0xd42   :  { %v5988_v6 = vsel %vm1771_vm3, %v11855_v9, 0.0 }
 0xd43   :  { %9273 = vpow2.f32 %v5956_v47  ;;  %5989 = vadd.xlane.f32.xlu1 %v5988_v6  ;;  %5983 = vadd.xlane.f32.xlu0 %v5982_v0 }
 0xd46   :  { %v5900_v63 = vpop.xlane.xlu1 %5899 }
 0xd47   :  { %v5938_v23 = vsub.f32 %v11777_v20, %v5900_v63 }
 0xd49   :  { %v11862_v50 = vpop.eup %9273  ;;  %v5958_v39 = vmul.f32 1.442695, %v5938_v23 }
 0xd4a   :  { %v5991_v48 = vsel %vm1771_vm3, %v11862_v50, 0.0 }
 0xd4b   :  { %9275 = vpow2.f32 %v5958_v39  ;;  %5992 = vadd.xlane.f32.xlu2 %v5991_v48 }
 0xd4e   :  { %v5903_v57 = vpop.xlane.xlu2 %5902 }
 0xd4f   :  { %v5939_v18 = vsub.f32 %v11783_v24, %v5903_v57 }
 0xd51   :  { %v11867_v21 = vpop.eup %9275  ;;  %v5960_v32 = vmul.f32 1.442695, %v5939_v18 }
 0xd52   :  { %v5994_v53 = vsel %vm1771_vm3, %v11867_v21, 0.0 }
 0xd53   :  { %9277 = vpow2.f32 %v5960_v32  ;;  %5995 = vadd.xlane.f32.xlu1 %v5994_v53 }
 0xd59   :  { %v11871_v20 = vpop.eup %9277 }
 0xd5a   :  { %v5997_v47 = vsel %vm1771_vm3, %v11871_v20, 0.0 }
 0xd5b   :  { %5998 = vadd.xlane.f32.xlu2 %v5997_v47 }
 0xd5e   :  { %v5906_v6 = vpop.xlane.xlu0 %5905 }
 0xd5f   :  { %v5940_v24 = vsub.f32 %v11791_v12, %v5906_v6 }
 0xd61   :  { %v5962_v39 = vmul.f32 1.442695, %v5940_v24 }
 0xd66   :  { %v5909_v0 = vpop.xlane.xlu1 %5908 }
 0xd67   :  { %v5941_v63 = vsub.f32 %v11797_v36, %v5909_v0 }
 0xd69   :  { %v5964_v23 = vmul.f32 1.442695, %v5941_v63 }
 0xd6b   :  { %9279 = vpow2.f32 %v5964_v23 }
 0xd6c   :  { %9281 = vpow2.f32 %v5962_v39 }
 0xd71   :  { %v11877_v48 = vpop.eup %9279 }
 0xd72   :  { %v6003_v57 = vsel %vm1771_vm3, %v11877_v48, 0.0  ;;  %v11881_v32 = vpop.eup %9281 }
 0xd73   :  { %6004 = vadd.xlane.f32.xlu1 %v6003_v57  ;;  %v6000_v36 = vsel %vm1771_vm3, %v11881_v32, 0.0 }
 0xd76   :  { %v5912_v18 = vpop.xlane.xlu0 %5911 }
 0xd77   :  { %v5942_v53 = vsub.f32 %v11805_v37, %v5912_v18 }
 0xd79   :  { %v5966_v47 = vmul.f32 1.442695, %v5942_v53 }
 0xd7b   :  { %9283 = vpow2.f32 %v5966_v47  ;;  %6001 = vadd.xlane.f32.xlu1 %v6000_v36 }
 0xd81   :  { %v11886_v12 = vpop.eup %9283 }
 0xd82   :  { %v6006_v6 = vsel %vm1771_vm3, %v11886_v12, 0.0 }
 0xd83   :  { %6007 = vadd.xlane.f32.xlu1 %v6006_v6 }
 0xd86   :  { %v5915_v0 = vpop.xlane.xlu2 %5914 }
 0xd87   :  { %v5943_v63 = vsub.f32 %v11818_v30, %v5915_v0 }
 0xd89   :  { %v5968_v24 = vmul.f32 1.442695, %v5943_v63 }
 0xd8b   :  { %9285 = vpow2.f32 %v5968_v24 }
 0xd91   :  { %v11891_v23 = vpop.eup %9285 }
 0xd92   :  { %v6009_v37 = vsel %vm1771_vm3, %v11891_v23, 0.0 }
 0xd93   :  { %6010 = vadd.xlane.f32.xlu0 %v6009_v37 }
 0xd96   :  { %v5921_v39 = vpop.xlane.xlu1 %5920 }
 0xd97   :  { %v5945_v57 = vsub.f32 %v11830_v42, %v5921_v39 }
 0xd99   :  { %v5972_v18 = vmul.f32 1.442695, %v5945_v57 }
 0xd9b   :  { %9287 = vpow2.f32 %v5972_v18 }
 0xd9e   :  { %v5918_v53 = vpop.xlane.xlu1 %5917  ;;  %v5924_v47 = vpop.xlane.xlu0 %5923 }
 0xd9f   :  { %v5944_v36 = vsub.f32 %v11820_v28, %v5918_v53  ;;  %v5946_v6 = vsub.f32 %v11836_v62, %v5924_v47 }
 0xda1   :  { %v11898_v30 = vpop.eup %9287  ;;  %v5970_v0 = vmul.f32 1.442695, %v5944_v36  ;;  %v5974_v63 = vmul.f32 1.442695, %v5946_v6 }
 0xda2   :  { %v6015_v24 = vsel %vm1771_vm3, %v11898_v30, 0.0 }
 0xda3   :  { %9289 = vpow2.f32 %v5970_v0  ;;  %6016 = vadd.xlane.f32.xlu2 %v6015_v24 }
 0xda4   :  { %9291 = vpow2.f32 %v5974_v63 }
 0xda6   :  { %v5927_v37 = vpop.xlane.xlu1 %5926  ;;  %v5930_v42 = vpop.xlane.xlu0 %5929 }
 0xda7   :  { %v5947_v39 = vsub.f32 %v11807_v15, %v5927_v37  ;;  %v5948_v57 = vsub.f32 %v11814_v22, %v5930_v42  ;;  %v5987_v42 = vpop.xlane.xlu2 %5986 }
 0xda9   :  { %v11904_v18 = vpop.eup %9289  ;;  %v5976_v28 = vmul.f32 1.442695, %v5947_v39  ;;  %v5978_v62 = vmul.f32 1.442695, %v5948_v57 }
 0xdaa   :  { %v11906_v53 = vpop.eup %9291  ;;  %v6012_v47 = vsel %vm1771_vm3, %v11904_v18, 0.0 }
 0xdab   :  { %9293 = vpow2.f32 %v5976_v28  ;;  %6013 = vadd.xlane.f32.xlu1 %v6012_v47  ;;  %v6018_v36 = vsel %vm1771_vm3, %v11906_v53, 0.0 }
 0xdac   :  { %9295 = vpow2.f32 %v5978_v62  ;;  %6019 = vadd.xlane.f32.xlu2 %v6018_v36 }
 0xdae   :  { %v5933_v6 = vpop.xlane.xlu0 %5932 }
 0xdaf   :  { %v5949_v15 = vsub.f32 %v11843_v16, %v5933_v6 }
 0xdb1   :  { %v11913_v22 = vpop.eup %9293  ;;  %v5980_v0 = vmul.f32 1.442695, %v5949_v15 }
 0xdb2   :  { %v11915_v63 = vpop.eup %9295  ;;  %v6021_v24 = vsel %vm1771_vm3, %v11913_v22, 0.0 }
 0xdb3   :  { %9297 = vpow2.f32 %v5980_v0  ;;  %6022 = vadd.xlane.f32.xlu1 %v6021_v24  ;;  %v6024_v37 = vsel %vm1771_vm3, %v11915_v63, 0.0 }
 0xdb4   :  { %6025 = vadd.xlane.f32.xlu2 %v6024_v37 }
 0xdb6   :  { %v5990_v39 = vpop.xlane.xlu1 %5989  ;;  %v5984_v24 = vpop.xlane.xlu0 %5983 }
 0xdb7   :  { %9299 = vrcp.f32 %v5990_v39 }
 0xdb9   :  { %v11921_v57 = vpop.eup %9297 }
 0xdba   :  { %v6027_v16 = vsel %vm1771_vm3, %v11921_v57, 0.0 }
 0xdbc   :  { %6028 = vadd.xlane.f32.xlu2 %v6027_v16 }
 0xdbd   :  { %v9300_v62 = vpop.eup %9299 }
 0xdbe   :  { %v5993_v28 = vpop.xlane.xlu2 %5992  ;;  %v6048_v47 = vmul.f32 %v9300_v62, %v11855_v9 }
 0xdbf   :  { %9301 = vrcp.f32 %v5993_v28 }
 0xdc0   :  { %v6064_v15 = vpack.c.bf16 %v6048_v47, %v6048_v47  ;;  %9303 = vrcp.f32 %v5987_v42 }
 0xdc1   :  { %9305 = vrcp.f32 %v5984_v24 }
 0xdc5   :  { %v9302_v36 = vpop.eup %9301 }
 0xdc6   :  { %v6049_v6 = vmul.f32 %v9302_v36, %v11862_v50  ;;  %v5996_v37 = vpop.xlane.xlu1 %5995  ;;  %v9304_v2 = vpop.eup %9303 }
 0xdc7   :  { %v9306_v29 = vpop.eup %9305  ;;  %9307 = vrcp.f32 %v5996_v37  ;;  %v6047_v39 = vmul.f32 %v9304_v2, %v11824_v5  ;;  %v4789_v2 = vmul.f32 %v11696_v11, %v11164_v41 }
 0xdc8   :  { %v6065_v0 = vpack.c.bf16 %v6049_v6, %v6049_v6  ;;  %v6046_v16 = vmul.f32 %v9306_v29, %v11852_v54 }
 0xdc9   :  { %v6063_v28 = vpack.c.bf16 %v6047_v39, %v6047_v39 }
 0xdca   :  { %8962 = vxpose.binary.xlu0.c.b16.start.end [1/2] (short) (narrow) %v6065_v0, %v6064_v15, 16  ;;  %v6062_v62 = vpack.c.bf16 %v6046_v16, %v6046_v16  ;;  %v14654_v15 = vld [vmem:[#allocation24_spill] sm:$0xff] }
 0xdcb   :  { %v11933_v0 = vadd.f32 %v11749_v31, %v14654_v15 }
 0xdcd   :  { %v9308_v9 = vpop.eup %9307  ;;  %v4756_v29 = vsel %vm1297_vm1, %v11933_v0, 0.0 }
 0xdce   :  { %v5999_v55 = vpop.xlane.xlu2 %5998  ;;  %v6050_v47 = vmul.f32 %v9308_v9, %v11867_v21  ;;  %v14655_v21 = vld [vmem:[#allocation23_spill] sm:$0xff] }
 0xdcf   :  { %9309 = vrcp.f32 %v5999_v55  ;;  %v11938_v55 = vsub.f32 %v11622_v4, %v4789_v2  ;;  %v11947_v31 = vadd.f32 %v11757_v43, %v14655_v21  ;;  %v6470_v2 = vsel %vm1985_vm2, %v11717_v51, 0 }
 0xdd0   :  { %v6066_v36 = vpack.c.bf16 %v6050_v47, %v6050_v47  ;;  %v6507_v21 = vsel %vm1985_vm2, %v11816_v1, 0 }
 0xdd1   :  { %v4821_v5 = vmul.f32 %v11938_v55, %v11938_v55  ;;  %v4762_v4 = vsel %vm1297_vm1, %v11947_v31, 0.0 }
 0xdd3   :  { %v4837_v54 = vsel %vm1297_vm1, %v4821_v5, 0.0 }
 0xdd5   :  { %v9310_v50 = vpop.eup %9309 }
 0xdd6   :  { %v6051_v42 = vmul.f32 %v9310_v50, %v11871_v20  ;;  %v14656_v20 = vld [vmem:[#allocation17_spill] sm:$0xff] }
 0xdd7   :  { %v11951_v11 = vadd.f32 %v11736_v59, %v14656_v20 }
 0xdd8   :  { %v6067_v6 = vpack.c.bf16 %v6051_v42, %v6051_v42 }
 0xdd9   :  { %v4753_v24 = vsel %vm1297_vm1, %v11951_v11, 0.0 }
 0xde5   :  { %8959 = vxpose.binary.xlu2.c.b16.start.end [1/2] (short) (narrow) %v6062_v62, %v6063_v28, 16 }
 0xde6   :  { %v11957_v37 = vpop.xlane.xlu1 %6004 }
 0xded   :  { %8965 = vxpose.binary.xlu1.c.b16.start.end [1/2] (short) (narrow) %v6066_v36, %v6067_v6, 16 }
 0xdee   :  { %v11961_v39 = vpop.xlane.xlu1 %6001 }
 0xdf6   :  { %v6008_v43 = vpop.xlane.xlu1 %6007 }
 0xdf7   :  { %9311 = vrcp.f32 %v6008_v43  ;;  %v6433_v43 = vsel %vm1985_vm2, %v11751_v60, 0  ;;  %v2801_v60 = vmul.f32 0.032258064, %v11393_v26  ;;  %v6544_v26 = vsel %vm1985_vm2, %v11721_v52, 0 }
 0xdf9   :  { %vm2841_vm0 = vcmp.eq.f32.partialorder %v2801_v60, inf  ;;  %vm2843_vm4 = vcmp.eq.f32.partialorder %v2801_v60, 0.0 }
 0xdfd   :  { %v9312_v9 = vpop.eup %9311 }
 0xdfe   :  { %v6054_v50 = vmul.f32 %v9312_v9, %v11886_v12  ;;  %v4791_v12 = vmul.f32 %v11710_v7, %v11164_v41  ;;  %v14657_v9 = vld [vmem:[#allocation31_spill] sm:$0xff] }
 0xe00   :  { %v6070_v42 = vpack.c.bf16 %v6054_v50, %v6054_v50  ;;  %v11982_v51 = vsub.f32 %v11637_v45, %v4791_v12 }
 0xe02   :  { %v4823_v7 = vmul.f32 %v11982_v51, %v11982_v51 }
 0xe04   :  { %v4843_v45 = vsel %vm1297_vm1, %v4823_v7, 0.0 }
 0xe06   :  { %v6011_v16 = vpop.xlane.xlu0 %6010 }
 0xe07   :  { %9313 = vrcp.f32 %v6011_v16 }
 0xe0d   :  { %v9314_v62 = vpop.eup %9313 }
 0xe0e   :  { %v6055_v47 = vmul.f32 %v9314_v62, %v11891_v23  ;;  %v6396_v62 = vsel %vm1985_vm2, %v11734_v33, 0 }
 0xe10   :  { %v6071_v36 = vpack.c.bf16 %v6055_v47, %v6055_v47 }
 0xe16   :  { %v6017_v59 = vpop.xlane.xlu2 %6016 }
 0xe17   :  { %9315 = vrcp.f32 %v6017_v59 }
 0xe1f   :  { %v11965_v28 = vpop.xlane.xlu2 %6019 }
 0xe27   :  { %v11969_v6 = vpop.xlane.xlu2 %6025 }
 0xe2f   :  { %v11976_v5 = vpop.xlane.xlu2 %6028 }
 0xe3b   :  { %4757 = vadd.xlane.f32.xlu0 %v4756_v29  ;;  %v6014_v29 = vpop.xlane.xlu1 %6013 }
 0xe3c   :  { %9317 = vrcp.f32 %v6014_v29 }
 0xe3d   :  { %9319 = vrsqrt.f32 %v2801_v60 }
 0xe3e   :  { %9321 = vrcp.f32 %v11957_v37 }
 0xe3f   :  { %9323 = vrcp.f32 %v11961_v39 }
 0xe43   :  { %4838 = vadd.xlane.f32.xlu0 %v4837_v54  ;;  %v9316_v54 = vpop.eup %9315  ;;  %v6023_v50 = vpop.xlane.xlu1 %6022 }
 0xe44   :  { %v9318_v20 = vpop.eup %9317 }
 0xe4b   :  { %4763 = vadd.xlane.f32.xlu0 %v4762_v4  ;;  %v6057_v4 = vmul.f32 %v9316_v54, %v11898_v30  ;;  %v11994_v30 = vadd.f32 %v11765_v56, %v14657_v9  ;;  %v6581_v56 = vsel %vm1985_vm2, %v11828_v35, 0 }
 0xe4d   :  { %4754 = vadd.xlane.f32.xlu1 %v4753_v24  ;;  %v6056_v24 = vmul.f32 %v9318_v20, %v11904_v18  ;;  %v6073_v16 = vpack.c.bf16 %v6057_v4, %v6057_v4  ;;  %v4768_v47 = vsel %vm1297_vm1, %v11994_v30, 0.0 }
 0xe4e   :  { %4640 = vrot.lane.b32.xlu2 %v10410_v10, %s9589_s26 }
 0xe4f   :  { %v6072_v1 = vpack.c.bf16 %v6056_v24, %v6056_v24 }
 0xe5f   :  { %6702 = vrot.lane.b32.xlu0 %v10432_v27, %s9590_s1 }
 0xe74   :  { %8968 = vxpose.binary.xlu2.c.b16.start.end [1/2] (short) (narrow) %v6070_v42, %v6071_v36, 16  ;;  %v9320_v36 = vpop.eup %9319 }
 0xe75   :  { %v2835_v33 = vmul.f32 %v9320_v36, %v2801_v60  ;;  %v9322_v54 = vpop.eup %9321 }
 0xe76   :  { %v8963_v15 = vpop.trf.xlu0  ;;  %v6053_v4 = vmul.f32 %v9322_v54, %v11877_v48 }
 0xe77   :  { %8788 = vmatmul.msk.bf16.vlgmr.msra.gmra.mxu3 %vm1771_vm3, %v8963_v15 }
 0xe78   :  { %6479 = vmatpush.bf16.msra.mxu3 %v6470_v2  ;;  %v2836_v2 = vmul.f32 %v9320_v36, %v2835_v33  ;;  %v6069_v37 = vpack.c.bf16 %v6053_v4, %v6053_v4 }
 0xe7a   :  { %v2837_v29 = vmul.f32 0.5, %v2836_v2 }
 0xe7c   :  { %v2838_v12 = vsub.f32 1.5, %v2837_v29 }
 0xe7e   :  { %v8964_v23 = vpop.trf.xlu0  ;;  %v2839_v35 = vmul.f32 %v9320_v36, %v2838_v12 }
 0xe7f   :  { %8789 = vmatmul.msk.bf16.vlgmr.msrb.gmra.mxu0 %vm1771_vm3, %v8964_v23 }
 0xe80   :  { %6516 = vmatpush.bf16.msrb.mxu0 %v6507_v21  ;;  %v9324_v21 = vpop.eup %9323  ;;  %v2840_v20 = vmul.f32 %v2839_v35, %v2801_v60 }
 0xe81   :  { %v6052_v52 = vmul.f32 %v9324_v21, %v11881_v32 }
 0xe82   :  { %v2842_v24 = vsel %vm2841_vm0, %v2801_v60, %v2840_v20 }
 0xe86   :  { %v8960_v59 = vpop.trf.xlu2 }
 0xe87   :  { %8787 = vmatmul.msk.bf16.vlgmr.msra.gmra.mxu2 %vm1771_vm3, %v8960_v59  ;;  %v2844_v59 = vand.u32 2147483648, %v2801_v60 }
 0xe88   :  { %6442 = vmatpush.bf16.msra.mxu2 %v6433_v43 }
 0xe89   :  { %8971 = vxpose.binary.xlu1.c.b16.start.end [1/2] (short) (narrow) %v6073_v16, %v6072_v1, 16  ;;  %v2845_v16 = vsel %vm2843_vm4, %v2844_v59, %v2842_v24  ;;  %v6068_v1 = vpack.c.bf16 %v6052_v52, %v6052_v52 }
 0xe8a   :  { %4844 = vadd.xlane.f32.xlu0 %v4843_v45  ;;  %v3026_v39 = vadd.f32 1e-06, %v2845_v16 }
 0xe8c   :  { %v3053_v52 = vand.u32 2147483648, %v3026_v39  ;;  %vm3047_vm8 = vweird.f32 %v3026_v39  ;;  %v3051_v24 = vand.u32 2147483647, %v3026_v39 }
 0xe8e   :  { %v8961_v18 = vpop.trf.xlu2  ;;  %vm3052_vm10 = vcmp.eq.f32.partialorder %v3051_v24, 8.507059e+37  ;;  %v14658_v24 = vld [vmem:[#allocation27_spill] sm:$0xff] }
 0xe8f   :  { %8786 = vmatmul.msk.bf16.vlgmr.msrb.gmra.mxu1 %vm1771_vm3, %v8961_v18 }
 0xe90   :  { %6405 = vmatpush.bf16.msrb.mxu1 %v6396_v62 }
 0xe92   :  { %4769 = vadd.xlane.f32.xlu0 %v4768_v47 }
 0xe99   :  { %v8966_v42 = vpop.trf.xlu1 }
 0xe9a   :  { %8791 = vmatmul.msk.bf16.vlgmr.msrb.gmra.mxu2 %vm1771_vm3, %v8966_v42 }
 0xe9b   :  { %6590 = vmatpush.bf16.msrb.mxu2 %v6581_v56 }
 0xea1   :  { %v8967_v15 = vpop.trf.xlu1 }
 0xea2   :  { %8790 = vmatmul.msk.bf16.vlgmr.msra.gmra.mxu1 %vm1771_vm3, %v8967_v15 }
 0xea3   :  { %6553 = vmatpush.bf16.msra.mxu1 %v6544_v26 }
 0xeae   :  { %v12010_v23 = vpop.xlane.xlu0 %4757 }
 0xeb6   :  { %v4839_v7 = vpop.xlane.xlu0 %4838 }
 0xeb7   :  { %v4885_v43 = vmul.f32 0.032258064, %v4839_v7  ;;  %v2803_v7 = vmul.f32 0.032258064, %v11330_v25 }
 0xeb9   :  { %9325 = vrsqrt.f32 %v4885_v43  ;;  %vm4924_vm5 = vcmp.eq.f32.partialorder %v4885_v43, inf  ;;  %vm4926_vm6 = vcmp.eq.f32.partialorder %v4885_v43, 0.0  ;;  %vm2865_vm15 = vcmp.eq.f32.partialorder %v2803_v7, inf }
 0xeba   :  { %9327 = vrcp.f32 %v11965_v28  ;;  %vm2867_vm0 = vcmp.eq.f32.partialorder %v2803_v7, 0.0 }
 0xebb   :  { %8974 = vxpose.binary.xlu0.c.b16.start.end [1/2] (short) (narrow) %v6069_v37, %v6068_v1, 16  ;;  %9329 = vrcp.f32 %v6023_v50  ;;  %v4927_v50 = vand.u32 2147483648, %v4885_v43  ;;  %v3054_v1 = vor.u32 1.1754944e-38, %v3053_v52 }
 0xebc   :  { %9331 = vrcp.f32 %v3026_v39 }
 0xebd   :  { %9333 = vrcp.f32 %v11969_v6 }
 0xebe   :  { %9335 = vrcp.f32 %v11976_v5 }
 0xebf   :  { %v9326_v45 = vpop.eup %9325 }
 0xec0   :  { %v4918_v9 = vmul.f32 %v9326_v45, %v4885_v43  ;;  %v9328_v48 = vpop.eup %9327 }
 0xec1   :  { %v9330_v18 = vpop.eup %9329  ;;  %v6058_v47 = vmul.f32 %v9328_v48, %v11906_v53 }
 0xec2   :  { %v4919_v32 = vmul.f32 %v9326_v45, %v4918_v9  ;;  %v6059_v60 = vmul.f32 %v9330_v18, %v11913_v22  ;;  %v9332_v42 = vpop.eup %9331 }
 0xec3   :  { %v6074_v33 = vpack.c.bf16 %v6058_v47, %v6058_v47  ;;  %v3043_v28 = vmul.f32 %v9332_v42, %v3026_v39  ;;  %v9334_v22 = vpop.eup %9333  ;;  %vm3048_vm7 = vweird.f32 %v9332_v42  ;;  %v12025_v39 = vld [vmem:[%s14548_s8 + $0x1] ss:$0 sm:$0xff] }
 0xec4   :  { %v4920_v62 = vmul.f32 0.5, %v4919_v32  ;;  %v6075_v15 = vpack.c.bf16 %v6059_v60, %v6059_v60  ;;  %v9336_v54 = vpop.eup %9335  ;;  %v6060_v21 = vmul.f32 %v9334_v22, %v11915_v63  ;;  %vm3049_vm9 = vmor %vm3047_vm8, %vm3048_vm7  ;;  %v2818_v25 = vmul.f32 %v12025_v39, %v11199_v58 }
 0xec5   :  { %v3044_v53 = vsub.f32 1.0, %v3043_v28  ;;  %v6061_v20 = vmul.f32 %v9336_v54, %v11921_v57  ;;  %v4901_v32 = vmul.f32 %v12025_v39, %v11938_v55 }
 0xec6   :  { %v4921_v56 = vsub.f32 1.5, %v4920_v62  ;;  %v6076_v59 = vpack.c.bf16 %v6060_v21, %v6060_v21 }
 0xec7   :  { %v3045_v35 = vmul.f32 %v9332_v42, %v3044_v53 }
 0xec8   :  { %v4922_v36 = vmul.f32 %v9326_v45, %v4921_v56 }
 0xec9   :  { %v3046_v4 = vadd.f32 %v9332_v42, %v3045_v35  ;;  %v2868_v35 = vand.u32 2147483648, %v2803_v7 }
 0xeca   :  { %v4923_v2 = vmul.f32 %v4922_v36, %v4885_v43 }
 0xecb   :  { %8977 = vxpose.binary.xlu0.c.b16.start.end [1/2] (short) (narrow) %v6074_v33, %v6075_v15, 16  ;;  %v3050_v16 = vsel %vm3049_vm9, %v9332_v42, %v3046_v4  ;;  %v12036_v42 = vld [vmem:[%s14548_s8 + $0x2] ss:$0 sm:$0xff] }
 0xecc   :  { %v4925_v26 = vsel %vm4924_vm5, %v4885_v43, %v4923_v2  ;;  %v6077_v43 = vpack.c.bf16 %v6061_v20, %v6061_v20  ;;  %v3055_v9 = vsel %vm3052_vm10, %v3054_v1, %v3050_v16  ;;  %v12046_v2 = vpop.xlane.xlu0 %4763 }
 0xecd   :  { %v4928_v29 = vsel %vm4926_vm6, %v4927_v50, %v4925_v26  ;;  %v3056_v62 = vmul.f32 %v3055_v9, %v2818_v25 }
 0xece   :  { %v5109_v12 = vadd.f32 1e-06, %v4928_v29 }
 0xed0   :  { %9337 = vrcp.f32 %v5109_v12  ;;  %v5136_v45 = vand.u32 2147483648, %v5109_v12  ;;  %v5134_v57 = vand.u32 2147483647, %v5109_v12  ;;  %vm5130_vm12 = vweird.f32 %v5109_v12 }
 0xed1   :  { %9339 = vrsqrt.f32 %v2803_v7 }
 0xed2   :  { %v5137_v18 = vor.u32 1.1754944e-38, %v5136_v45  ;;  %vm5135_vm14 = vcmp.eq.f32.partialorder %v5134_v57, 8.507059e+37 }
 0xed4   :  { %v12048_v29 = vpop.permute.xlu0 %6702 }
 0xed6   :  { %v9338_v6 = vpop.eup %9337 }
 0xed7   :  { %v5126_v5 = vmul.f32 %v9338_v6, %v5109_v12  ;;  %vm5131_vm11 = vweird.f32 %v9338_v6  ;;  %v9340_v56 = vpop.eup %9339 }
 0xed8   :  { %vm5132_vm13 = vmor %vm5130_vm12, %vm5131_vm11  ;;  %v2859_v33 = vmul.f32 %v9340_v56, %v2803_v7 }
 0xed9   :  { %v5127_v37 = vsub.f32 1.0, %v5126_v5  ;;  %v12057_v5 = vadd.f32 %v11753_v61, %v14658_v24 }
 0xeda   :  { %v2860_v15 = vmul.f32 %v9340_v56, %v2859_v33  ;;  %v9579_v33 = vld [vmem:[%s14551_s3 + $0x8] sm:$0xff] }
 0xedb   :  { %8980 = vxpose.binary.xlu0.c.b16.start.end [1/2] (short) (narrow) %v6077_v43, %v6076_v59, 16  ;;  %v5128_v63 = vmul.f32 %v9338_v6, %v5127_v37  ;;  %v4759_v16 = vsel %vm1297_vm1, %v12057_v5, 0.0  ;;  %v12063_v37 = vpop.permute.xlu2 %4640 }
 0xedc   :  { %v2861_v28 = vmul.f32 0.5, %v2860_v15 }
 0xedd   :  { %6698 = vrot.lane.b32.xlu2 %v10410_v10, %s9590_s1  ;;  %v5129_v48 = vadd.f32 %v9338_v6, %v5128_v63  ;;  %v3283_v10 = vadd.f32 %v12036_v42, %v3056_v62 }
 0xede   :  { %v2862_v50 = vsub.f32 1.5, %v2861_v28 }
 0xedf   :  { %v5133_v47 = vsel %vm5132_vm13, %v9338_v6, %v5129_v48 }
 0xee0   :  { %v5138_v60 = vsel %vm5135_vm14, %v5137_v18, %v5133_v47  ;;  %v2863_v26 = vmul.f32 %v9340_v56, %v2862_v50 }
 0xee1   :  { %v5139_v58 = vmul.f32 %v5138_v60, %v4901_v32 }
 0xee2   :  { %v2864_v53 = vmul.f32 %v2863_v26, %v2803_v7 }
 0xee3   :  { %4642 = vrot.lane.b32.xlu1 %v14614_v46, %s9589_s26  ;;  %v5365_v36 = vadd.f32 %v12036_v42, %v5139_v58 }
 0xee4   :  { %v2866_v12 = vsel %vm2865_vm15, %v2803_v7, %v2864_v53 }
 0xee5   :  { %6700 = vrot.lane.b32.xlu2 %v14614_v46, %s9590_s1  ;;  %v12044_v55 = vadd.f32 %v5365_v36, %v3283_v10  ;;  %v2869_v21 = vsel %vm2867_vm0, %v2868_v35, %v2866_v12  ;;  %v4790_v46 = vmul.f32 %v11747_v19, %v11164_v41 }
 0xee6   :  { %v3028_v20 = vadd.f32 1e-06, %v2869_v21 }
 0xee7   :  { %v12053_v4 = vsub.f32 %v11630_v40, %v4790_v46 }
 0xee8   :  { %v3083_v56 = vand.u32 2147483648, %v3028_v20  ;;  %vm3077_vm7 = vweird.f32 %v3028_v20  ;;  %v3081_v10 = vand.u32 2147483647, %v3028_v20 }
 0xee9   :  { %v4822_v7 = vmul.f32 %v12053_v4, %v12053_v4 }
 0xeea   :  { %v3084_v50 = vor.u32 1.1754944e-38, %v3083_v56  ;;  %vm3082_vm9 = vcmp.eq.f32.partialorder %v3081_v10, 8.507059e+37 }
 0xeeb   :  { %v4840_v1 = vsel %vm1297_vm1, %v4822_v7, 0.0 }
 0xefd   :  { %v4845_v22 = vpop.xlane.xlu0 %4844 }
 0xefe   :  { %v4887_v54 = vmul.f32 0.032258064, %v4845_v22  ;;  %v9580_v22 = vld [vmem:[%s14551_s3] sm:$0xff] }
 0xf00   :  { %9341 = vrsqrt.f32 %v4887_v54  ;;  %vm4948_vm4 = vcmp.eq.f32.partialorder %v4887_v54, inf  ;;  %v4951_v57 = vand.u32 2147483648, %v4887_v54  ;;  %vm4950_vm5 = vcmp.eq.f32.partialorder %v4887_v54, 0.0 }
 0xf01   :  { %9343 = vrcp.f32 %v3028_v20 }
 0xf06   :  { %v9342_v6 = vpop.eup %9341 }
 0xf07   :  { %v4942_v52 = vmul.f32 %v9342_v6, %v4887_v54  ;;  %v9344_v19 = vpop.eup %9343 }
 0xf08   :  { %v3073_v63 = vmul.f32 %v9344_v19, %v3028_v20  ;;  %vm3078_vm6 = vweird.f32 %v9344_v19  ;;  %v4903_v20 = vmul.f32 %v12025_v39, %v11982_v51  ;;  %v4792_v51 = vmul.f32 %v11811_v3, %v11164_v41  ;;  %v12103_v3 = vpop.xlane.xlu0 %4769 }
 0xf09   :  { %v4943_v59 = vmul.f32 %v9342_v6, %v4942_v52  ;;  %vm3079_vm8 = vmor %vm3077_vm7, %vm3078_vm6 }
 0xf0a   :  { %v3074_v48 = vsub.f32 1.0, %v3073_v63 }
 0xf0b   :  { %v4944_v43 = vmul.f32 0.5, %v4943_v59 }
 0xf0c   :  { %v3075_v62 = vmul.f32 %v9344_v19, %v3074_v48  ;;  %v12110_v48 = vpop.xlane.xlu1 %4754 }
 0xf0d   :  { %v4945_v40 = vsub.f32 1.5, %v4944_v43  ;;  %4760 = vadd.xlane.f32.xlu1 %v4759_v16  ;;  %v12091_v16 = vsub.f32 %v11678_v14, %v4792_v51  ;;  %v6148_v14 = vpop.f32.mrf.mxu2 }
 0xf0e   :  { %4841 = vadd.xlane.f32.xlu2 %v4840_v1  ;;  %v3076_v47 = vadd.f32 %v9344_v19, %v3075_v62 }
 0xf0f   :  { %v4946_v45 = vmul.f32 %v9342_v6, %v4945_v40  ;;  %v14659_v40 = vld [vmem:[#allocation30_spill] sm:$0xff] }
 0xf10   :  { %v3080_v15 = vsel %vm3079_vm8, %v9344_v19, %v3076_v47  ;;  %v12098_v1 = vadd.f32 %v11763_v38, %v14659_v40  ;;  %v6655_v47 = vsel %vm1985_vm2, %v11834_v13, 0 }
 0xf11   :  { %v4947_v61 = vmul.f32 %v4946_v45, %v4887_v54  ;;  %v3085_v35 = vsel %vm3082_vm9, %v3084_v50, %v3080_v15  ;;  %v6222_v15 = vpop.f32.mrf.mxu0 }
 0xf12   :  { %v4765_v45 = vsel %vm1297_vm1, %v12098_v1, 0.0 }
 0xf13   :  { %v4949_v9 = vsel %vm4948_vm4, %v4887_v54, %v4947_v61  ;;  %v2820_v54 = vmul.f32 %v12025_v39, %v11177_v49 }
 0xf14   :  { %v4952_v25 = vsel %vm4950_vm5, %v4951_v57, %v4949_v9  ;;  %v6111_v57 = vpop.f32.mrf.mxu1  ;;  %v6618_v9 = vsel %vm1985_vm2, %v11803_v8, 0 }
 0xf15   :  { %v5111_v18 = vadd.f32 1e-06, %v4952_v25  ;;  %v8969_v32 = vpop.trf.xlu2  ;;  %v3086_v6 = vmul.f32 %v3085_v35, %v2820_v54 }
 0xf16   :  { %8795 = vmatmul.msk.bf16.vlgmr.msra.gmra.mxu2 %vm1771_vm3, %v8969_v32 }
 0xf17   :  { %9345 = vrcp.f32 %v5111_v18  ;;  %v5166_v26 = vand.u32 2147483648, %v5111_v18  ;;  %v5164_v12 = vand.u32 2147483647, %v5111_v18  ;;  %vm5160_vm11 = vweird.f32 %v5111_v18 }
 0xf18   :  { %v3285_v49 = vadd.f32 %v12036_v42, %v3086_v6 }
 0xf19   :  { %v5167_v46 = vor.u32 1.1754944e-38, %v5166_v26  ;;  %vm5165_vm13 = vcmp.eq.f32.partialorder %v5164_v12, 8.507059e+37 }
 0xf1c   :  { %v6113_v62 = vpop.f32.mrf.mxu1 }
 0xf1d   :  { %v9346_v60 = vpop.eup %9345  ;;  %v8970_v58 = vpop.trf.xlu2 }
 0xf1e   :  { %8794 = vmatmul.msk.bf16.vlgmr.msrb.gmra.mxu1 %vm1771_vm3, %v8970_v58  ;;  %v5156_v36 = vmul.f32 %v9346_v60, %v5111_v18  ;;  %vm5161_vm10 = vweird.f32 %v9346_v60 }
 0xf1f   :  { %6756 = vmatpush.bf16.msrb.mxu1 %v9579_v33  ;;  %vm5162_vm12 = vmor %vm5160_vm11, %vm5161_vm10  ;;  %v6185_v33 = vpop.f32.mrf.mxu3 }
 0xf20   :  { %v5157_v28 = vsub.f32 1.0, %v5156_v36 }
 0xf22   :  { %v5158_v53 = vmul.f32 %v9346_v60, %v5157_v28 }
 0xf23   :  { %6757 = vmatpush.bf16.msrb.mxu1 %v9580_v22 }
 0xf24   :  { %v5159_v21 = vadd.f32 %v9346_v60, %v5158_v53  ;;  %v12123_v13 = vpop.f32.mrf.mxu1 }
 0xf26   :  { %4646 = vrot.lane.b32.xlu1 %v10434_v17, %s9589_s26  ;;  %4644 = vrot.lane.b32.xlu2 %v10432_v27, %s9589_s26  ;;  %v5163_v52 = vsel %vm5162_vm12, %v9346_v60, %v5159_v21  ;;  %v4824_v27 = vmul.f32 %v12091_v16, %v12091_v16 }
 0xf27   :  { %v5168_v24 = vsel %vm5165_vm13, %v5167_v46, %v5163_v52  ;;  %v6187_v21 = vpop.f32.mrf.mxu3  ;;  %v6224_v46 = vpop.f32.mrf.mxu0 }
 0xf28   :  { %v5169_v59 = vmul.f32 %v5168_v24, %v4903_v20  ;;  %v4846_v19 = vsel %vm1297_vm1, %v4824_v27, 0.0  ;;  %v6670_v27 = vpack.c.bf16 %v6148_v14, %v6111_v57  ;;  %v6671_v14 = vpack.c.bf16 %v6222_v15, %v6185_v33  ;;  %v14661_v21 = vld [vmem:[#allocation3_spill] sm:$0xff] }
 0xf29   :  { %v2819_v46 = vmul.f32 %v12025_v39, %v14661_v21 }
 0xf2a   :  { %v5367_v7 = vadd.f32 %v12036_v42, %v5169_v59 }
 0xf2c   :  { %v12084_v43 = vadd.f32 %v5367_v7, %v3285_v49  ;;  %v6261_v24 = vpop.f32.mrf.mxu1 }
 0xf2e   :  { %6704 = vrot.lane.b32.xlu2 %v10434_v17, %s9590_s1  ;;  %v2802_v17 = vmul.f32 0.032258064, %v11410_v44  ;;  %v6150_v44 = vpop.f32.mrf.mxu2 }
 0xf30   :  { %9347 = vrsqrt.f32 %v2802_v17  ;;  %vm2853_vm2 = vcmp.eq.f32.partialorder %v2802_v17, inf  ;;  %v2856_v35 = vand.u32 2147483648, %v2802_v17  ;;  %vm2855_vm14 = vcmp.eq.f32.partialorder %v2802_v17, 0.0 }
 0xf35   :  { %v8972_v58 = vpop.trf.xlu1 }
 0xf36   :  { %v9348_v63 = vpop.eup %9347  ;;  %v12125_v22 = vpop.f32.mrf.mxu2 }
 0xf37   :  { %v2847_v38 = vmul.f32 %v9348_v63, %v2802_v17  ;;  %v12112_v18 = vpop.permute.xlu2 %6698 }
 0xf39   :  { %v2848_v25 = vmul.f32 %v9348_v63, %v2847_v38 }
 0xf3b   :  { %v2849_v8 = vmul.f32 0.5, %v2848_v25 }
 0xf3d   :  { %v2850_v60 = vsub.f32 1.5, %v2849_v8  ;;  %v8973_v50 = vpop.trf.xlu1 }
 0xf3e   :  { %v6298_v59 = vpop.f32.mrf.mxu2 }
 0xf3f   :  { %v2851_v10 = vmul.f32 %v9348_v63, %v2850_v60  ;;  %v12119_v36 = vpop.permute.xlu2 %6700 }
 0xf41   :  { %v2852_v28 = vmul.f32 %v2851_v10, %v2802_v17 }
 0xf43   :  { %v2854_v53 = vsel %vm2853_vm2, %v2802_v17, %v2852_v28 }
 0xf44   :  { %v2857_v20 = vsel %vm2855_vm14, %v2856_v35, %v2854_v53 }
 0xf45   :  { %v3027_v6 = vadd.f32 1e-06, %v2857_v20 }
 0xf47   :  { %vm3062_vm4 = vweird.f32 %v3027_v6  ;;  %v3066_v10 = vand.u32 2147483647, %v3027_v6 }
 0xf49   :  { %vm3067_vm6 = vcmp.eq.f32.partialorder %v3066_v10, 8.507059e+37 }
 0xf50   :  { %4847 = vadd.xlane.f32.xlu1 %v4846_v19 }
 0xf57   :  { %4766 = vadd.xlane.f32.xlu2 %v4765_v45 }
 0xf67   :  { %v8975_v61 = vpop.trf.xlu0 }
 0xf68   :  { %8792 = vmatmul.msk.bf16.vlgmr.msrb.gmra.mxu3 %vm1771_vm3, %v8975_v61 }
 0xf69   :  { %6706 = vrot.lane.b32.xlu1 %v14617_v34, %s9590_s1  ;;  %6627 = vmatpush.bf16.msrb.mxu3 %v6618_v9 }
 0xf6f   :  { %v8976_v32 = vpop.trf.xlu0 }
 0xf70   :  { %8793 = vmatmul.msk.bf16.vlgmr.msra.gmra.mxu0 %vm1771_vm3, %v8976_v32 }
 0xf71   :  { %6664 = vmatpush.bf16.msra.mxu0 %v6655_v47  ;;  %v14660_v47 = vld [vmem:[#allocation42_spill] sm:$0xff] }
 0xf72   :  { %v2804_v8 = vmul.f32 0.032258064, %v14660_v47 }
 0xf74   :  { %vm2877_vm11 = vcmp.eq.f32.partialorder %v2804_v8, inf  ;;  %vm2879_vm12 = vcmp.eq.f32.partialorder %v2804_v8, 0.0 }
 0xf77   :  { %v8978_v56 = vpop.trf.xlu0 }
 0xf78   :  { %8796 = vmatmul.msk.bf16.vlgmr.msra.gmra.mxu3 %vm1771_vm3, %v8972_v58  ;;  %8799 = vmatmul.msk.bf16.vlgmr.msrb.gmra.mxu2 %vm1771_vm3, %v8978_v56  ;;  %v3068_v56 = vand.u32 2147483648, %v3027_v6 }
 0xf7a   :  { %v3069_v53 = vor.u32 1.1754944e-38, %v3068_v56 }
 0xf7f   :  { %v8979_v26 = vpop.trf.xlu0 }
 0xf80   :  { %8798 = vmatmul.msk.bf16.vlgmr.msra.gmra.mxu1 %vm1771_vm3, %v8979_v26  ;;  %8797 = vmatmul.msk.bf16.vlgmr.msrb.gmra.mxu0 %vm1771_vm3, %v8973_v50 }
 0xf81   :  { %v4842_v12 = vpop.xlane.xlu2 %4841 }
 0xf82   :  { %v4886_v54 = vmul.f32 0.032258064, %v4842_v12 }
 0xf84   :  { %9349 = vrsqrt.f32 %v4886_v54  ;;  %vm4936_vm15 = vcmp.eq.f32.partialorder %v4886_v54, inf  ;;  %v4939_v38 = vand.u32 2147483648, %v4886_v54  ;;  %vm4938_vm0 = vcmp.eq.f32.partialorder %v4886_v54, 0.0 }
 0xf85   :  { %9351 = vrcp.f32 %v3027_v6 }
 0xf87   :  { %v8981_v52 = vpop.trf.xlu0 }
 0xf88   :  { %8800 = vmatmul.msk.bf16.vlgmr.msrb.gmra.mxu3 %vm1771_vm3, %v8981_v52 }
 0xf8a   :  { %v9350_v49 = vpop.eup %9349 }
 0xf8b   :  { %v4930_v7 = vmul.f32 %v9350_v49, %v4886_v54  ;;  %v9352_v45 = vpop.eup %9351 }
 0xf8c   :  { %v3058_v61 = vmul.f32 %v9352_v45, %v3027_v6  ;;  %v4902_v6 = vmul.f32 %v12025_v39, %v12053_v4 }
 0xf8d   :  { %v4931_v51 = vmul.f32 %v9350_v49, %v4930_v7  ;;  %v12136_v7 = vpop.permute.xlu1 %4642 }
 0xf8e   :  { %v3059_v32 = vsub.f32 1.0, %v3058_v61 }
 0xf8f   :  { %v4932_v19 = vmul.f32 0.5, %v4931_v51  ;;  %v8982_v40 = vpop.trf.xlu0 }
 0xf90   :  { %8802 = vmatmul.msk.bf16.vlgmr.msrb.gmra.mxu1 %vm1297_vm1, %v6670_v27  ;;  %8801 = vmatmul.msk.bf16.vlgmr.msra.gmra.mxu0 %vm1771_vm3, %v8982_v40  ;;  %v3060_v57 = vmul.f32 %v9352_v45, %v3059_v32  ;;  %vm3063_vm3 = vweird.f32 %v9352_v45  ;;  %v6672_v27 = vpack.c.bf16 %v12125_v22, %v12123_v13  ;;  %v2880_v32 = vand.u32 2147483648, %v2804_v8 }
 0xf91   :  { %v4933_v17 = vsub.f32 1.5, %v4932_v19  ;;  %vm3064_vm5 = vmor %vm3062_vm4, %vm3063_vm3 }
 0xf92   :  { %v3061_v60 = vadd.f32 %v9352_v45, %v3060_v57 }
 0xf93   :  { %v4934_v63 = vmul.f32 %v9350_v49, %v4933_v17 }
 0xf94   :  { %v3065_v50 = vsel %vm3064_vm5, %v9352_v45, %v3061_v60 }
 0xf95   :  { %v4935_v9 = vmul.f32 %v4934_v63, %v4886_v54  ;;  %v3070_v35 = vsel %vm3067_vm6, %v3069_v53, %v3065_v50  ;;  %v12145_v61 = vpop.xlane.xlu1 %4760 }
 0xf96   :  { %v3071_v24 = vmul.f32 %v3070_v35, %v2819_v46 }
 0xf97   :  { %v4937_v25 = vsel %vm4936_vm15, %v4886_v54, %v4935_v9 }
 0xf98   :  { %v4940_v44 = vsel %vm4938_vm0, %v4939_v38, %v4937_v25  ;;  %v3284_v40 = vadd.f32 %v12036_v42, %v3071_v24 }
 0xf99   :  { %v5110_v62 = vadd.f32 1e-06, %v4940_v44 }
 0xf9b   :  { %9353 = vrcp.f32 %v5110_v62  ;;  %v5151_v12 = vand.u32 2147483648, %v5110_v62  ;;  %v5149_v15 = vand.u32 2147483647, %v5110_v62  ;;  %vm5145_vm8 = vweird.f32 %v5110_v62  ;;  %v12151_v47 = vpop.f32.mrf.mxu1 }
 0xf9c   :  { %9355 = vrsqrt.f32 %v2804_v8 }
 0xf9d   :  { %v5152_v52 = vor.u32 1.1754944e-38, %v5151_v12  ;;  %vm5150_vm10 = vcmp.eq.f32.partialorder %v5149_v15, 8.507059e+37  ;;  %v12147_v25 = vpop.permute.xlu1 %4646 }
 0xfa0   :  { %8803 = vmatmul.msk.bf16.gmra.mxu1 %vm1297_vm1, %v6671_v14  ;;  %v12149_v14 = vpop.f32.mrf.mxu2 }
 0xfa1   :  { %v9354_v58 = vpop.eup %9353 }
 0xfa2   :  { %v5141_v28 = vmul.f32 %v9354_v58, %v5110_v62  ;;  %vm5146_vm7 = vweird.f32 %v9354_v58  ;;  %v9356_v54 = vpop.eup %9355 }
 0xfa3   :  { %vm5147_vm9 = vmor %vm5145_vm8, %vm5146_vm7  ;;  %v2871_v49 = vmul.f32 %v9356_v54, %v2804_v8  ;;  %v6409_v50 = vpop.f32.mrf.mxu1 }
 0xfa4   :  { %v5142_v26 = vsub.f32 1.0, %v5141_v28 }
 0xfa5   :  { %v2872_v17 = vmul.f32 %v9356_v54, %v2871_v49 }
 0xfa6   :  { %v5143_v33 = vmul.f32 %v9354_v58, %v5142_v26 }
 0xfa7   :  { %v2873_v4 = vmul.f32 0.5, %v2872_v17 }
 0xfa8   :  { %v5144_v20 = vadd.f32 %v9354_v58, %v5143_v33  ;;  %v6446_v10 = vpop.f32.mrf.mxu2 }
 0xfa9   :  { %v2874_v9 = vsub.f32 1.5, %v2873_v4 }
 0xfaa   :  { %v5148_v59 = vsel %vm5147_vm9, %v9354_v58, %v5144_v20 }
 0xfab   :  { %v5153_v51 = vsel %vm5150_vm10, %v5152_v52, %v5148_v59  ;;  %v2875_v38 = vmul.f32 %v9356_v54, %v2874_v9 }
 0xfac   :  { %v5154_v19 = vmul.f32 %v5153_v51, %v4902_v6 }
 0xfad   :  { %v2876_v44 = vmul.f32 %v2875_v38, %v2804_v8  ;;  %v14662_v38 = vld [vmem:[#allocation33_spill] sm:$0xff] }
 0xfae   :  { %v5366_v45 = vadd.f32 %v12036_v42, %v5154_v19 }
 0xfaf   :  { %v2878_v13 = vsel %vm2877_vm11, %v2804_v8, %v2876_v44  ;;  %v2821_v44 = vmul.f32 %v12025_v39, %v14662_v38 }
 0xfb0   :  { %8804 = vmatmul.msk.bf16.gmra.mxu1 %vm1297_vm1, %v6672_v27  ;;  %v12143_v63 = vadd.f32 %v5366_v45, %v3284_v40  ;;  %v2881_v57 = vsel %vm2879_vm12, %v2880_v32, %v2878_v13 }
 0xfb1   :  { %v3029_v60 = vadd.f32 1e-06, %v2881_v57 }
 0xfb3   :  { %v3098_v59 = vand.u32 2147483648, %v3029_v60  ;;  %vm3092_vm15 = vweird.f32 %v3029_v60  ;;  %v3096_v49 = vand.u32 2147483647, %v3029_v60 }
 0xfb5   :  { %v3099_v40 = vor.u32 1.1754944e-38, %v3098_v59  ;;  %vm3097_vm3 = vcmp.eq.f32.partialorder %v3096_v49, 8.507059e+37  ;;  %v14663_v59 = vld [vmem:[#allocation8_spill] sm:$0xff] }
 0xfc3   :  { %v4848_v22 = vpop.xlane.xlu1 %4847 }
 0xfc4   :  { %v4888_v62 = vmul.f32 0.032258064, %v4848_v22 }
 0xfc6   :  { %9357 = vrsqrt.f32 %v4888_v62  ;;  %vm4960_vm13 = vcmp.eq.f32.partialorder %v4888_v62, inf  ;;  %v4963_v8 = vand.u32 2147483648, %v4888_v62  ;;  %vm4962_vm2 = vcmp.eq.f32.partialorder %v4888_v62, 0.0 }
 0xfc7   :  { %9359 = vrcp.f32 %v3029_v60 }
 0xfcc   :  { %v9358_v58 = vpop.eup %9357 }
 0xfcd   :  { %v4954_v56 = vmul.f32 %v9358_v58, %v4888_v62  ;;  %v9360_v53 = vpop.eup %9359 }
 0xfce   :  { %v3088_v15 = vmul.f32 %v9360_v53, %v3029_v60  ;;  %vm3093_vm14 = vweird.f32 %v9360_v53 }
 0xfcf   :  { %v4955_v28 = vmul.f32 %v9358_v58, %v4954_v56  ;;  %vm3094_vm0 = vmor %vm3092_vm15, %vm3093_vm14 }
 0xfd0   :  { %v3089_v46 = vsub.f32 1.0, %v3088_v15 }
 0xfd1   :  { %v4956_v26 = vmul.f32 0.5, %v4955_v28 }
 0xfd2   :  { %v3090_v52 = vmul.f32 %v9360_v53, %v3089_v46 }
 0xfd3   :  { %v4957_v12 = vsub.f32 1.5, %v4956_v26 }
 0xfd4   :  { %v3091_v6 = vadd.f32 %v9360_v53, %v3090_v52 }
 0xfd5   :  { %v4958_v33 = vmul.f32 %v9358_v58, %v4957_v12 }
 0xfd6   :  { %v3095_v27 = vsel %vm3094_vm0, %v9360_v53, %v3091_v6 }
 0xfd7   :  { %v4959_v35 = vmul.f32 %v4958_v33, %v4888_v62  ;;  %v3100_v9 = vsel %vm3097_vm3, %v3099_v40, %v3095_v27 }
 0xfd8   :  { %v3101_v57 = vmul.f32 %v3100_v9, %v2821_v44  ;;  %v14665_v9 = vld [vmem:[#allocation14_spill] sm:$0xff] }
 0xfd9   :  { %v4961_v54 = vsel %vm4960_vm13, %v4888_v62, %v4959_v35  ;;  %v4904_v62 = vmul.f32 %v12025_v39, %v12091_v16 }
 0xfda   :  { %v4964_v21 = vsel %vm4962_vm2, %v4963_v8, %v4961_v54  ;;  %v3286_v50 = vadd.f32 %v12036_v42, %v3101_v57  ;;  %v6674_v8 = vpack.c.bf16 %v12149_v14, %v12151_v47  ;;  %v14664_v47 = vld [vmem:[#allocation10_spill] sm:$0xff]  ;;  %v14667_v57 = vld [vmem:[#allocation20_spill] sm:$0xff] }
 0xfdb   :  { %v5112_v20 = vadd.f32 1e-06, %v4964_v21 }
 0xfdd   :  { %9361 = vrcp.f32 %v5112_v20  ;;  %v5181_v45 = vand.u32 2147483648, %v5112_v20  ;;  %v5179_v4 = vand.u32 2147483647, %v5112_v20  ;;  %vm5175_vm5 = vweird.f32 %v5112_v20 }
 0xfdf   :  { %v5182_v32 = vor.u32 1.1754944e-38, %v5181_v45  ;;  %vm5180_vm7 = vcmp.eq.f32.partialorder %v5179_v4, 8.507059e+37 }
 0xfe3   :  { %v9362_v24 = vpop.eup %9361 }
 0xfe4   :  { %v5171_v51 = vmul.f32 %v9362_v24, %v5112_v20  ;;  %vm5176_vm4 = vweird.f32 %v9362_v24 }
 0xfe5   :  { %vm5177_vm6 = vmor %vm5175_vm5, %vm5176_vm4 }
 0xfe6   :  { %v5172_v19 = vsub.f32 1.0, %v5171_v51 }
 0xfe8   :  { %v5173_v17 = vmul.f32 %v9362_v24, %v5172_v19 }
 0xfea   :  { %v5174_v13 = vadd.f32 %v9362_v24, %v5173_v17 }
 0xfeb   :  { %v6333_v22 = vpop.f32.mrf.mxu3 }
 0xfec   :  { %v5178_v60 = vsel %vm5177_vm6, %v9362_v24, %v5174_v13 }
 0xfed   :  { %v6370_v58 = vpop.f32.mrf.mxu0  ;;  %v5183_v56 = vsel %vm5180_vm7, %v5182_v32, %v5178_v60 }
 0xfee   :  { %v6673_v10 = vpack.c.bf16 %v6370_v58, %v6333_v22  ;;  %v5184_v28 = vmul.f32 %v5183_v56, %v4904_v62  ;;  %v14666_v22 = vld [vmem:[#allocation4_spill] sm:$0xff] }
 0xff0   :  { %8805 = vmatmul.msk.bf16.gmra.mxu1 %vm1297_vm1, %v6673_v10  ;;  %v5368_v26 = vadd.f32 %v12036_v42, %v5184_v28  ;;  %v14668_v10 = vld [vmem:[#allocation26_spill] sm:$0xff] }
 0xff2   :  { %v12160_v53 = vadd.f32 %v5368_v26, %v3286_v50  ;;  %v14669_v26 = vld [vmem:[#allocation22_spill] sm:$0xff] }
 0xff3   :  { %v6335_v12 = vpop.f32.mrf.mxu3 }
 0xff5   :  { %v6372_v33 = vpop.f32.mrf.mxu0 }
 0xffb   :  { %v6481_v15 = vpop.f32.mrf.mxu3  ;;  %v6592_v35 = vpop.f32.mrf.mxu2 }
 0xffd   :  { %v6555_v39 = vpop.f32.mrf.mxu1  ;;  %v6518_v16 = vpop.f32.mrf.mxu0 }
 0xffe   :  { %v6675_v6 = vpack.c.bf16 %v6518_v16, %v6481_v15  ;;  %v6676_v4 = vpack.c.bf16 %v6592_v35, %v6555_v39  ;;  %v4793_v15 = vmul.f32 %v12110_v48, %v11164_v41 }
0x1000   :  { %8806 = vmatmul.msk.bf16.gmra.mxu1 %vm1297_vm1, %v6674_v8  ;;  %v12199_v35 = vsub.f32 %v11951_v11, %v4793_v15 }
0x1002   :  { %v4825_v39 = vmul.f32 %v12199_v35, %v12199_v35 }
0x1003   :  { %v6483_v54 = vpop.f32.mrf.mxu3  ;;  %v6594_v21 = vpop.f32.mrf.mxu2 }
0x1004   :  { %v4849_v16 = vsel %vm1297_vm1, %v4825_v39, 0.0  ;;  %v4795_v39 = vmul.f32 %v12145_v61, %v11164_v41 }
0x1005   :  { %v6557_v46 = vpop.f32.mrf.mxu1  ;;  %v6520_v20 = vpop.f32.mrf.mxu0 }
0x1006   :  { %v14671_v46 = vld [vmem:[#allocation29_spill] sm:$0xff]  ;;  %v12215_v20 = vpop.permute.xlu2 %4644 }
0x100b   :  { %v6629_v52 = vpop.f32.mrf.mxu3 }
0x100d   :  { %v6759_v42 = vpop.f32.mrf.mxu1  ;;  %v6666_v24 = vpop.f32.mrf.mxu0 }
0x100e   :  { %v6760_v49 = vadd.f32 %v6759_v42, %v14663_v59  ;;  %v6677_v32 = vpack.c.bf16 %v6666_v24, %v6629_v52  ;;  %v12222_v24 = vpop.permute.xlu2 %6704 }
0x1010   :  { %8807 = vmatmul.msk.bf16.gmra.mxu1 %vm1297_vm1, %v6675_v6  ;;  %v6799_v51 = vsel %vm1297_vm1, %v6760_v49, 0.0  ;;  %v14672_v6 = vld [vmem:[#allocation25_spill] sm:$0xff] }
0x1011   :  { %6800 = vadd.xlane.f32.xlu0 %v6799_v51  ;;  %v14673_v51 = vld [vmem:[#allocation32_spill] sm:$0xff] }
0x1013   :  { %v6631_v27 = vpop.f32.mrf.mxu3 }
0x1015   :  { %v6761_v19 = vpop.f32.mrf.mxu1  ;;  %v6668_v14 = vpop.f32.mrf.mxu0 }
0x1016   :  { %v6762_v40 = vadd.f32 %v6761_v19, %v14664_v47  ;;  %v12229_v14 = vpop.xlane.xlu2 %4766 }
0x1018   :  { %v6802_v45 = vsel %vm1297_vm1, %v6762_v40, 0.0 }
0x1019   :  { %6803 = vadd.xlane.f32.xlu2 %v6802_v45 }
0x101d   :  { %v6764_v17 = vpop.f32.mrf.mxu1 }
0x101e   :  { %v12171_v38 = vadd.f32 %v6764_v17, %v14665_v9 }
0x1020   :  { %8808 = vmatmul.msk.bf16.gmra.mxu1 %vm1297_vm1, %v6676_v4  ;;  %v6805_v44 = vsel %vm1297_vm1, %v12171_v38, 0.0  ;;  %v14674_v4 = vld [vmem:[#allocation28_spill] sm:$0xff] }
0x1021   :  { %6806 = vadd.xlane.f32.xlu2 %v6805_v44 }
0x1025   :  { %v6766_v13 = vpop.f32.mrf.mxu1  ;;  %4650 = vrot.lane.b32.xlu0 %v14666_v22, %s9589_s26 }
0x1026   :  { %v12192_v12 = vadd.f32 %v6766_v13, %v14669_v26 }
0x1028   :  { %v6808_v33 = vsel %vm1297_vm1, %v12192_v12, 0.0 }
0x102d   :  { %v6769_v62 = vpop.f32.mrf.mxu1 }
0x102e   :  { %v12179_v60 = vadd.f32 %v6769_v62, %v14667_v57  ;;  %v14675_v57 = vld [vmem:[#allocation5_spill] sm:$0xff] }
0x1030   :  { %8809 = vmatmul.msk.bf16.gmra.mxu1 %vm1297_vm1, %v6677_v32  ;;  %v6811_v58 = vsel %vm1297_vm1, %v12179_v60, 0.0 }
0x1031   :  { %6812 = vadd.xlane.f32.xlu1 %v6811_v58  ;;  %v12244_v58 = vadd.f32 %v14675_v57, %v12063_v37 }
0x1035   :  { %v6771_v56 = vpop.f32.mrf.mxu1 }
0x1036   :  { %v12185_v28 = vadd.f32 %v6771_v56, %v14668_v10 }
0x1038   :  { %v6814_v50 = vsel %vm1297_vm1, %v12185_v28, 0.0 }
0x1039   :  { %6815 = vadd.xlane.f32.xlu1 %v6814_v50  ;;  %4648 = vrot.lane.b32.xlu2 %v14617_v34, %s9589_s26  ;;  %v14670_v34 = vld [vmem:[#allocation9_spill] sm:$0xff] }
0x103a   :  { %v12206_v8 = vadd.f32 %v14670_v34, %v12136_v7  ;;  %v12263_v34 = vsub.f32 %v12057_v5, %v4795_v39 }
0x103c   :  { %v4774_v54 = vsel %vm1297_vm1, %v12206_v8, 0.0 }
0x104f   :  { %6809 = vadd.xlane.f32.xlu0 %v6808_v33 }
0x1062   :  { %4850 = vadd.xlane.f32.xlu2 %v4849_v16 }
0x106a   :  { %4775 = vadd.xlane.f32.xlu2 %v4774_v54 }
0x106d   :  { %v6774_v21 = vpop.f32.mrf.mxu1 }
0x106e   :  { %v12211_v48 = vadd.f32 %v6774_v21, %v14671_v46  ;;  %v12266_v21 = vpop.permute.xlu1 %6706  ;;  %v4827_v46 = vmul.f32 %v12263_v34, %v12263_v34 }
0x1070   :  { %v6817_v11 = vsel %vm1297_vm1, %v12211_v48, 0.0 }
0x1071   :  { %6818 = vadd.xlane.f32.xlu0 %v6817_v11  ;;  %v4855_v11 = vsel %vm1297_vm1, %v4827_v46, 0.0 }
0x1075   :  { %v6776_v52 = vpop.f32.mrf.mxu1 }
0x1076   :  { %v12218_v42 = vadd.f32 %v6776_v52, %v14672_v6 }
0x1078   :  { %v6820_v7 = vsel %vm1297_vm1, %v12218_v42, 0.0 }
0x1079   :  { %6821 = vadd.xlane.f32.xlu0 %v6820_v7  ;;  %v14676_v7 = vld [vmem:[#allocation47_spill] sm:$0xff] }
0x107d   :  { %v6779_v59 = vpop.f32.mrf.mxu1 }
0x107e   :  { %v12225_v27 = vadd.f32 %v6779_v59, %v14673_v51  ;;  %v2805_v59 = vmul.f32 0.032258064, %v14676_v7 }
0x1080   :  { %v6823_v19 = vsel %vm1297_vm1, %v12225_v27, 0.0  ;;  %9363 = vrsqrt.f32 %v2805_v59  ;;  %vm2889_vm8 = vcmp.eq.f32.partialorder %v2805_v59, inf  ;;  %vm2891_vm9 = vcmp.eq.f32.partialorder %v2805_v59, 0.0 }
0x1081   :  { %6824 = vadd.xlane.f32.xlu0 %v6823_v19 }
0x1084   :  { %v6801_v47 = vpop.xlane.xlu0 %6800 }
0x1085   :  { %v6847_v45 = vmul.f32 %v6801_v47, %v11164_v41  ;;  %v6781_v17 = vpop.f32.mrf.mxu1 }
0x1086   :  { %v12233_v9 = vadd.f32 %v6781_v17, %v14674_v4  ;;  %v9364_v4 = vpop.eup %9363 }
0x1087   :  { %v12235_v44 = vsub.f32 %v6760_v49, %v6847_v45  ;;  %v4771_v49 = vsel %vm1297_vm1, %v12244_v58, 0.0  ;;  %v14677_v45 = vld [vmem:[#allocation13_spill] sm:$0xff] }
0x1088   :  { %v6826_v13 = vsel %vm1297_vm1, %v12233_v9, 0.0  ;;  %v12283_v17 = vadd.f32 %v14677_v45, %v12147_v25 }
0x1089   :  { %6827 = vadd.xlane.f32.xlu1 %v6826_v13  ;;  %v6879_v32 = vmul.f32 %v12235_v44, %v12235_v44 }
0x108b   :  { %v6895_v62 = vsel %vm1297_vm1, %v6879_v32, 0.0  ;;  %v2883_v32 = vmul.f32 %v9364_v4, %v2805_v59 }
0x108c   :  { %v6804_v56 = vpop.xlane.xlu2 %6803  ;;  %6896 = vadd.xlane.f32.xlu0 %v6895_v62  ;;  %v4798_v62 = vmul.f32 %v12103_v3, %v11164_v41 }
0x108d   :  { %v6848_v10 = vmul.f32 %v6804_v56, %v11164_v41  ;;  %v2884_v56 = vmul.f32 %v9364_v4, %v2883_v32 }
0x108e   :  { %v12295_v25 = vsub.f32 %v11994_v30, %v4798_v62 }
0x108f   :  { %v12247_v50 = vsub.f32 %v6762_v40, %v6848_v10  ;;  %v2885_v3 = vmul.f32 0.5, %v2884_v56 }
0x1090   :  { %v4830_v30 = vmul.f32 %v12295_v25, %v12295_v25 }
0x1091   :  { %4772 = vadd.xlane.f32.xlu1 %v4771_v49  ;;  %v6880_v26 = vmul.f32 %v12247_v50, %v12247_v50 }
0x1093   :  { %v6898_v33 = vsel %vm1297_vm1, %v6880_v26, 0.0 }
0x1094   :  { %v6807_v15 = vpop.xlane.xlu2 %6806  ;;  %6899 = vadd.xlane.f32.xlu0 %v6898_v33  ;;  %v4794_v33 = vmul.f32 %v12010_v23, %v11164_v41  ;;  %v4796_v23 = vmul.f32 %v12046_v2, %v11164_v41 }
0x1095   :  { %v6849_v37 = vmul.f32 %v6807_v15, %v11164_v41 }
0x1097   :  { %v12258_v16 = vsub.f32 %v12171_v38, %v6849_v37  ;;  %v6784_v38 = vpop.f32.mrf.mxu1  ;;  %v12310_v37 = vsub.f32 %v11933_v0, %v4794_v33  ;;  %v12322_v0 = vsub.f32 %v11947_v31, %v4796_v23 }
0x1099   :  { %v6881_v40 = vmul.f32 %v12258_v16, %v12258_v16 }
0x109b   :  { %v6901_v54 = vsel %vm1297_vm1, %v6881_v40, 0.0  ;;  %v2886_v40 = vsub.f32 1.5, %v2885_v3 }
0x109c   :  { %6902 = vadd.xlane.f32.xlu1 %v6901_v54  ;;  %v4864_v54 = vsel %vm1297_vm1, %v4830_v30, 0.0  ;;  %v4649_v46 = vpop.permute.xlu2 %4648 }
0x109f   :  { %v6786_v19 = vpop.f32.mrf.mxu1 }
0x10a0   :  { %v12328_v2 = vadd.f32 %v6786_v19, %v12119_v36 }
0x10a2   :  { %v6832_v32 = vsel %vm1297_vm1, %v12328_v2, 0.0 }
0x10a4   :  { %v6813_v61 = vpop.xlane.xlu1 %6812  ;;  %4856 = vadd.xlane.f32.xlu1 %v4855_v11  ;;  %v4826_v11 = vmul.f32 %v12310_v37, %v12310_v37 }
0x10a7   :  { %v6789_v13 = vpop.f32.mrf.mxu1 }
0x10a8   :  { %6708 = vrot.lane.b32.xlu0 %v14666_v22, %s9590_s1  ;;  %v12285_v22 = vpop.permute.xlu0 %4650  ;;  %v12292_v57 = vadd.f32 %v6789_v13, %v12048_v29 }
0x10aa   :  { %v6835_v26 = vsel %vm1297_vm1, %v12292_v57, 0.0 }
0x10ac   :  { %v6816_v52 = vpop.xlane.xlu1 %6815 }
0x10ad   :  { %v6852_v5 = vmul.f32 %v6816_v52, %v11164_v41  ;;  %v2887_v52 = vmul.f32 %v9364_v4, %v2886_v40  ;;  %v2892_v4 = vand.u32 2147483648, %v2805_v59 }
0x10af   :  { %v12275_v6 = vsub.f32 %v12185_v28, %v6852_v5  ;;  %v4780_v28 = vsel %vm1297_vm1, %v12283_v17, 0.0  ;;  %v4852_v5 = vsel %vm1297_vm1, %v4826_v11, 0.0  ;;  %v6791_v19 = vpop.f32.mrf.mxu1 }
0x10b0   :  { %v12342_v62 = vadd.f32 %v6791_v19, %v12222_v24  ;;  %v14678_v24 = vld [vmem:[#allocation11_spill] sm:$0xff] }
0x10b1   :  { %v6884_v51 = vmul.f32 %v12275_v6, %v12275_v6 }
0x10b3   :  { %v6910_v47 = vsel %vm1297_vm1, %v6884_v51, 0.0  ;;  %v2888_v51 = vmul.f32 %v2887_v52, %v2805_v59 }
0x10b4   :  { %6911 = vadd.xlane.f32.xlu1 %v6910_v47  ;;  %v4828_v47 = vmul.f32 %v12322_v0, %v12322_v0 }
0x10b5   :  { %v2890_v31 = vsel %vm2889_vm8, %v2805_v59, %v2888_v51 }
0x10b6   :  { %v4858_v36 = vsel %vm1297_vm1, %v4828_v47, 0.0 }
0x10bc   :  { %4781 = vadd.xlane.f32.xlu1 %v4780_v28  ;;  %v2893_v28 = vsel %vm2891_vm9, %v2892_v4, %v2890_v31 }
0x10c2   :  { %v6810_v10 = vpop.xlane.xlu0 %6809 }
0x10c3   :  { %v6850_v49 = vmul.f32 %v6810_v10, %v11164_v41 }
0x10c4   :  { %6836 = vadd.xlane.f32.xlu1 %v6835_v26  ;;  %v6838_v26 = vsel %vm1297_vm1, %v12342_v62, 0.0 }
0x10c5   :  { %v12303_v15 = vsub.f32 %v12192_v12, %v6850_v49  ;;  %v12317_v12 = vadd.f32 %v6784_v38, %v12112_v18  ;;  %v6851_v18 = vmul.f32 %v6813_v61, %v11164_v41  ;;  %v12339_v61 = vadd.f32 1e-06, %v2893_v28 }
0x10c6   :  { %v4797_v28 = vmul.f32 %v12229_v14, %v11164_v41 }
0x10c7   :  { %v6882_v29 = vmul.f32 %v12303_v15, %v12303_v15  ;;  %v6829_v7 = vsel %vm1297_vm1, %v12317_v12, 0.0  ;;  %v12334_v13 = vsub.f32 %v12179_v60, %v6851_v18  ;;  %vm3107_vm13 = vweird.f32 %v12339_v61 }
0x10c8   :  { %v12386_v14 = vsub.f32 %v12098_v1, %v4797_v28  ;;  %v3113_v1 = vand.u32 2147483648, %v12339_v61 }
0x10c9   :  { %v6904_v39 = vsel %vm1297_vm1, %v6882_v29, 0.0  ;;  %v6883_v59 = vmul.f32 %v12334_v13, %v12334_v13  ;;  %v12352_v29 = vadd.f32 %v14678_v24, %v12215_v20 }
0x10ca   :  { %6905 = vadd.xlane.f32.xlu2 %v6904_v39 }
0x10cb   :  { %v6907_v49 = vsel %vm1297_vm1, %v6883_v59, 0.0  ;;  %v4777_v52 = vsel %vm1297_vm1, %v12352_v29, 0.0 }
0x10cc   :  { %4865 = vadd.xlane.f32.xlu1 %v4864_v54 }
0x10d2   :  { %4853 = vadd.xlane.f32.xlu0 %v4852_v5  ;;  %6830 = vadd.xlane.f32.xlu2 %v6829_v7 }
0x10d5   :  { %v4851_v38 = vpop.xlane.xlu2 %4850 }
0x10d6   :  { %v4889_v45 = vmul.f32 0.032258064, %v4851_v38 }
0x10d8   :  { %9365 = vrsqrt.f32 %v4889_v45  ;;  %vm4972_vm10 = vcmp.eq.f32.partialorder %v4889_v45, inf  ;;  %v4975_v7 = vand.u32 2147483648, %v4889_v45  ;;  %vm4974_vm11 = vcmp.eq.f32.partialorder %v4889_v45, 0.0 }
0x10d9   :  { %9367 = vrcp.f32 %v12339_v61 }
0x10da   :  { %6833 = vadd.xlane.f32.xlu0 %v6832_v32  ;;  %4859 = vadd.xlane.f32.xlu2 %v4858_v36  ;;  %v14679_v32 = vld [vmem:[#allocation15_spill] sm:$0xff] }
0x10db   :  { %v12371_v36 = vadd.f32 %v14679_v32, %v4649_v46 }
0x10dd   :  { %v4783_v46 = vsel %vm1297_vm1, %v12371_v36, 0.0 }
0x10de   :  { %v9366_v56 = vpop.eup %9365 }
0x10df   :  { %v4966_v10 = vmul.f32 %v9366_v56, %v4889_v45  ;;  %v12355_v40 = vpop.eup %9367 }
0x10e0   :  { %v3103_v20 = vmul.f32 %v12355_v40, %v12339_v61  ;;  %vm3108_vm12 = vweird.f32 %v12355_v40 }
0x10e1   :  { %v4967_v60 = vmul.f32 %v9366_v56, %v4966_v10  ;;  %vm12404_vm2 = vmor %vm3107_vm13, %vm3108_vm12 }
0x10e2   :  { %6908 = vadd.xlane.f32.xlu0 %v6907_v49  ;;  %6839 = vadd.xlane.f32.xlu2 %v6838_v26  ;;  %v3104_v4 = vsub.f32 1.0, %v3103_v20 }
0x10e3   :  { %v4968_v33 = vmul.f32 0.5, %v4967_v60  ;;  %v14681_v60 = vld [vmem:[#allocation50_spill] sm:$0xff] }
0x10e4   :  { %v6819_v3 = vpop.xlane.xlu0 %6818  ;;  %v3105_v10 = vmul.f32 %v12355_v40, %v3104_v4  ;;  %v12383_v49 = vmul.f32 0.032258064, %v14681_v60  ;;  %v14685_v60 = vld [vmem:[#allocation44_spill] sm:$0xff] }
0x10e5   :  { %v4969_v30 = vsub.f32 1.5, %v4968_v33  ;;  %v6853_v39 = vmul.f32 %v6819_v3, %v11164_v41 }
0x10e6   :  { %v3106_v24 = vadd.f32 %v12355_v40, %v3105_v10  ;;  %vm2937_vm8 = vcmp.eq.f32.partialorder %v12383_v49, inf }
0x10e7   :  { %v4970_v54 = vmul.f32 %v9366_v56, %v4969_v30  ;;  %v12358_v23 = vsub.f32 %v12211_v48, %v6853_v39 }
0x10e9   :  { %v4971_v11 = vmul.f32 %v4970_v54, %v4889_v45  ;;  %v6885_v5 = vmul.f32 %v12358_v23, %v12358_v23  ;;  %v4829_v54 = vmul.f32 %v12386_v14, %v12386_v14 }
0x10ea   :  { %4778 = vadd.xlane.f32.xlu0 %v4777_v52 }
0x10eb   :  { %v4973_v51 = vsel %vm4972_vm10, %v4889_v45, %v4971_v11  ;;  %v6913_v18 = vsel %vm1297_vm1, %v6885_v5, 0.0  ;;  %v14680_v45 = vld [vmem:[#allocation43_spill] sm:$0xff]  ;;  %v3111_v11 = vand.u32 2147483647, %v12339_v61  ;;  %v4861_v61 = vsel %vm1297_vm1, %v4829_v54, 0.0 }
0x10ec   :  { %v4976_v38 = vsel %vm4974_vm11, %v4975_v7, %v4973_v51  ;;  %6914 = vadd.xlane.f32.xlu2 %v6913_v18  ;;  %v6822_v48 = vpop.xlane.xlu0 %6821  ;;  %v12377_v59 = vmul.f32 0.032258064, %v14680_v45  ;;  %v3114_v51 = vor.u32 1.1754944e-38, %v3113_v1  ;;  %v14686_v1 = vld [vmem:[#allocation6_spill] sm:$0xff]  ;;  %vm2939_vm10 = vcmp.eq.f32.partialorder %v12383_v49, 0.0 }
0x10ed   :  { %v5113_v47 = vadd.f32 1e-06, %v4976_v38  ;;  %v6854_v31 = vmul.f32 %v6822_v48, %v11164_v41  ;;  %vm3112_vm15 = vcmp.eq.f32.partialorder %v3111_v11, 8.507059e+37 }
0x10ee   :  { %vm2913_vm6 = vcmp.eq.f32.partialorder %v12377_v59, inf  ;;  %vm2915_vm9 = vcmp.eq.f32.partialorder %v12377_v59, 0.0 }
0x10ef   :  { %9369 = vrcp.f32 %v5113_v47  ;;  %v12374_v19 = vsub.f32 %v12218_v42, %v6854_v31  ;;  %v5196_v7 = vand.u32 2147483648, %v5113_v47  ;;  %v5194_v38 = vand.u32 2147483647, %v5113_v47 }
0x10f0   :  { %9371 = vrsqrt.f32 %v12377_v59  ;;  %vm5190_vm0 = vweird.f32 %v5113_v47 }
0x10f1   :  { %v6886_v56 = vmul.f32 %v12374_v19, %v12374_v19  ;;  %9373 = vrsqrt.f32 %v12383_v49  ;;  %vm5195_vm4 = vcmp.eq.f32.partialorder %v5194_v38, 8.507059e+37 }
0x10f3   :  { %v6916_v42 = vsel %vm1297_vm1, %v6886_v56, 0.0  ;;  %v14684_v56 = vld [vmem:[#allocation38_spill] sm:$0xff] }
0x10f4   :  { %4784 = vadd.xlane.f32.xlu2 %v4783_v46  ;;  %6917 = vadd.xlane.f32.xlu0 %v6916_v42  ;;  %v6825_v26 = vpop.xlane.xlu0 %6824  ;;  %v12427_v46 = vmul.f32 0.032258064, %v14685_v60 }
0x10f5   :  { %v9370_v33 = vpop.eup %9369  ;;  %v6855_v3 = vmul.f32 %v6825_v26, %v11164_v41  ;;  %v5197_v26 = vor.u32 1.1754944e-38, %v5196_v7 }
0x10f6   :  { %v5186_v30 = vmul.f32 %v9370_v33, %v5113_v47  ;;  %vm5191_vm14 = vweird.f32 %v9370_v33  ;;  %v12413_v48 = vpop.eup %9371  ;;  %9375 = vrsqrt.f32 %v12427_v46  ;;  %vm2949_vm13 = vcmp.eq.f32.partialorder %v12427_v46, inf }
0x10f7   :  { %v12398_v39 = vsub.f32 %v12225_v27, %v6855_v3  ;;  %v3110_v27 = vsel %vm12404_vm2, %v12355_v40, %v3106_v24  ;;  %v12417_v4 = vpop.eup %9373  ;;  %v12422_v40 = vld [vmem:[%s14548_s8 + $0x1] ss:$0 sm:$0xff]  ;;  %vm5192_vm3 = vmor %vm5190_vm0, %vm5191_vm14  ;;  %v2907_v3 = vmul.f32 %v12413_v48, %v12377_v59  ;;  %vm2951_vm0 = vcmp.eq.f32.partialorder %v12427_v46, 0.0 }
0x10f8   :  { %v5187_v5 = vsub.f32 1.0, %v5186_v30  ;;  %v3115_v32 = vsel %vm3112_vm15, %v3114_v51, %v3110_v27  ;;  %v2822_v10 = vmul.f32 %v12422_v40, %v14684_v56  ;;  %v4905_v47 = vmul.f32 %v12422_v40, %v12199_v35 }
0x10f9   :  { %v6887_v20 = vmul.f32 %v12398_v39, %v12398_v39  ;;  %v12437_v30 = vadd.f32 %v14686_v1, %v12285_v22  ;;  %v2908_v22 = vmul.f32 %v12413_v48, %v2907_v3 }
0x10fa   :  { %v5188_v18 = vmul.f32 %v9370_v33, %v5187_v5  ;;  %v3116_v52 = vmul.f32 %v3115_v32, %v2822_v10 }
0x10fb   :  { %v6919_v31 = vsel %vm1297_vm1, %v6887_v20, 0.0  ;;  %v2931_v20 = vmul.f32 %v12417_v4, %v12383_v49  ;;  %v4786_v51 = vsel %vm1297_vm1, %v12437_v30, 0.0  ;;  %v2909_v10 = vmul.f32 0.5, %v2908_v22 }
0x10fc   :  { %v6828_v28 = vpop.xlane.xlu1 %6827  ;;  %4862 = vadd.xlane.f32.xlu0 %v4861_v61  ;;  %6920 = vadd.xlane.f32.xlu1 %v6919_v31  ;;  %v5189_v45 = vadd.f32 %v9370_v33, %v5188_v18  ;;  %v12457_v18 = vld [vmem:[%s14548_s8 + $0x2] ss:$0 sm:$0xff]  ;;  %v12465_v60 = vpop.eup %9375 }
0x10fd   :  { %v6856_v42 = vmul.f32 %v6828_v28, %v11164_v41  ;;  %v3287_v38 = vadd.f32 %v12457_v18, %v3116_v52  ;;  %v2932_v31 = vmul.f32 %v12417_v4, %v2931_v20  ;;  %v4776_v28 = vpop.xlane.xlu2 %4775  ;;  %v2910_v20 = vsub.f32 1.5, %v2909_v10 }
0x10fe   :  { %v5193_v24 = vsel %vm5192_vm3, %v9370_v33, %v5189_v45 }
0x10ff   :  { %v12440_v54 = vsub.f32 %v12233_v9, %v6856_v42  ;;  %v6897_v11 = vpop.xlane.xlu0 %6896  ;;  %v5198_v5 = vsel %vm5195_vm4, %v5197_v26, %v5193_v24  ;;  %v6794_v9 = vpop.f32.mrf.mxu1  ;;  %v4800_v26 = vmul.f32 %v4776_v28, %v11164_v41  ;;  %v2933_v1 = vmul.f32 0.5, %v2932_v31 }
0x1100   :  { %v12444_v27 = vmul.f32 0.032258064, %v6897_v11  ;;  %v5199_v7 = vmul.f32 %v5198_v5, %v4905_v47  ;;  %v12468_v42 = vadd.f32 %v6794_v9, %v12266_v21  ;;  %v2943_v21 = vmul.f32 %v12465_v60, %v12427_v46 }
0x1101   :  { %14687 = vst [vmem:[#allocation18_spill] sm:$0xff] %v12440_v54  ;;  %v6888_v35 = vmul.f32 %v12440_v54, %v12440_v54  ;;  %v2934_v9 = vsub.f32 1.5, %v2933_v1 }
0x1102   :  { %9377 = vrsqrt.f32 %v12444_v27  ;;  %v5369_v61 = vadd.f32 %v12457_v18, %v5199_v7  ;;  %v12483_v7 = vsub.f32 %v12206_v8, %v4800_v26  ;;  %v6841_v22 = vsel %vm1297_vm1, %v12468_v42, 0.0 }
0x1103   :  { %v6922_v33 = vsel %vm1297_vm1, %v6888_v35, 0.0  ;;  %vm6982_vm5 = vcmp.eq.f32.partialorder %v12444_v27, inf  ;;  %vm6984_vm7 = vcmp.eq.f32.partialorder %v12444_v27, 0.0 }
0x1104   :  { %v4773_v32 = vpop.xlane.xlu1 %4772  ;;  %6923 = vadd.xlane.f32.xlu2 %v6922_v33  ;;  %4787 = vadd.xlane.f32.xlu0 %v4786_v51  ;;  %v12463_v56 = vadd.f32 %v5369_v61, %v3287_v38  ;;  %14689 = vst [vmem:[#allocation21_spill] sm:$0xff] %v12483_v7  ;;  %v2911_v51 = vmul.f32 %v12413_v48, %v2910_v20  ;;  %v8902_v20 = vld [vmem:[%s14552_s4 + $0x8] sm:$0xff] }
0x1105   :  { %v4799_v45 = vmul.f32 %v4773_v32, %v11164_v41  ;;  %v2944_v38 = vmul.f32 %v12465_v60, %v2943_v21  ;;  %v4832_v8 = vmul.f32 %v12483_v7, %v12483_v7  ;;  %v2935_v32 = vmul.f32 %v12417_v4, %v2934_v9  ;;  %7510 = vmatpush.bf16.msra.mxu2 %v8902_v20 }
0x1107   :  { %v12472_v3 = vsub.f32 %v12244_v58, %v4799_v45  ;;  %v6900_v47 = vpop.xlane.xlu0 %6899  ;;  %v2945_v1 = vmul.f32 0.5, %v2944_v38  ;;  %v2936_v4 = vmul.f32 %v2935_v32, %v12383_v49  ;;  %v2940_v32 = vand.u32 2147483648, %v12383_v49 }
0x1108   :  { %v9378_v24 = vpop.eup %9377  ;;  %v12474_v11 = vmul.f32 0.032258064, %v6900_v47  ;;  %v2912_v47 = vmul.f32 %v2911_v51, %v12377_v59 }
0x1109   :  { %14688 = vst [vmem:[#allocation16_spill] sm:$0xff] %v12472_v3  ;;  %v6976_v52 = vmul.f32 %v9378_v24, %v12444_v27  ;;  %v4831_v5 = vmul.f32 %v12472_v3, %v12472_v3 }
0x110a   :  { %9379 = vrsqrt.f32 %v12474_v11  ;;  %vm6994_vm11 = vcmp.eq.f32.partialorder %v12474_v11, inf  ;;  %vm6996_vm12 = vcmp.eq.f32.partialorder %v12474_v11, 0.0 }
0x110b   :  { %v6977_v58 = vmul.f32 %v9378_v24, %v6976_v52  ;;  %v4867_v35 = vsel %vm1297_vm1, %v4831_v5, 0.0  ;;  %v4870_v5 = vsel %vm1297_vm1, %v4832_v8, 0.0 }
0x110c   :  { %4868 = vadd.xlane.f32.xlu2 %v4867_v35  ;;  %6842 = vadd.xlane.f32.xlu0 %v6841_v22  ;;  %v2914_v35 = vsel %vm2913_vm6, %v12377_v59, %v2912_v47  ;;  %v2946_v22 = vsub.f32 1.5, %v2945_v1 }
0x110d   :  { %v6978_v33 = vmul.f32 0.5, %v6977_v58 }
0x110f   :  { %v6979_v61 = vsub.f32 1.5, %v6978_v33  ;;  %v6903_v31 = vpop.xlane.xlu1 %6902  ;;  %v2916_v33 = vand.u32 2147483648, %v12377_v59  ;;  %v6796_v59 = vpop.f32.mrf.mxu1 }
0x1110   :  { %v9380_v28 = vpop.eup %9379  ;;  %v12493_v45 = vmul.f32 0.032258064, %v6903_v31  ;;  %v8901_v31 = vld [vmem:[%s14552_s4] sm:$0xff] }
0x1111   :  { %v6980_v10 = vmul.f32 %v9378_v24, %v6979_v61  ;;  %v6988_v26 = vmul.f32 %v9380_v28, %v12474_v11  ;;  %v6985_v24 = vand.u32 2147483648, %v12444_v27  ;;  %7511 = vmatpush.bf16.msra.mxu2 %v8901_v31 }
0x1112   :  { %9381 = vrsqrt.f32 %v12493_v45  ;;  %vm7006_vm2 = vcmp.eq.f32.partialorder %v12493_v45, inf  ;;  %vm7008_vm15 = vcmp.eq.f32.partialorder %v12493_v45, 0.0 }
0x1113   :  { %v6981_v48 = vmul.f32 %v6980_v10, %v12444_v27  ;;  %v6989_v52 = vmul.f32 %v9380_v28, %v6988_v26  ;;  %v2917_v26 = vsel %vm2915_vm9, %v2916_v33, %v2914_v35 }
0x1114   :  { %4871 = vadd.xlane.f32.xlu0 %v4870_v5 }
0x1115   :  { %v6983_v21 = vsel %vm6982_vm5, %v12444_v27, %v6981_v48  ;;  %v6990_v58 = vmul.f32 0.5, %v6989_v52  ;;  %v2938_v27 = vsel %vm2937_vm8, %v12383_v49, %v2936_v4  ;;  %v2947_v48 = vmul.f32 %v12465_v60, %v2946_v22 }
0x1116   :  { %v6986_v9 = vsel %vm6984_vm7, %v6985_v24, %v6983_v21  ;;  %v2941_v5 = vsel %vm2939_vm10, %v2940_v32, %v2938_v27  ;;  %v12530_v21 = vadd.f32 1e-06, %v2917_v26 }
0x1117   :  { %v12512_v51 = vadd.f32 1e-06, %v6986_v9  ;;  %v6991_v38 = vsub.f32 1.5, %v6990_v58  ;;  %v4857_v61 = vpop.xlane.xlu1 %4856  ;;  %v12538_v35 = vadd.f32 1e-06, %v2941_v5  ;;  %v2948_v22 = vmul.f32 %v2947_v48, %v12427_v46 }
0x1118   :  { %v9382_v8 = vpop.eup %9381  ;;  %v12520_v10 = vmul.f32 0.032258064, %v4857_v61 }
0x1119   :  { %9383 = vrcp.f32 %v12512_v51  ;;  %v6992_v47 = vmul.f32 %v9380_v28, %v6991_v38  ;;  %v7000_v1 = vmul.f32 %v9382_v8, %v12493_v45  ;;  %v6997_v28 = vand.u32 2147483648, %v12474_v11 }
0x111a   :  { %9385 = vrsqrt.f32 %v12520_v10  ;;  %v6709_v52 = vpop.permute.xlu0 %6708  ;;  %v2950_v26 = vsel %vm2949_vm13, %v12427_v46, %v2948_v22  ;;  %vm7188_vm3 = vweird.f32 %v12512_v51  ;;  %vm4996_vm6 = vcmp.eq.f32.partialorder %v12520_v10, inf }
0x111b   :  { %v6993_v20 = vmul.f32 %v6992_v47, %v12474_v11  ;;  %v7001_v4 = vmul.f32 %v9382_v8, %v7000_v1  ;;  %v12528_v24 = vadd.f32 %v6796_v59, %v6709_v52  ;;  %9387 = vrcp.f32 %v12530_v21 }
0x111c   :  { %v7194_v59 = vand.u32 2147483648, %v12512_v51  ;;  %v7009_v52 = vand.u32 2147483648, %v12493_v45  ;;  %vm4998_vm7 = vcmp.eq.f32.partialorder %v12520_v10, 0.0 }
0x111d   :  { %v6995_v49 = vsel %vm6994_vm11, %v12474_v11, %v6993_v20  ;;  %v7002_v60 = vmul.f32 0.5, %v7001_v4  ;;  %v6844_v58 = vsel %vm1297_vm1, %v12528_v24, 0.0  ;;  %v2952_v20 = vand.u32 2147483648, %v12427_v46 }
0x111e   :  { %v6998_v9 = vsel %vm6996_vm12, %v6997_v28, %v6995_v49  ;;  %6845 = vadd.xlane.f32.xlu1 %v6844_v58  ;;  %vm3137_vm12 = vweird.f32 %v12530_v21 }
0x111f   :  { %v9384_v33 = vpop.eup %9383  ;;  %v12541_v38 = vadd.f32 1e-06, %v6998_v9  ;;  %v7003_v61 = vsub.f32 1.5, %v7002_v60  ;;  %v2953_v9 = vsel %vm2951_vm0, %v2952_v20, %v2950_v26  ;;  %vm3167_vm0 = vweird.f32 %v12538_v35 }
0x1120   :  { %v9386_v31 = vpop.eup %9385  ;;  %v7184_v27 = vmul.f32 %v9384_v33, %v12512_v51  ;;  %vm7189_vm14 = vweird.f32 %v9384_v33 }
0x1121   :  { %9389 = vrcp.f32 %v12541_v38  ;;  %v7004_v11 = vmul.f32 %v9382_v8, %v7003_v61  ;;  %v4990_v32 = vmul.f32 %v9386_v31, %v12520_v10  ;;  %v7192_v8 = vand.u32 2147483647, %v12512_v51  ;;  %v12558_v49 = vpop.eup %9387  ;;  %vm7190_vm4 = vmor %vm7188_vm3, %vm7189_vm14 }
0x1122   :  { %9391 = vrcp.f32 %v12538_v35  ;;  %v7185_v47 = vsub.f32 1.0, %v7184_v27  ;;  %v6959_v51 = vmul.f32 %v12422_v40, %v12235_v44  ;;  %vm7203_vm9 = vweird.f32 %v12541_v38 }
0x1123   :  { %v7005_v1 = vmul.f32 %v7004_v11, %v12493_v45  ;;  %v4991_v48 = vmul.f32 %v9386_v31, %v4990_v32  ;;  %v7195_v32 = vor.u32 1.1754944e-38, %v7194_v59  ;;  %vm7193_vm5 = vcmp.eq.f32.partialorder %v7192_v8, 8.507059e+37 }
0x1124   :  { %v7186_v5 = vmul.f32 %v9384_v33, %v7185_v47  ;;  %v12577_v59 = vadd.f32 1e-06, %v2953_v9 }
0x1125   :  { %v7007_v4 = vsel %vm7006_vm2, %v12493_v45, %v7005_v1  ;;  %v4992_v28 = vmul.f32 0.5, %v4991_v48  ;;  %vm3138_vm2 = vweird.f32 %v12558_v49 }
0x1126   :  { %v7010_v60 = vsel %vm7008_vm15, %v7009_v52, %v7007_v4  ;;  %v7187_v58 = vadd.f32 %v9384_v33, %v7186_v5  ;;  %v14690_v52 = vld [vmem:[#allocation35_spill] sm:$0xff]  ;;  %v7207_v4 = vand.u32 2147483647, %v12541_v38 }
0x1127   :  { %v9390_v22 = vpop.eup %9389  ;;  %v12562_v61 = vadd.f32 1e-06, %v7010_v60  ;;  %v4993_v27 = vsub.f32 1.5, %v4992_v28  ;;  %v6912_v11 = vpop.xlane.xlu1 %6911  ;;  %v12575_v5 = vmul.f32 %v12422_v40, %v14690_v52  ;;  %v7209_v28 = vand.u32 2147483648, %v12541_v38 }
0x1128   :  { %v12565_v47 = vpop.eup %9391  ;;  %v12567_v45 = vmul.f32 0.032258064, %v6912_v11  ;;  %v7191_v1 = vsel %vm7190_vm4, %v9384_v33, %v7187_v58  ;;  %v7199_v46 = vmul.f32 %v9390_v22, %v12541_v38  ;;  %v3133_v33 = vmul.f32 %v12558_v49, %v12530_v21 }
0x1129   :  { %9393 = vrcp.f32 %v12562_v61  ;;  %v4994_v26 = vmul.f32 %v9386_v31, %v4993_v27  ;;  %v7196_v48 = vsel %vm7193_vm5, %v7195_v32, %v7191_v1  ;;  %v4999_v31 = vand.u32 2147483648, %v12520_v10  ;;  %vm12644_vm5 = vmor %vm3137_vm12, %vm3138_vm2 }
0x112a   :  { %9395 = vrsqrt.f32 %v12567_v45  ;;  %v7197_v44 = vmul.f32 %v7196_v48, %v6959_v51  ;;  %v7200_v20 = vsub.f32 1.0, %v7199_v46  ;;  %vm7204_vm8 = vweird.f32 %v9390_v22 }
0x112b   :  { %v4995_v8 = vmul.f32 %v4994_v26, %v12520_v10  ;;  %v3134_v11 = vsub.f32 1.0, %v3133_v33  ;;  %v3141_v32 = vand.u32 2147483647, %v12530_v21  ;;  %v3163_v1 = vmul.f32 %v12565_v47, %v12538_v35  ;;  %vm7205_vm10 = vmor %vm7203_vm9, %vm7204_vm8 }
0x112c   :  { %v7201_v58 = vmul.f32 %v9390_v22, %v7200_v20  ;;  %v7423_v9 = vadd.f32 %v12457_v18, %v7197_v44  ;;  %9397 = vrcp.f32 %v12577_v59  ;;  %v6960_v33 = vmul.f32 %v12422_v40, %v12247_v50 }
0x112d   :  { %v4997_v60 = vsel %vm4996_vm6, %v12520_v10, %v4995_v8  ;;  %v7210_v8 = vor.u32 1.1754944e-38, %v7209_v28  ;;  %vm7208_vm11 = vcmp.eq.f32.partialorder %v7207_v4, 8.507059e+37  ;;  %v7224_v7 = vand.u32 2147483648, %v12562_v61 }
0x112e   :  { %v5000_v27 = vsel %vm4998_vm7, %v4999_v31, %v4997_v60  ;;  %v7202_v48 = vadd.f32 %v9390_v22, %v7201_v58  ;;  %v7439_v10 = vadd.f32 %v7423_v9, %v12044_v55  ;;  %v3135_v60 = vmul.f32 %v12558_v49, %v3134_v11  ;;  %v14691_v9 = vld [vmem:[#allocation48_spill] sm:$0xff] }
0x112f   :  { %v9394_v46 = vpop.eup %9393  ;;  %v12593_v51 = vadd.f32 1e-06, %v5000_v27  ;;  %v12595_v26 = vpop.xlane.xlu1 %4781  ;;  %v3164_v58 = vsub.f32 1.0, %v3163_v1  ;;  %v12609_v50 = vmul.f32 0.032258064, %v14691_v9  ;;  %vm7218_vm14 = vweird.f32 %v12562_v61 }
0x1130   :  { %v9396_v52 = vpop.eup %9395  ;;  %v7214_v44 = vmul.f32 %v9394_v46, %v12562_v61  ;;  %v7206_v31 = vsel %vm7205_vm10, %v9390_v22, %v7202_v48  ;;  %vm7219_vm13 = vweird.f32 %v9394_v46  ;;  %v7222_v54 = vand.u32 2147483647, %v12562_v61 }
0x1131   :  { %9399 = vrcp.f32 %v12593_v51  ;;  %v7036_v20 = vmul.f32 %v9396_v52, %v12567_v45  ;;  %v7211_v55 = vsel %vm7208_vm11, %v7210_v8, %v7206_v31  ;;  %v3143_v22 = vand.u32 2147483648, %v12530_v21  ;;  %vm7220_vm3 = vmor %vm7218_vm14, %vm7219_vm13 }
0x1132   :  { %v7215_v38 = vsub.f32 1.0, %v7214_v44  ;;  %v7212_v28 = vmul.f32 %v7211_v55, %v6960_v33  ;;  %v12617_v1 = vpop.eup %9397  ;;  %v3136_v33 = vadd.f32 %v12558_v49, %v3135_v60  ;;  %vm12621_vm15 = vcmp.eq.f32.partialorder %v3141_v32, 8.507059e+37 }
0x1133   :  { %v7037_v27 = vmul.f32 %v9396_v52, %v7036_v20  ;;  %v3165_v20 = vmul.f32 %v12565_v47, %v3164_v58  ;;  %9401 = vrsqrt.f32 %v12609_v50  ;;  %v7225_v61 = vor.u32 1.1754944e-38, %v7224_v7 }
0x1134   :  { %v7216_v3 = vmul.f32 %v9394_v46, %v7215_v38  ;;  %v7424_v48 = vadd.f32 %v12457_v18, %v7212_v28  ;;  %v6961_v32 = vmul.f32 %v12422_v40, %v12258_v16  ;;  %vm7223_vm4 = vcmp.eq.f32.partialorder %v7222_v54, 8.507059e+37 }
0x1135   :  { %v7038_v4 = vmul.f32 0.5, %v7037_v27  ;;  %v3144_v16 = vor.u32 1.1754944e-38, %v3143_v22  ;;  %v3173_v7 = vand.u32 2147483648, %v12538_v35  ;;  %vm3168_vm6 = vweird.f32 %v12565_v47 }
0x1136   :  { %v7217_v8 = vadd.f32 %v9394_v46, %v7216_v3  ;;  %v7440_v3 = vadd.f32 %v7424_v48, %v12143_v63  ;;  %vm7042_vm7 = vcmp.eq.f32.partialorder %v12567_v45, inf  ;;  %v7045_v21 = vand.u32 2147483648, %v12567_v45  ;;  %vm12681_vm10 = vmor %vm3167_vm0, %vm3168_vm6 }
0x1137   :  { %v12627_v31 = vpop.eup %9399  ;;  %v7039_v55 = vsub.f32 1.5, %v7038_v4  ;;  %v12630_v38 = vpop.xlane.xlu1 %6836  ;;  %v3178_v4 = vmul.f32 %v12617_v1, %v12577_v59  ;;  %vm7044_vm8 = vcmp.eq.f32.partialorder %v12567_v45, 0.0  ;;  %vm5220_vm11 = vweird.f32 %v12593_v51 }
0x1138   :  { %v7221_v60 = vsel %vm7220_vm3, %v9394_v46, %v7217_v8  ;;  %v5216_v58 = vmul.f32 %v12627_v31, %v12593_v51  ;;  %v7459_v27 = vpack.c.bf16 %v7440_v3, %v7439_v10  ;;  %v3140_v10 = vsel %vm12644_vm5, %v12558_v49, %v3136_v33 }
0x1139   :  { %v7040_v9 = vmul.f32 %v9396_v52, %v7039_v55  ;;  %v7226_v28 = vsel %vm7223_vm4, %v7225_v61, %v7221_v60  ;;  %v3166_v52 = vadd.f32 %v12565_v47, %v3165_v20  ;;  %v12660_v8 = vpop.eup %9401  ;;  %v5226_v49 = vand.u32 2147483648, %v12593_v51 }
0x113a   :  { %v7227_v11 = vmul.f32 %v7226_v28, %v6961_v32  ;;  %v5217_v54 = vsub.f32 1.0, %v5216_v58  ;;  %8818 = vmatmul.msk.bf16.vlgmr.msra.gmra.mxu2 %vm1297_vm1, %v7459_v27  ;;  %v3179_v33 = vsub.f32 1.0, %v3178_v4  ;;  %vm5221_vm9 = vweird.f32 %v12627_v31  ;;  %v14698_v28 = vld [vmem:[#allocation45_spill] sm:$0xff] }
0x113b   :  { %v7041_v46 = vmul.f32 %v7040_v9, %v12567_v45  ;;  %v3145_v58 = vsel %vm12621_vm15, %v3144_v16, %v3140_v10  ;;  %v5224_v9 = vand.u32 2147483647, %v12593_v51  ;;  %v3170_v44 = vsel %vm12681_vm10, %v12565_v47, %v3166_v52  ;;  %vm5222_vm12 = vmor %vm5220_vm11, %vm5221_vm9  ;;  %v14700_v52 = vld [vmem:[#allocation34_spill] sm:$0xff] }
0x113c   :  { %v7425_v22 = vadd.f32 %v12457_v18, %v7227_v11  ;;  %v5218_v48 = vmul.f32 %v12627_v31, %v5217_v54  ;;  %v12693_v4 = vmul.f32 0.032258064, %v14698_v28  ;;  %v3180_v16 = vmul.f32 %v12617_v1, %v3179_v33 }
0x113d   :  { %v7043_v55 = vsel %vm7042_vm7, %v12567_v45, %v7041_v46  ;;  %v6906_v3 = vpop.xlane.xlu2 %6905  ;;  %v3146_v54 = vmul.f32 %v3145_v58, %v12575_v5  ;;  %v5227_v10 = vor.u32 1.1754944e-38, %v5226_v49  ;;  %v3174_v51 = vor.u32 1.1754944e-38, %v3173_v7 }
0x113e   :  { %v7046_v20 = vsel %vm7044_vm8, %v7045_v21, %v7043_v55  ;;  %v12665_v61 = vmul.f32 0.032258064, %v6906_v3  ;;  %v12668_v32 = vadd.f32 %v7425_v22, %v12084_v43  ;;  %v5219_v45 = vadd.f32 %v12627_v31, %v5218_v48 }
0x113f   :  { %v12671_v11 = vadd.f32 1e-06, %v7046_v20  ;;  %v4866_v60 = vpop.xlane.xlu1 %4865  ;;  %v2955_v43 = vmul.f32 %v12660_v8, %v12609_v50  ;;  %v4907_v21 = vmul.f32 %v12422_v40, %v12263_v34  ;;  %vm5225_vm13 = vcmp.eq.f32.partialorder %v5224_v9, 8.507059e+37 }
0x1140   :  { %9403 = vrsqrt.f32 %v12665_v61  ;;  %v12696_v63 = vmul.f32 0.032258064, %v4866_v60  ;;  %v5223_v46 = vsel %vm5222_vm12, %v12627_v31, %v5219_v45  ;;  %v14699_v47 = vand.u32 2147483647, %v12538_v35 }
0x1141   :  { %9405 = vrcp.f32 %v12671_v11  ;;  %v2826_v22 = vmul.f32 %v12422_v40, %v14700_v52  ;;  %v2956_v48 = vmul.f32 %v12660_v8, %v2955_v43  ;;  %v5228_v55 = vsel %vm5225_vm13, %v5227_v10, %v5223_v46  ;;  %v14703_v46 = vld [vmem:[#allocation2_spill] sm:$0xff] }
0x1142   :  { %9407 = vrsqrt.f32 %v12696_v63  ;;  %vm3172_vm2 = vcmp.eq.f32.partialorder %v14699_v47, 8.507059e+37  ;;  %v5229_v3 = vmul.f32 %v5228_v55, %v4907_v21  ;;  %v3181_v34 = vadd.f32 %v12617_v1, %v3180_v16 }
0x1143   :  { %v3175_v5 = vsel %vm3172_vm2, %v3174_v51, %v3170_v44  ;;  %9409 = vrsqrt.f32 %v12693_v4  ;;  %vm3183_vm14 = vweird.f32 %v12617_v1  ;;  %v3289_v20 = vadd.f32 %v12457_v18, %v3146_v54 }
0x1144   :  { %vm3182_vm15 = vweird.f32 %v12577_v59  ;;  %v5371_v45 = vadd.f32 %v12457_v18, %v5229_v3  ;;  %v3186_v9 = vand.u32 2147483647, %v12577_v59  ;;  %v3188_v27 = vand.u32 2147483648, %v12577_v59 }
0x1145   :  { %v6831_v31 = vpop.xlane.xlu2 %6830  ;;  %v4854_v7 = vpop.xlane.xlu0 %4853  ;;  %v2957_v43 = vmul.f32 0.5, %v2956_v48  ;;  %v4802_v44 = vmul.f32 %v12595_v26, %v11164_v41  ;;  %vm12731_vm0 = vmor %vm3182_vm15, %vm3183_vm14  ;;  %v2827_v59 = vmul.f32 %v12422_v40, %v14703_v46  ;;  %v3176_v51 = vmul.f32 %v3175_v5, %v2826_v22 }
0x1146   :  { %v9404_v49 = vpop.eup %9403  ;;  %v6857_v35 = vmul.f32 %v6831_v31, %v11164_v41  ;;  %v12713_v33 = vmul.f32 0.032258064, %v4854_v7  ;;  %v12748_v52 = vadd.f32 %v5371_v45, %v3289_v20  ;;  %v14704_v31 = vld [vmem:[#allocation41_spill] sm:$0xff]  ;;  %vm3187_vm3 = vcmp.eq.f32.partialorder %v3186_v9, 8.507059e+37 }
0x1147   :  { %v12717_v60 = vpop.eup %9405  ;;  %v7012_v58 = vmul.f32 %v9404_v49, %v12665_v61  ;;  %v12754_v22 = vadd.f32 %v12457_v18, %v14704_v31  ;;  %v2958_v5 = vsub.f32 1.5, %v2957_v43  ;;  %v12757_v7 = vsub.f32 %v12283_v17, %v4802_v44 }
0x1148   :  { %v12726_v28 = vsub.f32 %v12317_v12, %v6857_v35  ;;  %9411 = vrsqrt.f32 %v12713_v33  ;;  %v12735_v54 = vpop.eup %9407  ;;  %v3185_v12 = vsel %vm12731_vm0, %v12617_v1, %v3181_v34  ;;  %v7259_v47 = vmul.f32 %v12717_v60, %v12671_v11 }
0x1149   :  { %v7013_v10 = vmul.f32 %v9404_v49, %v7012_v58  ;;  %v5026_v26 = vmul.f32 %v12735_v54, %v12696_v63  ;;  %v12750_v48 = vpop.eup %9409  ;;  %v3189_v1 = vor.u32 1.1754944e-38, %v3188_v27  ;;  %v6859_v35 = vmul.f32 %v12630_v38, %v11164_v41 }
0x114a   :  { %v6889_v21 = vmul.f32 %v12726_v28, %v12726_v28  ;;  %v12764_v46 = vadd.f32 %v12457_v18, %v3176_v51  ;;  %v12768_v17 = vmul.f32 %v12750_v48, %v12693_v4  ;;  %v7260_v44 = vsub.f32 1.0, %v7259_v47 }
0x114b   :  { %v7014_v55 = vmul.f32 0.5, %v7013_v10  ;;  %v5027_v3 = vmul.f32 %v12735_v54, %v5026_v26  ;;  %v3190_v16 = vsel %vm3187_vm3, %v3189_v1, %v3185_v12  ;;  %v2964_v38 = vand.u32 2147483648, %v12609_v50 }
0x114c   :  { %v6925_v34 = vsel %vm1297_vm1, %v6889_v21, 0.0  ;;  %v2959_v12 = vmul.f32 %v12660_v8, %v2958_v5  ;;  %v4834_v51 = vmul.f32 %v12757_v7, %v12757_v7  ;;  %v12782_v31 = vsub.f32 %v12292_v57, %v6859_v35 }
0x114d   :  { %v7015_v20 = vsub.f32 1.5, %v7014_v55  ;;  %v4860_v58 = vpop.xlane.xlu2 %4859  ;;  %6926 = vadd.xlane.f32.xlu1 %v6925_v34  ;;  %v6834_v45 = vpop.xlane.xlu0 %6833  ;;  %v5028_v26 = vmul.f32 0.5, %v5027_v3  ;;  %v12779_v55 = vmul.f32 %v3190_v16, %v2827_v59  ;;  %vm7018_vm4 = vcmp.eq.f32.partialorder %v12665_v61, inf }
0x114e   :  { %v9412_v9 = vpop.eup %9411  ;;  %v12770_v27 = vmul.f32 0.032258064, %v4860_v58  ;;  %v6858_v43 = vmul.f32 %v6834_v45, %v11164_v41  ;;  %vm7020_vm5 = vcmp.eq.f32.partialorder %v12665_v61, 0.0  ;;  %v7021_v8 = vand.u32 2147483648, %v12665_v61 }
0x114f   :  { %v7016_v10 = vmul.f32 %v9404_v49, %v7015_v20  ;;  %v4978_v21 = vmul.f32 %v9412_v9, %v12713_v33  ;;  %v7261_v5 = vmul.f32 %v12717_v60, %v7260_v44  ;;  %v5029_v3 = vsub.f32 1.5, %v5028_v26 }
0x1150   :  { %9413 = vrsqrt.f32 %v12770_v27  ;;  %v12786_v49 = vsub.f32 %v12328_v2, %v6858_v43  ;;  %v12796_v35 = vmul.f32 %v2959_v12, %v12609_v50  ;;  %v12800_v2 = vmul.f32 %v12422_v40, %v12310_v37 }
0x1151   :  { %v7017_v47 = vmul.f32 %v7016_v10, %v12665_v61  ;;  %v4979_v1 = vmul.f32 %v9412_v9, %v4978_v21  ;;  %v4876_v58 = vsel %vm1297_vm1, %v4834_v51, 0.0  ;;  %v12805_v45 = vmul.f32 %v12422_v40, %v12322_v0 }
0x1152   :  { %v6890_v57 = vmul.f32 %v12786_v49, %v12786_v49  ;;  %v6891_v37 = vmul.f32 %v12782_v31, %v12782_v31  ;;  %v7262_v21 = vadd.f32 %v12717_v60, %v7261_v5  ;;  %vm7264_vm6 = vweird.f32 %v12717_v60 }
0x1153   :  { %v7019_v59 = vsel %vm7018_vm4, %v12665_v61, %v7017_v47  ;;  %v4980_v34 = vmul.f32 0.5, %v4979_v1  ;;  %v5030_v0 = vmul.f32 %v12735_v54, %v5029_v3  ;;  %v6964_v1 = vmul.f32 %v12422_v40, %v12275_v6 }
0x1154   :  { %v7022_v20 = vsel %vm7020_vm5, %v7021_v8, %v7019_v59  ;;  %v6928_v43 = vsel %vm1297_vm1, %v6890_v57, 0.0  ;;  %v12823_v8 = vmul.f32 %v12422_v40, %v12303_v15  ;;  %v7269_v5 = vand.u32 2147483648, %v12671_v11 }
0x1155   :  { %v12807_v61 = vadd.f32 1e-06, %v7022_v20  ;;  %v4981_v16 = vsub.f32 1.5, %v4980_v34  ;;  %4877 = vadd.xlane.f32.xlu1 %v4876_v58  ;;  %v6909_v44 = vpop.xlane.xlu0 %6908  ;;  %6929 = vadd.xlane.f32.xlu2 %v6928_v43  ;;  %v6840_v47 = vpop.xlane.xlu2 %6839  ;;  %vm7263_vm7 = vweird.f32 %v12671_v11  ;;  %v7267_v54 = vand.u32 2147483647, %v12671_v11 }
0x1156   :  { %v9414_v10 = vpop.eup %9413  ;;  %v12810_v26 = vmul.f32 0.032258064, %v6909_v44  ;;  %vm4984_vm8 = vcmp.eq.f32.partialorder %v12713_v33, inf  ;;  %vm4986_vm9 = vcmp.eq.f32.partialorder %v12713_v33, 0.0  ;;  %v4987_v6 = vand.u32 2147483648, %v12713_v33  ;;  %vm12836_vm10 = vmor %vm7263_vm7, %vm7264_vm6 }
0x1157   :  { %9415 = vrcp.f32 %v12807_v61  ;;  %v4982_v12 = vmul.f32 %v9412_v9, %v4981_v16  ;;  %v5002_v51 = vmul.f32 %v9414_v10, %v12770_v27  ;;  %v6931_v15 = vsel %vm1297_vm1, %v6891_v37, 0.0 }
0x1158   :  { %9417 = vrsqrt.f32 %v12810_v26  ;;  %v5031_v3 = vmul.f32 %v5030_v0, %v12696_v63  ;;  %v7266_v11 = vsel %vm12836_vm10, %v12717_v60, %v7262_v21  ;;  %vm5032_vm11 = vcmp.eq.f32.partialorder %v12696_v63, inf }
0x1159   :  { %v4983_v59 = vmul.f32 %v4982_v12, %v12713_v33  ;;  %v5003_v34 = vmul.f32 %v9414_v10, %v5002_v51  ;;  %vm5034_vm12 = vcmp.eq.f32.partialorder %v12696_v63, 0.0  ;;  %v7270_v16 = vor.u32 1.1754944e-38, %v7269_v5 }
0x115a   :  { %v5035_v44 = vand.u32 2147483648, %v12696_v63  ;;  %vm7268_vm13 = vcmp.eq.f32.partialorder %v7267_v54, 8.507059e+37  ;;  %vm5008_vm2 = vcmp.eq.f32.partialorder %v12770_v27, inf  ;;  %v5033_v5 = vsel %vm5032_vm11, %v12696_v63, %v5031_v3 }
0x115b   :  { %v4985_v57 = vsel %vm4984_vm8, %v12713_v33, %v4983_v59  ;;  %v5004_v20 = vmul.f32 0.5, %v5003_v34  ;;  %v7271_v51 = vsel %vm7268_vm13, %v7270_v16, %v7266_v11  ;;  %vm5010_vm14 = vcmp.eq.f32.partialorder %v12770_v27, 0.0 }
0x115c   :  { %v4988_v58 = vsel %vm4986_vm9, %v4987_v6, %v4985_v57  ;;  %v6860_v6 = vmul.f32 %v6840_v47, %v11164_v41  ;;  %v5011_v3 = vand.u32 2147483648, %v12770_v27  ;;  %v7237_v47 = vand.u32 2147483647, %v12807_v61 }
0x115d   :  { %v12847_v43 = vpop.eup %9415  ;;  %v12850_v37 = vadd.f32 1e-06, %v4988_v58  ;;  %v5005_v0 = vsub.f32 1.5, %v5004_v20  ;;  %v4779_v12 = vpop.xlane.xlu0 %4778  ;;  %6932 = vadd.xlane.f32.xlu2 %v6931_v15  ;;  %vm7030_vm0 = vcmp.eq.f32.partialorder %v12810_v26, inf  ;;  %vm7032_vm3 = vcmp.eq.f32.partialorder %v12810_v26, 0.0 }
0x115e   :  { %v9418_v33 = vpop.eup %9417  ;;  %v4801_v60 = vmul.f32 %v4779_v12, %v11164_v41  ;;  %v7229_v21 = vmul.f32 %v12847_v43, %v12807_v61  ;;  %v7239_v12 = vand.u32 2147483648, %v12807_v61  ;;  %v12885_v63 = vsub.f32 %v12342_v62, %v6860_v6 }
0x115f   :  { %9419 = vrcp.f32 %v12850_v37  ;;  %v5006_v59 = vmul.f32 %v9414_v10, %v5005_v0  ;;  %v7024_v34 = vmul.f32 %v9418_v33, %v12810_v26  ;;  %v6915_v54 = vpop.xlane.xlu2 %6914  ;;  %v12872_v10 = vsel %vm5034_vm12, %v5035_v44, %v5033_v5 }
0x1160   :  { %v12863_v15 = vsub.f32 %v12352_v29, %v4801_v60  ;;  %v12865_v9 = vmul.f32 0.032258064, %v6915_v54  ;;  %v7230_v57 = vsub.f32 1.0, %v7229_v21  ;;  %v12876_v29 = vmul.f32 %v7271_v51, %v6964_v1 }
0x1161   :  { %v5007_v20 = vmul.f32 %v5006_v59, %v12770_v27  ;;  %v7025_v11 = vmul.f32 %v9418_v33, %v7024_v34  ;;  %vm7234_vm15 = vweird.f32 %v12847_v43  ;;  %vm7233_vm4 = vweird.f32 %v12807_v61 }
0x1162   :  { %9421 = vrsqrt.f32 %v12865_v9  ;;  %v4833_v0 = vmul.f32 %v12863_v15, %v12863_v15  ;;  %v7231_v44 = vmul.f32 %v12847_v43, %v7230_v57  ;;  %vm7235_vm5 = vmor %vm7233_vm4, %vm7234_vm15  ;;  %vm7238_vm6 = vcmp.eq.f32.partialorder %v7237_v47, 8.507059e+37 }
0x1163   :  { %v5009_v58 = vsel %vm5008_vm2, %v12770_v27, %v5007_v20  ;;  %v7026_v16 = vmul.f32 0.5, %v7025_v11  ;;  %v7240_v6 = vor.u32 1.1754944e-38, %v7239_v12  ;;  %v5209_v12 = vand.u32 2147483647, %v12850_v37 }
0x1164   :  { %v5012_v60 = vsel %vm5010_vm14, %v5011_v3, %v5009_v58  ;;  %v4873_v27 = vsel %vm1297_vm1, %v4833_v0, 0.0  ;;  %v7232_v5 = vadd.f32 %v12847_v43, %v7231_v44  ;;  %vm5205_vm8 = vweird.f32 %v12850_v37 }
0x1165   :  { %v12889_v1 = vpop.eup %9419  ;;  %v12891_v21 = vadd.f32 1e-06, %v5012_v60  ;;  %v7027_v51 = vsub.f32 1.5, %v7026_v16  ;;  %4874 = vadd.xlane.f32.xlu0 %v4873_v27  ;;  %v7033_v60 = vand.u32 2147483648, %v12810_v26  ;;  %v5211_v27 = vand.u32 2147483648, %v12850_v37 }
0x1166   :  { %v5201_v62 = vmul.f32 %v12889_v1, %v12850_v37  ;;  %v7236_v61 = vsel %vm7235_vm5, %v12847_v43, %v7232_v5  ;;  %vm5206_vm7 = vweird.f32 %v12889_v1  ;;  %vm12937_vm9 = vcmp.eq.f32.partialorder %v5209_v12, 8.507059e+37 }
0x1167   :  { %9423 = vrcp.f32 %v12891_v21  ;;  %v7028_v59 = vmul.f32 %v9418_v33, %v7027_v51  ;;  %v4785_v34 = vpop.xlane.xlu2 %4784  ;;  %v6918_v54 = vpop.xlane.xlu0 %6917  ;;  %v6892_v33 = vmul.f32 %v12885_v63, %v12885_v63  ;;  %v7241_v0 = vsel %vm7238_vm6, %v7240_v6, %v7236_v61  ;;  %vm5207_vm10 = vmor %vm5205_vm8, %vm5206_vm7 }
0x1168   :  { %v9422_v57 = vpop.eup %9421  ;;  %v4803_v20 = vmul.f32 %v4785_v34, %v11164_v41  ;;  %v12904_v3 = vmul.f32 0.032258064, %v6918_v54  ;;  %v5202_v11 = vsub.f32 1.0, %v5201_v62  ;;  %v7242_v51 = vmul.f32 %v7241_v0, %v12823_v8 }
0x1169   :  { %v7029_v58 = vmul.f32 %v7028_v59, %v12810_v26  ;;  %v7048_v16 = vmul.f32 %v9422_v57, %v12865_v9  ;;  %v6934_v6 = vsel %vm1297_vm1, %v6892_v33, 0.0  ;;  %v5212_v0 = vor.u32 1.1754944e-38, %v5211_v27 }
0x116a   :  { %v12913_v47 = vsub.f32 %v12371_v36, %v4803_v20  ;;  %9425 = vrsqrt.f32 %v12904_v3  ;;  %v5203_v62 = vmul.f32 %v12889_v1, %v5202_v11  ;;  %v7426_v8 = vadd.f32 %v12457_v18, %v7242_v51 }
0x116b   :  { %v7031_v43 = vsel %vm7030_vm0, %v12810_v26, %v7029_v58  ;;  %v7049_v44 = vmul.f32 %v9422_v57, %v7048_v16  ;;  %v12958_v27 = vmul.f32 %v12422_v40, %v12334_v13  ;;  %vm7054_vm11 = vcmp.eq.f32.partialorder %v12865_v9, inf }
0x116c   :  { %v7034_v5 = vsel %vm7032_vm3, %v7033_v60, %v7031_v43  ;;  %v4835_v36 = vmul.f32 %v12913_v47, %v12913_v47  ;;  %v5204_v20 = vadd.f32 %v12889_v1, %v5203_v62  ;;  %v7442_v33 = vadd.f32 %v7426_v8, %v12160_v53 }
0x116d   :  { %v12928_v59 = vpop.eup %9423  ;;  %v12930_v34 = vadd.f32 1e-06, %v7034_v5  ;;  %v7050_v54 = vmul.f32 0.5, %v7049_v44  ;;  %6935 = vadd.xlane.f32.xlu0 %v6934_v6  ;;  %v12961_v62 = vadd.f32 1e-06, %v12872_v10  ;;  %vm7056_vm12 = vcmp.eq.f32.partialorder %v12865_v9, 0.0 }
0x116e   :  { %v4879_v26 = vsel %vm1297_vm1, %v4835_v36, 0.0  ;;  %v5208_v12 = vsel %vm5207_vm10, %v12889_v1, %v5204_v20  ;;  %v5231_v44 = vmul.f32 %v12928_v59, %v12891_v21  ;;  %v7460_v36 = vpack.c.bf16 %v7442_v33, %v12668_v32 }
0x116f   :  { %9427 = vrcp.f32 %v12930_v34  ;;  %v7051_v11 = vsub.f32 1.5, %v7050_v54  ;;  %v6921_v58 = vpop.xlane.xlu1 %6920  ;;  %4880 = vadd.xlane.f32.xlu1 %v4879_v26  ;;  %v4863_v16 = vpop.xlane.xlu0 %4862  ;;  %v5213_v53 = vsel %vm12937_vm9, %v5212_v0, %v5208_v12  ;;  %v7428_v1 = vadd.f32 %v12457_v18, %v12876_v29 }
0x1170   :  { %v9426_v60 = vpop.eup %9425  ;;  %v12945_v43 = vmul.f32 0.032258064, %v6921_v58  ;;  %v12947_v37 = vmul.f32 0.032258064, %v4863_v16  ;;  %8819 = vmatmul.msk.bf16.gmra.mxu2 %vm1297_vm1, %v7460_v36  ;;  %v7057_v13 = vand.u32 2147483648, %v12865_v9  ;;  %v5214_v40 = vmul.f32 %v5213_v53, %v12800_v2 }
0x1171   :  { %v7052_v51 = vmul.f32 %v9422_v57, %v7051_v11  ;;  %v7060_v5 = vmul.f32 %v9426_v60, %v12904_v3  ;;  %v5239_v10 = vand.u32 2147483647, %v12891_v21  ;;  %vm7066_vm13 = vcmp.eq.f32.partialorder %v12904_v3, inf }
0x1172   :  { %9429 = vrsqrt.f32 %v12945_v43  ;;  %v5232_v8 = vsub.f32 1.0, %v5231_v44  ;;  %vm7068_vm2 = vcmp.eq.f32.partialorder %v12904_v3, 0.0  ;;  %v5370_v20 = vadd.f32 %v12457_v18, %v5214_v40 }
0x1173   :  { %v7053_v57 = vmul.f32 %v7052_v51, %v12865_v9  ;;  %v7061_v32 = vmul.f32 %v9426_v60, %v7060_v5  ;;  %9431 = vrsqrt.f32 %v12947_v37  ;;  %v7069_v58 = vand.u32 2147483648, %v12904_v3 }
0x1174   :  { %vm5235_vm14 = vweird.f32 %v12891_v21  ;;  %v5386_v18 = vadd.f32 %v5370_v20, %v12754_v22  ;;  %vm5236_vm15 = vweird.f32 %v12928_v59  ;;  %v7254_v40 = vand.u32 2147483648, %v12930_v34 }
0x1175   :  { %v12974_v54 = vpop.eup %9427  ;;  %v7055_v29 = vsel %vm7054_vm11, %v12865_v9, %v7053_v57  ;;  %v7062_v6 = vmul.f32 0.5, %v7061_v32  ;;  %v5241_v9 = vand.u32 2147483648, %v12891_v21  ;;  %v5233_v57 = vmul.f32 %v12928_v59, %v5232_v8  ;;  %vm13029_vm7 = vmor %vm5235_vm14, %vm5236_vm15 }
0x1176   :  { %v7058_v26 = vsel %vm7056_vm12, %v7057_v13, %v7055_v29  ;;  %v7244_v61 = vmul.f32 %v12974_v54, %v12930_v34  ;;  %v7252_v13 = vand.u32 2147483647, %v12930_v34  ;;  %vm7249_vm0 = vweird.f32 %v12974_v54 }
0x1177   :  { %v12982_v11 = vadd.f32 1e-06, %v7058_v26  ;;  %v7063_v2 = vsub.f32 1.5, %v7062_v6  ;;  %v6924_v16 = vpop.xlane.xlu2 %6923  ;;  %v4788_v33 = vpop.xlane.xlu0 %4787  ;;  %v13005_v26 = vadd.f32 %v7428_v1, %v5386_v18  ;;  %vm7248_vm3 = vweird.f32 %v12930_v34 }
0x1178   :  { %v9430_v0 = vpop.eup %9429  ;;  %v12987_v12 = vmul.f32 0.032258064, %v6924_v16  ;;  %v4804_v44 = vmul.f32 %v4788_v33, %v11164_v41  ;;  %v7245_v51 = vsub.f32 1.0, %v7244_v61  ;;  %vm2961_vm4 = vcmp.eq.f32.partialorder %v12609_v50, inf  ;;  %vm7250_vm5 = vmor %vm7248_vm3, %vm7249_vm0 }
0x1179   :  { %v9432_v5 = vpop.eup %9431  ;;  %v7064_v36 = vmul.f32 %v9426_v60, %v7063_v2  ;;  %v7072_v53 = vmul.f32 %v9430_v0, %v12945_v43  ;;  %vm7253_vm6 = vcmp.eq.f32.partialorder %v7252_v13, 8.507059e+37  ;;  %vm5240_vm8 = vcmp.eq.f32.partialorder %v5239_v10, 8.507059e+37 }
0x117a   :  { %v5014_v32 = vmul.f32 %v9432_v5, %v12947_v37  ;;  %9433 = vrsqrt.f32 %v12987_v12  ;;  %v13000_v6 = vsub.f32 %v12437_v30, %v4804_v44  ;;  %v7246_v8 = vmul.f32 %v12974_v54, %v7245_v51 }
0x117b   :  { %v7065_v29 = vmul.f32 %v7064_v36, %v12904_v3  ;;  %v7073_v22 = vmul.f32 %v9430_v0, %v7072_v53  ;;  %9435 = vrcp.f32 %v12982_v11  ;;  %v5234_v30 = vadd.f32 %v12928_v59, %v5233_v57 }
0x117c   :  { %v5015_v60 = vmul.f32 %v9432_v5, %v5014_v32  ;;  %v4836_v2 = vmul.f32 %v13000_v6, %v13000_v6  ;;  %v7247_v44 = vadd.f32 %v12974_v54, %v7246_v8  ;;  %v7255_v36 = vor.u32 1.1754944e-38, %v7254_v40 }
0x117d   :  { %v7067_v20 = vsel %vm7066_vm13, %v12904_v3, %v7065_v29  ;;  %v7074_v61 = vmul.f32 0.5, %v7073_v22  ;;  %9437 = vrcp.f32 %v12961_v62  ;;  %v5238_v29 = vsel %vm13029_vm7, %v12928_v59, %v5234_v30 }
0x117e   :  { %v7070_v16 = vsel %vm7068_vm2, %v7069_v58, %v7067_v20  ;;  %v5016_v33 = vmul.f32 0.5, %v5015_v60  ;;  %v4882_v18 = vsel %vm1297_vm1, %v4836_v2, 0.0  ;;  %v7251_v34 = vsel %vm7250_vm5, %v12974_v54, %v7247_v44 }
0x117f   :  { %v7075_v1 = vsub.f32 1.5, %v7074_v61  ;;  %v6843_v51 = vpop.xlane.xlu0 %6842  ;;  %v13021_v57 = vadd.f32 1e-06, %v7070_v16  ;;  %4883 = vadd.xlane.f32.xlu2 %v4882_v18  ;;  %v7256_v40 = vsel %vm7253_vm6, %v7255_v36, %v7251_v34  ;;  %v5242_v8 = vor.u32 1.1754944e-38, %v5241_v9  ;;  %v4869_v2 = vpop.xlane.xlu2 %4868 }
0x1180   :  { %v9434_v53 = vpop.eup %9433  ;;  %v5017_v3 = vsub.f32 1.5, %v5016_v33  ;;  %v6861_v58 = vmul.f32 %v6843_v51, %v11164_v41  ;;  %vm5020_vm9 = vcmp.eq.f32.partialorder %v12947_v37, inf  ;;  %vm5022_vm10 = vcmp.eq.f32.partialorder %v12947_v37, 0.0  ;;  %v13060_v33 = vld [vmem:[%s14548_s8 + $0x2] ss:$0 sm:$0xff] }
0x1181   :  { %v7084_v13 = vmul.f32 %v9434_v53, %v12987_v12  ;;  %v13038_v22 = vpop.eup %9435  ;;  %v7076_v54 = vmul.f32 %v9430_v0, %v7075_v1  ;;  %9439 = vrcp.f32 %v13021_v57  ;;  %v7257_v0 = vmul.f32 %v7256_v40, %v12958_v27 }
0x1182   :  { %v5018_v60 = vmul.f32 %v9432_v5, %v5017_v3  ;;  %v13045_v61 = vsub.f32 %v12468_v42, %v6861_v58  ;;  %v5243_v5 = vsel %vm5240_vm8, %v5242_v8, %v5238_v29  ;;  %v5023_v21 = vand.u32 2147483648, %v12947_v37 }
0x1183   :  { %v7085_v20 = vmul.f32 %v9434_v53, %v7084_v13  ;;  %v7274_v30 = vmul.f32 %v13038_v22, %v12982_v11  ;;  %v7077_v42 = vmul.f32 %v7076_v54, %v12945_v43  ;;  %v7427_v27 = vadd.f32 %v13060_v33, %v7257_v0  ;;  %v13064_v1 = vpop.eup %9437  ;;  %v14711_v13 = vld [vmem:[#allocation51_spill] sm:$0xff] }
0x1184   :  { %v5019_v59 = vmul.f32 %v5018_v60, %v12947_v37  ;;  %v6893_v9 = vmul.f32 %v13045_v61, %v13045_v61  ;;  %v5244_v44 = vmul.f32 %v5243_v5, %v12805_v45  ;;  %v13068_v36 = vmul.f32 0.032258064, %v4869_v2 }
0x1185   :  { %v7086_v10 = vmul.f32 0.5, %v7085_v20  ;;  %v13075_v58 = vsel %vm2961_vm4, %v12609_v50, %v12796_v35  ;;  %v7443_v45 = vadd.f32 %v7427_v27, %v12463_v56  ;;  %vm7078_vm11 = vcmp.eq.f32.partialorder %v12945_v43, inf }
0x1186   :  { %v5021_v16 = vsel %vm5020_vm9, %v12947_v37, %v5019_v59  ;;  %v6937_v3 = vsel %vm1297_vm1, %v6893_v9, 0.0  ;;  %v5372_v32 = vadd.f32 %v13060_v33, %v5244_v44  ;;  %v3290_v40 = vadd.f32 %v13060_v33, %v14711_v13 }
0x1187   :  { %v5024_v18 = vsel %vm5022_vm10, %v5023_v21, %v5021_v16  ;;  %v7087_v51 = vsub.f32 1.5, %v7086_v10  ;;  %6938 = vadd.xlane.f32.xlu0 %v6937_v3  ;;  %v7275_v29 = vsub.f32 1.0, %v7274_v30  ;;  %v13084_v54 = vpop.eup %9439  ;;  %v7079_v60 = vsel %vm7078_vm11, %v12945_v43, %v7077_v42  ;;  %v4872_v30 = vpop.xlane.xlu0 %4871 }
0x1188   :  { %v13077_v34 = vadd.f32 1e-06, %v5024_v18  ;;  %vm7080_vm12 = vcmp.eq.f32.partialorder %v12945_v43, 0.0  ;;  %v7081_v35 = vand.u32 2147483648, %v12945_v43  ;;  %vm7090_vm13 = vcmp.eq.f32.partialorder %v12987_v12, inf }
0x1189   :  { %v7088_v37 = vmul.f32 %v9434_v53, %v7087_v51  ;;  %v7461_v53 = vpack.c.bf16 %v13005_v26, %v7443_v45  ;;  %v13094_v8 = vadd.f32 %v5372_v32, %v3290_v40  ;;  %v7276_v20 = vmul.f32 %v13038_v22, %v7275_v29  ;;  %v13107_v26 = vld [vmem:[%s14548_s8 + $0x1] ss:$0 sm:$0xff] }
0x118a   :  { %9441 = vrcp.f32 %v13077_v34  ;;  %vm7279_vm2 = vweird.f32 %v13038_v22  ;;  %v7282_v59 = vand.u32 2147483647, %v12982_v11  ;;  %v7082_v2 = vsel %vm7080_vm12, %v7081_v35, %v7079_v60 }
0x118b   :  { %v7089_v56 = vmul.f32 %v7088_v37, %v12987_v12  ;;  %9443 = vrsqrt.f32 %v13068_v36  ;;  %8820 = vmatmul.msk.bf16.gmra.mxu2 %vm1297_vm1, %v7461_v53  ;;  %v7284_v0 = vand.u32 2147483648, %v12982_v11  ;;  %v7289_v5 = vmul.f32 %v13084_v54, %v13021_v57 }
0x118c   :  { %v6965_v21 = vmul.f32 %v13107_v26, %v12358_v23  ;;  %v7093_v10 = vand.u32 2147483648, %v12987_v12  ;;  %v7277_v9 = vadd.f32 %v13038_v22, %v7276_v20  ;;  %vm7278_vm14 = vweird.f32 %v12982_v11 }
0x118d   :  { %v7091_v43 = vsel %vm7090_vm13, %v12987_v12, %v7089_v56  ;;  %vm7092_vm15 = vcmp.eq.f32.partialorder %v12987_v12, 0.0  ;;  %vm7280_vm0 = vmor %vm7278_vm14, %vm7279_vm2  ;;  %v7285_v42 = vor.u32 1.1754944e-38, %v7284_v0  ;;  %v7290_v16 = vsub.f32 1.0, %v7289_v5 }
0x118e   :  { %v5261_v27 = vmul.f32 %v13064_v1, %v12961_v62  ;;  %v13119_v18 = vadd.f32 1e-06, %v7082_v2  ;;  %v7094_v23 = vsel %vm7092_vm15, %v7093_v10, %v7091_v43  ;;  %v7281_v51 = vsel %vm7280_vm0, %v13038_v22, %v7277_v9 }
0x118f   :  { %vm7283_vm3 = vcmp.eq.f32.partialorder %v7282_v59, 8.507059e+37  ;;  %v7291_v12 = vmul.f32 %v13084_v54, %v7290_v16  ;;  %vm7294_vm4 = vweird.f32 %v13084_v54  ;;  %v7299_v32 = vand.u32 2147483648, %v13021_v57 }
0x1190   :  { %v13117_v44 = vpop.eup %9441  ;;  %v7286_v45 = vsel %vm7283_vm3, %v7285_v42, %v7281_v51  ;;  %v13127_v37 = vmul.f32 0.032258064, %v4872_v30  ;;  %v7297_v29 = vand.u32 2147483647, %v13021_v57  ;;  %v6966_v22 = vmul.f32 %v13107_v26, %v12374_v19 }
0x1191   :  { %v13122_v3 = vpop.eup %9443  ;;  %v6846_v11 = vpop.xlane.xlu1 %6845  ;;  %v7287_v40 = vmul.f32 %v7286_v45, %v6965_v21  ;;  %v7292_v60 = vadd.f32 %v13084_v54, %v7291_v12  ;;  %vm7293_vm5 = vweird.f32 %v13021_v57  ;;  %v5246_v35 = vmul.f32 %v13117_v44, %v13077_v34 }
0x1192   :  { %v6862_v13 = vmul.f32 %v6846_v11, %v11164_v41  ;;  %9445 = vrcp.f32 %v13119_v18  ;;  %v13138_v56 = vadd.f32 1e-06, %v7094_v23  ;;  %vm7295_vm6 = vmor %vm7293_vm5, %vm7294_vm4  ;;  %v7300_v19 = vor.u32 1.1754944e-38, %v7299_v32 }
0x1193   :  { %v7429_v20 = vadd.f32 %v13060_v33, %v7287_v40  ;;  %v7296_v59 = vsel %vm7295_vm6, %v13084_v54, %v7292_v60  ;;  %v5247_v2 = vsub.f32 1.0, %v5246_v35  ;;  %v5262_v43 = vsub.f32 1.0, %v5261_v27 }
0x1194   :  { %v13141_v53 = vsub.f32 %v12528_v24, %v6862_v13  ;;  %v5038_v57 = vmul.f32 %v13122_v3, %v13068_v36  ;;  %9447 = vrsqrt.f32 %v13127_v37  ;;  %vm7298_vm7 = vcmp.eq.f32.partialorder %v7297_v29, 8.507059e+37 }
0x1195   :  { %v7301_v5 = vsel %vm7298_vm7, %v7300_v19, %v7296_v59  ;;  %v7445_v24 = vadd.f32 %v7429_v20, %v12748_v52  ;;  %v5248_v21 = vmul.f32 %v13117_v44, %v5247_v2  ;;  %vm5251_vm8 = vweird.f32 %v13117_v44 }
0x1196   :  { %v6894_v0 = vmul.f32 %v13141_v53, %v13141_v53  ;;  %9449 = vrcp.f32 %v13138_v56  ;;  %v7302_v10 = vmul.f32 %v7301_v5, %v6966_v22  ;;  %v5254_v9 = vand.u32 2147483647, %v13077_v34 }
0x1197   :  { %v5249_v30 = vadd.f32 %v13117_v44, %v5248_v21  ;;  %vm5250_vm9 = vweird.f32 %v13077_v34  ;;  %v5256_v42 = vand.u32 2147483648, %v13077_v34  ;;  %v5263_v52 = vmul.f32 %v13064_v1, %v5262_v43 }
0x1198   :  { %v6940_v54 = vsel %vm1297_vm1, %v6894_v0, 0.0  ;;  %v9446_v16 = vpop.eup %9445  ;;  %v4909_v27 = vmul.f32 %v13107_v26, %v12386_v14  ;;  %v5039_v23 = vmul.f32 %v13122_v3, %v5038_v57  ;;  %v7430_v51 = vadd.f32 %v13060_v33, %v7302_v10  ;;  %vm5252_vm10 = vmor %vm5250_vm9, %vm5251_vm8 }
0x1199   :  { %6941 = vadd.xlane.f32.xlu1 %v6940_v54  ;;  %vm5255_vm11 = vcmp.eq.f32.partialorder %v5254_v9, 8.507059e+37  ;;  %v5253_v11 = vsel %vm5252_vm10, %v13117_v44, %v5249_v30  ;;  %v5257_v45 = vor.u32 1.1754944e-38, %v5256_v42  ;;  %v5264_v12 = vadd.f32 %v13064_v1, %v5263_v52 }
0x119a   :  { %vm5266_vm12 = vweird.f32 %v13064_v1  ;;  %v13167_v34 = vpop.eup %9447  ;;  %v7446_v32 = vadd.f32 %v7430_v51, %v13094_v8  ;;  %vm5265_vm13 = vweird.f32 %v12961_v62  ;;  %v5269_v14 = vand.u32 2147483647, %v12961_v62 }
0x119b   :  { %v5271_v13 = vand.u32 2147483648, %v12961_v62  ;;  %vm2963_vm2 = vcmp.eq.f32.partialorder %v12609_v50, 0.0  ;;  %v3292_v44 = vadd.f32 %v13060_v33, %v12779_v55  ;;  %v5258_v40 = vsel %vm5255_vm11, %v5257_v45, %v5253_v11  ;;  %vm13176_vm14 = vmor %vm5265_vm13, %vm5266_vm12 }
0x119c   :  { %v7304_v22 = vmul.f32 %v9446_v16, %v13119_v18  ;;  %v9450_v60 = vpop.eup %9449  ;;  %v2965_v8 = vsel %vm2963_vm2, %v2964_v38, %v13075_v58  ;;  %v7462_v35 = vpack.c.bf16 %v7446_v32, %v7445_v24  ;;  %v5259_v20 = vmul.f32 %v5258_v40, %v4909_v27 }
0x119d   :  { %v5268_v62 = vsel %vm13176_vm14, %v13064_v1, %v5264_v12  ;;  %v4910_v55 = vmul.f32 %v13107_v26, %v12295_v25  ;;  %v5040_v59 = vmul.f32 0.5, %v5039_v23  ;;  %v5272_v19 = vor.u32 1.1754944e-38, %v5271_v13  ;;  %v14714_v23 = vld [vmem:[#allocation49_spill] sm:$0xff] }
0x119e   :  { %v7305_v2 = vsub.f32 1.0, %v7304_v22  ;;  %8821 = vmatmul.msk.bf16.gmra.mxu2 %vm1297_vm1, %v7462_v35  ;;  %vm5270_vm15 = vcmp.eq.f32.partialorder %v5269_v14, 8.507059e+37  ;;  %v5373_v43 = vadd.f32 %v13060_v33, %v5259_v20  ;;  %v7312_v50 = vand.u32 2147483647, %v13119_v18  ;;  %v14715_v14 = vld [vmem:[#allocation18_spill] sm:$0xff] }
0x119f   :  { %v7314_v38 = vand.u32 2147483648, %v13119_v18  ;;  %v5273_v58 = vsel %vm5270_vm15, %v5272_v19, %v5268_v62  ;;  %vm7309_vm0 = vweird.f32 %v9446_v16  ;;  %v7319_v1 = vmul.f32 %v9450_v60, %v13138_v56  ;;  %v14716_v62 = vld [vmem:[#allocation46_spill] sm:$0xff] }
0x11a0   :  { %v7306_v57 = vmul.f32 %v9446_v16, %v7305_v2  ;;  %v6967_v25 = vmul.f32 %v13107_v26, %v12398_v39  ;;  %v5050_v0 = vmul.f32 %v13167_v34, %v13127_v37  ;;  %v5274_v5 = vmul.f32 %v5273_v58, %v4910_v55 }
0x11a1   :  { %v5389_v24 = vadd.f32 %v5373_v43, %v12764_v46  ;;  %v5041_v21 = vsub.f32 1.5, %v5040_v59  ;;  %vm7308_vm3 = vweird.f32 %v13119_v18  ;;  %v7320_v10 = vsub.f32 1.0, %v7319_v1 }
0x11a2   :  { %v7307_v54 = vadd.f32 %v9446_v16, %v7306_v57  ;;  %v5374_v9 = vadd.f32 %v13060_v33, %v5274_v5  ;;  %vm7310_vm4 = vmor %vm7308_vm3, %vm7309_vm0  ;;  %vm7313_vm5 = vcmp.eq.f32.partialorder %v7312_v50, 8.507059e+37  ;;  %v7315_v30 = vor.u32 1.1754944e-38, %v7314_v38 }
0x11a3   :  { %v7329_v42 = vand.u32 2147483648, %v13138_v56  ;;  %v7321_v39 = vmul.f32 %v9450_v60, %v7320_v10  ;;  %vm7324_vm6 = vweird.f32 %v9450_v60  ;;  %v7327_v27 = vand.u32 2147483647, %v13138_v56 }
0x11a4   :  { %v7311_v52 = vsel %vm7310_vm4, %v9446_v16, %v7307_v54  ;;  %v13204_v51 = vmul.f32 0.032258064, %v14714_v23  ;;  %v5051_v46 = vmul.f32 %v13167_v34, %v5050_v0  ;;  %v5390_v11 = vadd.f32 %v5374_v9, %v3292_v44 }
0x11a5   :  { %v7316_v18 = vsel %vm7313_vm5, %v7315_v30, %v7311_v52  ;;  %v7322_v12 = vadd.f32 %v9450_v60, %v7321_v39  ;;  %vm7323_vm7 = vweird.f32 %v13138_v56  ;;  %v13208_v32 = vadd.f32 1e-06, %v2965_v8 }
0x11a6   :  { %v7317_v45 = vmul.f32 %v7316_v18, %v6967_v25  ;;  %v6968_v16 = vmul.f32 %v13107_v26, %v14715_v14  ;;  %vm7325_vm8 = vmor %vm7323_vm7, %vm7324_vm6  ;;  %v7330_v13 = vor.u32 1.1754944e-38, %v7329_v42  ;;  %v5042_v40 = vmul.f32 %v13122_v3, %v5041_v21 }
0x11a7   :  { %v7326_v29 = vsel %vm7325_vm8, %v9450_v60, %v7322_v12  ;;  %vm7328_vm9 = vcmp.eq.f32.partialorder %v7327_v27, 8.507059e+37  ;;  %v2980_v44 = vmul.f32 %v12750_v48, %v12768_v17  ;;  %9451 = vrsqrt.f32 %v13204_v51  ;;  %v8903_v27 = vld [vmem:[%s14553_s5] sm:$0xff] }
0x11a8   :  { %v7431_v22 = vadd.f32 %v13060_v33, %v7317_v45  ;;  %v5052_v35 = vmul.f32 0.5, %v5051_v46  ;;  %v7331_v56 = vsel %vm7328_vm9, %v7330_v13, %v7326_v29  ;;  %9453 = vrcp.f32 %v13208_v32 }
0x11a9   :  { %v7332_v8 = vmul.f32 %v7331_v56, %v6968_v16  ;;  %v13219_v55 = vmul.f32 0.032258064, %v14716_v62  ;;  %v5043_v3 = vmul.f32 %v5042_v40, %v13068_v36  ;;  %v2981_v59 = vmul.f32 0.5, %v2980_v44 }
0x11aa   :  { %v7447_v20 = vadd.f32 %v7431_v22, %v5389_v24  ;;  %v5053_v19 = vsub.f32 1.5, %v5052_v35  ;;  %vm5044_vm10 = vcmp.eq.f32.partialorder %v13068_v36, inf  ;;  %v5047_v57 = vand.u32 2147483648, %v13068_v36 }
0x11ab   :  { %v7432_v60 = vadd.f32 %v13060_v33, %v7332_v8  ;;  %9455 = vrsqrt.f32 %v13219_v55  ;;  %v5045_v17 = vsel %vm5044_vm10, %v13068_v36, %v5043_v3  ;;  %v2982_v58 = vsub.f32 1.5, %v2981_v59 }
0x11ac   :  { %v5054_v1 = vmul.f32 %v13167_v34, %v5053_v19  ;;  %vm5046_vm11 = vcmp.eq.f32.partialorder %v13068_v36, 0.0  ;;  %vm5056_vm12 = vcmp.eq.f32.partialorder %v13127_v37, inf  ;;  %v5059_v39 = vand.u32 2147483648, %v13127_v37 }
0x11ad   :  { %v7448_v2 = vadd.f32 %v7432_v60, %v5390_v11  ;;  %v9452_v43 = vpop.eup %9451  ;;  %v5048_v0 = vsel %vm5046_vm11, %v5047_v57, %v5045_v17  ;;  %v2983_v24 = vmul.f32 %v12750_v48, %v2982_v58  ;;  %v8904_v48 = vld [vmem:[%s14553_s5 + $0x8] sm:$0xff]  ;;  %vm5058_vm13 = vcmp.eq.f32.partialorder %v13127_v37, 0.0 }
0x11ae   :  { %v13226_v38 = vpop.eup %9453  ;;  %v2991_v25 = vmul.f32 %v9452_v43, %v13204_v51  ;;  %v5055_v21 = vmul.f32 %v5054_v1, %v13127_v37  ;;  %v13239_v9 = vadd.f32 1e-06, %v5048_v0  ;;  %7608 = vmatpush.bf16.msra.mxu3 %v8904_v48  ;;  %vm2985_vm2 = vcmp.eq.f32.partialorder %v12693_v4, inf  ;;  %v14717_v60 = vld [vmem:[#allocation39_spill] sm:$0xff] }
0x11af   :  { %v7463_v50 = vpack.c.bf16 %v7448_v2, %v7447_v20  ;;  %v3193_v5 = vmul.f32 %v13226_v38, %v13208_v32  ;;  %v2984_v36 = vmul.f32 %v2983_v24, %v12693_v4  ;;  %v2988_v12 = vand.u32 2147483648, %v12693_v4 }
0x11b0   :  { %v2992_v10 = vmul.f32 %v9452_v43, %v2991_v25  ;;  %v5057_v42 = vsel %vm5056_vm12, %v13127_v37, %v5055_v21  ;;  %9457 = vrcp.f32 %v13239_v9  ;;  %vm2987_vm14 = vcmp.eq.f32.partialorder %v12693_v4, 0.0 }
0x11b1   :  { %8822 = vmatmul.msk.bf16.gmra.mxu2 %vm1297_vm1, %v7463_v50  ;;  %v13237_v54 = vpop.eup %9455  ;;  %v3194_v34 = vsub.f32 1.0, %v3193_v5  ;;  %v5060_v23 = vsel %vm5058_vm13, %v5059_v39, %v5057_v42  ;;  %v2986_v11 = vsel %vm2985_vm2, %v12693_v4, %v2984_v36  ;;  %vm3198_vm15 = vweird.f32 %v13226_v38  ;;  %v13271_v4 = vld [vmem:[%s14548_s8 + $0x3] ss:$0 sm:$0xff] }
0x11b2   :  { %v3015_v30 = vmul.f32 %v13237_v54, %v13219_v55  ;;  %v2993_v52 = vmul.f32 0.5, %v2992_v10  ;;  %v13261_v37 = vadd.f32 1e-06, %v5060_v23  ;;  %7609 = vmatpush.bf16.msra.mxu3 %v8903_v27  ;;  %v2989_v40 = vsel %vm2987_vm14, %v2988_v12, %v2986_v11  ;;  %v14718_v27 = vld [vmem:[#allocation16_spill] sm:$0xff] }
0x11b3   :  { %v3195_v46 = vmul.f32 %v13226_v38, %v3194_v34  ;;  %v3203_v35 = vand.u32 2147483648, %v13208_v32  ;;  %vm3197_vm0 = vweird.f32 %v13208_v32  ;;  %v3201_v8 = vand.u32 2147483647, %v13208_v32 }
0x11b4   :  { %v3016_v18 = vmul.f32 %v13237_v54, %v3015_v30  ;;  %v2994_v14 = vsub.f32 1.5, %v2993_v52  ;;  %v13276_v20 = vadd.f32 1e-06, %v2989_v40  ;;  %vm3199_vm3 = vmor %vm3197_vm0, %vm3198_vm15  ;;  %v2828_v59 = vmul.f32 %v13107_v26, %v14717_v60 }
0x11b5   :  { %v3196_v22 = vadd.f32 %v13226_v38, %v3195_v46  ;;  %vm3202_vm4 = vcmp.eq.f32.partialorder %v3201_v8, 8.507059e+37  ;;  %v5284_v10 = vand.u32 2147483647, %v13239_v9  ;;  %vm2997_vm6 = vcmp.eq.f32.partialorder %v13204_v51, inf }
0x11b6   :  { %v9458_v13 = vpop.eup %9457  ;;  %v3017_v44 = vmul.f32 0.5, %v3016_v18  ;;  %v2995_v56 = vmul.f32 %v9452_v43, %v2994_v14  ;;  %v3204_v43 = vor.u32 1.1754944e-38, %v3203_v35  ;;  %v3000_v39 = vand.u32 2147483648, %v13204_v51 }
0x11b7   :  { %v5276_v62 = vmul.f32 %v9458_v13, %v13239_v9  ;;  %v3200_v3 = vsel %vm3199_vm3, %v13226_v38, %v3196_v22  ;;  %v5286_v38 = vand.u32 2147483648, %v13239_v9  ;;  %vm5281_vm5 = vweird.f32 %v9458_v13 }
0x11b8   :  { %v3018_v19 = vsub.f32 1.5, %v3017_v44  ;;  %v2996_v50 = vmul.f32 %v2995_v56, %v13204_v51  ;;  %v3205_v1 = vsel %vm3202_vm4, %v3204_v43, %v3200_v3  ;;  %vm5280_vm7 = vweird.f32 %v13239_v9 }
0x11b9   :  { %v5277_v17 = vsub.f32 1.0, %v5276_v62  ;;  %v4911_v23 = vmul.f32 %v13107_v26, %v14718_v27  ;;  %v3206_v46 = vmul.f32 %v3205_v1, %v2828_v59  ;;  %vm5282_vm8 = vmor %vm5280_vm7, %vm5281_vm5  ;;  %v5287_v11 = vor.u32 1.1754944e-38, %v5286_v38 }
0x11ba   :  { %v3019_v48 = vmul.f32 %v13237_v54, %v3018_v19  ;;  %v2998_v52 = vsel %vm2997_vm6, %v13204_v51, %v2996_v50  ;;  %vm5285_vm9 = vcmp.eq.f32.partialorder %v5284_v10, 8.507059e+37  ;;  %vm2999_vm10 = vcmp.eq.f32.partialorder %v13204_v51, 0.0 }
0x11bb   :  { %v5278_v25 = vmul.f32 %v9458_v13, %v5277_v17  ;;  %v3001_v14 = vsel %vm2999_vm10, %v3000_v39, %v2998_v52  ;;  %v3293_v44 = vadd.f32 %v13060_v33, %v3206_v46  ;;  %v5301_v35 = vand.u32 2147483648, %v13261_v37  ;;  %v14720_v39 = vld [vmem:[#allocation52_spill] sm:$0xff] }
0x11bc   :  { %v3020_v22 = vmul.f32 %v3019_v48, %v13219_v55  ;;  %v5299_v8 = vand.u32 2147483647, %v13261_v37  ;;  %vm3021_vm12 = vcmp.eq.f32.partialorder %v13219_v55, inf  ;;  %v13319_v3 = vadd.f32 1e-06, %v3001_v14 }
0x11bd   :  { %v7513_v45 = vpop.f32.mrf.mxu2  ;;  %v5279_v42 = vadd.f32 %v9458_v13, %v5278_v25  ;;  %vm5295_vm13 = vweird.f32 %v13261_v37  ;;  %v3024_v10 = vand.u32 2147483648, %v13219_v55  ;;  %vm3023_vm15 = vcmp.eq.f32.partialorder %v13219_v55, 0.0 }
0x11be   :  { %v7514_v32 = vadd.f32 %v13271_v4, %v7513_v45  ;;  %v3022_v50 = vsel %vm3021_vm12, %v13219_v55, %v3020_v22  ;;  %vm5300_vm14 = vcmp.eq.f32.partialorder %v5299_v8, 8.507059e+37  ;;  %v3294_v27 = vadd.f32 %v13060_v33, %v14720_v39 }
0x11bf   :  { %v5283_v54 = vsel %vm5282_vm8, %v9458_v13, %v5279_v42  ;;  %v3025_v48 = vsel %vm3023_vm15, %v3024_v10, %v3022_v50  ;;  %vm3227_vm0 = vweird.f32 %v13276_v20  ;;  %vm3242_vm10 = vweird.f32 %v13319_v3 }
0x11c0   :  { %v6927_v16 = vpop.xlane.xlu1 %6926  ;;  %v5288_v12 = vsel %vm5285_vm9, %v5287_v11, %v5283_v54  ;;  %v13354_v14 = vadd.f32 1e-06, %v3025_v48  ;;  %v14722_v48 = vld [vmem:[#allocation36_spill] sm:$0xff] }
0x11c1   :  { %v13263_v29 = vmul.f32 0.032258064, %v6927_v16  ;;  %v5289_v16 = vmul.f32 %v5288_v12, %v4911_v23 }
0x11c3   :  { %9459 = vrsqrt.f32 %v13263_v29  ;;  %v5375_v62 = vadd.f32 %v13060_v33, %v5289_v16  ;;  %vm7102_vm3 = vcmp.eq.f32.partialorder %v13263_v29, inf  ;;  %vm7104_vm5 = vcmp.eq.f32.partialorder %v13263_v29, 0.0 }
0x11c4   :  { %9461 = vrcp.f32 %v13261_v37 }
0x11c5   :  { %v7515_v2 = vpop.f32.mrf.mxu2  ;;  %9463 = vrcp.f32 %v13276_v20  ;;  %v13327_v17 = vadd.f32 %v5375_v62, %v3293_v44  ;;  %v3231_v62 = vand.u32 2147483647, %v13276_v20 }
0x11c6   :  { %v7516_v58 = vadd.f32 %v13271_v4, %v7515_v2 }
0x11c7   :  { %vm3232_vm9 = vcmp.eq.f32.partialorder %v3231_v62, 8.507059e+37 }
0x11c8   :  { %v4878_v57 = vpop.xlane.xlu1 %4877  ;;  %v7557_v5 = vpack.c.bf16 %v7516_v58, %v7514_v32  ;;  %v6930_v21 = vpop.xlane.xlu2 %6929  ;;  %v5302_v32 = vor.u32 1.1754944e-38, %v5301_v35 }
0x11c9   :  { %v13288_v0 = vpop.eup %9459  ;;  %v13290_v24 = vmul.f32 0.032258064, %v4878_v57  ;;  %v13296_v30 = vmul.f32 0.032258064, %v6930_v21  ;;  %v14719_v57 = vld [vmem:[#allocation21_spill] sm:$0xff] }
0x11ca   :  { %v9462_v34 = vpop.eup %9461  ;;  %v7096_v36 = vmul.f32 %v13288_v0, %v13263_v29  ;;  %8834 = vmatmul.msk.bf16.vlgmr.msra.gmra.mxu3 %vm1297_vm1, %v7557_v5  ;;  %v4912_v1 = vmul.f32 %v13107_v26, %v14719_v57 }
0x11cb   :  { %9465 = vrsqrt.f32 %v13296_v30  ;;  %v5291_v18 = vmul.f32 %v9462_v34, %v13261_v37  ;;  %v13309_v45 = vpop.eup %9463  ;;  %vm5296_vm11 = vweird.f32 %v9462_v34  ;;  %vm7114_vm6 = vcmp.eq.f32.partialorder %v13296_v30, inf }
0x11cc   :  { %9467 = vrsqrt.f32 %v13290_v24  ;;  %v7097_v9 = vmul.f32 %v13288_v0, %v7096_v36  ;;  %vm5297_vm2 = vmor %vm5295_vm13, %vm5296_vm11  ;;  %v3223_v58 = vmul.f32 %v13309_v45, %v13276_v20  ;;  %vm3228_vm4 = vweird.f32 %v13309_v45 }
0x11cd   :  { %v5292_v40 = vsub.f32 1.0, %v5291_v18  ;;  %vm13397_vm7 = vmor %vm3227_vm0, %vm3228_vm4  ;;  %vm7116_vm8 = vcmp.eq.f32.partialorder %v13296_v30, 0.0  ;;  %vm5080_vm12 = vcmp.eq.f32.partialorder %v13290_v24, inf }
0x11ce   :  { %v7098_v60 = vmul.f32 0.5, %v7097_v9  ;;  %v3224_v23 = vsub.f32 1.0, %v3223_v58  ;;  %v7105_v58 = vand.u32 2147483648, %v13263_v29 }
0x11cf   :  { %v5293_v56 = vmul.f32 %v9462_v34, %v5292_v40 }
0x11d0   :  { %v6933_v13 = vpop.xlane.xlu2 %6932  ;;  %v7099_v37 = vsub.f32 1.5, %v7098_v60  ;;  %v3225_v40 = vmul.f32 %v13309_v45, %v3224_v23 }
0x11d1   :  { %v9466_v51 = vpop.eup %9465  ;;  %v13321_v59 = vmul.f32 0.032258064, %v6933_v13  ;;  %v5294_v43 = vadd.f32 %v9462_v34, %v5293_v56 }
0x11d2   :  { %v13323_v19 = vpop.eup %9467  ;;  %v7108_v2 = vmul.f32 %v9466_v51, %v13296_v30  ;;  %v7100_v11 = vmul.f32 %v13288_v0, %v7099_v37  ;;  %v3226_v8 = vadd.f32 %v13309_v45, %v3225_v40  ;;  %v3233_v37 = vand.u32 2147483648, %v13276_v20 }
0x11d3   :  { %9469 = vrsqrt.f32 %v13321_v59  ;;  %v5298_v38 = vsel %vm5297_vm2, %v9462_v34, %v5294_v43  ;;  %v5074_v5 = vmul.f32 %v13323_v19, %v13290_v24  ;;  %vm7128_vm4 = vcmp.eq.f32.partialorder %v13321_v59, 0.0 }
0x11d4   :  { %v7109_v25 = vmul.f32 %v9466_v51, %v7108_v2  ;;  %9471 = vrcp.f32 %v13319_v3  ;;  %v5303_v21 = vsel %vm5300_vm14, %v5302_v32, %v5298_v38  ;;  %v7101_v0 = vmul.f32 %v7100_v11, %v13263_v29 }
0x11d5   :  { %v5304_v42 = vmul.f32 %v5303_v21, %v4912_v1  ;;  %v5075_v54 = vmul.f32 %v13323_v19, %v5074_v5  ;;  %v3230_v11 = vsel %vm13397_vm7, %v13309_v45, %v3226_v8  ;;  %v3248_v45 = vand.u32 2147483648, %v13319_v3 }
0x11d6   :  { %v7110_v36 = vmul.f32 0.5, %v7109_v25  ;;  %vm5082_vm14 = vcmp.eq.f32.partialorder %v13290_v24, 0.0 }
0x11d7   :  { %v5376_v34 = vadd.f32 %v13060_v33, %v5304_v42  ;;  %v5076_v22 = vmul.f32 0.5, %v5075_v54 }
0x11d8   :  { %v4875_v52 = vpop.xlane.xlu0 %4874  ;;  %v7111_v18 = vsub.f32 1.5, %v7110_v36  ;;  %v14721_v36 = vld [vmem:[#allocation40_spill] sm:$0xff] }
0x11d9   :  { %v13344_v46 = vpop.eup %9469  ;;  %v13348_v9 = vmul.f32 0.032258064, %v4875_v52  ;;  %v13350_v12 = vadd.f32 %v5376_v34, %v3294_v27  ;;  %v5077_v2 = vsub.f32 1.5, %v5076_v22  ;;  %v13387_v42 = vmul.f32 %v13107_v26, %v14721_v36 }
0x11da   :  { %v13352_v55 = vpop.eup %9471  ;;  %v7120_v16 = vmul.f32 %v13344_v46, %v13321_v59  ;;  %v7112_v44 = vmul.f32 %v9466_v51, %v7111_v18  ;;  %v7103_v51 = vsel %vm7102_vm3, %v13263_v29, %v7101_v0  ;;  %v2830_v29 = vmul.f32 %v13107_v26, %v14722_v48 }
0x11db   :  { %9473 = vrsqrt.f32 %v13348_v9  ;;  %v3238_v35 = vmul.f32 %v13352_v55, %v13319_v3  ;;  %v7106_v5 = vsel %vm7104_vm5, %v7105_v58, %v7103_v51  ;;  %v5078_v52 = vmul.f32 %v13323_v19, %v5077_v2 }
0x11dc   :  { %9475 = vrcp.f32 %v13354_v14  ;;  %v7121_v13 = vmul.f32 %v13344_v46, %v7120_v16  ;;  %v7113_v43 = vmul.f32 %v7112_v44, %v13296_v30  ;;  %v7117_v34 = vand.u32 2147483648, %v13296_v30 }
0x11dd   :  { %v3239_v25 = vsub.f32 1.0, %v3238_v35  ;;  %v13406_v19 = vadd.f32 1e-06, %v7106_v5  ;;  %v3234_v16 = vor.u32 1.1754944e-38, %v3233_v37  ;;  %v5079_v44 = vmul.f32 %v5078_v52, %v13290_v24 }
0x11de   :  { %v7122_v38 = vmul.f32 0.5, %v7121_v13  ;;  %v7115_v39 = vsel %vm7114_vm6, %v13296_v30, %v7113_v43  ;;  %vm3243_vm11 = vweird.f32 %v13352_v55  ;;  %v5083_v37 = vand.u32 2147483648, %v13290_v24 }
0x11df   :  { %v3240_v54 = vmul.f32 %v13352_v55, %v3239_v25  ;;  %v7118_v20 = vsel %vm7116_vm8, %v7117_v34, %v7115_v39  ;;  %v3235_v35 = vsel %vm3232_vm9, %v3234_v16, %v3230_v11  ;;  %v5081_v58 = vsel %vm5080_vm12, %v13290_v24, %v5079_v44  ;;  %vm13432_vm13 = vmor %vm3242_vm10, %vm3243_vm11 }
0x11e0   :  { %v6936_v56 = vpop.xlane.xlu0 %6935  ;;  %v7123_v18 = vsub.f32 1.5, %v7122_v38  ;;  %v13420_v62 = vadd.f32 1e-06, %v7118_v20  ;;  %vm5068_vm2 = vcmp.eq.f32.partialorder %v13348_v9, inf  ;;  %v5084_v48 = vsel %vm5082_vm14, %v5083_v37, %v5081_v58 }
0x11e1   :  { %v9474_v60 = vpop.eup %9473  ;;  %v13372_v50 = vmul.f32 0.032258064, %v6936_v56  ;;  %v3241_v8 = vadd.f32 %v13352_v55, %v3240_v54  ;;  %v5071_v52 = vand.u32 2147483648, %v13348_v9  ;;  %vm5070_vm0 = vcmp.eq.f32.partialorder %v13348_v9, 0.0 }
0x11e2   :  { %v4881_v32 = vpop.xlane.xlu1 %4880  ;;  %v5062_v57 = vmul.f32 %v9474_v60, %v13348_v9  ;;  %v13383_v10 = vpop.eup %9475  ;;  %v7124_v51 = vmul.f32 %v13344_v46, %v7123_v18  ;;  %v3249_v46 = vor.u32 1.1754944e-38, %v3248_v45  ;;  %vm7126_vm3 = vcmp.eq.f32.partialorder %v13321_v59, inf }
0x11e3   :  { %v13376_v1 = vmul.f32 0.032258064, %v4881_v32  ;;  %9477 = vrsqrt.f32 %v13372_v50  ;;  %v3268_v0 = vmul.f32 %v13383_v10, %v13354_v14  ;;  %v3246_v32 = vand.u32 2147483647, %v13319_v3 }
0x11e4   :  { %v5063_v21 = vmul.f32 %v9474_v60, %v5062_v57  ;;  %v7125_v3 = vmul.f32 %v7124_v51, %v13321_v59  ;;  %v13451_v18 = vmul.f32 %v3235_v35, %v2830_v29  ;;  %v13453_v16 = vadd.f32 1e-06, %v5084_v48 }
0x11e5   :  { %9479 = vrsqrt.f32 %v13376_v1  ;;  %v3269_v38 = vsub.f32 1.0, %v3268_v0  ;;  %vm3247_vm15 = vcmp.eq.f32.partialorder %v3246_v32, 8.507059e+37  ;;  %v7129_v44 = vand.u32 2147483648, %v13321_v59 }
0x11e6   :  { %v5064_v23 = vmul.f32 0.5, %v5063_v21  ;;  %9481 = vrcp.f32 %v13406_v19  ;;  %v3245_v21 = vsel %vm13432_vm13, %v13352_v55, %v3241_v8  ;;  %v3276_v55 = vand.u32 2147483647, %v13354_v14 }
0x11e7   :  { %9483 = vrcp.f32 %v13420_v62  ;;  %v7127_v20 = vsel %vm7126_vm3, %v13321_v59, %v7125_v3  ;;  %v13459_v0 = vmul.f32 %v13383_v10, %v3269_v38  ;;  %vm7138_vm5 = vcmp.eq.f32.partialorder %v13372_v50, inf }
0x11e8   :  { %v5065_v40 = vsub.f32 1.5, %v5064_v23  ;;  %v3250_v23 = vsel %vm3247_vm15, %v3249_v46, %v3245_v21  ;;  %v7130_v8 = vsel %vm7128_vm4, %v7129_v44, %v7127_v20  ;;  %vm7140_vm6 = vcmp.eq.f32.partialorder %v13372_v50, 0.0 }
0x11e9   :  { %v9478_v22 = vpop.eup %9477  ;;  %v13467_v29 = vmul.f32 %v3250_v23, %v13387_v42  ;;  %v7344_v59 = vand.u32 2147483648, %v13406_v19  ;;  %v7141_v42 = vand.u32 2147483648, %v13372_v50  ;;  %v7342_v58 = vand.u32 2147483647, %v13406_v19 }
0x11ea   :  { %v5066_v56 = vmul.f32 %v9474_v60, %v5065_v40  ;;  %v7132_v30 = vmul.f32 %v9478_v22, %v13372_v50  ;;  %vm7338_vm8 = vweird.f32 %v13406_v19  ;;  %vm7353_vm12 = vweird.f32 %v13420_v62 }
0x11eb   :  { %v13414_v13 = vpop.eup %9479  ;;  %v7345_v3 = vor.u32 1.1754944e-38, %v7344_v59  ;;  %vm7343_vm11 = vcmp.eq.f32.partialorder %v7342_v58, 8.507059e+37  ;;  %vm5092_vm14 = vcmp.eq.f32.partialorder %v13376_v1, inf  ;;  %vm5094_vm15 = vcmp.eq.f32.partialorder %v13376_v1, 0.0 }
0x11ec   :  { %v5086_v2 = vmul.f32 %v13414_v13, %v13376_v1  ;;  %v5067_v43 = vmul.f32 %v5066_v56, %v13348_v9  ;;  %v7133_v60 = vmul.f32 %v9478_v22, %v7132_v30  ;;  %v13446_v27 = vpop.eup %9481 }
0x11ed   :  { %v9484_v35 = vpop.eup %9483  ;;  %vm7339_vm7 = vweird.f32 %v13446_v27 }
0x11ee   :  { %v5087_v57 = vmul.f32 %v13414_v13, %v5086_v2  ;;  %v7134_v5 = vmul.f32 0.5, %v7133_v60  ;;  %v5069_v36 = vsel %vm5068_vm2, %v13348_v9, %v5067_v43  ;;  %v6969_v9 = vmul.f32 %v13107_v26, %v12726_v28  ;;  %vm13494_vm9 = vmor %vm7338_vm8, %vm7339_vm7 }
0x11ef   :  { %v5072_v24 = vsel %vm5070_vm0, %v5071_v52, %v5069_v36  ;;  %v6970_v28 = vmul.f32 %v13107_v26, %v12786_v49  ;;  %v7349_v49 = vmul.f32 %v9484_v35, %v13420_v62  ;;  %v13484_v60 = vadd.f32 1e-06, %v7130_v8 }
0x11f0   :  { %v7135_v39 = vsub.f32 1.5, %v7134_v5  ;;  %v5088_v34 = vmul.f32 0.5, %v5087_v57  ;;  %v13470_v45 = vadd.f32 1e-06, %v5072_v24  ;;  %vm7354_vm10 = vweird.f32 %v9484_v35 }
0x11f1   :  { %v7350_v38 = vsub.f32 1.0, %v7349_v49  ;;  %vm7355_vm13 = vmor %vm7353_vm12, %vm7354_vm10  ;;  %vm5325_vm10 = vweird.f32 %v13453_v16 }
0x11f2   :  { %v7136_v11 = vmul.f32 %v9478_v22, %v7135_v39  ;;  %v4884_v54 = vpop.xlane.xlu2 %4883  ;;  %v7334_v22 = vmul.f32 %v13446_v27, %v13406_v19  ;;  %v5089_v56 = vsub.f32 1.5, %v5088_v34  ;;  %v7357_v19 = vand.u32 2147483647, %v13420_v62 }
0x11f3   :  { %v13456_v40 = vmul.f32 0.032258064, %v4884_v54  ;;  %v7518_v30 = vpop.f32.mrf.mxu2  ;;  %v7351_v52 = vmul.f32 %v9484_v35, %v7350_v38  ;;  %vm5310_vm4 = vweird.f32 %v13470_v45 }
0x11f4   :  { %v7137_v51 = vmul.f32 %v7136_v11, %v13372_v50  ;;  %v7335_v2 = vsub.f32 1.0, %v7334_v22  ;;  %v5090_v32 = vmul.f32 %v13414_v13, %v5089_v56  ;;  %v7359_v13 = vand.u32 2147483648, %v13420_v62 }
0x11f5   :  { %9485 = vrsqrt.f32 %v13456_v40  ;;  %v7519_v34 = vadd.f32 %v13271_v4, %v7518_v30  ;;  %v7352_v20 = vadd.f32 %v9484_v35, %v7351_v52  ;;  %vm7358_vm2 = vcmp.eq.f32.partialorder %v7357_v19, 8.507059e+37 }
0x11f6   :  { %9487 = vrcp.f32 %v13453_v16  ;;  %v7336_v43 = vmul.f32 %v13446_v27, %v7335_v2  ;;  %v7139_v57 = vsel %vm7138_vm5, %v13372_v50, %v7137_v51  ;;  %v5091_v22 = vmul.f32 %v5090_v32, %v13376_v1 }
0x11f7   :  { %9489 = vrcp.f32 %v13470_v45  ;;  %v7360_v30 = vor.u32 1.1754944e-38, %v7359_v13  ;;  %v7356_v2 = vsel %vm7355_vm13, %v9484_v35, %v7352_v20  ;;  %v3278_v50 = vand.u32 2147483648, %v13354_v14 }
0x11f8   :  { %v7337_v46 = vadd.f32 %v13446_v27, %v7336_v43  ;;  %v13519_v43 = vadd.f32 %v13060_v33, %v13451_v18  ;;  %v13530_v35 = vadd.f32 %v13383_v10, %v13459_v0  ;;  %v13534_v18 = vmul.f32 %v13107_v26, %v12757_v7 }
0x11f9   :  { %v7361_v62 = vsel %vm7358_vm2, %v7360_v30, %v7356_v2  ;;  %v5093_v58 = vsel %vm5092_vm14, %v13376_v1, %v5091_v22  ;;  %v13545_v0 = vmul.f32 %v13107_v26, %v12782_v31  ;;  %v4913_v7 = vmul.f32 %v13107_v26, %v12863_v15 }
0x11fa   :  { %v6939_v25 = vpop.xlane.xlu0 %6938  ;;  %v7341_v48 = vsel %vm13494_vm9, %v13446_v27, %v7337_v46  ;;  %v7142_v27 = vsel %vm7140_vm6, %v7141_v42, %v7139_v57  ;;  %v7362_v42 = vmul.f32 %v7361_v62, %v6970_v28  ;;  %v5095_v46 = vand.u32 2147483648, %v13376_v1 }
0x11fb   :  { %v9486_v37 = vpop.eup %9485  ;;  %v13492_v5 = vmul.f32 0.032258064, %v6939_v25  ;;  %v7520_v23 = vpop.f32.mrf.mxu2  ;;  %v7346_v54 = vsel %vm7343_vm11, %v7345_v3, %v7341_v48  ;;  %v13536_v32 = vadd.f32 1e-06, %v7142_v27  ;;  %vm5104_vm0 = vcmp.eq.f32.partialorder %v13456_v40, inf }
0x11fc   :  { %v5098_v36 = vmul.f32 %v9486_v37, %v13456_v40  ;;  %v13504_v39 = vpop.eup %9487  ;;  %v7521_v11 = vadd.f32 %v13271_v4, %v7520_v23  ;;  %v7347_v56 = vmul.f32 %v7346_v54, %v6969_v9  ;;  %v13526_v9 = vadd.f32 %v13060_v33, %v13467_v29 }
0x11fd   :  { %9491 = vrsqrt.f32 %v13492_v5  ;;  %v13510_v44 = vpop.eup %9489  ;;  %v7434_v25 = vadd.f32 %v13060_v33, %v7362_v42  ;;  %v5321_v15 = vmul.f32 %v13504_v39, %v13453_v16  ;;  %vm7150_vm3 = vcmp.eq.f32.partialorder %v13492_v5, inf }
0x11fe   :  { %v5099_v24 = vmul.f32 %v9486_v37, %v5098_v36  ;;  %v7558_v51 = vpack.c.bf16 %v7521_v11, %v7519_v34  ;;  %v7433_v59 = vadd.f32 %v13060_v33, %v7347_v56  ;;  %9493 = vrcp.f32 %v13484_v60 }
0x11ff   :  { %v5306_v38 = vmul.f32 %v13510_v44, %v13470_v45  ;;  %v7450_v3 = vadd.f32 %v7434_v25, %v13350_v12  ;;  %9495 = vrcp.f32 %v13536_v32  ;;  %v13556_v33 = vsel %vm5094_vm15, %v5095_v46, %v5093_v58 }
0x1200   :  { %v5100_v8 = vmul.f32 0.5, %v5099_v24  ;;  %8835 = vmatmul.msk.bf16.gmra.mxu3 %vm1297_vm1, %v7558_v51  ;;  %v7449_v28 = vadd.f32 %v7433_v59, %v13327_v17  ;;  %v5107_v17 = vand.u32 2147483648, %v13456_v40  ;;  %vm5311_vm5 = vweird.f32 %v13510_v44 }
0x1201   :  { %v5307_v31 = vsub.f32 1.0, %v5306_v38  ;;  %v5316_v48 = vand.u32 2147483648, %v13470_v45  ;;  %v5322_v52 = vsub.f32 1.0, %v5321_v15  ;;  %vm5106_vm6 = vcmp.eq.f32.partialorder %v13456_v40, 0.0  ;;  %vm5312_vm9 = vmor %vm5310_vm4, %vm5311_vm5 }
0x1202   :  { %v5101_v57 = vsub.f32 1.5, %v5100_v8  ;;  %v7464_v1 = vpack.c.bf16 %v7450_v3, %v7449_v28  ;;  %vm5326_vm7 = vweird.f32 %v13504_v39  ;;  %v5331_v34 = vand.u32 2147483648, %v13453_v16 }
0x1203   :  { %v9492_v49 = vpop.eup %9491  ;;  %v5308_v12 = vmul.f32 %v13510_v44, %v5307_v31  ;;  %vm7152_vm8 = vcmp.eq.f32.partialorder %v13492_v5, 0.0  ;;  %v5323_v11 = vmul.f32 %v13504_v39, %v5322_v52  ;;  %v5329_v54 = vand.u32 2147483647, %v13453_v16  ;;  %vm5327_vm12 = vmor %vm5325_vm10, %vm5326_vm7 }
0x1204   :  { %v7144_v29 = vmul.f32 %v9492_v49, %v13492_v5  ;;  %v13561_v26 = vpop.eup %9493  ;;  %v5102_v13 = vmul.f32 %v9486_v37, %v5101_v57  ;;  %8823 = vmatmul.msk.bf16.gmra.mxu2 %vm1297_vm1, %v7464_v1  ;;  %v5314_v37 = vand.u32 2147483647, %v13470_v45  ;;  %v5317_v51 = vor.u32 1.1754944e-38, %v5316_v48 }
0x1205   :  { %v5309_v24 = vadd.f32 %v13510_v44, %v5308_v12  ;;  %v7364_v20 = vmul.f32 %v13561_v26, %v13484_v60  ;;  %v13587_v30 = vpop.eup %9495  ;;  %v5324_v2 = vadd.f32 %v13504_v39, %v5323_v11  ;;  %v5332_v45 = vor.u32 1.1754944e-38, %v5331_v34 }
0x1206   :  { %v7145_v21 = vmul.f32 %v9492_v49, %v7144_v29  ;;  %v5103_v27 = vmul.f32 %v5102_v13, %v13456_v40  ;;  %vm5315_vm11 = vcmp.eq.f32.partialorder %v5314_v37, 8.507059e+37  ;;  %vm5330_vm13 = vcmp.eq.f32.partialorder %v5329_v54, 8.507059e+37 }
0x1207   :  { %v5313_v8 = vsel %vm5312_vm9, %v13510_v44, %v5309_v24  ;;  %v7365_v62 = vsub.f32 1.0, %v7364_v20  ;;  %v5328_v16 = vsel %vm5327_vm12, %v13504_v39, %v5324_v2  ;;  %vm7368_vm2 = vweird.f32 %v13484_v60 }
0x1208   :  { %v7146_v36 = vmul.f32 0.5, %v7145_v21  ;;  %v5105_v28 = vsel %vm5104_vm0, %v13456_v40, %v5103_v27  ;;  %v5333_v57 = vsel %vm5330_vm13, %v5332_v45, %v5328_v16  ;;  %vm3273_vm14 = vweird.f32 %v13383_v10 }
0x1209   :  { %v7366_v44 = vmul.f32 %v13561_v26, %v7365_v62  ;;  %v5334_v25 = vmul.f32 %v5333_v57, %v13534_v18  ;;  %vm7369_vm15 = vweird.f32 %v13561_v26  ;;  %v7153_v46 = vand.u32 2147483648, %v13492_v5 }
0x120a   :  { %v7147_v19 = vsub.f32 1.5, %v7146_v36  ;;  %vm13615_vm0 = vmor %vm7368_vm2, %vm7369_vm15  ;;  %v7372_v3 = vand.u32 2147483647, %v13484_v60  ;;  %v7374_v18 = vand.u32 2147483648, %v13484_v60  ;;  %v5108_v31 = vsel %vm5106_vm6, %v5107_v17, %v5105_v28 }
0x120b   :  { %v7367_v39 = vadd.f32 %v13561_v26, %v7366_v44  ;;  %v7379_v36 = vmul.f32 %v13587_v30, %v13536_v32  ;;  %v13633_v12 = vadd.f32 1e-06, %v13556_v33  ;;  %vm7384_vm5 = vweird.f32 %v13587_v30 }
0x120c   :  { %v6942_v23 = vpop.xlane.xlu1 %6941  ;;  %v7148_v22 = vmul.f32 %v9492_v49, %v7147_v19  ;;  %v5318_v49 = vsel %vm5315_vm11, %v5317_v51, %v5313_v8  ;;  %v7375_v40 = vor.u32 1.1754944e-38, %v7374_v18  ;;  %vm7373_vm4 = vcmp.eq.f32.partialorder %v7372_v3, 8.507059e+37 }
0x120d   :  { %v13580_v56 = vmul.f32 0.032258064, %v6942_v23  ;;  %v5319_v58 = vmul.f32 %v5318_v49, %v4913_v7  ;;  %v13612_v7 = vld [vmem:[%s14548_s8 + $0x2] ss:$0 sm:$0xff]  ;;  %v7371_v13 = vsel %vm13615_vm0, %v13561_v26, %v7367_v39  ;;  %v7380_v19 = vsub.f32 1.0, %v7379_v36 }
0x120e   :  { %v7149_v59 = vmul.f32 %v7148_v22, %v13492_v5  ;;  %v7523_v42 = vpop.f32.mrf.mxu2  ;;  %v5378_v15 = vadd.f32 %v13612_v7, %v5334_v25  ;;  %v13640_v26 = vadd.f32 1e-06, %v5108_v31  ;;  %v7376_v37 = vsel %vm7373_vm4, %v7375_v40, %v7371_v13 }
0x120f   :  { %9497 = vrsqrt.f32 %v13580_v56  ;;  %v5377_v38 = vadd.f32 %v13612_v7, %v5319_v58  ;;  %v7389_v33 = vand.u32 2147483648, %v13536_v32  ;;  %v7387_v24 = vand.u32 2147483647, %v13536_v32 }
0x1210   :  { %v7151_v29 = vsel %vm7150_vm3, %v13492_v5, %v7149_v59  ;;  %vm3272_vm3 = vweird.f32 %v13354_v14  ;;  %v5394_v52 = vadd.f32 %v5378_v15, %v13526_v9  ;;  %v7377_v5 = vmul.f32 %v7376_v37, %v13545_v0  ;;  %v13658_v0 = vld [vmem:[%s14548_s8 + $0x1] ss:$0 sm:$0xff] }
0x1211   :  { %v7154_v60 = vsel %vm7152_vm8, %v7153_v46, %v7151_v29  ;;  %v5393_v48 = vadd.f32 %v5377_v38, %v13519_v43  ;;  %v7381_v43 = vmul.f32 %v13587_v30, %v7380_v19  ;;  %9499 = vrcp.f32 %v13633_v12  ;;  %vm3274_vm9 = vmor %vm3272_vm3, %vm3273_vm14  ;;  %v14731_v29 = vld [vmem:[#allocation37_spill] sm:$0xff] }
0x1212   :  { %v13648_v9 = vadd.f32 1e-06, %v7154_v60  ;;  %v7524_v11 = vadd.f32 %v13271_v4, %v7523_v42  ;;  %vm7383_vm6 = vweird.f32 %v13536_v32  ;;  %v7435_v22 = vadd.f32 %v13612_v7, %v7377_v5 }
0x1213   :  { %v7382_v27 = vadd.f32 %v13587_v30, %v7381_v43  ;;  %v6972_v8 = vmul.f32 %v13658_v0, %v12885_v63  ;;  %9501 = vrcp.f32 %v13640_v26  ;;  %vm7385_vm7 = vmor %vm7383_vm6, %vm7384_vm5  ;;  %v7390_v2 = vor.u32 1.1754944e-38, %v7389_v33 }
0x1214   :  { %vm7388_vm8 = vcmp.eq.f32.partialorder %v7387_v24, 8.507059e+37  ;;  %v7451_v59 = vadd.f32 %v7435_v22, %v5393_v48  ;;  %9503 = vrcp.f32 %v13648_v9  ;;  %v3275_v45 = vsel %vm3274_vm9, %v13383_v10, %v13530_v35 }
0x1215   :  { %v9498_v1 = vpop.eup %9497  ;;  %v7386_v32 = vsel %vm7385_vm7, %v13587_v30, %v7382_v27  ;;  %v3279_v30 = vor.u32 1.1754944e-38, %v3278_v50  ;;  %vm3277_vm10 = vcmp.eq.f32.partialorder %v3276_v55, 8.507059e+37  ;;  %v2833_v25 = vmul.f32 %v13658_v0, %v14731_v29 }
0x1216   :  { %v7156_v17 = vmul.f32 %v9498_v1, %v13580_v56  ;;  %v7525_v23 = vpop.f32.mrf.mxu2  ;;  %v7391_v63 = vsel %vm7388_vm8, %v7390_v2, %v7386_v32  ;;  %vm7162_vm11 = vcmp.eq.f32.partialorder %v13580_v56, inf  ;;  %v7165_v10 = vand.u32 2147483648, %v13580_v56 }
0x1217   :  { %v7526_v54 = vadd.f32 %v13271_v4, %v7525_v23  ;;  %v7392_v49 = vmul.f32 %v7391_v63, %v6972_v8  ;;  %v9500_v16 = vpop.eup %9499  ;;  %v3280_v58 = vsel %vm3277_vm10, %v3279_v30, %v3275_v45  ;;  %vm7164_vm12 = vcmp.eq.f32.partialorder %v13580_v56, 0.0 }
0x1218   :  { %v7157_v34 = vmul.f32 %v9498_v1, %v7156_v17  ;;  %v5344_v14 = vand.u32 2147483647, %v13633_v12  ;;  %v4915_v39 = vmul.f32 %v13658_v0, %v12913_v47  ;;  %v3281_v21 = vmul.f32 %v3280_v58, %v2833_v25 }
0x1219   :  { %v7559_v51 = vpack.c.bf16 %v7526_v54, %v7524_v11  ;;  %v7436_v28 = vadd.f32 %v13612_v7, %v7392_v49  ;;  %v9502_v57 = vpop.eup %9501  ;;  %v5336_v3 = vmul.f32 %v9500_v16, %v13633_v12  ;;  %v5346_v15 = vand.u32 2147483648, %v13633_v12 }
0x121a   :  { %v7158_v20 = vmul.f32 0.5, %v7157_v34  ;;  %v9504_v55 = vpop.eup %9503  ;;  %v5351_v13 = vmul.f32 %v9502_v57, %v13640_v26  ;;  %v6973_v36 = vmul.f32 %v13658_v0, %v13045_v61  ;;  %vm5340_vm13 = vweird.f32 %v13633_v12 }
0x121b   :  { %8836 = vmatmul.msk.bf16.gmra.mxu3 %vm1297_vm1, %v7559_v51  ;;  %v7452_v50 = vadd.f32 %v7436_v28, %v5394_v52  ;;  %vm13701_vm2 = vcmp.eq.f32.partialorder %v5344_v14, 8.507059e+37  ;;  %v7394_v48 = vmul.f32 %v9504_v55, %v13648_v9  ;;  %vm5341_vm14 = vweird.f32 %v9500_v16 }
0x121c   :  { %v7159_v62 = vsub.f32 1.5, %v7158_v20  ;;  %v5352_v60 = vsub.f32 1.0, %v5351_v13  ;;  %v5361_v61 = vand.u32 2147483648, %v13640_v26  ;;  %v5347_v17 = vor.u32 1.1754944e-38, %v5346_v15  ;;  %vm5342_vm3 = vmor %vm5340_vm13, %vm5341_vm14  ;;  %v8905_v13 = vld [vmem:[%s14554_s6] sm:$0xff] }
0x121d   :  { %v7465_v31 = vpack.c.bf16 %v7452_v50, %v7451_v59  ;;  %vm5356_vm15 = vweird.f32 %v9502_v57  ;;  %v7395_v19 = vsub.f32 1.0, %v7394_v48  ;;  %vm5355_vm0 = vweird.f32 %v13640_v26 }
0x121e   :  { %v7160_v42 = vmul.f32 %v9498_v1, %v7159_v62  ;;  %v5337_v1 = vsub.f32 1.0, %v5336_v3  ;;  %v5353_v52 = vmul.f32 %v9502_v57, %v5352_v60  ;;  %v7404_v34 = vand.u32 2147483648, %v13648_v9  ;;  %vm5357_vm5 = vmor %vm5355_vm0, %vm5356_vm15 }
0x121f   :  { %8824 = vmatmul.msk.bf16.gmra.mxu2 %vm1297_vm1, %v7465_v31  ;;  %v7396_v5 = vmul.f32 %v9504_v55, %v7395_v19  ;;  %vm7399_vm4 = vweird.f32 %v9504_v55  ;;  %v7402_v43 = vand.u32 2147483647, %v13648_v9  ;;  %v5362_v54 = vor.u32 1.1754944e-38, %v5361_v61 }
0x1220   :  { %v7161_v44 = vmul.f32 %v7160_v42, %v13580_v56  ;;  %v5338_v40 = vmul.f32 %v9500_v16, %v5337_v1  ;;  %v5354_v23 = vadd.f32 %v9502_v57, %v5353_v52  ;;  %vm7398_vm7 = vweird.f32 %v13648_v9  ;;  %v14734_v9 = vld [vmem:[#allocation53_spill] sm:$0xff] }
0x1221   :  { %v7528_v38 = vpop.f32.mrf.mxu2  ;;  %v7397_v22 = vadd.f32 %v9504_v55, %v7396_v5  ;;  %vm7400_vm8 = vmor %vm7398_vm7, %vm7399_vm4  ;;  %v7405_v2 = vor.u32 1.1754944e-38, %v7404_v34  ;;  %vm7403_vm9 = vcmp.eq.f32.partialorder %v7402_v43, 8.507059e+37  ;;  %v3297_v45 = vadd.f32 %v13612_v7, %v14734_v9  ;;  %v9587_v34 = vld [vmem:[%s14548_s8 + $0x3] ss:$0 sm:$0xff] }
0x1222   :  { %v7163_v35 = vsel %vm7162_vm11, %v13580_v56, %v7161_v44  ;;  %v4916_v56 = vmul.f32 %v13658_v0, %v13000_v6  ;;  %v5359_v6 = vand.u32 2147483647, %v13640_v26  ;;  %v7529_v37 = vadd.f32 %v13271_v4, %v7528_v38 }
0x1223   :  { %v7166_v46 = vsel %vm7164_vm12, %v7165_v10, %v7163_v35  ;;  %v5339_v33 = vadd.f32 %v9500_v16, %v5338_v40  ;;  %v5358_v12 = vsel %vm5357_vm5, %v9502_v57, %v5354_v23  ;;  %v7401_v63 = vsel %vm7400_vm8, %v9504_v55, %v7397_v22 }
0x1224   :  { %v13690_v18 = vadd.f32 1e-06, %v7166_v46  ;;  %vm5360_vm6 = vcmp.eq.f32.partialorder %v5359_v6, 8.507059e+37  ;;  %v7406_v49 = vsel %vm7403_vm9, %v7405_v2, %v7401_v63  ;;  %v3298_v44 = vadd.f32 %v13612_v7, %v3281_v21 }
0x1225   :  { %v5343_v11 = vsel %vm5342_vm3, %v9500_v16, %v5339_v33  ;;  %v5363_v51 = vsel %vm5360_vm6, %v5362_v54, %v5358_v12  ;;  %v8906_v16 = vld [vmem:[%s14554_s6 + $0x8] sm:$0xff]  ;;  %v7407_v58 = vmul.f32 %v7406_v49, %v6973_v36  ;;  %v6974_v46 = vmul.f32 %v13658_v0, %v13141_v53 }
0x1226   :  { %9505 = vrcp.f32 %v13690_v18  ;;  %v5348_v27 = vsel %vm13701_vm2, %v5347_v17, %v5343_v11  ;;  %v5364_v59 = vmul.f32 %v5363_v51, %v4916_v56  ;;  %v7419_v57 = vand.u32 2147483648, %v13690_v18  ;;  %7706 = vmatpush.bf16.msrb.mxu0 %v8906_v16 }
0x1227   :  { %v5349_v8 = vmul.f32 %v5348_v27, %v4915_v39  ;;  %v7417_v10 = vand.u32 2147483647, %v13690_v18  ;;  %v7437_v50 = vadd.f32 %v13612_v7, %v7407_v58  ;;  %vm7413_vm11 = vweird.f32 %v13690_v18 }
0x1228   :  { %v5380_v28 = vadd.f32 %v13612_v7, %v5364_v59  ;;  %v7420_v55 = vor.u32 1.1754944e-38, %v7419_v57 }
0x1229   :  { %v7530_v24 = vpop.f32.mrf.mxu2  ;;  %v5379_v42 = vadd.f32 %v13612_v7, %v5349_v8  ;;  %vm7418_vm13 = vcmp.eq.f32.partialorder %v7417_v10, 8.507059e+37 }
0x122a   :  { %v7531_v26 = vadd.f32 %v13271_v4, %v7530_v24  ;;  %v5396_v35 = vadd.f32 %v5380_v28, %v3298_v44  ;;  %7707 = vmatpush.bf16.msrb.mxu0 %v8905_v13 }
0x122b   :  { %v5395_v29 = vadd.f32 %v5379_v42, %v3297_v45 }
0x122c   :  { %v9506_v20 = vpop.eup %9505  ;;  %v7560_v32 = vpack.c.bf16 %v7531_v26, %v7529_v37 }
0x122d   :  { %v7409_v62 = vmul.f32 %v9506_v20, %v13690_v18  ;;  %vm7414_vm10 = vweird.f32 %v9506_v20  ;;  %v7453_v39 = vadd.f32 %v7437_v50, %v5395_v29 }
0x122e   :  { %8837 = vmatmul.msk.bf16.gmra.mxu3 %vm1297_vm1, %v7560_v32  ;;  %vm7415_vm12 = vmor %vm7413_vm11, %vm7414_vm10 }
0x122f   :  { %v7410_v30 = vsub.f32 1.0, %v7409_v62 }
0x1231   :  { %v7411_v25 = vmul.f32 %v9506_v20, %v7410_v30 }
0x1233   :  { %v7412_v14 = vadd.f32 %v9506_v20, %v7411_v25 }
0x1234   :  { %v7533_v21 = vpop.f32.mrf.mxu2 }
0x1235   :  { %v7416_v38 = vsel %vm7415_vm12, %v9506_v20, %v7412_v14  ;;  %v7534_v1 = vadd.f32 %v13271_v4, %v7533_v21 }
0x1236   :  { %v7421_v3 = vsel %vm7418_vm13, %v7420_v55, %v7416_v38 }
0x1237   :  { %v7422_v31 = vmul.f32 %v7421_v3, %v6974_v46 }
0x1239   :  { %v7438_v15 = vadd.f32 %v13612_v7, %v7422_v31  ;;  %v13746_v7 = vld [vmem:[%s14548_s8 + $0x4] ss:$0 sm:$0xff] }
0x123b   :  { %v7454_v56 = vadd.f32 %v7438_v15, %v5396_v35 }
0x123c   :  { %v7535_v36 = vpop.f32.mrf.mxu2 }
0x123d   :  { %v7466_v18 = vpack.c.bf16 %v7454_v56, %v7453_v39  ;;  %v7536_v47 = vadd.f32 %v13271_v4, %v7535_v36 }
0x123f   :  { %8825 = vmatmul.msk.bf16.gmra.mxu2 %vm1297_vm1, %v7466_v18  ;;  %v7561_v53 = vpack.c.bf16 %v7536_v47, %v7534_v1 }
0x1241   :  { %8838 = vmatmul.msk.bf16.gmra.mxu3 %vm1297_vm1, %v7561_v53 }
0x124d   :  { %v7611_v0 = vpop.f32.mrf.mxu3 }
0x124e   :  { %v7612_v48 = vadd.f32 %v13746_v7, %v7611_v0 }
0x1255   :  { %v7613_v60 = vpop.f32.mrf.mxu3 }
0x1256   :  { %v7614_v40 = vadd.f32 %v13746_v7, %v7613_v60 }
0x1258   :  { %v7655_v6 = vpack.c.bf16 %v7614_v40, %v7612_v48 }
0x125a   :  { %8850 = vmatmul.msk.bf16.vlgmr.msrb.gmra.mxu0 %vm1297_vm1, %v7655_v6 }
0x1283   :  { %v7616_v4 = vpop.f32.mrf.mxu3 }
0x1284   :  { %v7617_v52 = vadd.f32 %v13746_v7, %v7616_v4 }
0x1287   :  { %v7538_v61 = vpop.f32.mrf.mxu2 }
0x1288   :  { %v7539_v23 = vadd.f32 %v9587_v34, %v7538_v61  ;;  %v13785_v61 = vld [vmem:[%s14548_s8 + $0x5] ss:$0 sm:$0xff] }
0x128b   :  { %v7618_v17 = vpop.f32.mrf.mxu3 }
0x128c   :  { %v7619_v19 = vadd.f32 %v13746_v7, %v7618_v17 }
0x128e   :  { %v7656_v37 = vpack.c.bf16 %v7619_v19, %v7617_v52 }
0x128f   :  { %v7540_v33 = vpop.f32.mrf.mxu2 }
0x1290   :  { %8851 = vmatmul.msk.bf16.gmra.mxu0 %vm1297_vm1, %v7656_v37  ;;  %v7541_v5 = vadd.f32 %v9587_v34, %v7540_v33 }
0x1292   :  { %v7562_v43 = vpack.c.bf16 %v7541_v5, %v7539_v23 }
0x1294   :  { %8839 = vmatmul.msk.bf16.gmra.mxu3 %vm1297_vm1, %v7562_v43 }
0x129e   :  { %v7621_v24 = vpop.f32.mrf.mxu3 }
0x129f   :  { %v7622_v20 = vadd.f32 %v13746_v7, %v7621_v24 }
0x12a2   :  { %v7543_v54 = vpop.f32.mrf.mxu2 }
0x12a3   :  { %v7544_v22 = vadd.f32 %v9587_v34, %v7543_v54 }
0x12a6   :  { %v7623_v11 = vpop.f32.mrf.mxu3 }
0x12a7   :  { %v7624_v26 = vadd.f32 %v13746_v7, %v7623_v11 }
0x12a9   :  { %v7657_v27 = vpack.c.bf16 %v7624_v26, %v7622_v20 }
0x12aa   :  { %v7545_v12 = vpop.f32.mrf.mxu2 }
0x12ab   :  { %8852 = vmatmul.msk.bf16.gmra.mxu0 %vm1297_vm1, %v7657_v27  ;;  %v7546_v8 = vadd.f32 %v9587_v34, %v7545_v12 }
0x12ad   :  { %v7563_v2 = vpack.c.bf16 %v7546_v8, %v7544_v22 }
0x12af   :  { %8840 = vmatmul.msk.bf16.gmra.mxu3 %vm1297_vm1, %v7563_v2 }
0x12b1   :  { %v7626_v51 = vpop.f32.mrf.mxu3 }
0x12b2   :  { %v7627_v32 = vadd.f32 %v13746_v7, %v7626_v51 }
0x12b9   :  { %v7628_v62 = vpop.f32.mrf.mxu3 }
0x12ba   :  { %v7629_v59 = vadd.f32 %v13746_v7, %v7628_v62 }
0x12bc   :  { %v7658_v63 = vpack.c.bf16 %v7629_v59, %v7627_v32 }
0x12be   :  { %8853 = vmatmul.msk.bf16.gmra.mxu0 %vm1297_vm1, %v7658_v63 }
0x12c2   :  { %v7548_v9 = vpop.f32.mrf.mxu2 }
0x12c3   :  { %v7549_v49 = vadd.f32 %v9587_v34, %v7548_v9 }
0x12c4   :  { %v7631_v45 = vpop.f32.mrf.mxu3 }
0x12c5   :  { %v7632_v28 = vadd.f32 %v13746_v7, %v7631_v45 }
0x12ca   :  { %v7550_v42 = vpop.f32.mrf.mxu2 }
0x12cb   :  { %v7551_v30 = vadd.f32 %v9587_v34, %v7550_v42 }
0x12cc   :  { %v7633_v44 = vpop.f32.mrf.mxu3 }
0x12cd   :  { %v7564_v16 = vpack.c.bf16 %v7551_v30, %v7549_v49  ;;  %v7634_v58 = vadd.f32 %v13746_v7, %v7633_v44 }
0x12cf   :  { %8841 = vmatmul.msk.bf16.gmra.mxu3 %vm1297_vm1, %v7564_v16  ;;  %v7659_v57 = vpack.c.bf16 %v7634_v58, %v7632_v28 }
0x12d1   :  { %8854 = vmatmul.msk.bf16.gmra.mxu0 %vm1297_vm1, %v7659_v57 }
0x12d7   :  { %v13775_v3 = vpop.f32.mrf.mxu0 }
0x12df   :  { %v13779_v18 = vpop.f32.mrf.mxu0 }
0x130d   :  { %v7714_v36 = vpop.f32.mrf.mxu0 }
0x130e   :  { %v13814_v12 = vadd.f32 %v13785_v61, %v7714_v36 }
0x1310   :  { %v7751_v2 = vmax.f32 %v13814_v12, 0.0 }
0x1312   :  { %v7771_v9 = vsel %vm1297_vm1, %v7751_v2, 0.0 }
0x1315   :  { %v7716_v1 = vpop.f32.mrf.mxu0 }
0x1317   :  { %v7636_v29 = vpop.f32.mrf.mxu3 }
0x1318   :  { %v7637_v10 = vadd.f32 %v13746_v7, %v7636_v29 }
0x131f   :  { %v7638_v25 = vpop.f32.mrf.mxu3 }
0x1320   :  { %v7639_v35 = vadd.f32 %v13746_v7, %v7638_v25 }
0x1322   :  { %v7660_v50 = vpack.c.bf16 %v7639_v35, %v7637_v10  ;;  %v13846_v35 = vadd.f32 %v13785_v61, %v7716_v1 }
0x1324   :  { %8855 = vmatmul.msk.bf16.gmra.mxu0 %vm1297_vm1, %v7660_v50 }
0x1328   :  { %v7719_v47 = vpop.f32.mrf.mxu0 }
0x1329   :  { %v13849_v50 = vadd.f32 %v13785_v61, %v7719_v47  ;;  %v13872_v47 = vadd.f32 %v13785_v61, %v13775_v3 }
0x1330   :  { %v7721_v53 = vpop.f32.mrf.mxu0 }
0x1331   :  { %v13806_v24 = vadd.f32 %v13785_v61, %v7721_v53 }
0x1332   :  { %v7641_v14 = vpop.f32.mrf.mxu3 }
0x1333   :  { %v7642_v39 = vadd.f32 %v13746_v7, %v7641_v14  ;;  %v7754_v54 = vmax.f32 %v13806_v24, 0.0 }
0x1335   :  { %v7780_v22 = vsel %vm1297_vm1, %v7754_v54, 0.0 }
0x133a   :  { %v7643_v55 = vpop.f32.mrf.mxu3 }
0x133b   :  { %v7644_v46 = vadd.f32 %v13746_v7, %v7643_v55  ;;  %v7724_v0 = vpop.f32.mrf.mxu0 }
0x133c   :  { %v13799_v34 = vadd.f32 %v13785_v61, %v7724_v0 }
0x133d   :  { %v7661_v38 = vpack.c.bf16 %v7644_v46, %v7642_v39  ;;  %v7752_v39 = vmax.f32 %v13846_v35, 0.0  ;;  %v7753_v46 = vmax.f32 %v13849_v50, 0.0 }
0x133e   :  { %v7755_v5 = vmax.f32 %v13799_v34, 0.0 }
0x133f   :  { %8856 = vmatmul.msk.bf16.gmra.mxu0 %vm1297_vm1, %v7661_v38  ;;  %v7777_v38 = vsel %vm1297_vm1, %v7753_v46, 0.0 }
0x1340   :  { %v7783_v11 = vsel %vm1297_vm1, %v7755_v5, 0.0 }
0x1343   :  { %v7726_v60 = vpop.f32.mrf.mxu0 }
0x1344   :  { %v13834_v28 = vadd.f32 %v13785_v61, %v7726_v60 }
0x1346   :  { %v7756_v25 = vmax.f32 %v13834_v28, 0.0 }
0x1348   :  { %v7786_v55 = vsel %vm1297_vm1, %v7756_v25, 0.0 }
0x134e   :  { %v7729_v48 = vpop.f32.mrf.mxu0 }
0x134f   :  { %v13827_v45 = vadd.f32 %v13785_v61, %v7729_v48 }
0x1351   :  { %v7757_v16 = vmax.f32 %v13827_v45, 0.0 }
0x1352   :  { %v7646_v21 = vpop.f32.mrf.mxu3 }
0x1353   :  { %v7647_v15 = vadd.f32 %v13746_v7, %v7646_v21  ;;  %v7789_v29 = vsel %vm1297_vm1, %v7757_v16, 0.0  ;;  %v7774_v21 = vsel %vm1297_vm1, %v7752_v39, 0.0 }
0x1356   :  { %v7731_v40 = vpop.f32.mrf.mxu0 }
0x1357   :  { %v13837_v58 = vadd.f32 %v13785_v61, %v7731_v40 }
0x1359   :  { %v7758_v10 = vmax.f32 %v13837_v58, 0.0 }
0x135a   :  { %v7648_v31 = vpop.f32.mrf.mxu3 }
0x135b   :  { %v7649_v13 = vadd.f32 %v13746_v7, %v7648_v31  ;;  %v7792_v14 = vsel %vm1297_vm1, %v7758_v10, 0.0 }
0x135d   :  { %v7662_v56 = vpack.c.bf16 %v7649_v13, %v7647_v15 }
0x135f   :  { %8857 = vmatmul.msk.bf16.gmra.mxu0 %vm1297_vm1, %v7662_v56 }
0x13a1   :  { %v7734_v6 = vpop.f32.mrf.mxu0 }
0x13a2   :  { %v7735_v42 = vadd.f32 %v13785_v61, %v7734_v6  ;;  %v7749_v6 = vmax.f32 %v13872_v47, 0.0 }
0x13a4   :  { %v7759_v44 = vmax.f32 %v7735_v42, 0.0 }
0x13a6   :  { %v7795_v57 = vsel %vm1297_vm1, %v7759_v44, 0.0 }
0x13a9   :  { %v7736_v4 = vpop.f32.mrf.mxu0 }
0x13aa   :  { %v13792_v19 = vadd.f32 %v13785_v61, %v7736_v4 }
0x13ac   :  { %v7760_v33 = vmax.f32 %v13792_v19, 0.0 }
0x13ae   :  { %v7798_v23 = vsel %vm1297_vm1, %v7760_v33, 0.0 }
0x13bc   :  { %v7739_v7 = vpop.f32.mrf.mxu0 }
0x13bd   :  { %v13788_v17 = vadd.f32 %v13785_v61, %v7739_v7 }
0x13bf   :  { %v7761_v52 = vmax.f32 %v13788_v17, 0.0 }
0x13c1   :  { %v7801_v37 = vsel %vm1297_vm1, %v7761_v52, 0.0 }
0x13c2   :  { %7802 = vadd.xlane.f32.xlu1 %v7801_v37 }
0x13c4   :  { %v7741_v43 = vpop.f32.mrf.mxu0 }
0x13c5   :  { %v7742_v8 = vadd.f32 %v13785_v61, %v7741_v43 }
0x13c7   :  { %v7762_v32 = vmax.f32 %v7742_v8, 0.0 }
0x13c9   :  { %v7804_v30 = vsel %vm1297_vm1, %v7762_v32, 0.0 }
0x13ca   :  { %7799 = vadd.xlane.f32.xlu1 %v7798_v23 }
0x13d2   :  { %7784 = vadd.xlane.f32.xlu1 %v7783_v11 }
0x13da   :  { %7781 = vadd.xlane.f32.xlu1 %v7780_v22 }
0x13dc   :  { %v7744_v20 = vpop.f32.mrf.mxu0 }
0x13dd   :  { %v7745_v26 = vadd.f32 %v13785_v61, %v7744_v20  ;;  %v7765_v20 = vsel %vm1297_vm1, %v7749_v6, 0.0 }
0x13df   :  { %v7763_v27 = vmax.f32 %v7745_v26, 0.0 }
0x13e1   :  { %v7807_v51 = vsel %vm1297_vm1, %v7763_v27, 0.0 }
0x13e2   :  { %7808 = vadd.xlane.f32.xlu2 %v7807_v51  ;;  %7772 = vadd.xlane.f32.xlu1 %v7771_v9 }
0x13e4   :  { %v7746_v62 = vpop.f32.mrf.mxu0 }
0x13e5   :  { %v7747_v59 = vadd.f32 %v13785_v61, %v7746_v62 }
0x13e7   :  { %v7764_v63 = vmax.f32 %v7747_v59, 0.0 }
0x13e9   :  { %v7810_v49 = vsel %vm1297_vm1, %v7764_v63, 0.0 }
0x13ea   :  { %7811 = vadd.xlane.f32.xlu0 %v7810_v49  ;;  %7805 = vadd.xlane.f32.xlu2 %v7804_v30 }
0x13f2   :  { %7796 = vadd.xlane.f32.xlu0 %v7795_v57  ;;  %7790 = vadd.xlane.f32.xlu2 %v7789_v29 }
0x13fa   :  { %7793 = vadd.xlane.f32.xlu0 %v7792_v14  ;;  %7787 = vadd.xlane.f32.xlu2 %v7786_v55 }
0x1402   :  { %7778 = vadd.xlane.f32.xlu0 %v7777_v38  ;;  %7775 = vadd.xlane.f32.xlu2 %v7774_v21 }
0x1435   :  { %v7803_v31 = vpop.xlane.xlu1 %7802 }
0x1436   :  { %v7825_v4 = vmul.f32 %v7803_v31, %v11164_v41 }
0x1438   :  { %v13893_v26 = vsub.f32 %v7761_v52, %v7825_v4 }
0x143a   :  { %v7857_v52 = vmul.f32 %v13893_v26, %v13893_v26 }
0x143c   :  { %v7897_v49 = vsel %vm1297_vm1, %v7857_v52, 0.0 }
0x143d   :  { %v7800_v56 = vpop.xlane.xlu1 %7799 }
0x143e   :  { %v7824_v7 = vmul.f32 %v7800_v56, %v11164_v41 }
0x1445   :  { %v7785_v3 = vpop.xlane.xlu1 %7784 }
0x1446   :  { %v7819_v59 = vmul.f32 %v7785_v3, %v11164_v41 }
0x1448   :  { %v13917_v9 = vsub.f32 %v7755_v5, %v7819_v59 }
0x144a   :  { %v7851_v55 = vmul.f32 %v13917_v9, %v13917_v9 }
0x144c   :  { %v7879_v58 = vsel %vm1297_vm1, %v7851_v55, 0.0 }
0x144d   :  { %v7782_v42 = vpop.xlane.xlu1 %7781 }
0x1455   :  { %v7809_v15 = vpop.xlane.xlu2 %7808 }
0x1456   :  { %v7827_v13 = vmul.f32 %v7809_v15, %v11164_v41 }
0x1458   :  { %v13866_v36 = vsub.f32 %v7763_v27, %v7827_v13  ;;  %v13897_v27 = vsub.f32 %v7760_v33, %v7824_v7 }
0x145a   :  { %v7859_v1 = vmul.f32 %v13866_v36, %v13866_v36  ;;  %v7856_v19 = vmul.f32 %v13897_v27, %v13897_v27 }
0x145c   :  { %v7903_v53 = vsel %vm1297_vm1, %v7859_v1, 0.0  ;;  %v7894_v30 = vsel %vm1297_vm1, %v7856_v19, 0.0 }
0x145d   :  { %v7812_v0 = vpop.xlane.xlu0 %7811  ;;  %7904 = vadd.xlane.f32.xlu2 %v7903_v53  ;;  %v7806_v60 = vpop.xlane.xlu2 %7805 }
0x145e   :  { %v7828_v48 = vmul.f32 %v7812_v0, %v11164_v41  ;;  %v7826_v40 = vmul.f32 %v7806_v60, %v11164_v41 }
0x1460   :  { %v13880_v37 = vsub.f32 %v7764_v63, %v7828_v48  ;;  %v13882_v23 = vsub.f32 %v7762_v32, %v7826_v40  ;;  %v13913_v63 = vadd.f32 %v13785_v61, %v13779_v18  ;;  %v7818_v61 = vmul.f32 %v7782_v42, %v11164_v41  ;;  %v7773_v40 = vpop.xlane.xlu1 %7772 }
0x1461   :  { %v7815_v7 = vmul.f32 %v7773_v40, %v11164_v41 }
0x1462   :  { %v7860_v43 = vmul.f32 %v13880_v37, %v13880_v37  ;;  %v7858_v11 = vmul.f32 %v13882_v23, %v13882_v23  ;;  %v7750_v18 = vmax.f32 %v13913_v63, 0.0  ;;  %v13939_v31 = vsub.f32 %v7754_v54, %v7818_v61 }
0x1463   :  { %v13978_v3 = vsub.f32 %v7751_v2, %v7815_v7 }
0x1464   :  { %v7906_v22 = vsel %vm1297_vm1, %v7860_v43, 0.0  ;;  %v7900_v8 = vsel %vm1297_vm1, %v7858_v11, 0.0  ;;  %v7768_v21 = vsel %vm1297_vm1, %v7750_v18, 0.0  ;;  %v7850_v54 = vmul.f32 %v13939_v31, %v13939_v31 }
0x1465   :  { %7907 = vadd.xlane.f32.xlu0 %v7906_v22  ;;  %v7797_v51 = vpop.xlane.xlu0 %7796  ;;  %7766 = vadd.xlane.f32.xlu2 %v7765_v20  ;;  %v7791_v62 = vpop.xlane.xlu2 %7790 }
0x1466   :  { %v7823_v32 = vmul.f32 %v7797_v51, %v11164_v41  ;;  %7901 = vadd.xlane.f32.xlu1 %v7900_v8  ;;  %v7821_v34 = vmul.f32 %v7791_v62, %v11164_v41  ;;  %v7876_v48 = vsel %vm1297_vm1, %v7850_v54, 0.0 }
0x1468   :  { %v13903_v17 = vsub.f32 %v7759_v44, %v7823_v32  ;;  %v13943_v15 = vsub.f32 %v7757_v16, %v7821_v34 }
0x146a   :  { %v7855_v33 = vmul.f32 %v13903_v17, %v13903_v17  ;;  %v7853_v45 = vmul.f32 %v13943_v15, %v13943_v15 }
0x146c   :  { %v7891_v44 = vsel %vm1297_vm1, %v7855_v33, 0.0 }
0x146d   :  { %7898 = vadd.xlane.f32.xlu0 %v7897_v49  ;;  %v7794_v57 = vpop.xlane.xlu0 %7793  ;;  %7895 = vadd.xlane.f32.xlu2 %v7894_v30  ;;  %v7788_v29 = vpop.xlane.xlu2 %7787 }
0x146e   :  { %v7822_v14 = vmul.f32 %v7794_v57, %v11164_v41  ;;  %7892 = vadd.xlane.f32.xlu1 %v7891_v44  ;;  %v7820_v53 = vmul.f32 %v7788_v29, %v11164_v41 }
0x1470   :  { %v13928_v5 = vsub.f32 %v7758_v10, %v7822_v14  ;;  %v13962_v60 = vsub.f32 %v7756_v25, %v7820_v53 }
0x1472   :  { %v7854_v38 = vmul.f32 %v13928_v5, %v13928_v5  ;;  %v7852_v28 = vmul.f32 %v13962_v60, %v13962_v60 }
0x1474   :  { %v7888_v10 = vsel %vm1297_vm1, %v7854_v38, 0.0  ;;  %v7882_v43 = vsel %vm1297_vm1, %v7852_v28, 0.0  ;;  %v14022_v38 = vld [vmem:[%s14548_s8 + $0x6] ss:$0 sm:$0xff] }
0x1475   :  { %7769 = vadd.xlane.f32.xlu0 %v7768_v21  ;;  %v7779_v13 = vpop.xlane.xlu0 %7778  ;;  %7880 = vadd.xlane.f32.xlu2 %v7879_v58  ;;  %v7776_v1 = vpop.xlane.xlu2 %7775  ;;  %v14073_v63 = vmul.f32 %v14022_v38, %v13882_v23 }
0x1476   :  { %v7817_v56 = vmul.f32 %v7779_v13, %v11164_v41  ;;  %7889 = vadd.xlane.f32.xlu1 %v7888_v10  ;;  %v7816_v16 = vmul.f32 %v7776_v1, %v11164_v41 }
0x1478   :  { %v13951_v24 = vsub.f32 %v7753_v46, %v7817_v56  ;;  %v7885_v46 = vsel %vm1297_vm1, %v7853_v45, 0.0  ;;  %v13969_v4 = vsub.f32 %v7752_v39, %v7816_v16  ;;  %v7847_v39 = vmul.f32 %v13978_v3, %v13978_v3 }
0x147a   :  { %v7849_v0 = vmul.f32 %v13951_v24, %v13951_v24  ;;  %v7848_v25 = vmul.f32 %v13969_v4, %v13969_v4  ;;  %v7867_v11 = vsel %vm1297_vm1, %v7847_v39, 0.0 }
0x147c   :  { %v7873_v50 = vsel %vm1297_vm1, %v7849_v0, 0.0  ;;  %v7870_v35 = vsel %vm1297_vm1, %v7848_v25, 0.0  ;;  %v14036_v0 = vmul.f32 %v14022_v38, %v13893_v26  ;;  %v14053_v26 = vmul.f32 %v14022_v38, %v13917_v9 }
0x147d   :  { %7877 = vadd.xlane.f32.xlu2 %v7876_v48  ;;  %7886 = vadd.xlane.f32.xlu0 %v7885_v46  ;;  %v14044_v46 = vmul.f32 %v14022_v38, %v13897_v27  ;;  %v14063_v27 = vmul.f32 %v14022_v38, %v13866_v36  ;;  %v14069_v9 = vmul.f32 %v14022_v38, %v13880_v37 }
0x147e   :  { %7874 = vadd.xlane.f32.xlu1 %v7873_v50  ;;  %v14090_v37 = vmul.f32 %v14022_v38, %v13962_v60 }
0x1485   :  { %7883 = vadd.xlane.f32.xlu0 %v7882_v43 }
0x1486   :  { %7871 = vadd.xlane.f32.xlu1 %v7870_v35 }
0x148d   :  { %7868 = vadd.xlane.f32.xlu0 %v7867_v11  ;;  %v14082_v11 = vmul.f32 %v14022_v38, %v13943_v15 }
0x14d0   :  { %v7905_v20 = vpop.xlane.xlu2 %7904 }
0x14d1   :  { %v13985_v22 = vmul.f32 0.032258064, %v7905_v20  ;;  %v14086_v20 = vmul.f32 %v14022_v38, %v13928_v5 }
0x14d3   :  { %9507 = vrsqrt.f32 %v13985_v22  ;;  %vm8117_vm2 = vcmp.eq.f32.partialorder %v13985_v22, inf  ;;  %vm8119_vm15 = vcmp.eq.f32.partialorder %v13985_v22, 0.0 }
0x14d8   :  { %v7908_v12 = vpop.xlane.xlu0 %7907  ;;  %v7767_v2 = vpop.xlane.xlu2 %7766 }
0x14d9   :  { %v13988_v8 = vmul.f32 0.032258064, %v7908_v12  ;;  %v7902_v51 = vpop.xlane.xlu1 %7901  ;;  %v7813_v62 = vmul.f32 %v7767_v2, %v11164_v41  ;;  %v9508_v52 = vpop.eup %9507 }
0x14da   :  { %v13991_v32 = vmul.f32 0.032258064, %v7902_v51  ;;  %v8111_v30 = vmul.f32 %v9508_v52, %v13985_v22 }
0x14db   :  { %9509 = vrsqrt.f32 %v13988_v8  ;;  %v13997_v59 = vsub.f32 %v7749_v6, %v7813_v62  ;;  %vm8129_vm14 = vcmp.eq.f32.partialorder %v13988_v8, inf  ;;  %vm8131_vm0 = vcmp.eq.f32.partialorder %v13988_v8, 0.0 }
0x14dc   :  { %9511 = vrsqrt.f32 %v13991_v32  ;;  %v8112_v34 = vmul.f32 %v9508_v52, %v8111_v30  ;;  %vm8105_vm3 = vcmp.eq.f32.partialorder %v13991_v32, inf  ;;  %vm8107_vm10 = vcmp.eq.f32.partialorder %v13991_v32, 0.0 }
0x14dd   :  { %v7845_v19 = vmul.f32 %v13997_v59, %v13997_v59 }
0x14de   :  { %v8113_v56 = vmul.f32 0.5, %v8112_v34 }
0x14df   :  { %v7861_v29 = vsel %vm1297_vm1, %v7845_v19, 0.0 }
0x14e0   :  { %v7899_v33 = vpop.xlane.xlu0 %7898  ;;  %v7896_v42 = vpop.xlane.xlu2 %7895  ;;  %7862 = vadd.xlane.f32.xlu2 %v7861_v29  ;;  %v8114_v43 = vsub.f32 1.5, %v8113_v56 }
0x14e1   :  { %v14001_v49 = vpop.eup %9509  ;;  %v14004_v44 = vmul.f32 0.032258064, %v7899_v33  ;;  %v7893_v57 = vpop.xlane.xlu1 %7892  ;;  %v14011_v6 = vmul.f32 0.032258064, %v7896_v42 }
0x14e2   :  { %v14007_v14 = vpop.eup %9511  ;;  %v14009_v47 = vmul.f32 0.032258064, %v7893_v57  ;;  %v8123_v61 = vmul.f32 %v14001_v49, %v13988_v8  ;;  %v8115_v62 = vmul.f32 %v9508_v52, %v8114_v43 }
0x14e3   :  { %9513 = vrsqrt.f32 %v14004_v44  ;;  %v8099_v55 = vmul.f32 %v14007_v14, %v13991_v32  ;;  %vm8093_vm4 = vcmp.eq.f32.partialorder %v14004_v44, inf  ;;  %vm8081_vm6 = vcmp.eq.f32.partialorder %v14011_v6, inf }
0x14e4   :  { %9515 = vrsqrt.f32 %v14009_v47  ;;  %v8124_v21 = vmul.f32 %v14001_v49, %v8123_v61  ;;  %v8116_v56 = vmul.f32 %v8115_v62, %v13985_v22  ;;  %v8084_v62 = vand.u32 2147483648, %v14011_v6 }
0x14e5   :  { %9517 = vrsqrt.f32 %v14011_v6  ;;  %v8100_v1 = vmul.f32 %v14007_v14, %v8099_v55  ;;  %vm8069_vm5 = vcmp.eq.f32.partialorder %v14009_v47, inf  ;;  %vm8095_vm8 = vcmp.eq.f32.partialorder %v14004_v44, 0.0 }
0x14e6   :  { %v8125_v40 = vmul.f32 0.5, %v8124_v21  ;;  %vm8071_vm12 = vcmp.eq.f32.partialorder %v14009_v47, 0.0 }
0x14e7   :  { %v8101_v35 = vmul.f32 0.5, %v8100_v1 }
0x14e8   :  { %v7770_v58 = vpop.xlane.xlu0 %7769  ;;  %v7881_v10 = vpop.xlane.xlu2 %7880  ;;  %v8126_v23 = vsub.f32 1.5, %v8125_v40 }
0x14e9   :  { %v14026_v13 = vpop.eup %9513  ;;  %v7814_v53 = vmul.f32 %v7770_v58, %v11164_v41  ;;  %v7890_v54 = vpop.xlane.xlu1 %7889  ;;  %v14030_v45 = vmul.f32 0.032258064, %v7881_v10  ;;  %v8102_v19 = vsub.f32 1.5, %v8101_v35  ;;  %v8072_v35 = vand.u32 2147483648, %v14009_v47 }
0x14ea   :  { %v14032_v16 = vpop.eup %9515  ;;  %v8087_v48 = vmul.f32 %v14026_v13, %v14004_v44  ;;  %v14040_v50 = vmul.f32 0.032258064, %v7890_v54  ;;  %v8127_v55 = vmul.f32 %v14001_v49, %v8126_v23  ;;  %v8132_v54 = vand.u32 2147483648, %v13988_v8 }
0x14eb   :  { %v8063_v41 = vmul.f32 %v14032_v16, %v14009_v47  ;;  %9519 = vrsqrt.f32 %v14030_v45  ;;  %v14049_v7 = vpop.eup %9517  ;;  %v14058_v25 = vsub.f32 %v7750_v18, %v7814_v53  ;;  %v14077_v18 = vmul.f32 %v14022_v38, %v13903_v17 }
0x14ec   :  { %v8088_v28 = vmul.f32 %v14026_v13, %v8087_v48  ;;  %9521 = vrsqrt.f32 %v14040_v50  ;;  %v8075_v39 = vmul.f32 %v14049_v7, %v14011_v6  ;;  %v8120_v17 = vand.u32 2147483648, %v13985_v22 }
0x14ed   :  { %v8064_v36 = vmul.f32 %v14032_v16, %v8063_v41  ;;  %v7846_v51 = vmul.f32 %v14058_v25, %v14058_v25  ;;  %v8103_v49 = vmul.f32 %v14007_v14, %v8102_v19  ;;  %v8108_v48 = vand.u32 2147483648, %v13991_v32 }
0x14ee   :  { %v8089_v12 = vmul.f32 0.5, %v8088_v28  ;;  %v8076_v5 = vmul.f32 %v14049_v7, %v8075_v39  ;;  %v8128_v41 = vmul.f32 %v8127_v55, %v13988_v8  ;;  %v8096_v28 = vand.u32 2147483648, %v14004_v44 }
0x14ef   :  { %v8065_v57 = vmul.f32 0.5, %v8064_v36  ;;  %v7864_v34 = vsel %vm1297_vm1, %v7846_v51, 0.0  ;;  %vm8021_vm7 = vcmp.eq.f32.partialorder %v14030_v45, inf  ;;  %vm8057_vm9 = vcmp.eq.f32.partialorder %v14040_v50, inf }
0x14f0   :  { %v7887_v2 = vpop.xlane.xlu0 %7886  ;;  %v7878_v60 = vpop.xlane.xlu2 %7877  ;;  %7865 = vadd.xlane.f32.xlu0 %v7864_v34  ;;  %v8090_v21 = vsub.f32 1.5, %v8089_v12  ;;  %v8077_v1 = vmul.f32 0.5, %v8076_v5  ;;  %v8118_v12 = vsel %vm8117_vm2, %v13985_v22, %v8116_v56 }
0x14f1   :  { %v14096_v15 = vpop.eup %9519  ;;  %v7875_v33 = vpop.xlane.xlu1 %7874  ;;  %v14099_v42 = vmul.f32 0.032258064, %v7887_v2  ;;  %v14116_v10 = vmul.f32 0.032258064, %v7878_v60  ;;  %v8066_v40 = vsub.f32 1.5, %v8065_v57  ;;  %v8104_v2 = vmul.f32 %v8103_v49, %v13991_v32 }
0x14f2   :  { %v14101_v30 = vpop.eup %9521  ;;  %v8015_v29 = vmul.f32 %v14096_v15, %v14030_v45  ;;  %v14105_v61 = vmul.f32 0.032258064, %v7875_v33  ;;  %v8091_v14 = vmul.f32 %v14026_v13, %v8090_v21  ;;  %v8078_v51 = vsub.f32 1.5, %v8077_v1 }
0x14f3   :  { %v8051_v52 = vmul.f32 %v14101_v30, %v14040_v50  ;;  %9523 = vrsqrt.f32 %v14099_v42  ;;  %v8067_v13 = vmul.f32 %v14032_v16, %v8066_v40  ;;  %v14154_v56 = vsel %vm8105_vm3, %v13991_v32, %v8104_v2 }
0x14f4   :  { %v8016_v58 = vmul.f32 %v14096_v15, %v8015_v29  ;;  %9525 = vrsqrt.f32 %v14105_v61  ;;  %v8130_v29 = vsel %vm8129_vm14, %v13988_v8, %v8128_v41  ;;  %v8092_v21 = vmul.f32 %v8091_v14, %v14004_v44 }
0x14f5   :  { %v8052_v53 = vmul.f32 %v14101_v30, %v8051_v52  ;;  %9527 = vrsqrt.f32 %v14116_v10  ;;  %v8079_v49 = vmul.f32 %v14049_v7, %v8078_v51  ;;  %v8068_v41 = vmul.f32 %v8067_v13, %v14009_v47 }
0x14f6   :  { %v8017_v43 = vmul.f32 0.5, %v8016_v58  ;;  %vm8045_vm11 = vcmp.eq.f32.partialorder %v14099_v42, inf  ;;  %vm7997_vm2 = vcmp.eq.f32.partialorder %v14105_v61, inf  ;;  %vm8009_vm14 = vcmp.eq.f32.partialorder %v14116_v10, inf }
0x14f7   :  { %v8053_v39 = vmul.f32 0.5, %v8052_v53  ;;  %v8121_v53 = vsel %vm8119_vm15, %v8120_v17, %v8118_v12  ;;  %v8133_v17 = vsel %vm8131_vm0, %v8132_v54, %v8130_v29  ;;  %v8080_v13 = vmul.f32 %v8079_v49, %v14011_v6 }
0x14f8   :  { %v7884_v36 = vpop.xlane.xlu0 %7883  ;;  %v8018_v55 = vsub.f32 1.5, %v8017_v43  ;;  %v8070_v49 = vsel %vm8069_vm5, %v14009_v47, %v8068_v41  ;;  %vm8083_vm0 = vcmp.eq.f32.partialorder %v14011_v6, 0.0  ;;  %v8109_v41 = vsel %vm8107_vm10, %v8108_v48, %v14154_v56 }
0x14f9   :  { %v9524_v23 = vpop.eup %9523  ;;  %v7872_v19 = vpop.xlane.xlu1 %7871  ;;  %v14138_v60 = vmul.f32 0.032258064, %v7884_v36  ;;  %v8054_v16 = vsub.f32 1.5, %v8053_v39  ;;  %v8094_v36 = vsel %vm8093_vm4, %v14004_v44, %v8092_v21  ;;  %vm8059_vm10 = vcmp.eq.f32.partialorder %v14040_v50, 0.0 }
0x14fa   :  { %v9526_v5 = vpop.eup %9525  ;;  %v8039_v33 = vmul.f32 %v9524_v23, %v14099_v42  ;;  %v14140_v57 = vmul.f32 0.032258064, %v7872_v19  ;;  %v8019_v7 = vmul.f32 %v14096_v15, %v8018_v55  ;;  %v14178_v19 = vadd.f32 1e-06, %v8121_v53 }
0x14fb   :  { %v7991_v52 = vmul.f32 %v9526_v5, %v14105_v61  ;;  %9529 = vrsqrt.f32 %v14138_v60  ;;  %v14161_v40 = vpop.eup %9527  ;;  %v8055_v12 = vmul.f32 %v14101_v30, %v8054_v16  ;;  %v14201_v53 = vsel %vm8081_vm6, %v14011_v6, %v8080_v13 }
0x14fc   :  { %v8040_v58 = vmul.f32 %v9524_v23, %v8039_v33  ;;  %9531 = vrsqrt.f32 %v14140_v57  ;;  %v8003_v22 = vmul.f32 %v14161_v40, %v14116_v10  ;;  %v8020_v30 = vmul.f32 %v8019_v7, %v14030_v45 }
0x14fd   :  { %v7992_v1 = vmul.f32 %v9526_v5, %v7991_v52  ;;  %v14185_v52 = vadd.f32 1e-06, %v8133_v17  ;;  %9533 = vrcp.f32 %v14178_v19  ;;  %vm8365_vm13 = vweird.f32 %v14178_v19 }
0x14fe   :  { %v8041_v14 = vmul.f32 0.5, %v8040_v58  ;;  %v8004_v33 = vmul.f32 %v14161_v40, %v8003_v22  ;;  %vm8033_vm15 = vcmp.eq.f32.partialorder %v14138_v60, inf  ;;  %vm7985_vm5 = vcmp.eq.f32.partialorder %v14140_v57, inf }
0x14ff   :  { %v7993_v39 = vmul.f32 0.5, %v7992_v1  ;;  %v8048_v1 = vand.u32 2147483648, %v14099_v42 }
0x1500   :  { %v8042_v2 = vsub.f32 1.5, %v8041_v14  ;;  %v7869_v51 = vpop.xlane.xlu0 %7868  ;;  %v8005_v21 = vmul.f32 0.5, %v8004_v33 }
0x1501   :  { %v14183_v55 = vmul.f32 0.032258064, %v7869_v51  ;;  %v9530_v8 = vpop.eup %9529  ;;  %v7994_v54 = vsub.f32 1.5, %v7993_v39 }
0x1502   :  { %v8043_v29 = vmul.f32 %v9524_v23, %v8042_v2  ;;  %v8027_v16 = vmul.f32 %v9530_v8, %v14138_v60  ;;  %v9532_v58 = vpop.eup %9531  ;;  %v8056_v23 = vmul.f32 %v8055_v12, %v14040_v50  ;;  %v14212_v12 = vsel %vm8021_vm7, %v14030_v45, %v8020_v30 }
0x1503   :  { %9535 = vrsqrt.f32 %v14183_v55  ;;  %v7979_v39 = vmul.f32 %v9532_v58, %v14140_v57  ;;  %v7995_v22 = vmul.f32 %v9526_v5, %v7994_v54  ;;  %v8006_v2 = vsub.f32 1.5, %v8005_v21  ;;  %v9534_v33 = vpop.eup %9533 }
0x1504   :  { %v8028_v7 = vmul.f32 %v9530_v8, %v8027_v16  ;;  %v8044_v17 = vmul.f32 %v8043_v29, %v14099_v42  ;;  %9537 = vrcp.f32 %v14185_v52  ;;  %v14217_v5 = vsel %vm8057_vm9, %v14040_v50, %v8056_v23 }
0x1505   :  { %v7980_v13 = vmul.f32 %v9532_v58, %v7979_v39  ;;  %v8097_v29 = vsel %vm8095_vm8, %v8096_v28, %v8094_v36  ;;  %v8369_v23 = vand.u32 2147483647, %v14178_v19  ;;  %v7996_v39 = vmul.f32 %v7995_v22, %v14105_v61 }
0x1506   :  { %v8029_v51 = vmul.f32 0.5, %v8028_v7  ;;  %v8361_v7 = vmul.f32 %v9534_v33, %v14178_v19  ;;  %v14234_v54 = vsel %vm8045_vm11, %v14099_v42, %v8044_v17  ;;  %v8007_v36 = vmul.f32 %v14161_v40, %v8006_v2 }
0x1507   :  { %v7981_v16 = vmul.f32 0.5, %v7980_v13  ;;  %v8371_v13 = vand.u32 2147483648, %v14178_v19  ;;  %v14250_v43 = vadd.f32 1e-06, %v8097_v29  ;;  %vm8366_vm3 = vweird.f32 %v9534_v33 }
0x1508   :  { %v8030_v21 = vsub.f32 1.5, %v8029_v51  ;;  %v8362_v22 = vsub.f32 1.0, %v8361_v7  ;;  %vm14252_vm4 = vcmp.eq.f32.partialorder %v8369_v23, 8.507059e+37  ;;  %v8384_v2 = vand.u32 2147483647, %v14185_v52  ;;  %vm8367_vm6 = vmor %vm8365_vm13, %vm8366_vm3 }
0x1509   :  { %v14225_v30 = vpop.eup %9535  ;;  %v7982_v17 = vsub.f32 1.5, %v7981_v16  ;;  %v14259_v16 = vadd.f32 1e-06, %v8109_v41  ;;  %9539 = vrcp.f32 %v14250_v43  ;;  %v8008_v32 = vmul.f32 %v8007_v36, %v14116_v10  ;;  %v14302_v36 = vld [vmem:[%s14548_s8 + $0x7] ss:$0 sm:$0xff] }
0x150a   :  { %v7967_v44 = vmul.f32 %v14225_v30, %v14183_v55  ;;  %v8031_v51 = vmul.f32 %v9530_v8, %v8030_v21  ;;  %v9538_v14 = vpop.eup %9537  ;;  %v8363_v28 = vmul.f32 %v9534_v33, %v8362_v22  ;;  %v8386_v21 = vand.u32 2147483648, %v14185_v52 }
0x150b   :  { %v8376_v8 = vmul.f32 %v9538_v14, %v14185_v52  ;;  %v7983_v7 = vmul.f32 %v9532_v58, %v7982_v17  ;;  %v8073_v41 = vsel %vm8071_vm12, %v8072_v35, %v8070_v49  ;;  %vm8381_vm7 = vweird.f32 %v9538_v14 }
0x150c   :  { %v7968_v15 = vmul.f32 %v14225_v30, %v7967_v44  ;;  %v8032_v48 = vmul.f32 %v8031_v51, %v14138_v60  ;;  %v8364_v56 = vadd.f32 %v9534_v33, %v8363_v28  ;;  %v8372_v44 = vor.u32 1.1754944e-38, %v8371_v13 }
0x150d   :  { %v8377_v29 = vsub.f32 1.0, %v8376_v8  ;;  %9541 = vrcp.f32 %v14259_v16  ;;  %v14275_v28 = vsel %vm7997_vm2, %v14105_v61, %v7996_v39  ;;  %vm8380_vm8 = vweird.f32 %v14185_v52 }
0x150e   :  { %v7969_v23 = vmul.f32 0.5, %v7968_v15  ;;  %v8368_v22 = vsel %vm8367_vm6, %v9534_v33, %v8364_v56  ;;  %vm14280_vm9 = vcmp.eq.f32.partialorder %v8384_v2, 8.507059e+37  ;;  %vm8047_vm11 = vcmp.eq.f32.partialorder %v14099_v42, 0.0  ;;  %vm8382_vm12 = vmor %vm8380_vm8, %vm8381_vm7 }
0x150f   :  { %v8378_v34 = vmul.f32 %v9538_v14, %v8377_v29  ;;  %v8373_v19 = vsel %vm14252_vm4, %v8372_v44, %v8368_v22  ;;  %v14289_v47 = vsel %vm8009_vm14, %v14116_v10, %v8008_v32  ;;  %v14294_v35 = vsel %vm8033_vm15, %v14138_v60, %v8032_v48  ;;  %v9540_v49 = vpop.eup %9539 }
0x1510   :  { %v8387_v52 = vor.u32 1.1754944e-38, %v8386_v21  ;;  %v7984_v33 = vmul.f32 %v7983_v7, %v14140_v57  ;;  %v8374_v39 = vmul.f32 %v8373_v19, %v14063_v27  ;;  %v8085_v51 = vsel %vm8083_vm0, %v8084_v62, %v14201_v53 }
0x1511   :  { %v8379_v58 = vadd.f32 %v9538_v14, %v8378_v34  ;;  %v14309_v34 = vadd.f32 1e-06, %v8073_v41  ;;  %v7970_v13 = vsub.f32 1.5, %v7969_v23  ;;  %v8331_v40 = vmul.f32 %v9540_v49, %v14250_v43 }
0x1512   :  { %vm8335_vm13 = vweird.f32 %v14250_v43  ;;  %v8339_v8 = vand.u32 2147483647, %v14250_v43  ;;  %v8341_v2 = vand.u32 2147483648, %v14250_v43  ;;  %v8354_v21 = vand.u32 2147483647, %v14259_v16 }
0x1513   :  { %v8383_v17 = vsel %vm8382_vm12, %v9538_v14, %v8379_v58  ;;  %v9542_v32 = vpop.eup %9541  ;;  %v8332_v62 = vsub.f32 1.0, %v8331_v40  ;;  %v14319_v53 = vadd.f32 1e-06, %v8085_v51  ;;  %9543 = vrcp.f32 %v14309_v34 }
0x1514   :  { %v8388_v27 = vsel %vm14280_vm9, %v8387_v52, %v8383_v17  ;;  %v14325_v14 = vsel %vm7985_vm5, %v14140_v57, %v7984_v33  ;;  %v8405_v48 = vadd.f32 %v14302_v36, %v8374_v39  ;;  %v8346_v56 = vmul.f32 %v9542_v32, %v14259_v16 }
0x1515   :  { %v8389_v6 = vmul.f32 %v8388_v27, %v14069_v9  ;;  %v8356_v29 = vand.u32 2147483648, %v14259_v16  ;;  %v8333_v23 = vmul.f32 %v9540_v49, %v8332_v62  ;;  %vm8336_vm2 = vweird.f32 %v9540_v49 }
0x1516   :  { %9545 = vrcp.f32 %v14319_v53  ;;  %v14333_v9 = vmul.f32 %v14225_v30, %v7970_v13  ;;  %vm14335_vm14 = vcmp.eq.f32.partialorder %v8339_v8, 8.507059e+37  ;;  %v8342_v41 = vor.u32 1.1754944e-38, %v8341_v2  ;;  %vm8337_vm5 = vmor %vm8335_vm13, %vm8336_vm2 }
0x1517   :  { %v8406_v7 = vadd.f32 %v14302_v36, %v8389_v6  ;;  %v8347_v22 = vsub.f32 1.0, %v8346_v56  ;;  %v8334_v15 = vadd.f32 %v9540_v49, %v8333_v23  ;;  %vm8350_vm15 = vweird.f32 %v14259_v16 }
0x1518   :  { %vm14340_vm0 = vcmp.eq.f32.partialorder %v8354_v21, 8.507059e+37  ;;  %vm8023_vm3 = vcmp.eq.f32.partialorder %v14030_v45, 0.0  ;;  %vm8035_vm4 = vcmp.eq.f32.partialorder %v14138_v60, 0.0  ;;  %vm8351_vm6 = vweird.f32 %v9542_v32 }
0x1519   :  { %v8415_v19 = vpack.c.bf16 %v8406_v7, %v8405_v48  ;;  %v8348_v30 = vmul.f32 %v9542_v32, %v8347_v22  ;;  %v8049_v52 = vsel %vm8047_vm11, %v8048_v1, %v14234_v54  ;;  %v14743_v33 = vand.u32 2147483648, %v14040_v50  ;;  %v9544_v51 = vpop.eup %9543  ;;  %vm8352_vm7 = vmor %vm8350_vm15, %vm8351_vm6 }
0x151a   :  { %v8338_v17 = vsel %vm8337_vm5, %v9540_v49, %v8334_v15  ;;  %v8357_v43 = vor.u32 1.1754944e-38, %v8356_v29  ;;  %v14359_v40 = vadd.f32 1e-06, %v8049_v52  ;;  %v8301_v42 = vmul.f32 %v9544_v51, %v14309_v34 }
0x151b   :  { %v8061_v39 = vsel %vm8059_vm10, %v14743_v33, %v14217_v5  ;;  %v8446_v13 = vsel %vm1297_vm1, %v8415_v19, 0  ;;  %v8343_v27 = vsel %vm14335_vm14, %v8342_v41, %v8338_v17  ;;  %v8349_v8 = vadd.f32 %v9542_v32, %v8348_v30 }
0x151c   :  { %8448 = vmatpush.bf16.xpose.msra.mxu1 %v8446_v13  ;;  %v8309_v1 = vand.u32 2147483647, %v14309_v34  ;;  %v9546_v54 = vpop.eup %9545  ;;  %v8344_v50 = vmul.f32 %v8343_v27, %v14036_v0  ;;  %v8311_v5 = vand.u32 2147483648, %v14309_v34  ;;  %v14370_v49 = vadd.f32 1e-06, %v8061_v39 }
0x151d   :  { %9547 = vrcp.f32 %v14359_v40  ;;  %v8353_v2 = vsel %vm8352_vm7, %v9542_v32, %v8349_v8  ;;  %v8302_v21 = vsub.f32 1.0, %v8301_v42  ;;  %v8316_v6 = vmul.f32 %v9546_v54, %v14319_v53 }
0x151e   :  { %v8324_v62 = vand.u32 2147483647, %v14319_v53  ;;  %v8358_v48 = vsel %vm14340_vm0, %v8357_v43, %v8353_v2  ;;  %v8403_v0 = vadd.f32 %v14302_v36, %v8344_v50  ;;  %vm8306_vm8 = vweird.f32 %v9544_v51 }
0x151f   :  { %v8326_v16 = vand.u32 2147483648, %v14319_v53  ;;  %v8359_v56 = vmul.f32 %v8358_v48, %v14073_v63  ;;  %v8303_v29 = vmul.f32 %v9544_v51, %v8302_v21  ;;  %v8317_v7 = vsub.f32 1.0, %v8316_v6 }
0x1520   :  { %9549 = vrcp.f32 %v14370_v49  ;;  %vm7999_vm9 = vcmp.eq.f32.partialorder %v14105_v61, 0.0  ;;  %vm8305_vm10 = vweird.f32 %v14309_v34  ;;  %vm14383_vm11 = vcmp.eq.f32.partialorder %v8309_v1, 8.507059e+37 }
0x1521   :  { %v8312_v23 = vor.u32 1.1754944e-38, %v8311_v5  ;;  %vm8320_vm12 = vweird.f32 %v14319_v53  ;;  %v8404_v44 = vadd.f32 %v14302_v36, %v8359_v56  ;;  %v8304_v41 = vadd.f32 %v9544_v51, %v8303_v29  ;;  %vm8307_vm14 = vmor %vm8305_vm10, %vm8306_vm8 }
0x1522   :  { %v8318_v22 = vmul.f32 %v9546_v54, %v8317_v7  ;;  %vm8321_vm13 = vweird.f32 %v9546_v54  ;;  %vm8011_vm2 = vcmp.eq.f32.partialorder %v14116_v10, 0.0  ;;  %vm14391_vm15 = vcmp.eq.f32.partialorder %v8324_v62, 8.507059e+37 }
0x1523   :  { %v9548_v63 = vpop.eup %9547  ;;  %v8327_v34 = vor.u32 1.1754944e-38, %v8326_v16  ;;  %v14748_v15 = vand.u32 2147483648, %v14030_v45  ;;  %v14749_v30 = vand.u32 2147483648, %v14138_v60  ;;  %v8414_v33 = vpack.c.bf16 %v8404_v44, %v8403_v0  ;;  %vm8322_vm0 = vmor %vm8320_vm12, %vm8321_vm13 }
0x1524   :  { %v8308_v39 = vsel %vm8307_vm14, %v9544_v51, %v8304_v41  ;;  %v8319_v13 = vadd.f32 %v9546_v54, %v8318_v22  ;;  %v8271_v17 = vmul.f32 %v9548_v63, %v14359_v40  ;;  %v8279_v45 = vand.u32 2147483647, %v14359_v40 }
0x1525   :  { %v8025_v58 = vsel %vm8023_vm3, %v14748_v15, %v14212_v12  ;;  %v8037_v52 = vsel %vm8035_vm4, %v14749_v30, %v14294_v35  ;;  %v8313_v43 = vsel %vm14383_vm11, %v8312_v23, %v8308_v39  ;;  %v8281_v12 = vand.u32 2147483648, %v14359_v40 }
0x1526   :  { %v14412_v27 = vadd.f32 1e-06, %v8025_v58  ;;  %v9550_v8 = vpop.eup %9549  ;;  %v8443_v60 = vsel %vm1297_vm1, %v8414_v33, 0  ;;  %v8314_v35 = vmul.f32 %v8313_v43, %v14077_v18  ;;  %v8323_v51 = vsel %vm8322_vm0, %v9546_v54, %v8319_v13 }
0x1527   :  { %v8272_v42 = vsub.f32 1.0, %v8271_v17  ;;  %vm7973_vm3 = vcmp.eq.f32.partialorder %v14183_v55, inf  ;;  %8449 = vmatpush.bf16.xpose.msra.mxu1 %v8443_v60  ;;  %v8328_v53 = vsel %vm14391_vm15, %v8327_v34, %v8323_v51  ;;  %vm8276_vm4 = vweird.f32 %v9548_v63 }
0x1528   :  { %v8286_v1 = vmul.f32 %v9550_v8, %v14370_v49  ;;  %v14420_v50 = vadd.f32 1e-06, %v8037_v52  ;;  %v8329_v5 = vmul.f32 %v8328_v53, %v14044_v46  ;;  %v8401_v2 = vadd.f32 %v14302_v36, %v8314_v35 }
0x1529   :  { %v8273_v21 = vmul.f32 %v9548_v63, %v8272_v42  ;;  %9551 = vrcp.f32 %v14412_v27  ;;  %v7972_v18 = vmul.f32 %v14333_v9, %v14183_v55  ;;  %vm8275_vm5 = vweird.f32 %v14359_v40 }
0x152a   :  { %v8287_v54 = vsub.f32 1.0, %v8286_v1  ;;  %v8296_v6 = vand.u32 2147483648, %v14370_v49  ;;  %v8402_v62 = vadd.f32 %v14302_v36, %v8329_v5  ;;  %9553 = vrcp.f32 %v14420_v50  ;;  %vm8277_vm8 = vmor %vm8275_vm5, %vm8276_vm4 }
0x152b   :  { %v8274_v48 = vadd.f32 %v9548_v63, %v8273_v21  ;;  %v14750_v46 = vand.u32 2147483648, %v14105_v61  ;;  %vm7987_vm6 = vcmp.eq.f32.partialorder %v14140_v57, 0.0  ;;  %vm7975_vm7 = vcmp.eq.f32.partialorder %v14183_v55, 0.0 }
0x152c   :  { %v8282_v9 = vor.u32 1.1754944e-38, %v8281_v12  ;;  %v8288_v40 = vmul.f32 %v9550_v8, %v8287_v54  ;;  %vm8291_vm10 = vweird.f32 %v9550_v8  ;;  %v8294_v16 = vand.u32 2147483647, %v14370_v49 }
0x152d   :  { %v8001_v0 = vsel %vm7999_vm9, %v14750_v46, %v14275_v28  ;;  %v8413_v56 = vpack.c.bf16 %v8402_v62, %v8401_v2  ;;  %v8278_v29 = vsel %vm8277_vm8, %v9548_v63, %v8274_v48  ;;  %vm8280_vm11 = vcmp.eq.f32.partialorder %v8279_v45, 8.507059e+37 }
0x152e   :  { %v14751_v7 = vand.u32 2147483648, %v14116_v10  ;;  %v8283_v28 = vsel %vm8280_vm11, %v8282_v9, %v8278_v29  ;;  %v8289_v32 = vadd.f32 %v9550_v8, %v8288_v40  ;;  %vm8290_vm9 = vweird.f32 %v14370_v49 }
0x152f   :  { %v14446_v23 = vadd.f32 1e-06, %v8001_v0  ;;  %v9552_v44 = vpop.eup %9551  ;;  %v8440_v41 = vsel %vm1297_vm1, %v8413_v56, 0  ;;  %v8284_v22 = vmul.f32 %v8283_v28, %v14082_v11  ;;  %vm8292_vm12 = vmor %vm8290_vm9, %vm8291_vm10  ;;  %v8297_v63 = vor.u32 1.1754944e-38, %v8296_v6 }
0x1530   :  { %v8013_v61 = vsel %vm8011_vm2, %v14751_v7, %v14289_v47  ;;  %8450 = vmatpush.bf16.xpose.msra.mxu1 %v8440_v41  ;;  %v8293_v34 = vsel %vm8292_vm12, %v9550_v8, %v8289_v32  ;;  %vm8295_vm13 = vcmp.eq.f32.partialorder %v8294_v16, 8.507059e+37  ;;  %v8241_v10 = vmul.f32 %v9552_v44, %v14412_v27  ;;  %v9554_v47 = vpop.eup %9553 }
0x1531   :  { %v14450_v19 = vadd.f32 1e-06, %v8013_v61  ;;  %9555 = vrcp.f32 %v14446_v23  ;;  %v7974_v49 = vsel %vm7973_vm3, %v14183_v55, %v7972_v18  ;;  %v8298_v15 = vsel %vm8295_vm13, %v8297_v63, %v8293_v34 }
0x1532   :  { %vm8245_vm2 = vweird.f32 %v14412_v27  ;;  %v8249_v11 = vand.u32 2147483647, %v14412_v27  ;;  %v8299_v58 = vmul.f32 %v8298_v15, %v14086_v20  ;;  %v8399_v30 = vadd.f32 %v14302_v36, %v8284_v22 }
0x1533   :  { %v8242_v52 = vsub.f32 1.0, %v8241_v10  ;;  %v8256_v33 = vmul.f32 %v9554_v47, %v14420_v50  ;;  %v8251_v39 = vand.u32 2147483648, %v14412_v27  ;;  %vm8260_vm14 = vweird.f32 %v14420_v50 }
0x1534   :  { %v8266_v13 = vand.u32 2147483648, %v14420_v50  ;;  %9557 = vrcp.f32 %v14450_v19  ;;  %v8400_v17 = vadd.f32 %v14302_v36, %v8299_v58  ;;  %vm8246_vm15 = vweird.f32 %v9552_v44 }
0x1535   :  { %v8243_v43 = vmul.f32 %v9552_v44, %v8242_v52  ;;  %v8257_v45 = vsub.f32 1.0, %v8256_v33  ;;  %vm14467_vm0 = vcmp.eq.f32.partialorder %v8249_v11, 8.507059e+37  ;;  %v8264_v12 = vand.u32 2147483647, %v14420_v50  ;;  %vm8247_vm4 = vmor %vm8245_vm2, %vm8246_vm15 }
0x1536   :  { %v14754_v8 = vand.u32 2147483648, %v14183_v55  ;;  %v14755_v35 = vand.u32 2147483648, %v14140_v57  ;;  %v8412_v53 = vpack.c.bf16 %v8400_v17, %v8399_v30  ;;  %vm8261_vm3 = vweird.f32 %v9554_v47 }
0x1537   :  { %v9556_v42 = vpop.eup %9555  ;;  %v8244_v1 = vadd.f32 %v9552_v44, %v8243_v43  ;;  %v8258_v5 = vmul.f32 %v9554_v47, %v8257_v45  ;;  %v8252_v2 = vor.u32 1.1754944e-38, %v8251_v39  ;;  %v8267_v21 = vor.u32 1.1754944e-38, %v8266_v13  ;;  %vm8262_vm5 = vmor %vm8260_vm14, %vm8261_vm3 }
0x1538   :  { %v7977_v60 = vsel %vm7975_vm7, %v14754_v8, %v7974_v49  ;;  %v7989_v51 = vsel %vm7987_vm6, %v14755_v35, %v14325_v14  ;;  %v8211_v18 = vmul.f32 %v9556_v42, %v14446_v23  ;;  %v8437_v54 = vsel %vm1297_vm1, %v8412_v53, 0 }
0x1539   :  { %v14484_v55 = vadd.f32 1e-06, %v7977_v60  ;;  %v8248_v6 = vsel %vm8247_vm4, %v9552_v44, %v8244_v1  ;;  %v8259_v62 = vadd.f32 %v9554_v47, %v8258_v5  ;;  %v14487_v57 = vadd.f32 1e-06, %v7989_v51  ;;  %8451 = vmatpush.bf16.xpose.msra.mxu1 %v8437_v54 }
0x153a   :  { %v9558_v14 = vpop.eup %9557  ;;  %v8253_v48 = vsel %vm14467_vm0, %v8252_v2, %v8248_v6  ;;  %v8212_v27 = vsub.f32 1.0, %v8211_v18  ;;  %v8221_v46 = vand.u32 2147483648, %v14446_v23  ;;  %vm8265_vm6 = vcmp.eq.f32.partialorder %v8264_v12, 8.507059e+37 }
0x153b   :  { %9559 = vrcp.f32 %v14484_v55  ;;  %v8254_v0 = vmul.f32 %v8253_v48, %v14053_v26  ;;  %v8263_v9 = vsel %vm8262_vm5, %v9554_v47, %v8259_v62  ;;  %v8226_v40 = vmul.f32 %v9558_v14, %v14450_v19 }
0x153c   :  { %v8268_v16 = vsel %vm8265_vm6, %v8267_v21, %v8263_v9  ;;  %v8213_v56 = vmul.f32 %v9556_v42, %v8212_v27  ;;  %vm8216_vm7 = vweird.f32 %v9556_v42  ;;  %v8219_v29 = vand.u32 2147483647, %v14446_v23 }
0x153d   :  { %v8269_v7 = vmul.f32 %v8268_v16, %v14090_v37  ;;  %vm8215_vm8 = vweird.f32 %v14446_v23  ;;  %v8227_v50 = vsub.f32 1.0, %v8226_v40  ;;  %9561 = vrcp.f32 %v14487_v57 }
0x153e   :  { %v8214_v61 = vadd.f32 %v9556_v42, %v8213_v56  ;;  %v8222_v28 = vor.u32 1.1754944e-38, %v8221_v46  ;;  %v8234_v26 = vand.u32 2147483647, %v14450_v19  ;;  %v8236_v32 = vand.u32 2147483648, %v14450_v19  ;;  %vm8217_vm10 = vmor %vm8215_vm8, %vm8216_vm7 }
0x153f   :  { %v8397_v44 = vadd.f32 %v14302_v36, %v8254_v0  ;;  %v8398_v41 = vadd.f32 %v14302_v36, %v8269_v7  ;;  %v8228_v22 = vmul.f32 %v9558_v14, %v8227_v50  ;;  %vm8231_vm11 = vweird.f32 %v9558_v14 }
0x1540   :  { %v7930_v37 = vmul.f32 %v14022_v38, %v13951_v24  ;;  %v8218_v23 = vsel %vm8217_vm10, %v9556_v42, %v8214_v61  ;;  %vm8220_vm9 = vcmp.eq.f32.partialorder %v8219_v29, 8.507059e+37  ;;  %vm8230_vm12 = vweird.f32 %v14450_v19 }
0x1541   :  { %v9560_v63 = vpop.eup %9559  ;;  %v8411_v34 = vpack.c.bf16 %v8398_v41, %v8397_v44  ;;  %v8223_v10 = vsel %vm8220_vm9, %v8222_v28, %v8218_v23  ;;  %v8229_v47 = vadd.f32 %v9558_v14, %v8228_v22  ;;  %v7931_v15 = vmul.f32 %v14022_v38, %v13939_v31  ;;  %vm8232_vm13 = vmor %vm8230_vm12, %vm8231_vm11 }
0x1542   :  { %v8181_v49 = vmul.f32 %v9560_v63, %v14484_v55  ;;  %v8224_v11 = vmul.f32 %v8223_v10, %v7930_v37  ;;  %v8237_v58 = vor.u32 1.1754944e-38, %v8236_v32  ;;  %vm8235_vm2 = vcmp.eq.f32.partialorder %v8234_v26, 8.507059e+37 }
0x1543   :  { %v9562_v30 = vpop.eup %9561  ;;  %v8434_v52 = vsel %vm1297_vm1, %v8411_v34, 0  ;;  %v8233_v33 = vsel %vm8232_vm13, %v9558_v14, %v8229_v47  ;;  %v8189_v19 = vand.u32 2147483647, %v14484_v55  ;;  %v8191_v13 = vand.u32 2147483648, %v14484_v55 }
0x1544   :  { %v8182_v24 = vsub.f32 1.0, %v8181_v49  ;;  %8452 = vmatpush.bf16.xpose.msra.mxu1 %v8434_v52  ;;  %v8238_v39 = vsel %vm8235_vm2, %v8237_v58, %v8233_v33  ;;  %v8196_v17 = vmul.f32 %v9562_v30, %v14487_v57  ;;  %v8395_v31 = vadd.f32 %v14302_v36, %v8224_v11  ;;  %v41_v33 = vld [vmem:[%s14548_s8 + $0x8] sm:$0x1] }
0x1545   :  { %v8239_v43 = vmul.f32 %v8238_v39, %v7931_v15  ;;  %vm8186_vm14 = vweird.f32 %v9560_v63  ;;  %vm8185_vm15 = vweird.f32 %v14484_v55  ;;  %v8206_v60 = vand.u32 2147483648, %v14487_v57 }
0x1546   :  { %v8183_v45 = vmul.f32 %v9560_v63, %v8182_v24  ;;  %v8197_v20 = vsub.f32 1.0, %v8196_v17  ;;  %vm8187_vm0 = vmor %vm8185_vm15, %vm8186_vm14  ;;  %v8192_v35 = vor.u32 1.1754944e-38, %v8191_v13  ;;  %vm8201_vm3 = vweird.f32 %v9562_v30 }
0x1547   :  { %v8396_v12 = vadd.f32 %v14302_v36, %v8239_v43  ;;  %v8204_v42 = vand.u32 2147483647, %v14487_v57  ;;  %v7928_v53 = vmul.f32 %v14022_v38, %v13978_v3  ;;  %vm8190_vm4 = vcmp.eq.f32.partialorder %v8189_v19, 8.507059e+37 }
0x1548   :  { %v8184_v8 = vadd.f32 %v9560_v63, %v8183_v45  ;;  %v8198_v51 = vmul.f32 %v9562_v30, %v8197_v20  ;;  %vm8200_vm5 = vweird.f32 %v14487_v57  ;;  %v8207_v54 = vor.u32 1.1754944e-38, %v8206_v60 }
0x1549   :  { %v8410_v1 = vpack.c.bf16 %v8396_v12, %v8395_v31  ;;  %vm8202_vm6 = vmor %vm8200_vm5, %vm8201_vm3  ;;  %v7929_v6 = vmul.f32 %v14022_v38, %v13969_v4  ;;  %vm8205_vm7 = vcmp.eq.f32.partialorder %v8204_v42, 8.507059e+37  ;;  %v9592_v24 = vmov 0   ;;  %v9588_v42 = vld [vmem:[%s14548_s8 + $0x6] ss:$0 sm:$0xff] }
0x154a   :  { %v8188_v5 = vsel %vm8187_vm0, %v9560_v63, %v8184_v8  ;;  %v8199_v21 = vadd.f32 %v9562_v30, %v8198_v51  ;;  %8983 = vset.pattern.permute.xlu1 %v9592_v24  ;;  %8984 = vset.pattern.permute.xlu0 %v9592_v24 }
0x154b   :  { %v8193_v2 = vsel %vm8190_vm4, %v8192_v35, %v8188_v5  ;;  %v8431_v18 = vsel %vm1297_vm1, %v8410_v1, 0  ;;  %8418 = vperm.xlu1 %8983, %v41_v33  }
0x154c   :  { %v8194_v55 = vmul.f32 %v8193_v2, %v7928_v53  ;;  %8453 = vmatpush.bf16.xpose.msra.mxu1 %v8431_v18  ;;  %v8203_v62 = vsel %vm8202_vm6, %v9562_v30, %v8199_v21  ;;  %v7926_v53 = vmul.f32 %v9588_v42, %v13997_v59  ;;  %v7927_v2 = vmul.f32 %v9588_v42, %v14058_v25  ;;  %v8407_v59 = vld [vmem:[%s14555_s7] sm:$0x1] }
0x154d   :  { %v8208_v14 = vsel %vm8205_vm7, %v8207_v54, %v8203_v62 }
0x154e   :  { %v8209_v3 = vmul.f32 %v8208_v14, %v7929_v6  ;;  %v8393_v48 = vadd.f32 %v14302_v36, %v8194_v55 }
0x1550   :  { %v8394_v27 = vadd.f32 %v14302_v36, %v8209_v3 }
0x1552   :  { %v8409_v46 = vpack.c.bf16 %v8394_v27, %v8393_v48 }
0x1553   :  { %v7863_v0 = vpop.xlane.xlu2 %7862 }
0x1554   :  { %v8428_v57 = vsel %vm1297_vm1, %v8409_v46, 0  ;;  %v7909_v9 = vmul.f32 0.032258064, %v7863_v0 }
0x1555   :  { %8454 = vmatpush.bf16.xpose.msra.mxu1 %v8428_v57 }
0x1556   :  { %9563 = vrsqrt.f32 %v7909_v9  ;;  %vm7949_vm8 = vcmp.eq.f32.partialorder %v7909_v9, inf  ;;  %v7952_v28 = vand.u32 2147483648, %v7909_v9  ;;  %vm7951_vm10 = vcmp.eq.f32.partialorder %v7909_v9, 0.0 }
0x155c   :  { %v9564_v40 = vpop.eup %9563 }
0x155d   :  { %v7943_v16 = vmul.f32 %v9564_v40, %v7909_v9 }
0x155f   :  { %v7944_v56 = vmul.f32 %v9564_v40, %v7943_v16 }
0x1561   :  { %v7945_v4 = vmul.f32 0.5, %v7944_v56 }
0x1563   :  { %v7946_v38 = vsub.f32 1.5, %v7945_v4  ;;  %v7866_v29 = vpop.xlane.xlu0 %7865 }
0x1564   :  { %v7910_v50 = vmul.f32 0.032258064, %v7866_v29 }
0x1565   :  { %v7947_v7 = vmul.f32 %v9564_v40, %v7946_v38 }
0x1566   :  { %9565 = vrsqrt.f32 %v7910_v50  ;;  %vm7961_vm11 = vcmp.eq.f32.partialorder %v7910_v50, inf  ;;  %v7964_v15 = vand.u32 2147483648, %v7910_v50  ;;  %vm7963_vm9 = vcmp.eq.f32.partialorder %v7910_v50, 0.0 }
0x1567   :  { %v7948_v61 = vmul.f32 %v7947_v7, %v7909_v9 }
0x1569   :  { %v7950_v26 = vsel %vm7949_vm8, %v7909_v9, %v7948_v61 }
0x156a   :  { %v7953_v32 = vsel %vm7951_vm10, %v7952_v28, %v7950_v26 }
0x156b   :  { %v8134_v44 = vadd.f32 1e-06, %v7953_v32 }
0x156c   :  { %v9566_v41 = vpop.eup %9565 }
0x156d   :  { %v7955_v22 = vmul.f32 %v9566_v41, %v7910_v50  ;;  %9567 = vrcp.f32 %v8134_v44  ;;  %v8161_v17 = vand.u32 2147483648, %v8134_v44  ;;  %vm8155_vm13 = vweird.f32 %v8134_v44 }
0x156e   :  { %v8159_v43 = vand.u32 2147483647, %v8134_v44 }
0x156f   :  { %v7956_v63 = vmul.f32 %v9566_v41, %v7955_v22  ;;  %v8162_v12 = vor.u32 1.1754944e-38, %v8161_v17 }
0x1570   :  { %vm8160_vm14 = vcmp.eq.f32.partialorder %v8159_v43, 8.507059e+37 }
0x1571   :  { %v7957_v37 = vmul.f32 0.5, %v7956_v63 }
0x1573   :  { %v9568_v23 = vpop.eup %9567  ;;  %v7958_v34 = vsub.f32 1.5, %v7957_v37 }
0x1574   :  { %v8151_v47 = vmul.f32 %v9568_v23, %v8134_v44  ;;  %vm8156_vm12 = vweird.f32 %v9568_v23 }
0x1575   :  { %v7959_v10 = vmul.f32 %v9566_v41, %v7958_v34  ;;  %vm8157_vm2 = vmor %vm8155_vm13, %vm8156_vm12 }
0x1576   :  { %v8152_v30 = vsub.f32 1.0, %v8151_v47 }
0x1577   :  { %v7960_v49 = vmul.f32 %v7959_v10, %v7910_v50 }
0x1578   :  { %v8153_v39 = vmul.f32 %v9568_v23, %v8152_v30 }
0x1579   :  { %v7962_v11 = vsel %vm7961_vm11, %v7910_v50, %v7960_v49 }
0x157a   :  { %v7965_v58 = vsel %vm7963_vm9, %v7964_v15, %v7962_v11  ;;  %v8154_v19 = vadd.f32 %v9568_v23, %v8153_v39 }
0x157b   :  { %v8135_v52 = vadd.f32 1e-06, %v7965_v58 }
0x157c   :  { %v8158_v45 = vsel %vm8157_vm2, %v9568_v23, %v8154_v19 }
0x157d   :  { %9569 = vrcp.f32 %v8135_v52  ;;  %v8176_v8 = vand.u32 2147483648, %v8135_v52  ;;  %v8174_v35 = vand.u32 2147483647, %v8135_v52  ;;  %v8163_v51 = vsel %vm8160_vm14, %v8162_v12, %v8158_v45 }
0x157e   :  { %vm8170_vm0 = vweird.f32 %v8135_v52  ;;  %v8164_v21 = vmul.f32 %v8163_v51, %v7926_v53 }
0x157f   :  { %v8177_v5 = vor.u32 1.1754944e-38, %v8176_v8  ;;  %vm8175_vm4 = vcmp.eq.f32.partialorder %v8174_v35, 8.507059e+37 }
0x1580   :  { %v8391_v6 = vadd.f32 %v14302_v36, %v8164_v21 }
0x1583   :  { %v9570_v13 = vpop.eup %9569 }
0x1584   :  { %v8166_v31 = vmul.f32 %v9570_v13, %v8135_v52  ;;  %vm8171_vm15 = vweird.f32 %v9570_v13 }
0x1585   :  { %vm8172_vm3 = vmor %vm8170_vm0, %vm8171_vm15 }
0x1586   :  { %v8167_v20 = vsub.f32 1.0, %v8166_v31 }
0x1588   :  { %v8168_v60 = vmul.f32 %v9570_v13, %v8167_v20 }
0x158a   :  { %v8169_v1 = vadd.f32 %v9570_v13, %v8168_v60 }
0x158c   :  { %v8173_v18 = vsel %vm8172_vm3, %v9570_v13, %v8169_v1 }
0x158d   :  { %v8178_v55 = vsel %vm8175_vm4, %v8177_v5, %v8173_v18 }
0x158e   :  { %v8179_v54 = vmul.f32 %v8178_v55, %v7927_v2 }
0x1590   :  { %v8392_v62 = vadd.f32 %v14302_v36, %v8179_v54 }
0x1592   :  { %v8408_v14 = vpack.c.bf16 %v8392_v62, %v8391_v6 }
0x1594   :  { %v8425_v3 = vsel %vm1297_vm1, %v8408_v14, 0 }
0x1595   :  { %8455 = vmatpush.bf16.xpose.msra.mxu1 %v8425_v3 }
0x159c   :  { %8858 = vmatmul.msk.bf16.vlgmr.msra.gmra.mxu1 %vm1297_vm1, %v8407_v59 }
0x15bd   :  { %v8419_v25 = vpop.permute.xlu1 %8418 }
0x1619   :  { %v8457_v48 = vpop.f32.mrf.mxu1 }
0x161a   :  { %v8458_v27 = vadd.f32 %v8457_v48, %v8419_v25 }
0x161c   :  { %8461 = vst [vmem:[%s14556_s9] sm:$0x1] %v8458_v27 }
0x1621   :  { %v8459_v46 = vpop.f32.mrf.mxu1 }

</bundles_post_ra>
